<compile_context>
chip_gen: v7x
topology: tpu7x:2x2x1
jax: 0.10.0
libtpu: 0.0.40
codegen_flags: <defaults>
</compile_context>

<pallas_src>
import functools
import math

import numpy as np
import jax
import jax.numpy as jnp
from jax.experimental import pallas as pl
from jax.experimental.pallas import tpu as pltpu


def _round_up(x, m):
    return ((x + m - 1) // m) * m


def _padded_width(w, c):
    """Smallest width >= w such that width*channels is a multiple of 128 lanes."""
    step = 128 // math.gcd(c, 128)
    return _round_up(max(w, 1), step)


# ----------------------------------------------------------------------------
# Fused kernel body
# ----------------------------------------------------------------------------
def _conv_pool_stage(x, t_ref, b_ref, r_ref, c_ref, g):
    """One valid-conv + bias + ReLU + 2x2 max-pool stage on a lane-dense slab.

    x      : (H, Wp*Cin)              bf16 value (in VMEM, never HBM)
    t_ref  : (k, Wp*Cin, Wc*Cout)     bf16 block-Toeplitz conv weights per row tap
    b_ref  : (1, Wc*Cout)             f32  bias (zero beyond Wo*Cout)
    r_ref  : (Ho2, Ho-1)              bf16 0/1 pooled-row selection
    c_ref  : ((Wc-1)*Cout, Wn*Cout)   bf16 0/1 pooled-column selection
    returns: (Ho2, Wn*Cout)           bf16
    """
    k, ho, cout = g["k"], g["Ho"], g["cout"]

    # ---- convolution: k row-shifted matmuls, f32 accumulation on the MXU ----
    # TODO(synk): dh>0 row slices are sublane-misaligned (Mosaic retiles a small
    # VMEM copy per tap); a pltpu.roll-based variant would push that to the XLU,
    # but the slice form is the numerically validated one and the cost is minor.
    acc = jnp.dot(x[0:ho, :], t_ref[0], preferred_element_type=jnp.float32)
    for dh in range(1, k):
        acc = acc + jnp.dot(x[dh:dh + ho, :], t_ref[dh],
                            preferred_element_type=jnp.float32)
    z = jnp.maximum(acc + b_ref[...], 0.0)           # bias + ReLU  (Ho, Wc*Cout)

    # ---- 2x2 max-pool: pairwise maxima of shifted slices (VPU) --------------
    zv = jnp.maximum(z[:-1, :], z[1:, :])            # rows 2i vs 2i+1
    zh = jnp.maximum(zv[:, :-cout], zv[:, cout:])    # cols 2j vs 2j+1 (per chan)
    zh = zh.astype(jnp.bfloat16)                     # bf16 for compaction matmuls

    # ---- compaction to (Ho//2, Wn*Cout) via 0/1 selection matmuls (MXU) -----
    if ho == 2:                                      # single pooled row: identity
        rows = zh
    else:
        rows = jnp.dot(r_ref[...], zh,
                       preferred_element_type=jnp.float32).astype(jnp.bfloat16)
    pooled = jnp.dot(rows, c_ref[...], preferred_element_type=jnp.float32)
    return pooled.astype(jnp.bfloat16)


def _fused_cnn_kernel(*refs, plan):
    """Whole CNNModel forward for one image; activations never leave VMEM.

    refs = [x, (T, b, R, C) * n_layers, W1, b1, W2, b2, out]
    """
    nl = len(plan)
    x_ref = refs[0]
    layer_refs = refs[1:1 + 4 * nl]
    w1_ref, b1_ref, w2_ref, b2_ref, o_ref = refs[1 + 4 * nl:]

    x = x_ref[0]                                     # (H0, Wp0*Cin) bf16
    for li, g in enumerate(plan):
        t_ref, b_ref, r_ref, c_ref = layer_refs[4 * li:4 * li + 4]
        x = _conv_pool_stage(x, t_ref, b_ref, r_ref, c_ref, g)

    # Flatten (torch (C,H,W) order handled by the W1 row scatter at init time).
    feat = x.reshape(1, -1)
    h = jnp.dot(feat, w1_ref[...], preferred_element_type=jnp.float32)
    h = jnp.maximum(h + b1_ref[...], 0.0)            # fc_layer + ReLU
    o = jnp.dot(h.astype(jnp.bfloat16), w2_ref[...],
                preferred_element_type=jnp.float32)
    o_ref[0] = o + b2_ref[...]                       # out layer (padded classes)


# ----------------------------------------------------------------------------
# pallas_call wrapper (single launch for the whole forward pass)
# ----------------------------------------------------------------------------
def _const_map(ndim):
    zeros = (0,) * ndim
    return lambda n: zeros


def cnn_forward(x_nchw, params, *, plan, num_classes):
    g0 = plan[0]
    N = x_nchw.shape[0]
    # One-time layout glue on the tiny network input:
    # NCHW -> (N, H, Wp*Cin) channel-minor lane slab, bf16.
    x = jnp.transpose(x_nchw, (0, 2, 3, 1)).astype(jnp.bfloat16)
    x = jnp.pad(x, ((0, 0), (0, 0), (0, g0["Wp"] - g0["W"]), (0, 0)))
    x = x.reshape(N, g0["H"], g0["Wp"] * g0["cin"])

    tables = []
    for t in params["layers"]:
        tables += [t["T"], t["b"], t["R"], t["C"]]
    operands = [x] + tables + [params["W1"], params["b1"],
                               params["W2"], params["b2"]]

    ncp = params["W2"].shape[1]
    in_specs = [pl.BlockSpec((1, g0["H"], g0["Wp"] * g0["cin"]),
                             lambda n: (n, 0, 0))]
    in_specs += [pl.BlockSpec(a.shape, _const_map(a.ndim)) for a in operands[1:]]

    out = pl.pallas_call(
        functools.partial(_fused_cnn_kernel, plan=plan),
        out_shape=jax.ShapeDtypeStruct((N, 1, ncp), jnp.float32),
        grid_spec=pltpu.PrefetchScalarGridSpec(
            num_scalar_prefetch=0,
            grid=(N,),                               # one whole image per step
            in_specs=in_specs,
            out_specs=pl.BlockSpec((1, 1, ncp), lambda n: (n, 0, 0)),
        ),
        compiler_params=pltpu.CompilerParams(
            dimension_semantics=("parallel",),       # shards batch across v7x TCs
            vmem_limit_bytes=24 * 1024 * 1024,       # ~11 MB used; headroom kept
        ),
    )(*operands)
    return out.reshape(N, ncp)[:, :num_classes]


# ----------------------------------------------------------------------------
# Static plan + parameter / table construction (one-time host-side setup)
# ----------------------------------------------------------------------------
def make_plan(image_size, in_channels, num_filters, kernel_size):
    """Per-layer geometry, mirroring CNNModel.__init__'s size tracing."""
    H, W = image_size
    cin = in_channels
    Wp = _padded_width(W, cin)
    plan = []
    for cout, k in zip(num_filters, kernel_size):
        Ho, Wo = H - k + 1, W - k + 1
        Ho2, Wo2 = Ho // 2, Wo // 2
        g = dict(cin=cin, cout=cout, k=k, H=H, W=W, Wp=Wp, Ho=Ho, Wo=Wo,
                 Wc=_padded_width(Wo, cout), Ho2=Ho2, Wo2=Wo2,
                 Wn=_padded_width(Wo2, cout))
        plan.append(g)
        H, W, cin, Wp = Ho2, Wo2, cout, g["Wn"]
    return plan, (H, W, cin)


def _build_conv_tables(w, b, g):
    """w: (k, k, cin, cout) f32 (torch (Cout,Cin,kh,kw) transposed), b: (cout,)."""
    k, cin, cout = g["k"], g["cin"], g["cout"]
    # Block-Toeplitz matrices: T[dh] maps the lane slab of input row (h+dh)
    # directly to the lane slab of conv-output row h.
    T = np.zeros((k, g["Wp"] * cin, g["Wc"] * cout), np.float32)
    for dh in range(k):
        for dw in range(k):
            blk = w[dh, dw]                                   # (cin, cout)
            for wo in range(g["Wo"]):
                wi = wo + dw
                T[dh, wi * cin:(wi + 1) * cin, wo * cout:(wo + 1) * cout] = blk
    bt = np.zeros((1, g["Wc"] * cout), np.float32)
    bt[0, :g["Wo"] * cout] = np.tile(b, g["Wo"])
    # 0/1 selection matrices (bf16 is exact for 0/1) for pooled-row / pooled-
    # column compaction.
    R = np.zeros((g["Ho2"], max(g["Ho"] - 1, 1)), np.float32)
    R[np.arange(g["Ho2"]), 2 * np.arange(g["Ho2"])] = 1.0
    C = np.zeros(((g["Wc"] - 1) * cout, g["Wn"] * cout), np.float32)
    ch = np.arange(cout)
    for wo2 in range(g["Wo2"]):
        C[2 * wo2 * cout + ch, wo2 * cout + ch] = 1.0
    return dict(T=jnp.asarray(T, jnp.bfloat16), b=jnp.asarray(bt),
                R=jnp.asarray(R, jnp.bfloat16), C=jnp.asarray(C, jnp.bfloat16))


def init_model(key, image_size, in_channels, num_classes, num_filters,
               kernel_size, fc_layer_size):
    plan, (Hf, Wf, Cf) = make_plan(image_size, in_channels, num_filters,
                                   kernel_size)
    keys = jax.random.split(key, 2 * len(num_filters) + 4)
    layers = []
    for i, g in enumerate(plan):
        w = 0.05 * jax.random.normal(
            keys[2 * i], (g["k"], g["k"], g["cin"], g["cout"]), jnp.float32)
        b = 0.05 * jax.random.normal(keys[2 * i + 1], (g["cout"],), jnp.float32)
        layers.append(_build_conv_tables(np.asarray(w), np.asarray(b), g))

    # fc_layer: PyTorch flattens NCHW in (C, H, W) order; our stored layout is
    # (H, Wn*C) channel-minor.  Scatter the fc weight rows accordingly (with
    # zero rows for the width padding) so the flatten order matches the spec.
    g_last = plan[-1]
    fc_in = Cf * Hf * Wf
    w1 = np.asarray(0.05 * jax.random.normal(keys[-4], (fc_in, fc_layer_size),
                                             jnp.float32))
    b1 = np.asarray(0.05 * jax.random.normal(keys[-3], (fc_layer_size,),
                                             jnp.float32))
    W1p = np.zeros((Hf * g_last["Wn"] * Cf, fc_layer_size), np.float32)
    for c in range(Cf):
        for h in range(Hf):
            for w_ in range(Wf):
                src = c * Hf * Wf + h * Wf + w_              # torch flatten idx
                dst = h * g_last["Wn"] * Cf + w_ * Cf + c    # our stored idx
                W1p[dst, :] = w1[src, :]

    # out layer: pad the class dimension to a full 128-lane slab.
    ncp = _round_up(num_classes, 128)
    w2 = np.asarray(0.05 * jax.random.normal(keys[-2],
                                             (fc_layer_size, num_classes),
                                             jnp.float32))
    b2 = np.asarray(0.05 * jax.random.normal(keys[-1], (num_classes,),
                                             jnp.float32))
    W2p = np.zeros((fc_layer_size, ncp), np.float32)
    W2p[:, :num_classes] = w2
    b2p = np.zeros((1, ncp), np.float32)
    b2p[0, :num_classes] = b2

    params = dict(
        layers=layers,
        W1=jnp.asarray(W1p, jnp.bfloat16),
        b1=jnp.asarray(b1.reshape(1, -1), jnp.float32),
        W2=jnp.asarray(W2p, jnp.bfloat16),
        b2=jnp.asarray(b2p, jnp.float32),
    )
    return plan, params


if __name__ == "__main__":
    # Small config consistent with CNNModel's constructor.
    batch = 2
    image_size = (96, 96)          # smallest-ish size surviving 5 conv+pool stages
    in_channels = 3
    num_classes = 10
    num_filters = [8, 8, 8, 8, 8]
    kernel_size = [3, 3, 3, 3, 3]
    fc_layer_size = 128

    key = jax.random.PRNGKey(0)
    pkey, xkey = jax.random.split(key)
    plan, params = init_model(pkey, image_size, in_channels, num_classes,
                              num_filters, kernel_size, fc_layer_size)
    x = jax.random.normal(xkey, (batch, in_channels, *image_size), jnp.float32)

    fwd = jax.jit(functools.partial(cnn_forward, plan=plan,
                                    num_classes=num_classes))
    logits = fwd(x, params)
    jax.block_until_ready(logits)
    assert logits.shape == (batch, num_classes), logits.shape
    print("KERNEL_OK")
</pallas_src>

<mosaic_0001>
module attributes {stable_mosaic.version = 11 : i64} {
  func.func @_fused_cnn_kernel(%arg0: i32, %arg1: memref<1x96x384xbf16, #tpu.memory_space<vmem>>, %arg2: memref<3x384x768xbf16, #tpu.memory_space<vmem>>, %arg3: memref<1x768xf32, #tpu.memory_space<vmem>>, %arg4: memref<47x93xbf16, #tpu.memory_space<vmem>>, %arg5: memref<760x384xbf16, #tpu.memory_space<vmem>>, %arg6: memref<3x384x384xbf16, #tpu.memory_space<vmem>>, %arg7: memref<1x384xf32, #tpu.memory_space<vmem>>, %arg8: memref<22x44xbf16, #tpu.memory_space<vmem>>, %arg9: memref<376x256xbf16, #tpu.memory_space<vmem>>, %arg10: memref<3x256x256xbf16, #tpu.memory_space<vmem>>, %arg11: memref<1x256xf32, #tpu.memory_space<vmem>>, %arg12: memref<10x19xbf16, #tpu.memory_space<vmem>>, %arg13: memref<248x128xbf16, #tpu.memory_space<vmem>>, %arg14: memref<3x128x128xbf16, #tpu.memory_space<vmem>>, %arg15: memref<1x128xf32, #tpu.memory_space<vmem>>, %arg16: memref<4x7xbf16, #tpu.memory_space<vmem>>, %arg17: memref<120x128xbf16, #tpu.memory_space<vmem>>, %arg18: memref<3x128x128xbf16, #tpu.memory_space<vmem>>, %arg19: memref<1x128xf32, #tpu.memory_space<vmem>>, %arg20: memref<1x1xbf16, #tpu.memory_space<vmem>>, %arg21: memref<120x128xbf16, #tpu.memory_space<vmem>>, %arg22: memref<128x128xbf16, #tpu.memory_space<vmem>>, %arg23: memref<1x128xf32, #tpu.memory_space<vmem>>, %arg24: memref<128x128xbf16, #tpu.memory_space<vmem>>, %arg25: memref<1x128xf32, #tpu.memory_space<vmem>>, %arg26: memref<1x1x128xf32, #tpu.memory_space<vmem>>) attributes {dimension_semantics = [#tpu.dimension_semantics<parallel>], iteration_bounds = array<i64: 2>, scalar_prefetch = 0 : i64, scratch_operands = 0 : i64, tpu.core_type = #tpu.core_type<tc>, window_params = [{transform_indices = @transform_0, window_bounds = array<i64: 1, 96, 384>}, {pipeline_mode = #tpu.pipeline_mode<synchronous>, transform_indices = @transform_1, window_bounds = array<i64: 3, 384, 768>}, {pipeline_mode = #tpu.pipeline_mode<synchronous>, transform_indices = @transform_2, window_bounds = array<i64: 1, 768>}, {pipeline_mode = #tpu.pipeline_mode<synchronous>, transform_indices = @transform_3, window_bounds = array<i64: 47, 93>}, {pipeline_mode = #tpu.pipeline_mode<synchronous>, transform_indices = @transform_4, window_bounds = array<i64: 760, 384>}, {pipeline_mode = #tpu.pipeline_mode<synchronous>, transform_indices = @transform_5, window_bounds = array<i64: 3, 384, 384>}, {pipeline_mode = #tpu.pipeline_mode<synchronous>, transform_indices = @transform_6, window_bounds = array<i64: 1, 384>}, {pipeline_mode = #tpu.pipeline_mode<synchronous>, transform_indices = @transform_7, window_bounds = array<i64: 22, 44>}, {pipeline_mode = #tpu.pipeline_mode<synchronous>, transform_indices = @transform_8, window_bounds = array<i64: 376, 256>}, {pipeline_mode = #tpu.pipeline_mode<synchronous>, transform_indices = @transform_9, window_bounds = array<i64: 3, 256, 256>}, {pipeline_mode = #tpu.pipeline_mode<synchronous>, transform_indices = @transform_10, window_bounds = array<i64: 1, 256>}, {pipeline_mode = #tpu.pipeline_mode<synchronous>, transform_indices = @transform_11, window_bounds = array<i64: 10, 19>}, {pipeline_mode = #tpu.pipeline_mode<synchronous>, transform_indices = @transform_12, window_bounds = array<i64: 248, 128>}, {pipeline_mode = #tpu.pipeline_mode<synchronous>, transform_indices = @transform_13, window_bounds = array<i64: 3, 128, 128>}, {pipeline_mode = #tpu.pipeline_mode<synchronous>, transform_indices = @transform_14, window_bounds = array<i64: 1, 128>}, {pipeline_mode = #tpu.pipeline_mode<synchronous>, transform_indices = @transform_15, window_bounds = array<i64: 4, 7>}, {pipeline_mode = #tpu.pipeline_mode<synchronous>, transform_indices = @transform_16, window_bounds = array<i64: 120, 128>}, {pipeline_mode = #tpu.pipeline_mode<synchronous>, transform_indices = @transform_17, window_bounds = array<i64: 3, 128, 128>}, {pipeline_mode = #tpu.pipeline_mode<synchronous>, transform_indices = @transform_18, window_bounds = array<i64: 1, 128>}, {pipeline_mode = #tpu.pipeline_mode<synchronous>, transform_indices = @transform_19, window_bounds = array<i64: 1, 1>}, {pipeline_mode = #tpu.pipeline_mode<synchronous>, transform_indices = @transform_20, window_bounds = array<i64: 120, 128>}, {pipeline_mode = #tpu.pipeline_mode<synchronous>, transform_indices = @transform_21, window_bounds = array<i64: 128, 128>}, {pipeline_mode = #tpu.pipeline_mode<synchronous>, transform_indices = @transform_22, window_bounds = array<i64: 1, 128>}, {pipeline_mode = #tpu.pipeline_mode<synchronous>, transform_indices = @transform_23, window_bounds = array<i64: 128, 128>}, {pipeline_mode = #tpu.pipeline_mode<synchronous>, transform_indices = @transform_24, window_bounds = array<i64: 1, 128>}, {transform_indices = @transform_25, window_bounds = array<i64: 1, 1, 128>}]} {
    %c0 = arith.constant 0 : index
    %c0_0 = arith.constant 0 : index
    %c0_1 = arith.constant 0 : index
    %0 = vector.load %arg1[%c0, %c0_0, %c0_1] : memref<1x96x384xbf16, #tpu.memory_space<vmem>>, vector<1x96x384xbf16>
    %1 = vector.shape_cast %0 : vector<1x96x384xbf16> to vector<96x384xbf16>
    %2 = vector.extract_strided_slice %1 {offsets = [0, 0], sizes = [94, 384], strides = [1, 1]} : vector<96x384xbf16> to vector<94x384xbf16>
    %c0_2 = arith.constant 0 : index
    %c0_3 = arith.constant 0 : index
    %c0_4 = arith.constant 0 : index
    %3 = vector.load %arg2[%c0_2, %c0_3, %c0_4] : memref<3x384x768xbf16, #tpu.memory_space<vmem>>, vector<1x384x768xbf16>
    %4 = vector.shape_cast %3 : vector<1x384x768xbf16> to vector<384x768xbf16>
    %cst = arith.constant dense<0.000000e+00> : vector<94x768xf32>
    %5 = tpu.matmul %2, %4, %cst {dimension_numbers = #tpu.dot_dimension_numbers<[1], [0], [0], [1], [0, 0, 1, 1], [], []>} : vector<94x384xbf16>, vector<384x768xbf16>, vector<94x768xf32> -> vector<94x768xf32>
    %6 = vector.extract_strided_slice %1 {offsets = [1, 0], sizes = [94, 384], strides = [1, 1]} : vector<96x384xbf16> to vector<94x384xbf16>
    %c1 = arith.constant 1 : index
    %c0_5 = arith.constant 0 : index
    %c0_6 = arith.constant 0 : index
    %7 = vector.load %arg2[%c1, %c0_5, %c0_6] : memref<3x384x768xbf16, #tpu.memory_space<vmem>>, vector<1x384x768xbf16>
    %8 = vector.shape_cast %7 : vector<1x384x768xbf16> to vector<384x768xbf16>
    %cst_7 = arith.constant dense<0.000000e+00> : vector<94x768xf32>
    %9 = tpu.matmul %6, %8, %cst_7 {dimension_numbers = #tpu.dot_dimension_numbers<[1], [0], [0], [1], [0, 0, 1, 1], [], []>} : vector<94x384xbf16>, vector<384x768xbf16>, vector<94x768xf32> -> vector<94x768xf32>
    %10 = arith.addf %5, %9 : vector<94x768xf32>
    %11 = vector.extract_strided_slice %1 {offsets = [2, 0], sizes = [94, 384], strides = [1, 1]} : vector<96x384xbf16> to vector<94x384xbf16>
    %c2 = arith.constant 2 : index
    %c0_8 = arith.constant 0 : index
    %c0_9 = arith.constant 0 : index
    %12 = vector.load %arg2[%c2, %c0_8, %c0_9] : memref<3x384x768xbf16, #tpu.memory_space<vmem>>, vector<1x384x768xbf16>
    %13 = vector.shape_cast %12 : vector<1x384x768xbf16> to vector<384x768xbf16>
    %cst_10 = arith.constant dense<0.000000e+00> : vector<94x768xf32>
    %14 = tpu.matmul %11, %13, %cst_10 {dimension_numbers = #tpu.dot_dimension_numbers<[1], [0], [0], [1], [0, 0, 1, 1], [], []>} : vector<94x384xbf16>, vector<384x768xbf16>, vector<94x768xf32> -> vector<94x768xf32>
    %15 = arith.addf %10, %14 : vector<94x768xf32>
    %c0_11 = arith.constant 0 : index
    %c0_12 = arith.constant 0 : index
    %16 = vector.load %arg3[%c0_11, %c0_12] : memref<1x768xf32, #tpu.memory_space<vmem>>, vector<1x768xf32>
    %17 = vector.broadcast %16 : vector<1x768xf32> to vector<94x768xf32>
    %18 = arith.addf %15, %17 : vector<94x768xf32>
    %cst_13 = arith.constant 0.000000e+00 : f32
    %19 = vector.broadcast %cst_13 : f32 to vector<94x768xf32>
    %20 = arith.maximumf %18, %19 : vector<94x768xf32>
    %21 = vector.extract_strided_slice %20 {offsets = [0, 0], sizes = [93, 768], strides = [1, 1]} : vector<94x768xf32> to vector<93x768xf32>
    %22 = vector.extract_strided_slice %20 {offsets = [1, 0], sizes = [93, 768], strides = [1, 1]} : vector<94x768xf32> to vector<93x768xf32>
    %23 = arith.maximumf %21, %22 : vector<93x768xf32>
    %24 = vector.extract_strided_slice %23 {offsets = [0, 0], sizes = [93, 760], strides = [1, 1]} : vector<93x768xf32> to vector<93x760xf32>
    %25 = vector.extract_strided_slice %23 {offsets = [0, 8], sizes = [93, 760], strides = [1, 1]} : vector<93x768xf32> to vector<93x760xf32>
    %26 = arith.maximumf %24, %25 : vector<93x760xf32>
    %27 = arith.truncf %26 : vector<93x760xf32> to vector<93x760xbf16>
    %c0_14 = arith.constant 0 : index
    %c0_15 = arith.constant 0 : index
    %28 = vector.load %arg4[%c0_14, %c0_15] : memref<47x93xbf16, #tpu.memory_space<vmem>>, vector<47x93xbf16>
    %cst_16 = arith.constant dense<0.000000e+00> : vector<47x760xf32>
    %29 = tpu.matmul %28, %27, %cst_16 {dimension_numbers = #tpu.dot_dimension_numbers<[1], [0], [0], [1], [0, 0, 1, 1], [], []>} : vector<47x93xbf16>, vector<93x760xbf16>, vector<47x760xf32> -> vector<47x760xf32>
    %30 = arith.truncf %29 : vector<47x760xf32> to vector<47x760xbf16>
    %c0_17 = arith.constant 0 : index
    %c0_18 = arith.constant 0 : index
    %31 = vector.load %arg5[%c0_17, %c0_18] : memref<760x384xbf16, #tpu.memory_space<vmem>>, vector<760x384xbf16>
    %cst_19 = arith.constant dense<0.000000e+00> : vector<47x384xf32>
    %32 = tpu.matmul %30, %31, %cst_19 {dimension_numbers = #tpu.dot_dimension_numbers<[1], [0], [0], [1], [0, 0, 1, 1], [], []>} : vector<47x760xbf16>, vector<760x384xbf16>, vector<47x384xf32> -> vector<47x384xf32>
    %33 = arith.truncf %32 : vector<47x384xf32> to vector<47x384xbf16>
    %34 = vector.extract_strided_slice %33 {offsets = [0, 0], sizes = [45, 384], strides = [1, 1]} : vector<47x384xbf16> to vector<45x384xbf16>
    %c0_20 = arith.constant 0 : index
    %c0_21 = arith.constant 0 : index
    %c0_22 = arith.constant 0 : index
    %35 = vector.load %arg6[%c0_20, %c0_21, %c0_22] : memref<3x384x384xbf16, #tpu.memory_space<vmem>>, vector<1x384x384xbf16>
    %36 = vector.shape_cast %35 : vector<1x384x384xbf16> to vector<384x384xbf16>
    %cst_23 = arith.constant dense<0.000000e+00> : vector<45x384xf32>
    %37 = tpu.matmul %34, %36, %cst_23 {dimension_numbers = #tpu.dot_dimension_numbers<[1], [0], [0], [1], [0, 0, 1, 1], [], []>} : vector<45x384xbf16>, vector<384x384xbf16>, vector<45x384xf32> -> vector<45x384xf32>
    %38 = vector.extract_strided_slice %33 {offsets = [1, 0], sizes = [45, 384], strides = [1, 1]} : vector<47x384xbf16> to vector<45x384xbf16>
    %c1_24 = arith.constant 1 : index
    %c0_25 = arith.constant 0 : index
    %c0_26 = arith.constant 0 : index
    %39 = vector.load %arg6[%c1_24, %c0_25, %c0_26] : memref<3x384x384xbf16, #tpu.memory_space<vmem>>, vector<1x384x384xbf16>
    %40 = vector.shape_cast %39 : vector<1x384x384xbf16> to vector<384x384xbf16>
    %cst_27 = arith.constant dense<0.000000e+00> : vector<45x384xf32>
    %41 = tpu.matmul %38, %40, %cst_27 {dimension_numbers = #tpu.dot_dimension_numbers<[1], [0], [0], [1], [0, 0, 1, 1], [], []>} : vector<45x384xbf16>, vector<384x384xbf16>, vector<45x384xf32> -> vector<45x384xf32>
    %42 = arith.addf %37, %41 : vector<45x384xf32>
    %43 = vector.extract_strided_slice %33 {offsets = [2, 0], sizes = [45, 384], strides = [1, 1]} : vector<47x384xbf16> to vector<45x384xbf16>
    %c2_28 = arith.constant 2 : index
    %c0_29 = arith.constant 0 : index
    %c0_30 = arith.constant 0 : index
    %44 = vector.load %arg6[%c2_28, %c0_29, %c0_30] : memref<3x384x384xbf16, #tpu.memory_space<vmem>>, vector<1x384x384xbf16>
    %45 = vector.shape_cast %44 : vector<1x384x384xbf16> to vector<384x384xbf16>
    %cst_31 = arith.constant dense<0.000000e+00> : vector<45x384xf32>
    %46 = tpu.matmul %43, %45, %cst_31 {dimension_numbers = #tpu.dot_dimension_numbers<[1], [0], [0], [1], [0, 0, 1, 1], [], []>} : vector<45x384xbf16>, vector<384x384xbf16>, vector<45x384xf32> -> vector<45x384xf32>
    %47 = arith.addf %42, %46 : vector<45x384xf32>
    %c0_32 = arith.constant 0 : index
    %c0_33 = arith.constant 0 : index
    %48 = vector.load %arg7[%c0_32, %c0_33] : memref<1x384xf32, #tpu.memory_space<vmem>>, vector<1x384xf32>
    %49 = vector.broadcast %48 : vector<1x384xf32> to vector<45x384xf32>
    %50 = arith.addf %47, %49 : vector<45x384xf32>
    %cst_34 = arith.constant 0.000000e+00 : f32
    %51 = vector.broadcast %cst_34 : f32 to vector<45x384xf32>
    %52 = arith.maximumf %50, %51 : vector<45x384xf32>
    %53 = vector.extract_strided_slice %52 {offsets = [0, 0], sizes = [44, 384], strides = [1, 1]} : vector<45x384xf32> to vector<44x384xf32>
    %54 = vector.extract_strided_slice %52 {offsets = [1, 0], sizes = [44, 384], strides = [1, 1]} : vector<45x384xf32> to vector<44x384xf32>
    %55 = arith.maximumf %53, %54 : vector<44x384xf32>
    %56 = vector.extract_strided_slice %55 {offsets = [0, 0], sizes = [44, 376], strides = [1, 1]} : vector<44x384xf32> to vector<44x376xf32>
    %57 = vector.extract_strided_slice %55 {offsets = [0, 8], sizes = [44, 376], strides = [1, 1]} : vector<44x384xf32> to vector<44x376xf32>
    %58 = arith.maximumf %56, %57 : vector<44x376xf32>
    %59 = arith.truncf %58 : vector<44x376xf32> to vector<44x376xbf16>
    %c0_35 = arith.constant 0 : index
    %c0_36 = arith.constant 0 : index
    %60 = vector.load %arg8[%c0_35, %c0_36] : memref<22x44xbf16, #tpu.memory_space<vmem>>, vector<22x44xbf16>
    %cst_37 = arith.constant dense<0.000000e+00> : vector<22x376xf32>
    %61 = tpu.matmul %60, %59, %cst_37 {dimension_numbers = #tpu.dot_dimension_numbers<[1], [0], [0], [1], [0, 0, 1, 1], [], []>} : vector<22x44xbf16>, vector<44x376xbf16>, vector<22x376xf32> -> vector<22x376xf32>
    %62 = arith.truncf %61 : vector<22x376xf32> to vector<22x376xbf16>
    %c0_38 = arith.constant 0 : index
    %c0_39 = arith.constant 0 : index
    %63 = vector.load %arg9[%c0_38, %c0_39] : memref<376x256xbf16, #tpu.memory_space<vmem>>, vector<376x256xbf16>
    %cst_40 = arith.constant dense<0.000000e+00> : vector<22x256xf32>
    %64 = tpu.matmul %62, %63, %cst_40 {dimension_numbers = #tpu.dot_dimension_numbers<[1], [0], [0], [1], [0, 0, 1, 1], [], []>} : vector<22x376xbf16>, vector<376x256xbf16>, vector<22x256xf32> -> vector<22x256xf32>
    %65 = arith.truncf %64 : vector<22x256xf32> to vector<22x256xbf16>
    %66 = vector.extract_strided_slice %65 {offsets = [0, 0], sizes = [20, 256], strides = [1, 1]} : vector<22x256xbf16> to vector<20x256xbf16>
    %c0_41 = arith.constant 0 : index
    %c0_42 = arith.constant 0 : index
    %c0_43 = arith.constant 0 : index
    %67 = vector.load %arg10[%c0_41, %c0_42, %c0_43] : memref<3x256x256xbf16, #tpu.memory_space<vmem>>, vector<1x256x256xbf16>
    %68 = vector.shape_cast %67 : vector<1x256x256xbf16> to vector<256x256xbf16>
    %cst_44 = arith.constant dense<0.000000e+00> : vector<20x256xf32>
    %69 = tpu.matmul %66, %68, %cst_44 {dimension_numbers = #tpu.dot_dimension_numbers<[1], [0], [0], [1], [0, 0, 1, 1], [], []>} : vector<20x256xbf16>, vector<256x256xbf16>, vector<20x256xf32> -> vector<20x256xf32>
    %70 = vector.extract_strided_slice %65 {offsets = [1, 0], sizes = [20, 256], strides = [1, 1]} : vector<22x256xbf16> to vector<20x256xbf16>
    %c1_45 = arith.constant 1 : index
    %c0_46 = arith.constant 0 : index
    %c0_47 = arith.constant 0 : index
    %71 = vector.load %arg10[%c1_45, %c0_46, %c0_47] : memref<3x256x256xbf16, #tpu.memory_space<vmem>>, vector<1x256x256xbf16>
    %72 = vector.shape_cast %71 : vector<1x256x256xbf16> to vector<256x256xbf16>
    %cst_48 = arith.constant dense<0.000000e+00> : vector<20x256xf32>
    %73 = tpu.matmul %70, %72, %cst_48 {dimension_numbers = #tpu.dot_dimension_numbers<[1], [0], [0], [1], [0, 0, 1, 1], [], []>} : vector<20x256xbf16>, vector<256x256xbf16>, vector<20x256xf32> -> vector<20x256xf32>
    %74 = arith.addf %69, %73 : vector<20x256xf32>
    %75 = vector.extract_strided_slice %65 {offsets = [2, 0], sizes = [20, 256], strides = [1, 1]} : vector<22x256xbf16> to vector<20x256xbf16>
    %c2_49 = arith.constant 2 : index
    %c0_50 = arith.constant 0 : index
    %c0_51 = arith.constant 0 : index
    %76 = vector.load %arg10[%c2_49, %c0_50, %c0_51] : memref<3x256x256xbf16, #tpu.memory_space<vmem>>, vector<1x256x256xbf16>
    %77 = vector.shape_cast %76 : vector<1x256x256xbf16> to vector<256x256xbf16>
    %cst_52 = arith.constant dense<0.000000e+00> : vector<20x256xf32>
    %78 = tpu.matmul %75, %77, %cst_52 {dimension_numbers = #tpu.dot_dimension_numbers<[1], [0], [0], [1], [0, 0, 1, 1], [], []>} : vector<20x256xbf16>, vector<256x256xbf16>, vector<20x256xf32> -> vector<20x256xf32>
    %79 = arith.addf %74, %78 : vector<20x256xf32>
    %c0_53 = arith.constant 0 : index
    %c0_54 = arith.constant 0 : index
    %80 = vector.load %arg11[%c0_53, %c0_54] : memref<1x256xf32, #tpu.memory_space<vmem>>, vector<1x256xf32>
    %81 = vector.broadcast %80 : vector<1x256xf32> to vector<20x256xf32>
    %82 = arith.addf %79, %81 : vector<20x256xf32>
    %cst_55 = arith.constant 0.000000e+00 : f32
    %83 = vector.broadcast %cst_55 : f32 to vector<20x256xf32>
    %84 = arith.maximumf %82, %83 : vector<20x256xf32>
    %85 = vector.extract_strided_slice %84 {offsets = [0, 0], sizes = [19, 256], strides = [1, 1]} : vector<20x256xf32> to vector<19x256xf32>
    %86 = vector.extract_strided_slice %84 {offsets = [1, 0], sizes = [19, 256], strides = [1, 1]} : vector<20x256xf32> to vector<19x256xf32>
    %87 = arith.maximumf %85, %86 : vector<19x256xf32>
    %88 = vector.extract_strided_slice %87 {offsets = [0, 0], sizes = [19, 248], strides = [1, 1]} : vector<19x256xf32> to vector<19x248xf32>
    %89 = vector.extract_strided_slice %87 {offsets = [0, 8], sizes = [19, 248], strides = [1, 1]} : vector<19x256xf32> to vector<19x248xf32>
    %90 = arith.maximumf %88, %89 : vector<19x248xf32>
    %91 = arith.truncf %90 : vector<19x248xf32> to vector<19x248xbf16>
    %c0_56 = arith.constant 0 : index
    %c0_57 = arith.constant 0 : index
    %92 = vector.load %arg12[%c0_56, %c0_57] : memref<10x19xbf16, #tpu.memory_space<vmem>>, vector<10x19xbf16>
    %cst_58 = arith.constant dense<0.000000e+00> : vector<10x248xf32>
    %93 = tpu.matmul %92, %91, %cst_58 {dimension_numbers = #tpu.dot_dimension_numbers<[1], [0], [0], [1], [0, 0, 1, 1], [], []>} : vector<10x19xbf16>, vector<19x248xbf16>, vector<10x248xf32> -> vector<10x248xf32>
    %94 = arith.truncf %93 : vector<10x248xf32> to vector<10x248xbf16>
    %c0_59 = arith.constant 0 : index
    %c0_60 = arith.constant 0 : index
    %95 = vector.load %arg13[%c0_59, %c0_60] : memref<248x128xbf16, #tpu.memory_space<vmem>>, vector<248x128xbf16>
    %cst_61 = arith.constant dense<0.000000e+00> : vector<10x128xf32>
    %96 = tpu.matmul %94, %95, %cst_61 {dimension_numbers = #tpu.dot_dimension_numbers<[1], [0], [0], [1], [0, 0, 1, 1], [], []>} : vector<10x248xbf16>, vector<248x128xbf16>, vector<10x128xf32> -> vector<10x128xf32>
    %97 = arith.truncf %96 : vector<10x128xf32> to vector<10x128xbf16>
    %98 = vector.extract_strided_slice %97 {offsets = [0, 0], sizes = [8, 128], strides = [1, 1]} : vector<10x128xbf16> to vector<8x128xbf16>
    %c0_62 = arith.constant 0 : index
    %c0_63 = arith.constant 0 : index
    %c0_64 = arith.constant 0 : index
    %99 = vector.load %arg14[%c0_62, %c0_63, %c0_64] : memref<3x128x128xbf16, #tpu.memory_space<vmem>>, vector<1x128x128xbf16>
    %100 = vector.shape_cast %99 : vector<1x128x128xbf16> to vector<128x128xbf16>
    %cst_65 = arith.constant dense<0.000000e+00> : vector<8x128xf32>
    %101 = tpu.matmul %98, %100, %cst_65 {dimension_numbers = #tpu.dot_dimension_numbers<[1], [0], [0], [1], [0, 0, 1, 1], [], []>} : vector<8x128xbf16>, vector<128x128xbf16>, vector<8x128xf32> -> vector<8x128xf32>
    %102 = vector.extract_strided_slice %97 {offsets = [1, 0], sizes = [8, 128], strides = [1, 1]} : vector<10x128xbf16> to vector<8x128xbf16>
    %c1_66 = arith.constant 1 : index
    %c0_67 = arith.constant 0 : index
    %c0_68 = arith.constant 0 : index
    %103 = vector.load %arg14[%c1_66, %c0_67, %c0_68] : memref<3x128x128xbf16, #tpu.memory_space<vmem>>, vector<1x128x128xbf16>
    %104 = vector.shape_cast %103 : vector<1x128x128xbf16> to vector<128x128xbf16>
    %cst_69 = arith.constant dense<0.000000e+00> : vector<8x128xf32>
    %105 = tpu.matmul %102, %104, %cst_69 {dimension_numbers = #tpu.dot_dimension_numbers<[1], [0], [0], [1], [0, 0, 1, 1], [], []>} : vector<8x128xbf16>, vector<128x128xbf16>, vector<8x128xf32> -> vector<8x128xf32>
    %106 = arith.addf %101, %105 : vector<8x128xf32>
    %107 = vector.extract_strided_slice %97 {offsets = [2, 0], sizes = [8, 128], strides = [1, 1]} : vector<10x128xbf16> to vector<8x128xbf16>
    %c2_70 = arith.constant 2 : index
    %c0_71 = arith.constant 0 : index
    %c0_72 = arith.constant 0 : index
    %108 = vector.load %arg14[%c2_70, %c0_71, %c0_72] : memref<3x128x128xbf16, #tpu.memory_space<vmem>>, vector<1x128x128xbf16>
    %109 = vector.shape_cast %108 : vector<1x128x128xbf16> to vector<128x128xbf16>
    %cst_73 = arith.constant dense<0.000000e+00> : vector<8x128xf32>
    %110 = tpu.matmul %107, %109, %cst_73 {dimension_numbers = #tpu.dot_dimension_numbers<[1], [0], [0], [1], [0, 0, 1, 1], [], []>} : vector<8x128xbf16>, vector<128x128xbf16>, vector<8x128xf32> -> vector<8x128xf32>
    %111 = arith.addf %106, %110 : vector<8x128xf32>
    %c0_74 = arith.constant 0 : index
    %c0_75 = arith.constant 0 : index
    %112 = vector.load %arg15[%c0_74, %c0_75] : memref<1x128xf32, #tpu.memory_space<vmem>>, vector<1x128xf32>
    %113 = vector.broadcast %112 : vector<1x128xf32> to vector<8x128xf32>
    %114 = arith.addf %111, %113 : vector<8x128xf32>
    %cst_76 = arith.constant 0.000000e+00 : f32
    %115 = vector.broadcast %cst_76 : f32 to vector<8x128xf32>
    %116 = arith.maximumf %114, %115 : vector<8x128xf32>
    %117 = vector.extract_strided_slice %116 {offsets = [0, 0], sizes = [7, 128], strides = [1, 1]} : vector<8x128xf32> to vector<7x128xf32>
    %118 = vector.extract_strided_slice %116 {offsets = [1, 0], sizes = [7, 128], strides = [1, 1]} : vector<8x128xf32> to vector<7x128xf32>
    %119 = arith.maximumf %117, %118 : vector<7x128xf32>
    %120 = vector.extract_strided_slice %119 {offsets = [0, 0], sizes = [7, 120], strides = [1, 1]} : vector<7x128xf32> to vector<7x120xf32>
    %121 = vector.extract_strided_slice %119 {offsets = [0, 8], sizes = [7, 120], strides = [1, 1]} : vector<7x128xf32> to vector<7x120xf32>
    %122 = arith.maximumf %120, %121 : vector<7x120xf32>
    %123 = arith.truncf %122 : vector<7x120xf32> to vector<7x120xbf16>
    %c0_77 = arith.constant 0 : index
    %c0_78 = arith.constant 0 : index
    %124 = vector.load %arg16[%c0_77, %c0_78] : memref<4x7xbf16, #tpu.memory_space<vmem>>, vector<4x7xbf16>
    %cst_79 = arith.constant dense<0.000000e+00> : vector<4x120xf32>
    %125 = tpu.matmul %124, %123, %cst_79 {dimension_numbers = #tpu.dot_dimension_numbers<[1], [0], [0], [1], [0, 0, 1, 1], [], []>} : vector<4x7xbf16>, vector<7x120xbf16>, vector<4x120xf32> -> vector<4x120xf32>
    %126 = arith.truncf %125 : vector<4x120xf32> to vector<4x120xbf16>
    %c0_80 = arith.constant 0 : index
    %c0_81 = arith.constant 0 : index
    %127 = vector.load %arg17[%c0_80, %c0_81] : memref<120x128xbf16, #tpu.memory_space<vmem>>, vector<120x128xbf16>
    %cst_82 = arith.constant dense<0.000000e+00> : vector<4x128xf32>
    %128 = tpu.matmul %126, %127, %cst_82 {dimension_numbers = #tpu.dot_dimension_numbers<[1], [0], [0], [1], [0, 0, 1, 1], [], []>} : vector<4x120xbf16>, vector<120x128xbf16>, vector<4x128xf32> -> vector<4x128xf32>
    %129 = arith.truncf %128 : vector<4x128xf32> to vector<4x128xbf16>
    %130 = vector.extract_strided_slice %129 {offsets = [0, 0], sizes = [2, 128], strides = [1, 1]} : vector<4x128xbf16> to vector<2x128xbf16>
    %c0_83 = arith.constant 0 : index
    %c0_84 = arith.constant 0 : index
    %c0_85 = arith.constant 0 : index
    %131 = vector.load %arg18[%c0_83, %c0_84, %c0_85] : memref<3x128x128xbf16, #tpu.memory_space<vmem>>, vector<1x128x128xbf16>
    %132 = vector.shape_cast %131 : vector<1x128x128xbf16> to vector<128x128xbf16>
    %cst_86 = arith.constant dense<0.000000e+00> : vector<2x128xf32>
    %133 = tpu.matmul %130, %132, %cst_86 {dimension_numbers = #tpu.dot_dimension_numbers<[1], [0], [0], [1], [0, 0, 1, 1], [], []>} : vector<2x128xbf16>, vector<128x128xbf16>, vector<2x128xf32> -> vector<2x128xf32>
    %134 = vector.extract_strided_slice %129 {offsets = [1, 0], sizes = [2, 128], strides = [1, 1]} : vector<4x128xbf16> to vector<2x128xbf16>
    %c1_87 = arith.constant 1 : index
    %c0_88 = arith.constant 0 : index
    %c0_89 = arith.constant 0 : index
    %135 = vector.load %arg18[%c1_87, %c0_88, %c0_89] : memref<3x128x128xbf16, #tpu.memory_space<vmem>>, vector<1x128x128xbf16>
    %136 = vector.shape_cast %135 : vector<1x128x128xbf16> to vector<128x128xbf16>
    %cst_90 = arith.constant dense<0.000000e+00> : vector<2x128xf32>
    %137 = tpu.matmul %134, %136, %cst_90 {dimension_numbers = #tpu.dot_dimension_numbers<[1], [0], [0], [1], [0, 0, 1, 1], [], []>} : vector<2x128xbf16>, vector<128x128xbf16>, vector<2x128xf32> -> vector<2x128xf32>
    %138 = arith.addf %133, %137 : vector<2x128xf32>
    %139 = vector.extract_strided_slice %129 {offsets = [2, 0], sizes = [2, 128], strides = [1, 1]} : vector<4x128xbf16> to vector<2x128xbf16>
    %c2_91 = arith.constant 2 : index
    %c0_92 = arith.constant 0 : index
    %c0_93 = arith.constant 0 : index
    %140 = vector.load %arg18[%c2_91, %c0_92, %c0_93] : memref<3x128x128xbf16, #tpu.memory_space<vmem>>, vector<1x128x128xbf16>
    %141 = vector.shape_cast %140 : vector<1x128x128xbf16> to vector<128x128xbf16>
    %cst_94 = arith.constant dense<0.000000e+00> : vector<2x128xf32>
    %142 = tpu.matmul %139, %141, %cst_94 {dimension_numbers = #tpu.dot_dimension_numbers<[1], [0], [0], [1], [0, 0, 1, 1], [], []>} : vector<2x128xbf16>, vector<128x128xbf16>, vector<2x128xf32> -> vector<2x128xf32>
    %143 = arith.addf %138, %142 : vector<2x128xf32>
    %c0_95 = arith.constant 0 : index
    %c0_96 = arith.constant 0 : index
    %144 = vector.load %arg19[%c0_95, %c0_96] : memref<1x128xf32, #tpu.memory_space<vmem>>, vector<1x128xf32>
    %145 = vector.broadcast %144 : vector<1x128xf32> to vector<2x128xf32>
    %146 = arith.addf %143, %145 : vector<2x128xf32>
    %cst_97 = arith.constant 0.000000e+00 : f32
    %147 = vector.broadcast %cst_97 : f32 to vector<2x128xf32>
    %148 = arith.maximumf %146, %147 : vector<2x128xf32>
    %149 = vector.extract_strided_slice %148 {offsets = [0, 0], sizes = [1, 128], strides = [1, 1]} : vector<2x128xf32> to vector<1x128xf32>
    %150 = vector.extract_strided_slice %148 {offsets = [1, 0], sizes = [1, 128], strides = [1, 1]} : vector<2x128xf32> to vector<1x128xf32>
    %151 = arith.maximumf %149, %150 : vector<1x128xf32>
    %152 = vector.extract_strided_slice %151 {offsets = [0, 0], sizes = [1, 120], strides = [1, 1]} : vector<1x128xf32> to vector<1x120xf32>
    %153 = vector.extract_strided_slice %151 {offsets = [0, 8], sizes = [1, 120], strides = [1, 1]} : vector<1x128xf32> to vector<1x120xf32>
    %154 = arith.maximumf %152, %153 : vector<1x120xf32>
    %155 = arith.truncf %154 : vector<1x120xf32> to vector<1x120xbf16>
    %c0_98 = arith.constant 0 : index
    %c0_99 = arith.constant 0 : index
    %156 = vector.load %arg21[%c0_98, %c0_99] : memref<120x128xbf16, #tpu.memory_space<vmem>>, vector<120x128xbf16>
    %cst_100 = arith.constant dense<0.000000e+00> : vector<1x128xf32>
    %157 = tpu.matmul %155, %156, %cst_100 {dimension_numbers = #tpu.dot_dimension_numbers<[1], [0], [0], [1], [0, 0, 1, 1], [], []>} : vector<1x120xbf16>, vector<120x128xbf16>, vector<1x128xf32> -> vector<1x128xf32>
    %158 = arith.truncf %157 : vector<1x128xf32> to vector<1x128xbf16>
    %c0_101 = arith.constant 0 : index
    %c0_102 = arith.constant 0 : index
    %159 = vector.load %arg22[%c0_101, %c0_102] : memref<128x128xbf16, #tpu.memory_space<vmem>>, vector<128x128xbf16>
    %cst_103 = arith.constant dense<0.000000e+00> : vector<1x128xf32>
    %160 = tpu.matmul %158, %159, %cst_103 {dimension_numbers = #tpu.dot_dimension_numbers<[1], [0], [0], [1], [0, 0, 1, 1], [], []>} : vector<1x128xbf16>, vector<128x128xbf16>, vector<1x128xf32> -> vector<1x128xf32>
    %c0_104 = arith.constant 0 : index
    %c0_105 = arith.constant 0 : index
    %161 = vector.load %arg23[%c0_104, %c0_105] : memref<1x128xf32, #tpu.memory_space<vmem>>, vector<1x128xf32>
    %162 = arith.addf %160, %161 : vector<1x128xf32>
    %cst_106 = arith.constant 0.000000e+00 : f32
    %163 = vector.broadcast %cst_106 : f32 to vector<1x128xf32>
    %164 = arith.maximumf %162, %163 : vector<1x128xf32>
    %165 = arith.truncf %164 : vector<1x128xf32> to vector<1x128xbf16>
    %c0_107 = arith.constant 0 : index
    %c0_108 = arith.constant 0 : index
    %166 = vector.load %arg24[%c0_107, %c0_108] : memref<128x128xbf16, #tpu.memory_space<vmem>>, vector<128x128xbf16>
    %cst_109 = arith.constant dense<0.000000e+00> : vector<1x128xf32>
    %167 = tpu.matmul %165, %166, %cst_109 {dimension_numbers = #tpu.dot_dimension_numbers<[1], [0], [0], [1], [0, 0, 1, 1], [], []>} : vector<1x128xbf16>, vector<128x128xbf16>, vector<1x128xf32> -> vector<1x128xf32>
    %c0_110 = arith.constant 0 : index
    %c0_111 = arith.constant 0 : index
    %168 = vector.load %arg25[%c0_110, %c0_111] : memref<1x128xf32, #tpu.memory_space<vmem>>, vector<1x128xf32>
    %169 = arith.addf %167, %168 : vector<1x128xf32>
    %c0_112 = arith.constant 0 : index
    %c0_113 = arith.constant 0 : index
    %c0_114 = arith.constant 0 : index
    %170 = vector.load %arg26[%c0_112, %c0_113, %c0_114] : memref<1x1x128xf32, #tpu.memory_space<vmem>>, vector<1x1x128xf32>
    %171 = vector.shape_cast %170 : vector<1x1x128xf32> to vector<1x128xf32>
    %172 = vector.shape_cast %169 : vector<1x128xf32> to vector<1x1x128xf32>
    tpu.vector_store %arg26[%c0_112, %c0_113, %c0_114], %172 {strides = array<i32>} : memref<1x1x128xf32, #tpu.memory_space<vmem>>, vector<1x1x128xf32>,
    return
  }
  func.func @transform_0(%arg0: i32) -> (i32, i32, i32) {
    %c0_i32 = arith.constant 0 : i32
    %c0_i32_0 = arith.constant 0 : i32
    %c0_i32_1 = arith.constant 0 : i32
    return %arg0, %c0_i32, %c0_i32_0 : i32, i32, i32
  }
  func.func @transform_1(%arg0: i32) -> (i32, i32, i32) {
    %c0_i32 = arith.constant 0 : i32
    %c0_i32_0 = arith.constant 0 : i32
    %c0_i32_1 = arith.constant 0 : i32
    %c0_i32_2 = arith.constant 0 : i32
    return %c0_i32, %c0_i32_0, %c0_i32_1 : i32, i32, i32
  }
  func.func @transform_2(%arg0: i32) -> (i32, i32) {
    %c0_i32 = arith.constant 0 : i32
    %c0_i32_0 = arith.constant 0 : i32
    %c0_i32_1 = arith.constant 0 : i32
    return %c0_i32, %c0_i32_0 : i32, i32
  }
  func.func @transform_3(%arg0: i32) -> (i32, i32) {
    %c0_i32 = arith.constant 0 : i32
    %c0_i32_0 = arith.constant 0 : i32
    %c0_i32_1 = arith.constant 0 : i32
    return %c0_i32, %c0_i32_0 : i32, i32
  }
  func.func @transform_4(%arg0: i32) -> (i32, i32) {
    %c0_i32 = arith.constant 0 : i32
    %c0_i32_0 = arith.constant 0 : i32
    %c0_i32_1 = arith.constant 0 : i32
    return %c0_i32, %c0_i32_0 : i32, i32
  }
  func.func @transform_5(%arg0: i32) -> (i32, i32, i32) {
    %c0_i32 = arith.constant 0 : i32
    %c0_i32_0 = arith.constant 0 : i32
    %c0_i32_1 = arith.constant 0 : i32
    %c0_i32_2 = arith.constant 0 : i32
    return %c0_i32, %c0_i32_0, %c0_i32_1 : i32, i32, i32
  }
  func.func @transform_6(%arg0: i32) -> (i32, i32) {
    %c0_i32 = arith.constant 0 : i32
    %c0_i32_0 = arith.constant 0 : i32
    %c0_i32_1 = arith.constant 0 : i32
    return %c0_i32, %c0_i32_0 : i32, i32
  }
  func.func @transform_7(%arg0: i32) -> (i32, i32) {
    %c0_i32 = arith.constant 0 : i32
    %c0_i32_0 = arith.constant 0 : i32
    %c0_i32_1 = arith.constant 0 : i32
    return %c0_i32, %c0_i32_0 : i32, i32
  }
  func.func @transform_8(%arg0: i32) -> (i32, i32) {
    %c0_i32 = arith.constant 0 : i32
    %c0_i32_0 = arith.constant 0 : i32
    %c0_i32_1 = arith.constant 0 : i32
    return %c0_i32, %c0_i32_0 : i32, i32
  }
  func.func @transform_9(%arg0: i32) -> (i32, i32, i32) {
    %c0_i32 = arith.constant 0 : i32
    %c0_i32_0 = arith.constant 0 : i32
    %c0_i32_1 = arith.constant 0 : i32
    %c0_i32_2 = arith.constant 0 : i32
    return %c0_i32, %c0_i32_0, %c0_i32_1 : i32, i32, i32
  }
  func.func @transform_10(%arg0: i32) -> (i32, i32) {
    %c0_i32 = arith.constant 0 : i32
    %c0_i32_0 = arith.constant 0 : i32
    %c0_i32_1 = arith.constant 0 : i32
    return %c0_i32, %c0_i32_0 : i32, i32
  }
  func.func @transform_11(%arg0: i32) -> (i32, i32) {
    %c0_i32 = arith.constant 0 : i32
    %c0_i32_0 = arith.constant 0 : i32
    %c0_i32_1 = arith.constant 0 : i32
    return %c0_i32, %c0_i32_0 : i32, i32
  }
  func.func @transform_12(%arg0: i32) -> (i32, i32) {
    %c0_i32 = arith.constant 0 : i32
    %c0_i32_0 = arith.constant 0 : i32
    %c0_i32_1 = arith.constant 0 : i32
    return %c0_i32, %c0_i32_0 : i32, i32
  }
  func.func @transform_13(%arg0: i32) -> (i32, i32, i32) {
    %c0_i32 = arith.constant 0 : i32
    %c0_i32_0 = arith.constant 0 : i32
    %c0_i32_1 = arith.constant 0 : i32
    %c0_i32_2 = arith.constant 0 : i32
    return %c0_i32, %c0_i32_0, %c0_i32_1 : i32, i32, i32
  }
  func.func @transform_14(%arg0: i32) -> (i32, i32) {
    %c0_i32 = arith.constant 0 : i32
    %c0_i32_0 = arith.constant 0 : i32
    %c0_i32_1 = arith.constant 0 : i32
    return %c0_i32, %c0_i32_0 : i32, i32
  }
  func.func @transform_15(%arg0: i32) -> (i32, i32) {
    %c0_i32 = arith.constant 0 : i32
    %c0_i32_0 = arith.constant 0 : i32
    %c0_i32_1 = arith.constant 0 : i32
    return %c0_i32, %c0_i32_0 : i32, i32
  }
  func.func @transform_16(%arg0: i32) -> (i32, i32) {
    %c0_i32 = arith.constant 0 : i32
    %c0_i32_0 = arith.constant 0 : i32
    %c0_i32_1 = arith.constant 0 : i32
    return %c0_i32, %c0_i32_0 : i32, i32
  }
  func.func @transform_17(%arg0: i32) -> (i32, i32, i32) {
    %c0_i32 = arith.constant 0 : i32
    %c0_i32_0 = arith.constant 0 : i32
    %c0_i32_1 = arith.constant 0 : i32
    %c0_i32_2 = arith.constant 0 : i32
    return %c0_i32, %c0_i32_0, %c0_i32_1 : i32, i32, i32
  }
  func.func @transform_18(%arg0: i32) -> (i32, i32) {
    %c0_i32 = arith.constant 0 : i32
    %c0_i32_0 = arith.constant 0 : i32
    %c0_i32_1 = arith.constant 0 : i32
    return %c0_i32, %c0_i32_0 : i32, i32
  }
  func.func @transform_19(%arg0: i32) -> (i32, i32) {
    %c0_i32 = arith.constant 0 : i32
    %c0_i32_0 = arith.constant 0 : i32
    %c0_i32_1 = arith.constant 0 : i32
    return %c0_i32, %c0_i32_0 : i32, i32
  }
  func.func @transform_20(%arg0: i32) -> (i32, i32) {
    %c0_i32 = arith.constant 0 : i32
    %c0_i32_0 = arith.constant 0 : i32
    %c0_i32_1 = arith.constant 0 : i32
    return %c0_i32, %c0_i32_0 : i32, i32
  }
  func.func @transform_21(%arg0: i32) -> (i32, i32) {
    %c0_i32 = arith.constant 0 : i32
    %c0_i32_0 = arith.constant 0 : i32
    %c0_i32_1 = arith.constant 0 : i32
    return %c0_i32, %c0_i32_0 : i32, i32
  }
  func.func @transform_22(%arg0: i32) -> (i32, i32) {
    %c0_i32 = arith.constant 0 : i32
    %c0_i32_0 = arith.constant 0 : i32
    %c0_i32_1 = arith.constant 0 : i32
    return %c0_i32, %c0_i32_0 : i32, i32
  }
  func.func @transform_23(%arg0: i32) -> (i32, i32) {
    %c0_i32 = arith.constant 0 : i32
    %c0_i32_0 = arith.constant 0 : i32
    %c0_i32_1 = arith.constant 0 : i32
    return %c0_i32, %c0_i32_0 : i32, i32
  }
  func.func @transform_24(%arg0: i32) -> (i32, i32) {
    %c0_i32 = arith.constant 0 : i32
    %c0_i32_0 = arith.constant 0 : i32
    %c0_i32_1 = arith.constant 0 : i32
    return %c0_i32, %c0_i32_0 : i32, i32
  }
  func.func @transform_25(%arg0: i32) -> (i32, i32, i32) {
    %c0_i32 = arith.constant 0 : i32
    %c0_i32_0 = arith.constant 0 : i32
    %c0_i32_1 = arith.constant 0 : i32
    return %arg0, %c0_i32, %c0_i32_0 : i32, i32, i32
  }
}

</mosaic_0001>

<bundles_post_ra>
// kernel: cnn_forward.1
= control target key start
LH: loop header
LB: loop body
LE: loop exit
PB: predicated region body
PF: predicated region fallthrough
CT: control target
= control target key end

     0   :  { %s22550_s0 = inlined_call_operand.vmem [shape: bf16[2,96,384], index: 0, kind: input, shape index: {}]   ;;  %s22551_s1 = inlined_call_operand.hbm [shape: bf16[3,384,768], index: 1, kind: input, shape index: {}]   ;;  %s22552_s2 = inlined_call_operand.hbm [shape: f32[1,768], index: 2, kind: input, shape index: {}]   ;;  %s22553_s3 = inlined_call_operand.hbm [shape: bf16[47,93], index: 3, kind: input, shape index: {}]   ;;  %s22554_s4 = inlined_call_operand.hbm [shape: bf16[760,384], index: 4, kind: input, shape index: {}]   ;;  %s22555_s5 = inlined_call_operand.vmem [shape: bf16[3,384,384], index: 5, kind: input, shape index: {}]   ;;  %s22556_s6 = inlined_call_operand.hbm [shape: f32[1,384], index: 6, kind: input, shape index: {}]   ;;  %s22557_s7 = inlined_call_operand.hbm [shape: bf16[22,44], index: 7, kind: input, shape index: {}]   ;;  %s22558_s8 = inlined_call_operand.hbm [shape: bf16[376,256], index: 8, kind: input, shape index: {}]   ;;  %s22559_s9 = inlined_call_operand.hbm [shape: bf16[3,256,256], index: 9, kind: input, shape index: {}]   ;;  %s22560_s10 = inlined_call_operand.hbm [shape: f32[1,256], index: 10, kind: input, shape index: {}]   ;;  %s22561_s11 = inlined_call_operand.hbm [shape: bf16[10,19], index: 11, kind: input, shape index: {}]   ;;  %s22562_s12 = inlined_call_operand.hbm [shape: bf16[248,128], index: 12, kind: input, shape index: {}]   ;;  %s22563_s13 = inlined_call_operand.hbm [shape: bf16[3,128,128], index: 13, kind: input, shape index: {}]   ;;  %s22564_s14 = inlined_call_operand.hbm [shape: f32[1,128], index: 14, kind: input, shape index: {}]   ;;  %s22565_s15 = inlined_call_operand.hbm [shape: bf16[4,7], index: 15, kind: input, shape index: {}]   ;;  %s22566_s16 = inlined_call_operand.hbm [shape: bf16[120,128], index: 16, kind: input, shape index: {}]   ;;  %s22567_s17 = inlined_call_operand.hbm [shape: bf16[3,128,128], index: 17, kind: input, shape index: {}]   ;;  %s22568_s18 = inlined_call_operand.hbm [shape: f32[1,128], index: 18, kind: input, shape index: {}]   ;;  %s22569_s19 = inlined_call_operand.<no memory space> [shape: bf16[1,1], index: 19, kind: input, shape index: {}]   ;;  %s22570_s20 = inlined_call_operand.hbm [shape: bf16[120,128], index: 20, kind: input, shape index: {}]   ;;  %s22571_s21 = inlined_call_operand.hbm [shape: bf16[128,128], index: 21, kind: input, shape index: {}]   ;;  %s22572_s22 = inlined_call_operand.hbm [shape: f32[1,128], index: 22, kind: input, shape index: {}]   ;;  %s22573_s23 = inlined_call_operand.hbm [shape: bf16[128,128], index: 23, kind: input, shape index: {}]   ;;  %s22574_s24 = inlined_call_operand.hbm [shape: f32[1,128], index: 24, kind: input, shape index: {}]   ;;  %s22575_s25 = inlined_call_operand.hbm [shape: f32[2,1,128], index: 25, kind: output, shape index: {}]  }
   0x1   :  { %22678 = sst [smem:[#allocation100_spill]] %s22550_s0 }
   0x2   :  { %22679 = sst [smem:[#allocation101_spill]] %s22551_s1 }
   0x3   :  { %22680 = sst [smem:[#allocation102_spill]] %s22552_s2 }
   0x4   :  { %22681 = sst [smem:[#allocation103_spill]] %s22553_s3 }
   0x5   :  { %22682 = sst [smem:[#allocation104_spill]] %s22554_s4 }
   0x6   :  { %22683 = sst [smem:[#allocation105_spill]] %s22555_s5 }
   0x7   :  { %22684 = sst [smem:[#allocation106_spill]] %s22556_s6 }
   0x8   :  { %22685 = sst [smem:[#allocation107_spill]] %s22557_s7 }
   0x9   :  { %22686 = sst [smem:[#allocation108_spill]] %s22558_s8 }
   0xa   :  { %22687 = sst [smem:[#allocation109_spill]] %s22559_s9 }
   0xb   :  { %22688 = sst [smem:[#allocation110_spill]] %s22560_s10 }
   0xc   :  { %22689 = sst [smem:[#allocation111_spill]] %s22561_s11 }
   0xd   :  { %22690 = sst [smem:[#allocation112_spill]] %s22571_s21 }
   0xe   :  { %22691 = sst [smem:[#allocation113_spill]] %s22573_s23 }
   0xf   :  { %22692 = sst [smem:[#allocation114_spill]] %s22574_s24 }
  0x10   :  { %22693 = sst [smem:[#allocation115_spill]] %s22575_s25 }
  0x11   :  { %32 = vsyncpa [#allocation4], 0 }
  0x12   :  { %33 = vsyncpa [#allocation7], 0 }
  0x13   :  { %34 = vsyncpa [#allocation10], 0 }
  0x14   :  { %35 = vsyncpa [#allocation13], 0 }
  0x15   :  { %36 = vsyncpa [#allocation16], 0 }
  0x16   :  { %37 = vsyncpa [#allocation19], 0 }
  0x17   :  { %38 = vsyncpa [#allocation22], 0 }
  0x18   :  { %39 = vsyncpa [#allocation25], 0 }
  0x19   :  { %40 = vsyncpa [#allocation28], 0 }
  0x1a   :  { %41 = vsyncpa [#allocation31], 0 }
  0x1b   :  { %42 = vsyncpa [#allocation34], 0 }
  0x1c   :  { %43 = vsyncpa [#allocation37], 0 }
  0x1d   :  { %44 = vsyncpa [#allocation5], 0 }
  0x1e   :  { %46 = vsyncpa [#allocation5 + $0x1], 0  ;;  %s19324_s19 = smov 0   ;;  %s19326_s29 = smov 0  }
  0x1f   :  { %s19328_s2 = smov 0   ;;  %s19330_s6 = smov 0  }
  0x20 LB: > { %22694 = sst [smem:[#allocation52_spill]] %s19144_s19  ;;  %s19345_s30 = sadd.s32 4294967295, %s19156_s6   ;;  %s19156_s6 = sphi %s19330_s6, %s22882_s6   ;;  %s19152_s2 = sphi %s19328_s2, %s22885_s2   ;;  %s19148_s29 = sphi %s19326_s29, %s22884_s29   ;;  %s19144_s19 = sphi %s19324_s19, %s22883_s19  }
  0x21   : > { %22695 = sst [smem:[#allocation53_spill]] %s19148_s29  ;;  %s13961_s7 = sadd.s32 4294967294, %s19156_s6  }
  0x22   : > { %22696 = sst [smem:[#allocation54_spill]] %s19152_s2  ;;  %s19349_s3 = sadd.s32 1, %s19156_s6  }
  0x23   : > { %22697 = sst [smem:[#allocation55_spill]] %s19156_s6  ;;  %s589_s26 = sadd.s32 1, %s19152_s2 }
  0x24   : > { %22698 = sst [smem:[#allocation56_spill]] %s19345_s30  ;;  %s586_s1 = ssub.s32 %s19156_s6, %s19349_s3 }
  0x25   : > { %22699 = sst [smem:[#allocation57_spill]] %s19349_s3  ;;  %p599_p0 = scmp.ne.s32.totalorder %s19152_s2, %s19148_s29 }
  0x26   : > { %p587_p1 = scmp.eq.s32.totalorder %s586_s1, 0  ;;  %p600_p2 = scmp.eq.s32.totalorder %s19345_s30, 1 }
  0x27   : > { %p605_p3 = scmp.ne.s32.totalorder %s19148_s29, %s19144_s19  ;;  %p606_p4 = scmp.eq.s32.totalorder %s13961_s7, 1 }
  0x28   : > { %s19360_s8 = scalar_select %p587_p1, %s19152_s2, %s589_s26  }
  0x29   : > { %p19362_p5 = por %p600_p2, %p599_p0  ;;  %p19366_p6 = por %p606_p4, %p605_p3 }
  0x2a   : > { %22700 = sst [smem:[#allocation58_spill]] %s19360_s8  ;;  %p13962_p7 = scmp.ge.s32.totalorder %s19156_s6, 1 }
  0x2b   : > { %s22701_s27 = scalar_select %p19362_p5, 1, 0 }
  0x2c   : > { %s22703_s4 = scalar_select %p19366_p6, 1, 0 }
  0x2d   : > { %22702 = sst [smem:[#allocation59_spill]] %s22701_s27  ;;  %p613_p8 = scmp.lt.s32.totalorder %s19156_s6, 3 }
  0x2e   : > { %22704 = sst [smem:[#allocation60_spill]] %s22703_s4  ;;  %p22592_p9 = scmp.eq.s32.totalorder %s19345_s30, 0 }
  0x2f   : > { %p19373_p10 = pnand %p13962_p7, %p613_p8  ;;  %s19158_s9 = smov [#allocation6]  }
  0x30   : > { %s639_s5 = sshll.u32 %s19158_s9, 4  ;;  %s19159_s0 = smov [#allocation9]   ;;  %s640_s5 = int_to_ptr.vmem [resolvable:$true] %s639_s5 }
  0x31   : > { %s22705_s28 = scalar_select %p19373_p10, 1, 0 }
  0x32   : > { %p16502_p11 = pneg %p19373_p10  ;;  %s662_s7 = sshll.u32 %s19159_s0, 4  ;;  %s19385_s7 = int_to_ptr.vmem [resolvable:$true] %s662_s7 }
  0x33   : > { %22706 = sst [smem:[#allocation61_spill]] %s22705_s28  ;;  %s22708_s2 = sld [smem:[#allocation102_spill]] }
  0x34   : > { %p19381_p12 = pnand %p22592_p9, %p16502_p11 }
  0x36   : > { %p19395_p0 = pneg %p19381_p12 }
  0x39   : > { %s22709_s3 = smov %s22708_s2  ;;  %s18430_s4 = scalar_lea.hbm %s22708_s2, 96 }
  0x3a   : > { %p18431_p13 = scmp.ne.s32.totalorder %s22709_s3, %s18430_s4  ;;  %p18437_p3 = scmp.lt.u32.totalorder %s18430_s4, %s22709_s3 }
  0x3c   : > { %p18433_p1 = pnand %p19395_p0, %p18431_p13 }
  0x3e   : > { %p18434_p2 = pneg %p18433_p1 }
  0x40   : > { %p18439_p4 = pnand %p18437_p3, %p18434_p2 }
  0x42   : > { %18442 = shalt.err (!%p18439_p4)
}
  0x43   : > { %s18443_s2 = scalar_lea.vmem %s640_s5, 96  ;;  %p18451_p9 = scmp.lt.s32.totalorder %s640_s5, %s640_s5 }
  0x44   : > { %p18444_p7 = scmp.ne.s32.totalorder %s640_s5, %s18443_s2  ;;  %p18452_p6 = scmp.lt.s32.totalorder %s18443_s2, %s18443_s2 }
  0x46   : > { %p18446_p8 = pnand %p18444_p7, %p19395_p0  ;;  %p18453_p5 = por %p18452_p6, %p18451_p9 }
  0x48   : > { %p18447_p11 = pneg %p18446_p8 }
  0x4a   : > { %p18454_p10 = pnand %p18453_p5, %p18447_p11 }
  0x4c   : > { %18457 = shalt.err (!%p18454_p10)
}
  0x4d   : > { %16508 = dma.hbm_to_vmem [thread:$0]  (!%p19381_p12), %s22709_s3, 96, %s640_s5, [#allocation7]  }
  0x4e   : > { %s22711_s4 = sld [smem:[#allocation104_spill]] }
  0x54   : > { %s18458_s1 = scalar_lea.hbm %s22711_s4, 18240 }
  0x55   : > { %p18459_p13 = scmp.ne.s32.totalorder %s22711_s4, %s18458_s1  ;;  %p18465_p5 = scmp.lt.u32.totalorder %s18458_s1, %s22711_s4 }
  0x57   : > { %p18461_p1 = pnand %p18459_p13, %p19395_p0 }
  0x59   : > { %p18462_p6 = pneg %p18461_p1 }
  0x5b   : > { %p18467_p9 = pnand %p18465_p5, %p18462_p6 }
  0x5d   : > { %18470 = shalt.err (!%p18467_p9)
}
  0x5e   : > { %s18471_s5 = scalar_lea.vmem %s19385_s7, 18240  ;;  %p18479_p4 = scmp.lt.s32.totalorder %s19385_s7, %s19385_s7 }
  0x5f   : > { %p18472_p10 = scmp.ne.s32.totalorder %s19385_s7, %s18471_s5  ;;  %p18480_p7 = scmp.lt.s32.totalorder %s18471_s5, %s18471_s5 }
  0x61   : > { %p18474_p2 = pnand %p18472_p10, %p19395_p0  ;;  %p18481_p8 = por %p18480_p7, %p18479_p4 }
  0x63   : > { %p18475_p3 = pneg %p18474_p2 }
  0x65   : > { %p18482_p11 = pnand %p18481_p8, %p18475_p3 }
  0x67   : > { %18485 = shalt.err (!%p18482_p11)
}
  0x68   : > { %s19160_s27 = smov 192   ;;  %s19161_s29 = smov 12  }
  0x69   : > { %16514 = dma.hbm_to_vmem [thread:$0]  (!%p19381_p12), %s22711_s4, 18240, %s19385_s7, [#allocation10], %s19160_s27, %s19160_s27, %s19161_s29  }
  0x6a   : > { %s19162_s25 = smov [#allocation12]   ;;  %s22712_s2 = sld [smem:[#allocation107_spill]] }
  0x6b   : > { %s689_s8 = sshll.u32 %s19162_s25, 4  ;;  %s690_s8 = int_to_ptr.vmem [resolvable:$true] %s689_s8 }
  0x70   : > { %s22713_s3 = smov %s22712_s2  ;;  %s18486_s5 = scalar_lea.hbm %s22712_s2, 192 }
  0x71   : > { %p18487_p13 = scmp.ne.s32.totalorder %s22713_s3, %s18486_s5  ;;  %p18493_p5 = scmp.lt.u32.totalorder %s18486_s5, %s22713_s3 }
  0x73   : > { %p18489_p1 = pnand %p18487_p13, %p19395_p0 }
  0x75   : > { %p18490_p6 = pneg %p18489_p1 }
  0x77   : > { %p18495_p9 = pnand %p18493_p5, %p18490_p6 }
  0x79   : > { %18498 = shalt.err (!%p18495_p9)
}
  0x7a   : > { %s18499_s7 = scalar_lea.vmem %s690_s8, 192  ;;  %p18507_p4 = scmp.lt.s32.totalorder %s690_s8, %s690_s8 }
  0x7b   : > { %p18500_p10 = scmp.ne.s32.totalorder %s690_s8, %s18499_s7  ;;  %p18508_p7 = scmp.lt.s32.totalorder %s18499_s7, %s18499_s7 }
  0x7d   : > { %p18502_p2 = pnand %p18500_p10, %p19395_p0  ;;  %p18509_p8 = por %p18508_p7, %p18507_p4 }
  0x7f   : > { %p18503_p3 = pneg %p18502_p2 }
  0x81   : > { %p18510_p11 = pnand %p18509_p8, %p18503_p3 }
  0x83   : > { %18513 = shalt.err (!%p18510_p11)
}
  0x84   : > { %s22608_s30 = smov 64   ;;  %s22610_s28 = smov 4  }
  0x85   : > { %16520 = dma.hbm_to_vmem [thread:$0]  (!%p19381_p12), %s22713_s3, 192, %s690_s8, [#allocation13], %s22608_s30, %s22608_s30, %s22610_s28  }
  0x86   : > { %s19165_s27 = smov [#allocation15]   ;;  %s19166_s19 = smov [#allocation18]  }
  0x87   : > { %s715_s29 = sshll.u32 %s19165_s27, 4  ;;  %s739_s6 = sshll.u32 %s19166_s19, 4  ;;  %s716_s29 = int_to_ptr.vmem [resolvable:$true] %s715_s29  ;;  %s740_s6 = int_to_ptr.vmem [resolvable:$true] %s739_s6 }
  0x88   : > { %s22714_s0 = sld [smem:[#allocation109_spill]] }
  0x8e   : > { %s18514_s2 = scalar_lea.hbm %s22714_s0, 12288 }
  0x8f   : > { %p18515_p13 = scmp.ne.s32.totalorder %s22714_s0, %s18514_s2  ;;  %p18521_p5 = scmp.lt.u32.totalorder %s18514_s2, %s22714_s0 }
  0x91   : > { %p18517_p1 = pnand %p18515_p13, %p19395_p0 }
  0x93   : > { %p18518_p6 = pneg %p18517_p1 }
  0x95   : > { %p18523_p9 = pnand %p18521_p5, %p18518_p6 }
  0x97   : > { %18526 = shalt.err (!%p18523_p9)
}
  0x98   : > { %s18527_s8 = scalar_lea.vmem %s716_s29, 12288  ;;  %p18535_p4 = scmp.lt.s32.totalorder %s716_s29, %s716_s29 }
  0x99   : > { %p18528_p10 = scmp.ne.s32.totalorder %s716_s29, %s18527_s8  ;;  %p18536_p7 = scmp.lt.s32.totalorder %s18527_s8, %s18527_s8 }
  0x9b   : > { %p18530_p2 = pnand %p18528_p10, %p19395_p0  ;;  %p18537_p8 = por %p18536_p7, %p18535_p4 }
  0x9d   : > { %p18531_p3 = pneg %p18530_p2 }
  0x9f   : > { %p18538_p11 = pnand %p18537_p8, %p18531_p3 }
  0xa1   : > { %18541 = shalt.err (!%p18538_p11)
}
  0xa2   : > { %s22606_s23 = smov 128   ;;  %s22607_s24 = smov 8  }
  0xa3   : > { %16526 = dma.hbm_to_vmem [thread:$0]  (!%p19381_p12), %s22714_s0, 12288, %s716_s29, [#allocation16], %s22606_s23, %s22606_s23, %s22607_s24  }
  0xa4   : > { %s22715_s11 = sld [smem:[#allocation111_spill]] }
  0xaa   : > { %s18542_s25 = scalar_lea.hbm %s22715_s11, 128 }
  0xab   : > { %p18543_p13 = scmp.ne.s32.totalorder %s22715_s11, %s18542_s25  ;;  %p18549_p5 = scmp.lt.u32.totalorder %s18542_s25, %s22715_s11 }
  0xad   : > { %p18545_p1 = pnand %p18543_p13, %p19395_p0 }
  0xaf   : > { %p18546_p6 = pneg %p18545_p1 }
  0xb1   : > { %p18551_p9 = pnand %p18549_p5, %p18546_p6 }
  0xb3   : > { %18554 = shalt.err (!%p18551_p9)
}
  0xb4   : > { %s18555_s8 = scalar_lea.vmem %s740_s6, 128  ;;  %p18563_p4 = scmp.lt.s32.totalorder %s740_s6, %s740_s6 }
  0xb5   : > { %p18556_p10 = scmp.ne.s32.totalorder %s740_s6, %s18555_s8  ;;  %p18564_p7 = scmp.lt.s32.totalorder %s18555_s8, %s18555_s8 }
  0xb7   : > { %p18558_p2 = pnand %p18556_p10, %p19395_p0  ;;  %p18565_p8 = por %p18564_p7, %p18563_p4 }
  0xb9   : > { %p18559_p3 = pneg %p18558_p2 }
  0xbb   : > { %p18566_p11 = pnand %p18565_p8, %p18559_p3 }
  0xbd   : > { %18569 = shalt.err (!%p18566_p11)
}
  0xbe   : > { %16532 = dma.hbm_to_vmem [thread:$0]  (!%p19381_p12), %s22715_s11, 128, %s740_s6, [#allocation19], %s22608_s30, %s22608_s30, %s22610_s28  }
  0xbf   : > { %s19169_s4 = smov [#allocation21]   ;;  %s19170_s19 = smov [#allocation24]  }
  0xc0   : > { %s765_s27 = sshll.u32 %s19169_s4, 4  ;;  %s790_s25 = sshll.u32 %s19170_s19, 4  ;;  %s766_s27 = int_to_ptr.vmem [resolvable:$true] %s765_s27  ;;  %s791_s25 = int_to_ptr.vmem [resolvable:$true] %s790_s25 }
  0xc1   : > { %s18570_s5 = scalar_lea.hbm %s22563_s13, 3072 }
  0xc2   : > { %p18571_p13 = scmp.ne.s32.totalorder %s22563_s13, %s18570_s5  ;;  %p18577_p5 = scmp.lt.u32.totalorder %s18570_s5, %s22563_s13 }
  0xc4   : > { %p18573_p1 = pnand %p18571_p13, %p19395_p0 }
  0xc6   : > { %p18574_p6 = pneg %p18573_p1 }
  0xc8   : > { %p18579_p9 = pnand %p18577_p5, %p18574_p6 }
  0xca   : > { %18582 = shalt.err (!%p18579_p9)
}
  0xcb   : > { %s18583_s6 = scalar_lea.vmem %s766_s27, 3072  ;;  %p18591_p4 = scmp.lt.s32.totalorder %s766_s27, %s766_s27 }
  0xcc   : > { %p18584_p10 = scmp.ne.s32.totalorder %s766_s27, %s18583_s6  ;;  %p18592_p7 = scmp.lt.s32.totalorder %s18583_s6, %s18583_s6 }
  0xce   : > { %p18586_p2 = pnand %p18584_p10, %p19395_p0  ;;  %p18593_p8 = por %p18592_p7, %p18591_p4 }
  0xd0   : > { %p18587_p3 = pneg %p18586_p2 }
  0xd2   : > { %p18594_p11 = pnand %p18593_p8, %p18587_p3 }
  0xd4   : > { %18597 = shalt.err (!%p18594_p11)
}
  0xd5   : > { %16538 = dma.hbm_to_vmem [thread:$0]  (!%p19381_p12), %s22563_s13, 3072, %s766_s27, [#allocation22], %s22608_s30, %s22608_s30, %s22610_s28  }
  0xd6   : > { %s18598_s1 = scalar_lea.hbm %s22565_s15, 32 }
  0xd7   : > { %p18599_p13 = scmp.ne.s32.totalorder %s22565_s15, %s18598_s1  ;;  %p18605_p5 = scmp.lt.u32.totalorder %s18598_s1, %s22565_s15 }
  0xd9   : > { %p18601_p1 = pnand %p18599_p13, %p19395_p0 }
  0xdb   : > { %p18602_p6 = pneg %p18601_p1 }
  0xdd   : > { %p18607_p9 = pnand %p18605_p5, %p18602_p6 }
  0xdf   : > { %18610 = shalt.err (!%p18607_p9)
}
  0xe0   : > { %s18611_s29 = scalar_lea.vmem %s791_s25, 32  ;;  %p18619_p4 = scmp.lt.s32.totalorder %s791_s25, %s791_s25 }
  0xe1   : > { %p18612_p10 = scmp.ne.s32.totalorder %s791_s25, %s18611_s29  ;;  %p18620_p7 = scmp.lt.s32.totalorder %s18611_s29, %s18611_s29 }
  0xe3   : > { %p18614_p2 = pnand %p18612_p10, %p19395_p0  ;;  %p18621_p8 = por %p18620_p7, %p18619_p4 }
  0xe5   : > { %p18615_p3 = pneg %p18614_p2 }
  0xe7   : > { %p18622_p11 = pnand %p18621_p8, %p18615_p3 }
  0xe9   : > { %18625 = shalt.err (!%p18622_p11)
}
  0xea   : > { %16544 = dma.hbm_to_vmem [thread:$0]  (!%p19381_p12), %s22565_s15, 32, %s791_s25, [#allocation25]  }
  0xeb   : > { %s19171_s23 = smov [#allocation27]   ;;  %s19172_s4 = smov [#allocation30]  }
  0xec   : > { %s813_s21 = sshll.u32 %s19171_s23, 4  ;;  %s840_s19 = sshll.u32 %s19172_s4, 4  ;;  %s814_s21 = int_to_ptr.vmem [resolvable:$true] %s813_s21  ;;  %s841_s19 = int_to_ptr.vmem [resolvable:$true] %s840_s19 }
  0xed   : > { %s18626_s5 = scalar_lea.hbm %s22567_s17, 3072 }
  0xee   : > { %p18627_p13 = scmp.ne.s32.totalorder %s22567_s17, %s18626_s5  ;;  %p18633_p5 = scmp.lt.u32.totalorder %s18626_s5, %s22567_s17 }
  0xf0   : > { %p18629_p1 = pnand %p18627_p13, %p19395_p0 }
  0xf2   : > { %p18630_p6 = pneg %p18629_p1 }
  0xf4   : > { %p18635_p9 = pnand %p18633_p5, %p18630_p6 }
  0xf6   : > { %18638 = shalt.err (!%p18635_p9)
}
  0xf7   : > { %s18639_s25 = scalar_lea.vmem %s814_s21, 3072  ;;  %p18647_p4 = scmp.lt.s32.totalorder %s814_s21, %s814_s21 }
  0xf8   : > { %p18640_p10 = scmp.ne.s32.totalorder %s814_s21, %s18639_s25  ;;  %p18648_p7 = scmp.lt.s32.totalorder %s18639_s25, %s18639_s25 }
  0xfa   : > { %p18642_p2 = pnand %p18640_p10, %p19395_p0  ;;  %p18649_p8 = por %p18648_p7, %p18647_p4 }
  0xfc   : > { %p18643_p3 = pneg %p18642_p2 }
  0xfe   : > { %p18650_p11 = pnand %p18649_p8, %p18643_p3 }
 0x100   : > { %18653 = shalt.err (!%p18650_p11)
}
 0x101   : > { %16550 = dma.hbm_to_vmem [thread:$0]  (!%p19381_p12), %s22567_s17, 3072, %s814_s21, [#allocation28], %s22608_s30, %s22608_s30, %s22610_s28  }
 0x102   : > { %s18654_s2 = scalar_lea.hbm %s22570_s20, 960 }
 0x103   : > { %p18655_p13 = scmp.ne.s32.totalorder %s22570_s20, %s18654_s2  ;;  %p18661_p5 = scmp.lt.u32.totalorder %s18654_s2, %s22570_s20 }
 0x105   : > { %p18657_p1 = pnand %p18655_p13, %p19395_p0 }
 0x107   : > { %p18658_p6 = pneg %p18657_p1 }
 0x109   : > { %p18663_p9 = pnand %p18661_p5, %p18658_p6 }
 0x10b   : > { %18666 = shalt.err (!%p18663_p9)
}
 0x10c   : > { %s18667_s27 = scalar_lea.vmem %s841_s19, 960  ;;  %p18675_p4 = scmp.lt.s32.totalorder %s841_s19, %s841_s19 }
 0x10d   : > { %p18668_p10 = scmp.ne.s32.totalorder %s841_s19, %s18667_s27  ;;  %p18676_p7 = scmp.lt.s32.totalorder %s18667_s27, %s18667_s27 }
 0x10f   : > { %p18670_p2 = pnand %p18668_p10, %p19395_p0  ;;  %p18677_p8 = por %p18676_p7, %p18675_p4 }
 0x111   : > { %p18671_p3 = pneg %p18670_p2 }
 0x113   : > { %p18678_p11 = pnand %p18677_p8, %p18671_p3 }
 0x115   : > { %18681 = shalt.err (!%p18678_p11)
}
 0x116   : > { %16556 = dma.hbm_to_vmem [thread:$0]  (!%p19381_p12), %s22570_s20, 960, %s841_s19, [#allocation31], %s22608_s30, %s22608_s30, %s22610_s28  }
 0x117   : > { %s19173_s6 = smov [#allocation33]   ;;  %s19174_s4 = smov [#allocation3]  }
 0x118   : > { %s867_s23 = sshll.u32 %s19173_s6, 4  ;;  %s625_s1 = sshll.u32 %s19174_s4, 4  ;;  %s868_s23 = int_to_ptr.vmem [resolvable:$true] %s867_s23  ;;  %s626_s1 = int_to_ptr.vmem [resolvable:$true] %s625_s1 }
 0x119   : > { %s18682_s7 = scalar_lea.hbm %s22572_s22, 16 }
 0x11a   : > { %p18683_p13 = scmp.ne.s32.totalorder %s22572_s22, %s18682_s7  ;;  %p18689_p5 = scmp.lt.u32.totalorder %s18682_s7, %s22572_s22 }
 0x11c   : > { %p18685_p1 = pnand %p18683_p13, %p19395_p0 }
 0x11e   : > { %p18686_p6 = pneg %p18685_p1 }
 0x120   : > { %p18691_p9 = pnand %p18689_p5, %p18686_p6 }
 0x122   : > { %18694 = shalt.err (!%p18691_p9)
}
 0x123   : > { %s18695_s19 = scalar_lea.vmem %s868_s23, 16  ;;  %s18702_s25 = scalar_lea.vmem %s868_s23, 32 }
 0x124   : > { %p18696_p10 = scmp.ne.s32.totalorder %s868_s23, %s18695_s19  ;;  %p18703_p4 = scmp.lt.s32.totalorder %s868_s23, %s868_s23 }
 0x125   : > { %p18704_p7 = scmp.lt.s32.totalorder %s18702_s25, %s18695_s19 }
 0x126   : > { %p18698_p2 = pnand %p18696_p10, %p19395_p0 }
 0x127   : > { %p18705_p8 = por %p18704_p7, %p18703_p4 }
 0x128   : > { %p18699_p3 = pneg %p18698_p2 }
 0x12a   : > { %p18706_p11 = pnand %p18705_p8, %p18699_p3 }
 0x12c   : > { %18709 = shalt.err (!%p18706_p11)
}
 0x12d   : > { %16562 = dma.hbm_to_vmem [thread:$0]  (!%p19381_p12), %s22572_s22, 16, %s868_s23, [#allocation34]  }
 0x12e   : > { %s22716_s7 = sld [smem:[#allocation101_spill]] }
 0x134   : > { %s18710_s8 = scalar_lea.hbm %s22716_s7, 55296 }
 0x135   : > { %p18711_p13 = scmp.ne.s32.totalorder %s22716_s7, %s18710_s8  ;;  %p18717_p5 = scmp.lt.u32.totalorder %s18710_s8, %s22716_s7 }
 0x137   : > { %p18713_p1 = pnand %p18711_p13, %p19395_p0 }
 0x139   : > { %p18714_p6 = pneg %p18713_p1 }
 0x13b   : > { %p18719_p9 = pnand %p18717_p5, %p18714_p6 }
 0x13d   : > { %18722 = shalt.err (!%p18719_p9)
}
 0x13e   : > { %s18723_s25 = scalar_lea.vmem %s626_s1, 55296  ;;  %p18731_p4 = scmp.lt.s32.totalorder %s626_s1, %s626_s1 }
 0x13f   : > { %p18724_p10 = scmp.ne.s32.totalorder %s626_s1, %s18723_s25  ;;  %p18732_p7 = scmp.lt.s32.totalorder %s18723_s25, %s18723_s25 }
 0x141   : > { %p18726_p2 = pnand %p18724_p10, %p19395_p0  ;;  %p18733_p8 = por %p18732_p7, %p18731_p4 }
 0x143   : > { %p18727_p3 = pneg %p18726_p2 }
 0x145   : > { %p18734_p11 = pnand %p18733_p8, %p18727_p3 }
 0x147   : > { %18737 = shalt.err (!%p18734_p11)
}
 0x148   : > { %s19175_s23 = smov 384   ;;  %s19176_s6 = smov 24  }
 0x149   : > { %16505 = dma.hbm_to_vmem [thread:$0]  (!%p19381_p12), %s22716_s7, 55296, %s626_s1, [#allocation4], %s19175_s23, %s19175_s23, %s19176_s6  }
 0x14a   : > { %s19177_s5 = smov [#allocation8]   ;;  %s19178_s29 = smov [#allocation11]  }
 0x14b   : > { %s649_s8 = sshll.u32 %s19177_s5, 4  ;;  %s679_s27 = sshll.u32 %s19178_s29, 4  ;;  %s650_s8 = int_to_ptr.vmem [resolvable:$true] %s649_s8  ;;  %s680_s27 = int_to_ptr.vmem [resolvable:$true] %s679_s27 }
 0x14c   : > { %s22717_s25 = sld [smem:[#allocation103_spill]] }
 0x152   : > { %s18738_s24 = scalar_lea.hbm %s22717_s25, 384 }
 0x153   : > { %p18739_p13 = scmp.ne.s32.totalorder %s22717_s25, %s18738_s24  ;;  %p18745_p5 = scmp.lt.u32.totalorder %s18738_s24, %s22717_s25 }
 0x155   : > { %p18741_p1 = pnand %p18739_p13, %p19395_p0 }
 0x157   : > { %p18742_p6 = pneg %p18741_p1 }
 0x159   : > { %p18747_p9 = pnand %p18745_p5, %p18742_p6 }
 0x15b   : > { %18750 = shalt.err (!%p18747_p9)
}
 0x15c   : > { %s18751_s1 = scalar_lea.vmem %s650_s8, 384  ;;  %p18759_p4 = scmp.lt.s32.totalorder %s650_s8, %s650_s8 }
 0x15d   : > { %p18752_p10 = scmp.ne.s32.totalorder %s650_s8, %s18751_s1  ;;  %p18760_p7 = scmp.lt.s32.totalorder %s18751_s1, %s18751_s1 }
 0x15f   : > { %p18754_p2 = pnand %p18752_p10, %p19395_p0  ;;  %p18761_p8 = por %p18760_p7, %p18759_p4 }
 0x161   : > { %p18755_p3 = pneg %p18754_p2 }
 0x163   : > { %p18762_p11 = pnand %p18761_p8, %p18755_p3 }
 0x165   : > { %18765 = shalt.err (!%p18762_p11)
}
 0x166   : > { %s22718_s30 = smov 4   ;;  %s22719_s28 = smov 64  }
 0x167   : > { %16511 = dma.hbm_to_vmem [thread:$0]  (!%p19381_p12), %s22717_s25, 384, %s650_s8, [#allocation7], %s22719_s28, %s22719_s28, %s22718_s30  }
 0x168   : > { %s22720_s6 = sld [smem:[#allocation106_spill]] }
 0x16e   : > { %s22721_s4 = smov %s22720_s6  ;;  %s18766_s2 = scalar_lea.hbm %s22720_s6, 48 }
 0x16f   : > { %p18767_p13 = scmp.ne.s32.totalorder %s22721_s4, %s18766_s2  ;;  %p18773_p5 = scmp.lt.u32.totalorder %s18766_s2, %s22721_s4 }
 0x171   : > { %p18769_p1 = pnand %p18767_p13, %p19395_p0 }
 0x173   : > { %p18770_p6 = pneg %p18769_p1 }
 0x175   : > { %p18775_p9 = pnand %p18773_p5, %p18770_p6 }
 0x177   : > { %18778 = shalt.err (!%p18775_p9)
}
 0x178   : > { %s18779_s1 = scalar_lea.vmem %s680_s27, 48  ;;  %s18786_s8 = scalar_lea.vmem %s680_s27, 64 }
 0x179   : > { %p18780_p10 = scmp.ne.s32.totalorder %s680_s27, %s18779_s1  ;;  %p18787_p4 = scmp.lt.s32.totalorder %s680_s27, %s680_s27 }
 0x17a   : > { %p18788_p7 = scmp.lt.s32.totalorder %s18786_s8, %s18779_s1 }
 0x17b   : > { %p18782_p2 = pnand %p18780_p10, %p19395_p0 }
 0x17c   : > { %p18789_p8 = por %p18788_p7, %p18787_p4 }
 0x17d   : > { %p18783_p3 = pneg %p18782_p2 }
 0x17f   : > { %p18790_p11 = pnand %p18789_p8, %p18783_p3 }
 0x181   : > { %18793 = shalt.err (!%p18790_p11)
}
 0x182   : > { %16517 = dma.hbm_to_vmem [thread:$0]  (!%p19381_p12), %s22721_s4, 48, %s680_s27, [#allocation10]  }
 0x183   : > { %s19179_s24 = smov [#allocation14]   ;;  %s19180_s6 = smov [#allocation17]  }
 0x184   : > { %s702_s23 = sshll.u32 %s19179_s24, 4  ;;  %s729_s2 = sshll.u32 %s19180_s6, 4  ;;  %s703_s23 = int_to_ptr.vmem [resolvable:$true] %s702_s23  ;;  %s730_s2 = int_to_ptr.vmem [resolvable:$true] %s729_s2 }
 0x185   : > { %s22722_s21 = sld [smem:[#allocation108_spill]] }
 0x18b   : > { %s18794_s19 = scalar_lea.hbm %s22722_s21, 6016 }
 0x18c   : > { %p18795_p13 = scmp.ne.s32.totalorder %s22722_s21, %s18794_s19  ;;  %p18801_p5 = scmp.lt.u32.totalorder %s18794_s19, %s22722_s21 }
 0x18e   : > { %p18797_p1 = pnand %p18795_p13, %p19395_p0 }
 0x190   : > { %p18798_p6 = pneg %p18797_p1 }
 0x192   : > { %p18803_p9 = pnand %p18801_p5, %p18798_p6 }
 0x194   : > { %18806 = shalt.err (!%p18803_p9)
}
 0x195   : > { %s18807_s27 = scalar_lea.vmem %s703_s23, 6016  ;;  %p18815_p4 = scmp.lt.s32.totalorder %s703_s23, %s703_s23 }
 0x196   : > { %p18808_p10 = scmp.ne.s32.totalorder %s703_s23, %s18807_s27  ;;  %p18816_p7 = scmp.lt.s32.totalorder %s18807_s27, %s18807_s27 }
 0x198   : > { %p18810_p2 = pnand %p18808_p10, %p19395_p0  ;;  %p18817_p8 = por %p18816_p7, %p18815_p4 }
 0x19a   : > { %p18811_p3 = pneg %p18810_p2 }
 0x19c   : > { %p18818_p11 = pnand %p18817_p8, %p18811_p3 }
 0x19e   : > { %18821 = shalt.err (!%p18818_p11)
}
 0x19f   : > { %s22723_s0 = smov 8   ;;  %s22724_s24 = smov 128  }
 0x1a0   : > { %16523 = dma.hbm_to_vmem [thread:$0]  (!%p19381_p12), %s22722_s21, 6016, %s703_s23, [#allocation13], %s22724_s24, %s22724_s24, %s22723_s0  }
 0x1a1   : > { %s22725_s10 = sld [smem:[#allocation110_spill]] }
 0x1a7   : > { %s18822_s19 = scalar_lea.hbm %s22725_s10, 32 }
 0x1a8   : > { %p18823_p13 = scmp.ne.s32.totalorder %s22725_s10, %s18822_s19  ;;  %p18829_p5 = scmp.lt.u32.totalorder %s18822_s19, %s22725_s10 }
 0x1aa   : > { %p18825_p1 = pnand %p18823_p13, %p19395_p0 }
 0x1ac   : > { %p18826_p6 = pneg %p18825_p1 }
 0x1ae   : > { %p18831_p9 = pnand %p18829_p5, %p18826_p6 }
 0x1b0   : > { %18834 = shalt.err (!%p18831_p9)
}
 0x1b1   : > { %s18835_s7 = scalar_lea.vmem %s730_s2, 32  ;;  %p18843_p4 = scmp.lt.s32.totalorder %s730_s2, %s730_s2 }
 0x1b2   : > { %p18836_p10 = scmp.ne.s32.totalorder %s730_s2, %s18835_s7  ;;  %p18844_p7 = scmp.lt.s32.totalorder %s18835_s7, %s18835_s7 }
 0x1b4   : > { %p18838_p2 = pnand %p18836_p10, %p19395_p0  ;;  %p18845_p8 = por %p18844_p7, %p18843_p4 }
 0x1b6   : > { %p18839_p3 = pneg %p18838_p2 }
 0x1b8   : > { %p18846_p11 = pnand %p18845_p8, %p18839_p3 }
 0x1ba   : > { %18849 = shalt.err (!%p18846_p11)
}
 0x1bb   : > { %16529 = dma.hbm_to_vmem [thread:$0]  (!%p19381_p12), %s22725_s10, 32, %s730_s2, [#allocation16]  }
 0x1bc   : > { %s19181_s24 = smov [#allocation20]   ;;  %s19182_s5 = smov [#allocation23]  }
 0x1bd   : > { %s752_s6 = sshll.u32 %s19181_s24, 4  ;;  %s779_s29 = sshll.u32 %s19182_s5, 4  ;;  %s753_s6 = int_to_ptr.vmem [resolvable:$true] %s752_s6  ;;  %s780_s29 = int_to_ptr.vmem [resolvable:$true] %s779_s29 }
 0x1be   : > { %s18850_s8 = scalar_lea.hbm %s22562_s12, 1984 }
 0x1bf   : > { %p18851_p13 = scmp.ne.s32.totalorder %s22562_s12, %s18850_s8  ;;  %p18857_p5 = scmp.lt.u32.totalorder %s18850_s8, %s22562_s12 }
 0x1c1   : > { %p18853_p1 = pnand %p18851_p13, %p19395_p0 }
 0x1c3   : > { %p18854_p6 = pneg %p18853_p1 }
 0x1c5   : > { %p18859_p9 = pnand %p18857_p5, %p18854_p6 }
 0x1c7   : > { %18862 = shalt.err (!%p18859_p9)
}
 0x1c8   : > { %s18863_s2 = scalar_lea.vmem %s753_s6, 1984  ;;  %p18871_p4 = scmp.lt.s32.totalorder %s753_s6, %s753_s6 }
 0x1c9   : > { %p18864_p10 = scmp.ne.s32.totalorder %s753_s6, %s18863_s2  ;;  %p18872_p7 = scmp.lt.s32.totalorder %s18863_s2, %s18863_s2 }
 0x1cb   : > { %p18866_p2 = pnand %p18864_p10, %p19395_p0  ;;  %p18873_p8 = por %p18872_p7, %p18871_p4 }
 0x1cd   : > { %p18867_p3 = pneg %p18866_p2 }
 0x1cf   : > { %p18874_p11 = pnand %p18873_p8, %p18867_p3 }
 0x1d1   : > { %18877 = shalt.err (!%p18874_p11)
}
 0x1d2   : > { %16535 = dma.hbm_to_vmem [thread:$0]  (!%p19381_p12), %s22562_s12, 1984, %s753_s6, [#allocation19], %s22719_s28, %s22719_s28, %s22718_s30  }
 0x1d3   : > { %s18878_s1 = scalar_lea.hbm %s22564_s14, 16 }
 0x1d4   : > { %p18879_p13 = scmp.ne.s32.totalorder %s22564_s14, %s18878_s1  ;;  %p18885_p5 = scmp.lt.u32.totalorder %s18878_s1, %s22564_s14 }
 0x1d6   : > { %p18881_p1 = pnand %p18879_p13, %p19395_p0 }
 0x1d8   : > { %p18882_p6 = pneg %p18881_p1 }
 0x1da   : > { %p18887_p9 = pnand %p18885_p5, %p18882_p6 }
 0x1dc   : > { %18890 = shalt.err (!%p18887_p9)
}
 0x1dd   : > { %s18891_s23 = scalar_lea.vmem %s780_s29, 16  ;;  %s18898_s6 = scalar_lea.vmem %s780_s29, 32 }
 0x1de   : > { %p18892_p10 = scmp.ne.s32.totalorder %s780_s29, %s18891_s23  ;;  %p18899_p4 = scmp.lt.s32.totalorder %s780_s29, %s780_s29 }
 0x1df   : > { %p18900_p7 = scmp.lt.s32.totalorder %s18898_s6, %s18891_s23 }
 0x1e0   : > { %p18894_p2 = pnand %p18892_p10, %p19395_p0 }
 0x1e1   : > { %p18901_p8 = por %p18900_p7, %p18899_p4 }
 0x1e2   : > { %p18895_p3 = pneg %p18894_p2 }
 0x1e4   : > { %p18902_p11 = pnand %p18901_p8, %p18895_p3 }
 0x1e6   : > { %18905 = shalt.err (!%p18902_p11)
}
 0x1e7   : > { %16541 = dma.hbm_to_vmem [thread:$0]  (!%p19381_p12), %s22564_s14, 16, %s780_s29, [#allocation22]  }
 0x1e8   : > { %s19183_s24 = smov [#allocation26]   ;;  %s19184_s19 = smov [#allocation29]  }
 0x1e9   : > { %s800_s5 = sshll.u32 %s19183_s24, 4  ;;  %s827_s1 = sshll.u32 %s19184_s19, 4  ;;  %s801_s5 = int_to_ptr.vmem [resolvable:$true] %s800_s5  ;;  %s828_s1 = int_to_ptr.vmem [resolvable:$true] %s827_s1 }
 0x1ea   : > { %s18906_s27 = scalar_lea.hbm %s22566_s16, 960 }
 0x1eb   : > { %p18907_p13 = scmp.ne.s32.totalorder %s22566_s16, %s18906_s27  ;;  %p18913_p5 = scmp.lt.u32.totalorder %s18906_s27, %s22566_s16 }
 0x1ed   : > { %p18909_p1 = pnand %p18907_p13, %p19395_p0 }
 0x1ef   : > { %p18910_p6 = pneg %p18909_p1 }
 0x1f1   : > { %p18915_p9 = pnand %p18913_p5, %p18910_p6 }
 0x1f3   : > { %18918 = shalt.err (!%p18915_p9)
}
 0x1f4   : > { %s18919_s29 = scalar_lea.vmem %s801_s5, 960  ;;  %p18927_p4 = scmp.lt.s32.totalorder %s801_s5, %s801_s5 }
 0x1f5   : > { %p18920_p10 = scmp.ne.s32.totalorder %s801_s5, %s18919_s29  ;;  %p18928_p7 = scmp.lt.s32.totalorder %s18919_s29, %s18919_s29 }
 0x1f7   : > { %p18922_p2 = pnand %p18920_p10, %p19395_p0  ;;  %p18929_p8 = por %p18928_p7, %p18927_p4 }
 0x1f9   : > { %p18923_p3 = pneg %p18922_p2 }
 0x1fb   : > { %p18930_p11 = pnand %p18929_p8, %p18923_p3 }
 0x1fd   : > { %18933 = shalt.err (!%p18930_p11)
}
 0x1fe   : > { %16547 = dma.hbm_to_vmem [thread:$0]  (!%p19381_p12), %s22566_s16, 960, %s801_s5, [#allocation25], %s22719_s28, %s22719_s28, %s22718_s30  }
 0x1ff   : > { %s18934_s3 = scalar_lea.hbm %s22568_s18, 16 }
 0x200   : > { %p18935_p13 = scmp.ne.s32.totalorder %s22568_s18, %s18934_s3  ;;  %p18941_p5 = scmp.lt.u32.totalorder %s18934_s3, %s22568_s18 }
 0x202   : > { %p18937_p1 = pnand %p18935_p13, %p19395_p0 }
 0x204   : > { %p18938_p6 = pneg %p18937_p1 }
 0x206   : > { %p18943_p9 = pnand %p18941_p5, %p18938_p6 }
 0x208   : > { %18946 = shalt.err (!%p18943_p9)
}
 0x209   : > { %s18947_s2 = scalar_lea.vmem %s828_s1, 16  ;;  %s18954_s5 = scalar_lea.vmem %s828_s1, 32 }
 0x20a   : > { %p18948_p10 = scmp.ne.s32.totalorder %s828_s1, %s18947_s2  ;;  %p18955_p4 = scmp.lt.s32.totalorder %s828_s1, %s828_s1 }
 0x20b   : > { %p18956_p7 = scmp.lt.s32.totalorder %s18954_s5, %s18947_s2 }
 0x20c   : > { %p18950_p2 = pnand %p18948_p10, %p19395_p0 }
 0x20d   : > { %p18957_p8 = por %p18956_p7, %p18955_p4 }
 0x20e   : > { %p18951_p3 = pneg %p18950_p2 }
 0x210   : > { %p18958_p11 = pnand %p18957_p8, %p18951_p3 }
 0x212   : > { %18961 = shalt.err (!%p18958_p11)
}
 0x213   : > { %16553 = dma.hbm_to_vmem [thread:$0]  (!%p19381_p12), %s22568_s18, 16, %s828_s1, [#allocation28]  }
 0x214   : > { %s19185_s24 = smov [#allocation32]   ;;  %s19186_s8 = smov [#allocation35]  }
 0x215   : > { %s853_s19 = sshll.u32 %s19185_s24, 4  ;;  %s877_s3 = sshll.u32 %s19186_s8, 4  ;;  %s854_s19 = int_to_ptr.vmem [resolvable:$true] %s853_s19  ;;  %s878_s3 = int_to_ptr.vmem [resolvable:$true] %s877_s3 }
 0x216   : > { %s22726_s23 = sld [smem:[#allocation112_spill]] }
 0x21c   : > { %s18962_s6 = scalar_lea.hbm %s22726_s23, 1024 }
 0x21d   : > { %p18963_p13 = scmp.ne.s32.totalorder %s22726_s23, %s18962_s6  ;;  %p18969_p5 = scmp.lt.u32.totalorder %s18962_s6, %s22726_s23 }
 0x21f   : > { %p18965_p1 = pnand %p18963_p13, %p19395_p0 }
 0x221   : > { %p18966_p6 = pneg %p18965_p1 }
 0x223   : > { %p18971_p9 = pnand %p18969_p5, %p18966_p6 }
 0x225   : > { %18974 = shalt.err (!%p18971_p9)
}
 0x226   : > { %s18975_s1 = scalar_lea.vmem %s854_s19, 1024  ;;  %p18983_p4 = scmp.lt.s32.totalorder %s854_s19, %s854_s19 }
 0x227   : > { %p18976_p10 = scmp.ne.s32.totalorder %s854_s19, %s18975_s1  ;;  %p18984_p7 = scmp.lt.s32.totalorder %s18975_s1, %s18975_s1 }
 0x229   : > { %p18978_p2 = pnand %p18976_p10, %p19395_p0  ;;  %p18985_p8 = por %p18984_p7, %p18983_p4 }
 0x22b   : > { %p18979_p3 = pneg %p18978_p2 }
 0x22d   : > { %p18986_p11 = pnand %p18985_p8, %p18979_p3 }
 0x22f   : > { %18989 = shalt.err (!%p18986_p11)
}
 0x230   : > { %16559 = dma.hbm_to_vmem [thread:$0]  (!%p19381_p12), %s22726_s23, 1024, %s854_s19, [#allocation31], %s22719_s28, %s22719_s28, %s22718_s30  }
 0x231   : > { %s22727_s27 = sld [smem:[#allocation113_spill]] }
 0x237   : > { %s18990_s7 = scalar_lea.hbm %s22727_s27, 1024 }
 0x238   : > { %p18991_p13 = scmp.ne.s32.totalorder %s22727_s27, %s18990_s7  ;;  %p18997_p5 = scmp.lt.u32.totalorder %s18990_s7, %s22727_s27 }
 0x23a   : > { %p18993_p1 = pnand %p18991_p13, %p19395_p0 }
 0x23c   : > { %p18994_p6 = pneg %p18993_p1 }
 0x23e   : > { %p18999_p9 = pnand %p18997_p5, %p18994_p6 }
 0x240   : > { %19002 = shalt.err (!%p18999_p9)
}
 0x241   : > { %s19003_s1 = scalar_lea.vmem %s878_s3, 1024  ;;  %p19011_p4 = scmp.lt.s32.totalorder %s878_s3, %s878_s3 }
 0x242   : > { %p19004_p10 = scmp.ne.s32.totalorder %s878_s3, %s19003_s1  ;;  %p19012_p7 = scmp.lt.s32.totalorder %s19003_s1, %s19003_s1 }
 0x244   : > { %p19006_p2 = pnand %p19004_p10, %p19395_p0  ;;  %p19013_p8 = por %p19012_p7, %p19011_p4 }
 0x246   : > { %p19007_p3 = pneg %p19006_p2 }
 0x248   : > { %p19014_p11 = pnand %p19013_p8, %p19007_p3 }
 0x24a   : > { %19017 = shalt.err (!%p19014_p11)
}
 0x24b   : > { %16565 = dma.hbm_to_vmem [thread:$0]  (!%p19381_p12), %s22727_s27, 1024, %s878_s3, [#allocation34], %s22719_s28, %s22719_s28, %s22718_s30  }
 0x24c   : > { %s19187_s0 = smov [#allocation36]   ;;  %s22728_s6 = sld [smem:[#allocation114_spill]] }
 0x24d   : > { %s891_s24 = sshll.u32 %s19187_s0, 4  ;;  %s892_s24 = int_to_ptr.vmem [resolvable:$true] %s891_s24 }
 0x252   : > { %s22729_s5 = smov %s22728_s6  ;;  %s19018_s2 = scalar_lea.hbm %s22728_s6, 16 }
 0x253   : > { %p19019_p13 = scmp.ne.s32.totalorder %s22729_s5, %s19018_s2  ;;  %p19025_p5 = scmp.lt.u32.totalorder %s19018_s2, %s22729_s5 }
 0x255   : > { %p19021_p1 = pnand %p19019_p13, %p19395_p0 }
 0x257   : > { %p19022_p6 = pneg %p19021_p1 }
 0x259   : > { %p19027_p9 = pnand %p19025_p5, %p19022_p6 }
 0x25b   : > { %19030 = shalt.err (!%p19027_p9)
}
 0x25c   : > { %s19031_s30 = scalar_lea.vmem %s892_s24, 16  ;;  %s19038_s28 = scalar_lea.vmem %s892_s24, 32 }
 0x25d   : > { %p19032_p10 = scmp.ne.s32.totalorder %s892_s24, %s19031_s30  ;;  %p19039_p4 = scmp.lt.s32.totalorder %s892_s24, %s892_s24 }
 0x25e   : > { %p19040_p7 = scmp.lt.s32.totalorder %s19038_s28, %s19031_s30 }
 0x25f   : > { %p19034_p2 = pnand %p19032_p10, %p19395_p0 }
 0x260   : > { %p19041_p8 = por %p19040_p7, %p19039_p4 }
 0x261   : > { %p19035_p3 = pneg %p19034_p2 }
 0x263   : > { %p19042_p11 = pnand %p19041_p8, %p19035_p3 }
 0x265   : > { %19045 = shalt.err (!%p19042_p11)
}
 0x266   : > { %16568 = dma.hbm_to_vmem [thread:$0]  (!%p19381_p12), %s22729_s5, 16, %s892_s24, [#allocation37]  }
 0x267   : > { %s22730_s10 = sld [smem:[#allocation61_spill]] }
 0x26d   : > { %p22731_p13 = scmp.ne.s32.totalorder %s22730_s10, 0 }
 0x26f   : > { %912 = sbr.rel (%p22731_p13) target bundleno = 6186 (0x182a), region = 120 }
 0x276   : > { %s22732_s11 = sld [smem:[#allocation56_spill]] }
 0x27c   : > { %p22733_p1 = scmp.eq.s32.totalorder %s22732_s11, 0 }
 0x27e   : > { %19091 = dma.done.wait (%p22733_p1), [#allocation4], 55296   ;;  %p22734_p0 = pmov %p22733_p1 }
 0x280   : > { %19093 = vsyncadd (%p22734_p0), [#allocation4], 4294912000  ;;  %p22735_p6 = pmov %p22734_p0 }
 0x281   : > { %p22736_p5 = pmov %p22734_p0 }
 0x282   : > { %19095 = dma.done.wait (%p22735_p6), [#allocation7], 480  }
 0x283   : > { %19097 = vsyncadd (%p22736_p5), [#allocation7], 4294966816  ;;  %p22737_p9 = pmov %p22734_p0 }
 0x284   : > { %p22738_p12 = pmov %p22734_p0 }
 0x285   : > { %19099 = dma.done.wait (%p22737_p9), [#allocation10], 18288  }
 0x286   : > { %19101 = vsyncadd (%p22738_p12), [#allocation10], 4294949008  ;;  %p22739_p10 = pmov %p22734_p0 }
 0x287   : > { %p22740_p2 = pmov %p22734_p0 }
 0x288   : > { %19103 = dma.done.wait (%p22739_p10), [#allocation13], 6208  }
 0x289   : > { %19105 = vsyncadd (%p22740_p2), [#allocation13], 4294961088  ;;  %p22741_p3 = pmov %p22734_p0 }
 0x28a   : > { %p22742_p4 = pmov %p22734_p0 }
 0x28b   : > { %19107 = dma.done.wait (%p22741_p3), [#allocation16], 12320  }
 0x28c   : > { %19109 = vsyncadd (%p22742_p4), [#allocation16], 4294954976  ;;  %p22743_p7 = pmov %p22734_p0 }
 0x28d   : > { %p22744_p8 = pmov %p22734_p0 }
 0x28e   : > { %19111 = dma.done.wait (%p22743_p7), [#allocation19], 2112  }
 0x28f   : > { %19113 = vsyncadd (%p22744_p8), [#allocation19], 4294965184  ;;  %p22745_p11 = pmov %p22734_p0 }
 0x290   : > { %p22746_p13 = pmov %p22734_p0 }
 0x291   : > { %19115 = dma.done.wait (%p22745_p11), [#allocation22], 3088  }
 0x292   : > { %19117 = vsyncadd (%p22746_p13), [#allocation22], 4294964208  ;;  %p22747_p1 = pmov %p22734_p0 }
 0x294   : > { %19119 = dma.done.wait (%p22747_p1), [#allocation25], 992  }
 0x295   : > { %19121 = vsyncadd (%p22734_p0), [#allocation25], 4294966304  ;;  %p22748_p6 = pmov %p22734_p0 }
 0x296   : > { %p22749_p5 = pmov %p22734_p0 }
 0x297   : > { %19123 = dma.done.wait (%p22748_p6), [#allocation28], 3088  }
 0x298   : > { %19125 = vsyncadd (%p22749_p5), [#allocation28], 4294964208  ;;  %p22750_p9 = pmov %p22734_p0 }
 0x299   : > { %p22751_p12 = pmov %p22734_p0 }
 0x29a   : > { %19127 = dma.done.wait (%p22750_p9), [#allocation31], 1984  }
 0x29b   : > { %19129 = vsyncadd (%p22751_p12), [#allocation31], 4294965312  ;;  %p22752_p10 = pmov %p22734_p0 }
 0x29c   : > { %p22753_p2 = pmov %p22734_p0 }
 0x29d   : > { %19131 = dma.done.wait (%p22752_p10), [#allocation34], 1040  }
 0x29e   : > { %19133 = vsyncadd (%p22753_p2), [#allocation34], 4294966256  ;;  %p22754_p3 = pmov %p22734_p0 }
 0x29f   : > { %p22755_p4 = pmov %p22734_p0 }
 0x2a0   : > { %19135 = dma.done.wait (%p22754_p3), [#allocation37], 16  }
 0x2a1   : > { %19137 = vsyncadd (%p22755_p4), [#allocation37], 4294967280  ;;  %v16925_v0 = vld [vmem:[#allocation3 + $0x484] ss:$24 sps:$4 sm:$0xff]   ;;  %v16929_v2 = vld [vmem:[#allocation3 + $0x480] ss:$24 sps:$4 sm:$0xff]  }
 0x2a2   : > { %v16927_v1 = vld [vmem:[#allocation3 + $0x48c] ss:$24 sps:$4 sm:$0xff]   ;;  %2340 = vmatprep.subr.bf16.mxu0 %v16925_v0  ;;  %v16930_v3 = vld [vmem:[#allocation3 + $0x488] ss:$24 sps:$4 sm:$0xff]   ;;  %v16933_v5 = vld [vmem:[#allocation3 + $0x4bc] ss:$24 sps:$4 sm:$0xff]  }
 0x2a3   : > { %2526 = vmatprep.subr.bf16.mxu1 %v16927_v1  ;;  %v16931_v4 = vld [vmem:[#allocation3 + $0x4b4] ss:$24 sps:$4 sm:$0xff]   ;;  %2341 = vmatpush1.bf16.msra.mxu0 %v16929_v2  ;;  %v16935_v6 = vld [vmem:[#allocation3 + $0x4b0] ss:$24 sps:$4 sm:$0xff]   ;;  %v16937_v8 = vld [vmem:[#allocation3 + $0x4e4] ss:$24 sps:$4 sm:$0xff]  }
 0x2a4   : > { %2527 = vmatpush1.bf16.msra.mxu1 %v16930_v3  ;;  %2342 = vmatprep.subr.bf16.mxu0 %v16931_v4  ;;  %v16936_v7 = vld [vmem:[#allocation3 + $0x4b8] ss:$24 sps:$4 sm:$0xff]   ;;  %v16939_v9 = vld [vmem:[#allocation3 + $0x4ec] ss:$24 sps:$4 sm:$0xff]   ;;  %v16942_v11 = vld [vmem:[#allocation3 + $0x4e8] ss:$24 sps:$4 sm:$0xff]  }
 0x2a5   : > { %2528 = vmatprep.subr.bf16.mxu1 %v16933_v5  ;;  %v16941_v10 = vld [vmem:[#allocation3 + $0x4e0] ss:$24 sps:$4 sm:$0xff]   ;;  %v16943_v12 = vld [vmem:[#allocation3 + $0x514] ss:$24 sps:$4 sm:$0xff]   ;;  %v16947_v14 = vld [vmem:[#allocation3 + $0x510] ss:$24 sps:$4 sm:$0xff]  }
 0x2a6   : > { %v16945_v13 = vld [vmem:[#allocation3 + $0x51c] ss:$24 sps:$4 sm:$0xff]   ;;  %v16948_v15 = vld [vmem:[#allocation3 + $0x518] ss:$24 sps:$4 sm:$0xff]   ;;  %v16951_v17 = vld [vmem:[#allocation3 + $0x54c] ss:$24 sps:$4 sm:$0xff]  }
 0x2a7   : > { %2343 = vmatpush1.bf16.msra.mxu0 %v16935_v6  ;;  %v16949_v16 = vld [vmem:[#allocation3 + $0x544] ss:$24 sps:$4 sm:$0xff]   ;;  %v16953_v18 = vld [vmem:[#allocation3 + $0x540] ss:$24 sps:$4 sm:$0xff]   ;;  %v16955_v20 = vld [vmem:[#allocation3 + $0x574] ss:$24 sps:$4 sm:$0xff]  }
 0x2a8   : > { %2529 = vmatpush1.bf16.msra.mxu1 %v16936_v7  ;;  %2344 = vmatprep.subr.bf16.mxu0 %v16937_v8  ;;  %v16954_v19 = vld [vmem:[#allocation3 + $0x548] ss:$24 sps:$4 sm:$0xff]   ;;  %v16957_v21 = vld [vmem:[#allocation3 + $0x57c] ss:$24 sps:$4 sm:$0xff]   ;;  %v16960_v23 = vld [vmem:[#allocation3 + $0x578] ss:$24 sps:$4 sm:$0xff]  }
 0x2a9   : > { %2530 = vmatprep.subr.bf16.mxu1 %v16939_v9  ;;  %v16959_v22 = vld [vmem:[#allocation3 + $0x570] ss:$24 sps:$4 sm:$0xff]   ;;  %v16961_v24 = vld [vmem:[#allocation3 + $0x5a4] ss:$24 sps:$4 sm:$0xff]   ;;  %v16965_v26 = vld [vmem:[#allocation3 + $0x5a0] ss:$24 sps:$4 sm:$0xff]  }
 0x2aa   : > { %v16963_v25 = vld [vmem:[#allocation3 + $0x5ac] ss:$24 sps:$4 sm:$0xff]   ;;  %v16966_v27 = vld [vmem:[#allocation3 + $0x5a8] ss:$24 sps:$4 sm:$0xff]   ;;  %v16969_v29 = vld [vmem:[#allocation3 + $0x5dc] ss:$24 sps:$4 sm:$0xff]  }
 0x2ab   : > { %2345 = vmatpush1.bf16.msra.mxu0 %v16941_v10  ;;  %v16967_v28 = vld [vmem:[#allocation3 + $0x5d4] ss:$24 sps:$4 sm:$0xff]   ;;  %v16971_v30 = vld [vmem:[#allocation3 + $0x5d0] ss:$24 sps:$4 sm:$0xff]   ;;  %v16973_v32 = vld [vmem:[#allocation3 + $0x604] ss:$24 sps:$4 sm:$0xff]  }
 0x2ac   : > { %2531 = vmatpush1.bf16.msra.mxu1 %v16942_v11  ;;  %2346 = vmatprep.subr.bf16.mxu0 %v16943_v12  ;;  %v16972_v31 = vld [vmem:[#allocation3 + $0x5d8] ss:$24 sps:$4 sm:$0xff]   ;;  %v16975_v33 = vld [vmem:[#allocation3 + $0x60c] ss:$24 sps:$4 sm:$0xff]   ;;  %p1063_p7 = scmp.lt.s32.totalorder %s22732_s11, 1  ;;  %s22756_s24 = sld [smem:[#allocation100_spill]] }
 0x2ad   : > { %2532 = vmatprep.subr.bf16.mxu1 %v16945_v13  ;;  %v16977_v34 = vld [vmem:[#allocation3 + $0x600] ss:$24 sps:$4 sm:$0xff]   ;;  %v16979_v36 = vld [vmem:[#allocation3 + $0x634] ss:$24 sps:$4 sm:$0xff]   ;;  %v16983_v38 = vld [vmem:[#allocation3 + $0x630] ss:$24 sps:$4 sm:$0xff]  }
 0x2ae   : > { %v16978_v35 = vld [vmem:[#allocation3 + $0x608] ss:$24 sps:$4 sm:$0xff]   ;;  %v16981_v37 = vld [vmem:[#allocation3 + $0x63c] ss:$24 sps:$4 sm:$0xff]   ;;  %s1064_s26 = scalar_select %p1063_p7, %s22732_s11, 1  ;;  %vm4339_vm1 = vcmask 1046528  }
 0x2af   : > { %2347 = vmatpush1.bf16.msra.mxu0 %v16947_v14  ;;  %v16984_v39 = vld [vmem:[#allocation3 + $0x638] ss:$24 sps:$4 sm:$0xff]   ;;  %v16985_v40 = vld [vmem:[#allocation3 + $0x664] ss:$24 sps:$4 sm:$0xff]   ;;  %v16990_v43 = vld [vmem:[#allocation3 + $0x668] ss:$24 sps:$4 sm:$0xff]  }
 0x2b0   : > { %2533 = vmatpush1.bf16.msra.mxu1 %v16948_v15  ;;  %2348 = vmatprep.subr.bf16.mxu0 %v16949_v16  ;;  %v16987_v41 = vld [vmem:[#allocation3 + $0x66c] ss:$24 sps:$4 sm:$0xff]   ;;  %s16411_s9 = smul.u32 144, %s1064_s26  ;;  %v16989_v42 = vld [vmem:[#allocation3 + $0x660] ss:$24 sps:$4 sm:$0xff]   ;;  %s19189_s7 = smov 120  }
 0x2b1   : > { %2534 = vmatprep.subr.bf16.mxu1 %v16951_v17  ;;  %v16991_v44 = vld [vmem:[#allocation3 + $0x694] ss:$24 sps:$4 sm:$0xff]   ;;  %v16995_v46 = vld [vmem:[#allocation3 + $0x690] ss:$24 sps:$4 sm:$0xff]   ;;  %v16997_v48 = vld [vmem:[#allocation3 + $0x6c4] ss:$24 sps:$4 sm:$0xff]  }
 0x2b2   : > { %v16993_v45 = vld [vmem:[#allocation3 + $0x69c] ss:$24 sps:$4 sm:$0xff]   ;;  %s19885_s8 = scalar_lea.vmem %s22756_s24, %s16411_s9  ;;  %v16996_v47 = vld [vmem:[#allocation3 + $0x698] ss:$24 sps:$4 sm:$0xff]   ;;  %v16999_v51 = vld [vmem:[#allocation3 + $0x6cc] ss:$24 sps:$4 sm:$0xff]  }
 0x2b3   : > { %2349 = vmatpush1.bf16.msra.mxu0 %v16953_v18  ;;  %v17021_v49 = vld [vmem:[%s19885_s8 + $0x4] ss:$12 sps:$4 sm:$0xff]   ;;  %v17023_v50 = vld [vmem:[%s19885_s8 + $0x1c] ss:$12 sps:$4 sm:$0xff]   ;;  %vm1460_vm0 = vsmask.f32 7424 }
 0x2b4   : > { %2535 = vmatpush1.bf16.msra.mxu1 %v16954_v19  ;;  %2350 = vmatprep.subr.bf16.mxu0 %v16955_v20  ;;  %v1474_v52 = vshrl.u32 %v17021_v49, 16  ;;  %v1476_v53 = vshll.u32 %v17021_v49, 16  ;;  %v1481_v54 = vshll.u32 %v17023_v50, 16  ;;  %v17001_v55 = vld [vmem:[#allocation3 + $0x6c0] ss:$24 sps:$4 sm:$0xff]   ;;  %v1505_v14 = vshrl.u32 %v17023_v50, 16 }
 0x2b5   : > { %2536 = vmatprep.subr.bf16.mxu1 %v16957_v21  ;;  %v17002_v56 = vld [vmem:[#allocation3 + $0x6c8] ss:$24 sps:$4 sm:$0xff]   ;;  %v17003_v60 = vld [vmem:[#allocation3 + $0x6f4] ss:$24 sps:$4 sm:$0xff]   ;;  %v17008_v0 = vld [vmem:[#allocation3 + $0x6f8] ss:$24 sps:$4 sm:$0xff]  }
 0x2b6   : > { %v17025_v57 = vld [vmem:[%s19885_s8] ss:$12 sps:$4 sm:$0xff]   ;;  %v1478_v58 = vrot.slane %v1476_v53, 1  ;;  %v1483_v59 = vrot.slane %v1481_v54, 1  ;;  %v17005_v61 = vld [vmem:[#allocation3 + $0x6fc] ss:$24 sps:$4 sm:$0xff]  }
 0x2b7   : > { %2351 = vmatpush1.bf16.msra.mxu0 %v16959_v22  ;;  %v17007_v62 = vld [vmem:[#allocation3 + $0x6f0] ss:$24 sps:$4 sm:$0xff]   ;;  %v17009_v1 = vld [vmem:[#allocation3 + $0x724] ss:$24 sps:$4 sm:$0xff]   ;;  %v1464_v4 = vshll.u32 %v17025_v57, 16  ;;  %v1462_v10 = vshrl.u32 %v17025_v57, 16 }
 0x2b8   : > { %2537 = vmatpush1.bf16.msra.mxu1 %v16960_v23  ;;  %2352 = vmatprep.subr.bf16.mxu0 %v16961_v24  ;;  %v1479_v63 = vor.u32 %v1478_v58, %v1474_v52  ;;  %v17026_v3 = vld [vmem:[%s19885_s8 + $0x18] ss:$12 sps:$4 sm:$0xff]   ;;  %v17027_v6 = vld [vmem:[%s19885_s8 + $0x34] ss:$12 sps:$4 sm:$0xff]   ;;  %v17019_v16 = vld [vmem:[#allocation3 + $0x750] ss:$24 sps:$4 sm:$0xff]   ;;  %v1507_v22 = vor.u32 %v1505_v14, %v1483_v59 }
 0x2b9   : > { %2538 = vmatprep.subr.bf16.mxu1 %v16963_v25  ;;  %v17011_v5 = vld [vmem:[#allocation3 + $0x72c] ss:$24 sps:$4 sm:$0xff]   ;;  %v17013_v7 = vld [vmem:[#allocation3 + $0x720] ss:$24 sps:$4 sm:$0xff]   ;;  %v1466_v11 = vrot.slane %v1464_v4, 1  ;;  %v1469_v12 = vshll.u32 %v17026_v3, 16 }
 0x2ba   : > { %v19891_v2 = vsel %vm1460_vm0, %v1479_v63, %v1483_v59  ;;  %v17014_v8 = vld [vmem:[#allocation3 + $0x728] ss:$24 sps:$4 sm:$0xff]   ;;  %v17015_v9 = vld [vmem:[#allocation3 + $0x754] ss:$24 sps:$4 sm:$0xff]   ;;  %v1509_v15 = vshll.u32 %v17027_v6, 16  ;;  %vm6488_vm2 = vcmask 982016  }
 0x2bb   : > { %2353 = vmatpush1.bf16.msra.mxu0 %v16965_v26  ;;  %2372 = vmatprep.mubr.bf16.mxu0 %v19891_v2  ;;  %v17017_v13 = vld [vmem:[#allocation3 + $0x75c] ss:$24 sps:$4 sm:$0xff]   ;;  %v17020_v17 = vld [vmem:[#allocation3 + $0x758] ss:$24 sps:$4 sm:$0xff]   ;;  %v1467_v19 = vor.u32 %v1466_v11, %v1462_v10  ;;  %v1471_v20 = vrot.slane %v1469_v12, 1  ;;  %vm6760_vm3 = vcmask 1045504  }
 0x2bc   : > { %2539 = vmatpush1.bf16.msra.mxu1 %v16966_v27  ;;  %2354 = vmatprep.subr.bf16.mxu0 %v16967_v28  ;;  %v19898_v18 = vld [vmem:[%s19885_s8 + $0x30] ss:$12 sps:$4 sm:$0xff]   ;;  %v1511_v23 = vrot.slane %v1509_v15, 1  ;;  %v17036_v24 = vld [vmem:[%s19885_s8 + $0x4c] ss:$12 sps:$4 sm:$0xff]   ;;  %v1497_v28 = vshrl.u32 %v17026_v3, 16 }
 0x2bd   : > { %2540 = vmatprep.subr.bf16.mxu1 %v16969_v29  ;;  %2558 = vmatprep.mubr.bf16.mxu1 %v19891_v2  ;;  %v17032_v21 = vld [vmem:[#allocation3 + $0x784] ss:$24 sps:$4 sm:$0xff]   ;;  %v17030_v26 = vld [vmem:[#allocation3 + $0x780] ss:$24 sps:$4 sm:$0xff]   ;;  %v19902_v27 = vsel %vm1460_vm0, %v1467_v19, %v1471_v20  ;;  %v1501_v29 = vshll.u32 %v19898_v18, 16  ;;  %v1521_v49 = vshrl.u32 %v19898_v18, 16 }
 0x2be   : > { %v17040_v25 = vld [vmem:[#allocation3 + $0x78c] ss:$24 sps:$4 sm:$0xff]   ;;  %v1553_v52 = vshrl.u32 %v17036_v24, 16  ;;  %v17050_v53 = vld [vmem:[#allocation3 + $0x7e8] ss:$24 sps:$4 sm:$0xff]   ;;  %vm6750_vm4 = vcmask 760832  }
 0x2bf   : > { %2355 = vmatpush1.bf16.msra.mxu0 %v16971_v30  ;;  %v17035_v30 = vld [vmem:[#allocation3 + $0x7b4] ss:$24 sps:$4 sm:$0xff]   ;;  %v17054_v59 = vld [vmem:[#allocation3 + $0x810] ss:$24 sps:$4 sm:$0xff]   ;;  %vm7947_vm5 = vcmask 1043456   ;;  %s22866_s29 = sld [smem:[#allocation105_spill]] }
 0x2c0   : > { %2541 = vmatpush1.bf16.msra.mxu1 %v16972_v31  ;;  %2356 = vmatprep.subr.bf16.mxu0 %v16973_v32  ;;  %v19906_v31 = vsel %vm1460_vm0, %v1507_v22, %v1511_v23  ;;  %v1529_v32 = vshrl.u32 %v17027_v6, 16  ;;  %v19928_v54 = vld [vmem:[%s19885_s8 + $0x60] ss:$12 sps:$4 sm:$0xff]   ;;  %v17074_v12 = vld [vmem:[#allocation3 + $0x87c] ss:$24 sps:$4 sm:$0xff]   ;;  %vm19192_vm6 = vmmov 0  }
 0x2c1   : > { %2542 = vmatprep.subr.bf16.mxu1 %v16975_v33  ;;  %v1533_v33 = vshll.u32 %v17036_v24, 16  ;;  %v17062_v6 = vld [vmem:[#allocation3 + $0x840] ss:$24 sps:$4 sm:$0xff]   ;;  %v17071_v11 = vld [vmem:[#allocation3 + $0x874] ss:$24 sps:$4 sm:$0xff]   ;;  %v1569_v24 = vshrl.u32 %v19928_v54, 16 }
 0x2c2   : > { %v17065_v10 = vld [vmem:[#allocation3 + $0x848] ss:$24 sps:$4 sm:$0xff]   ;;  %v17072_v19 = vld [vmem:[#allocation3 + $0x878] ss:$24 sps:$4 sm:$0xff]   ;;  %vm10879_vm7 = vcmask 359424   ;;  %vm12285_vm8 = vcmask 1040384  }
 0x2c3   : > { %2357 = vmatpush1.bf16.msra.mxu0 %v16977_v34  ;;  %v17038_v34 = vld [vmem:[#allocation3 + $0x788] ss:$24 sps:$4 sm:$0xff]   ;;  %vm12286_vm9 = vcmask 1041408   ;;  %vm12281_vm10 = vcmask 154624   ;;  %vm12862_vm11 = vcmask 1042432   ;;  %vm12858_vm12 = vcmask 56320  }
 0x2c4   : > { %2543 = vmatpush1.bf16.msra.mxu1 %v16978_v35  ;;  %2358 = vmatprep.subr.bf16.mxu0 %v16979_v36  ;;  %v19909_v35 = vld [vmem:[%s19885_s8 + $0x48] ss:$12 sps:$4 sm:$0xff]   ;;  %s22874_s6 = sld [smem:[#allocation59_spill]]  ;;  %s15289_s2 = sshll.u32 %s22732_s11, 4 }
 0x2c5   : > { %2544 = vmatprep.subr.bf16.mxu1 %v16981_v37  ;;  %v17044_v36 = vld [vmem:[#allocation3 + $0x7bc] ss:$24 sps:$4 sm:$0xff]   ;;  %v19914_v37 = vld [vmem:[%s19885_s8 + $0x64] ss:$12 sps:$4 sm:$0xff]   ;;  %v1545_v4 = vshrl.u32 %v19909_v35, 16  ;;  %s22867_s1 = smov %s22866_s29  ;;  %s22875_s19 = sld [smem:[#allocation115_spill]] }
 0x2c6   : > { %s19193_s4 = smov [#allocation38]  }
 0x2c7   : > { %2359 = vmatpush1.bf16.msra.mxu0 %v16983_v38  ;;  %v1499_v38 = vor.u32 %v1497_v28, %v1471_v20  ;;  %v17077_v20 = vld [vmem:[#allocation3 + $0x8a4] ss:$24 sps:$4 sm:$0xff]   ;;  %v17078_v28 = vld [vmem:[#allocation3 + $0x8a8] ss:$24 sps:$4 sm:$0xff]   ;;  %s19050_s0 = sshll.u32 %s19193_s4, 4  ;;  %s19051_s0 = int_to_ptr.vmem [resolvable:$false] %s19050_s0 }
 0x2c8   : > { %2545 = vmatpush1.bf16.msra.mxu1 %v16984_v39  ;;  %2360 = vmatprep.subr.bf16.mxu0 %v16985_v40  ;;  %v1503_v39 = vrot.slane %v1501_v29, 1  ;;  %v17033_v40 = vld [vmem:[#allocation3 + $0x7b0] ss:$24 sps:$4 sm:$0xff]   ;;  %v17083_v29 = vld [vmem:[#allocation3 + $0x8d4] ss:$24 sps:$4 sm:$0xff]   ;;  %s19052_s24 = scalar_lea.vmem %s19051_s0, 32 }
 0x2c9   : > { %2546 = vmatprep.subr.bf16.mxu1 %v16987_v41  ;;  %v1531_v41 = vor.u32 %v1529_v32, %v1511_v23 }
 0x2ca   : > { %p22877_p11 = scmp.ne.s32.totalorder %s22874_s6, 0 }
 0x2cb   : > { %2361 = vmatpush1.bf16.msra.mxu0 %v16989_v42  ;;  %v1535_v42 = vrot.slane %v1533_v33, 1  ;;  %s22876_s10 = smov %s22875_s19  ;;  %s22508_s26 = scalar_lea.hbm %s22875_s19, %s15289_s2 }
 0x2cc   : > { %2547 = vmatpush1.bf16.msra.mxu1 %v16990_v43  ;;  %2362 = vmatprep.subr.bf16.mxu0 %v16991_v44  ;;  %v17042_v43 = vld [vmem:[#allocation3 + $0x7b8] ss:$24 sps:$4 sm:$0xff]   ;;  %v17047_v44 = vld [vmem:[#allocation3 + $0x7e4] ss:$24 sps:$4 sm:$0xff]  }
 0x2cd   : > { %2548 = vmatprep.subr.bf16.mxu1 %v16993_v45  ;;  %v17052_v45 = vld [vmem:[#allocation3 + $0x7ec] ss:$24 sps:$4 sm:$0xff]   ;;  %v19925_v50 = vsel %vm1460_vm0, %v1531_v41, %v1535_v42  ;;  %v1555_v63 = vor.u32 %v1553_v52, %v1535_v42  ;;  %v17093_v41 = vld [vmem:[%s19885_s8 + $0x8] ss:$12 sps:$4 sm:$0xff]  }
 0x2cf   : > { %2363 = vmatpush1.bf16.msra.mxu0 %v16995_v46  ;;  %v1525_v46 = vshll.u32 %v19909_v35, 16 }
 0x2d0   : > { %2549 = vmatpush1.bf16.msra.mxu1 %v16996_v47  ;;  %2364 = vmatprep.subr.bf16.mxu0 %v16997_v48  ;;  %v1557_v47 = vshll.u32 %v19914_v37, 16  ;;  %v19921_v48 = vsel %vm1460_vm0, %v1499_v38, %v1503_v39  ;;  %v17092_v38 = vld [vmem:[#allocation3 + $0xc] ss:$24 sps:$4 sm:$0xff]  }
 0x2d1   : > { %2550 = vmatprep.subr.bf16.mxu1 %v16999_v51  ;;  %v17045_v51 = vld [vmem:[#allocation3 + $0x7e0] ss:$24 sps:$4 sm:$0xff]   ;;  %v1527_v57 = vrot.slane %v1525_v46, 1  ;;  %v1486_v46 = vshrl.u32 %v17093_v41, 16 }
 0x2d2   : > { %v1559_v58 = vrot.slane %v1557_v47, 1 }
 0x2d3   : > { %2365 = vmatpush1.bf16.msra.mxu0 %v17001_v55  ;;  %v17056_v55 = vld [vmem:[#allocation3 + $0x814] ss:$24 sps:$4 sm:$0xff]   ;;  %v1547_v14 = vor.u32 %v1545_v4, %v1527_v57 }
 0x2d4   : > { %2551 = vmatpush1.bf16.msra.mxu1 %v17002_v56  ;;  %2366 = vmatprep.subr.bf16.mxu0 %v17003_v60  ;;  %v17059_v56 = vld [vmem:[#allocation3 + $0x81c] ss:$24 sps:$4 sm:$0xff]   ;;  %v17057_v60 = vld [vmem:[#allocation3 + $0x818] ss:$24 sps:$4 sm:$0xff]  }
 0x2d5   : > { %2552 = vmatprep.subr.bf16.mxu1 %v17005_v61  ;;  %v1523_v61 = vor.u32 %v1521_v49, %v1503_v39 }
 0x2d7   : > { %2367 = vmatpush1.bf16.msra.mxu0 %v17007_v62  ;;  %v19935_v62 = vld [vmem:[%s19885_s8 + $0x7c] ss:$12 sps:$4 sm:$0xff]   ;;  %v19938_v3 = vsel %vm1460_vm0, %v1523_v61, %v1527_v57 }
 0x2d8   : > { %2553 = vmatpush1.bf16.msra.mxu1 %v17008_v0  ;;  %2368 = vmatprep.subr.bf16.mxu0 %v17009_v1  ;;  %v17064_v0 = vld [vmem:[#allocation3 + $0x844] ss:$24 sps:$4 sm:$0xff]   ;;  %v1596_v33 = vshrl.u32 %v19935_v62, 16 }
 0x2d9   : > { %2554 = vmatprep.subr.bf16.mxu1 %v17011_v5  ;;  %v17067_v1 = vld [vmem:[#allocation3 + $0x84c] ss:$24 sps:$4 sm:$0xff]   ;;  %v1549_v5 = vshll.u32 %v19928_v54, 16  ;;  %v17100_v61 = vld [vmem:[#allocation3 + $0x3c] ss:$24 sps:$4 sm:$0xff]  }
 0x2da   : > { %v17125_v54 = vld [vmem:[%s19885_s8 + $0x38] ss:$12 sps:$4 sm:$0xff]  }
 0x2db   : > { %2369 = vmatpush1.bf16.msra.mxu0 %v17013_v7  ;;  %v19943_v7 = vsel %vm1460_vm0, %v1555_v63, %v1559_v58  ;;  %v1551_v15 = vrot.slane %v1549_v5, 1  ;;  %v17098_v63 = vld [vmem:[#allocation3 + $0x38] ss:$24 sps:$4 sm:$0xff]  }
 0x2dc   : > { %2555 = vmatpush1.bf16.msra.mxu1 %v17014_v8  ;;  %2370 = vmatprep.subr.bf16.mxu0 %v17015_v9  ;;  %v1577_v8 = vshrl.u32 %v19914_v37, 16  ;;  %v1581_v9 = vshll.u32 %v19935_v62, 16  ;;  %v17089_v37 = vld [vmem:[#allocation3 + $0x494] ss:$24 sps:$4 sm:$0xff]   ;;  %v17095_v62 = vld [vmem:[#allocation3 + $0x4c0] ss:$24 sps:$4 sm:$0xff]  }
 0x2dd   : > { %2556 = vmatprep.subr.bf16.mxu1 %v17017_v13  ;;  %v17068_v13 = vld [vmem:[%s19885_s8 + $0x78] ss:$12 sps:$4 sm:$0xff]   ;;  %v19953_v23 = vsel %vm1460_vm0, %v1547_v14, %v1551_v15  ;;  %v1571_v35 = vor.u32 %v1569_v24, %v1551_v15  ;;  %v17138_v5 = vld [vmem:[%s19885_s8 + $0x50] ss:$12 sps:$4 sm:$0xff]   ;;  %v17116_v24 = vld [vmem:[#allocation3 + $0xc8] ss:$24 sps:$4 sm:$0xff]  }
 0x2de   : > { %v1583_v18 = vrot.slane %v1581_v9, 1  ;;  %v1573_v22 = vshll.u32 %v17068_v13, 16  ;;  %v1593_v42 = vshrl.u32 %v17068_v13, 16  ;;  %v17104_v9 = vld [vmem:[#allocation3 + $0x68] ss:$24 sps:$4 sm:$0xff]   ;;  %v1541_v13 = vshll.u32 %v17138_v5, 16 }
 0x2df   : > { %2371 = vmatpush1.bf16.msra.mxu0 %v17019_v16  ;;  %v17069_v16 = vld [vmem:[#allocation3 + $0x870] ss:$24 sps:$4 sm:$0xff]   ;;  %v17112_v14 = vld [vmem:[#allocation3 + $0x9c] ss:$24 sps:$4 sm:$0xff]   ;;  %v17107_v15 = vld [vmem:[#allocation3 + $0x520] ss:$24 sps:$4 sm:$0xff]  }
 0x2e0   : > { %2557 = vmatpush1.bf16.msra.mxu1 %v17020_v17  ;;  %2433 = vmatprep.subr.bf16.mxu0 %v17032_v21  ;;  %v1579_v17 = vor.u32 %v1577_v8, %v1559_v58  ;;  %v17080_v21 = vld [vmem:[#allocation3 + $0x8ac] ss:$24 sps:$4 sm:$0xff]   ;;  %v1575_v32 = vrot.slane %v1573_v22, 1  ;;  %v17101_v8 = vld [vmem:[#allocation3 + $0x4f0] ss:$24 sps:$4 sm:$0xff]  }
 0x2e1   : > { %2619 = vmatprep.subr.bf16.mxu1 %v17040_v25  ;;  %v17075_v25 = vld [vmem:[#allocation3 + $0x8a0] ss:$24 sps:$4 sm:$0xff]   ;;  %v17097_v58 = vld [vmem:[#allocation3 + $0x4c4] ss:$24 sps:$4 sm:$0xff]   ;;  %v17113_v22 = vld [vmem:[#allocation3 + $0x550] ss:$24 sps:$4 sm:$0xff]  }
 0x2e2   : > { %2373 = vmatmul.mubr.bf16.vlgmr.msra.gmra.mrb[0].mxu0 %v19902_v27  ;;  %v19965_v39 = vsel %vm1460_vm0, %v1571_v35, %v1575_v32  ;;  %v17128_v35 = vld [vmem:[#allocation3 + $0x5b4] ss:$24 sps:$4 sm:$0xff]  }
 0x2e3   : > { %2559 = vmatmul.mubr.bf16.vlgmr.msra.gmra.mrb[0].mxu1 %v19902_v27  ;;  %2382 = vmatprep.mubr.bf16.mxu0 %v19906_v31 }
 0x2e4   : > { %2568 = vmatprep.mubr.bf16.mxu1 %v19906_v31  ;;  %2434 = vmatpush1.bf16.msra.mxu0 %v17030_v26  ;;  %v19957_v26 = vsel %vm1460_vm0, %v1579_v17, %v1583_v18  ;;  %v17115_v17 = vld [vmem:[#allocation3 + $0x554] ss:$24 sps:$4 sm:$0xff]  }
 0x2e5   : > { %2620 = vmatpush1.bf16.msra.mxu1 %v17038_v34  ;;  %2435 = vmatprep.subr.bf16.mxu0 %v17035_v30  ;;  %v17086_v30 = vld [vmem:[#allocation3 + $0x8dc] ss:$24 sps:$4 sm:$0xff]   ;;  %v17081_v34 = vld [vmem:[#allocation3 + $0x8d0] ss:$24 sps:$4 sm:$0xff]  }
 0x2e6   : > { %2621 = vmatprep.subr.bf16.mxu1 %v17044_v36  ;;  %v17084_v36 = vld [vmem:[#allocation3 + $0x8d8] ss:$24 sps:$4 sm:$0xff]  }
 0x2e8   : > { %2436 = vmatpush1.bf16.msra.mxu0 %v17033_v40  ;;  %v19967_v40 = vor.u32 %v1596_v33, %v1583_v18  ;;  %v17119_v33 = vld [vmem:[#allocation3 + $0x580] ss:$24 sps:$4 sm:$0xff]  }
 0x2e9   : > { %2622 = vmatpush1.bf16.msra.mxu1 %v17042_v43  ;;  %2437 = vmatprep.subr.bf16.mxu0 %v17047_v44  ;;  %v17094_v43 = vld [vmem:[%s19885_s8 + $0x20] ss:$12 sps:$4 sm:$0xff]   ;;  %v1488_v44 = vshll.u32 %v17093_v41, 16 }
 0x2ea   : > { %2623 = vmatprep.subr.bf16.mxu1 %v17052_v45  ;;  %2383 = vmatmul.mubr.bf16.gmra.mrb[4].mxu0 %v19921_v48  ;;  %v19975_v45 = vor.u32 %v1593_v42, %v1575_v32  ;;  %v1493_v49 = vshll.u32 %v17094_v43, 16  ;;  %v17124_v32 = vld [vmem:[#allocation3 + $0xfc] ss:$24 sps:$4 sm:$0xff]   ;;  %v17131_v41 = vld [vmem:[#allocation3 + $0x12c] ss:$24 sps:$4 sm:$0xff]  }
 0x2eb   : > { %2569 = vmatmul.mubr.bf16.gmra.mrb[4].mxu1 %v19921_v48  ;;  %2392 = vmatprep.mubr.bf16.mxu0 %v19925_v50  ;;  %v1490_v47 = vrot.slane %v1488_v44, 1  ;;  %v17126_v42 = vld [vmem:[#allocation3 + $0x5b0] ss:$24 sps:$4 sm:$0xff]   ;;  %v17134_v44 = vld [vmem:[#allocation3 + $0x5e4] ss:$24 sps:$4 sm:$0xff]  }
 0x2ec   : > { %2578 = vmatprep.mubr.bf16.mxu1 %v19925_v50  ;;  %2438 = vmatpush1.bf16.msra.mxu0 %v17045_v51  ;;  %v22617_v51 = vmov 0  }
 0x2ed   : > { %2624 = vmatpush1.bf16.msra.mxu1 %v17050_v53  ;;  %2439 = vmatprep.subr.bf16.mxu0 %v17056_v55  ;;  %v1491_v52 = vor.u32 %v1490_v47, %v1486_v46  ;;  %v1495_v53 = vrot.slane %v1493_v49, 1  ;;  %v17087_v55 = vld [vmem:[#allocation3 + $0x490] ss:$24 sps:$4 sm:$0xff]  }
 0x2ee   : > { %2625 = vmatprep.subr.bf16.mxu1 %v17059_v56  ;;  %v17090_v56 = vld [vmem:[#allocation3 + $0x8] ss:$24 sps:$4 sm:$0xff]  }
 0x2ef   : > { %v19983_v57 = vsel %vm1460_vm0, %v1491_v52, %v1495_v53  ;;  %v17137_v52 = vld [vmem:[#allocation3 + $0x15c] ss:$24 sps:$4 sm:$0xff]  }
 0x2f0   : > { %2440 = vmatpush1.bf16.msra.mxu0 %v17054_v59  ;;  %v1513_v59 = vshrl.u32 %v17094_v43, 16  ;;  %v17129_v43 = vld [vmem:[#allocation3 + $0x128] ss:$24 sps:$4 sm:$0xff]  }
 0x2f1   : > { %2626 = vmatpush1.bf16.msra.mxu1 %v17057_v60  ;;  %2441 = vmatprep.subr.bf16.mxu0 %v17064_v0  ;;  %v1517_v60 = vshll.u32 %v17125_v54, 16  ;;  %v17103_v0 = vld [vmem:[#allocation3 + $0x4f4] ss:$24 sps:$4 sm:$0xff]  }
 0x2f2   : > { %2627 = vmatprep.subr.bf16.mxu1 %v17067_v1  ;;  %2393 = vmatmul.mubr.bf16.gmra.mrb[8].mxu0 %v19938_v3  ;;  %v1515_v1 = vor.u32 %v1513_v59, %v1495_v53  ;;  %v17132_v53 = vld [vmem:[#allocation3 + $0x5e0] ss:$24 sps:$4 sm:$0xff]   ;;  %v17144_v59 = vld [vmem:[#allocation3 + $0x18c] ss:$24 sps:$4 sm:$0xff]  }
 0x2f3   : > { %2579 = vmatmul.mubr.bf16.gmra.mrb[8].mxu1 %v19938_v3  ;;  %2402 = vmatprep.mubr.bf16.mxu0 %v19943_v7  ;;  %v1519_v4 = vrot.slane %v1517_v60, 1  ;;  %v17139_v60 = vld [vmem:[#allocation3 + $0x610] ss:$24 sps:$4 sm:$0xff]  }
 0x2f4   : > { %2588 = vmatprep.mubr.bf16.mxu1 %v19943_v7  ;;  %2442 = vmatpush1.bf16.msra.mxu0 %v17062_v6  ;;  %v17106_v6 = vld [vmem:[#allocation3 + $0x6c] ss:$24 sps:$4 sm:$0xff]  }
 0x2f5   : > { %2628 = vmatpush1.bf16.msra.mxu1 %v17065_v10  ;;  %2443 = vmatprep.subr.bf16.mxu0 %v17071_v11  ;;  %v17109_v10 = vld [vmem:[#allocation3 + $0x524] ss:$24 sps:$4 sm:$0xff]   ;;  %v19991_v11 = vsel %vm1460_vm0, %v1515_v1, %v1519_v4  ;;  %v17145_v1 = vld [vmem:[#allocation3 + $0x640] ss:$24 sps:$4 sm:$0xff]  }
 0x2f6   : > { %2629 = vmatprep.subr.bf16.mxu1 %v17074_v12  ;;  %v1537_v12 = vshrl.u32 %v17125_v54, 16  ;;  %v17135_v54 = vld [vmem:[#allocation3 + $0x158] ss:$24 sps:$4 sm:$0xff]  }
 0x2f8   : > { %2444 = vmatpush1.bf16.msra.mxu0 %v17069_v16  ;;  %v17110_v16 = vld [vmem:[#allocation3 + $0x98] ss:$24 sps:$4 sm:$0xff]   ;;  %v1539_v18 = vor.u32 %v1537_v12, %v1519_v4 }
 0x2f9   : > { %2630 = vmatpush1.bf16.msra.mxu1 %v17072_v19  ;;  %2445 = vmatprep.subr.bf16.mxu0 %v17077_v20  ;;  %v1543_v19 = vrot.slane %v1541_v13, 1  ;;  %v17151_v20 = vld [vmem:[%s19885_s8 + $0x68] ss:$12 sps:$4 sm:$0xff]   ;;  %v17148_v4 = vld [vmem:[#allocation3 + $0x1b8] ss:$24 sps:$4 sm:$0xff]  }
 0x2fa   : > { %2631 = vmatprep.subr.bf16.mxu1 %v17080_v21  ;;  %2403 = vmatmul.mubr.bf16.gmra.mrb[12].mxu0 %v19953_v23  ;;  %v17118_v21 = vld [vmem:[#allocation3 + $0xcc] ss:$24 sps:$4 sm:$0xff]   ;;  %v1585_v47 = vshrl.u32 %v17151_v20, 16 }
 0x2fb   : > { %2589 = vmatmul.mubr.bf16.gmra.mrb[12].mxu1 %v19953_v23  ;;  %2412 = vmatprep.mubr.bf16.mxu0 %v19957_v26  ;;  %v17160_v13 = vld [vmem:[#allocation3 + $0x6a4] ss:$24 sps:$4 sm:$0xff]  }
 0x2fc   : > { %2598 = vmatprep.mubr.bf16.mxu1 %v19957_v26  ;;  %2446 = vmatpush1.bf16.msra.mxu0 %v17075_v25  ;;  %v17121_v25 = vld [vmem:[#allocation3 + $0x584] ss:$24 sps:$4 sm:$0xff]  }
 0x2fd   : > { %2632 = vmatpush1.bf16.msra.mxu1 %v17078_v28  ;;  %2447 = vmatprep.subr.bf16.mxu0 %v17083_v29  ;;  %v19999_v28 = vsel %vm1460_vm0, %v1539_v18, %v1543_v19  ;;  %v1561_v29 = vshrl.u32 %v17138_v5, 16  ;;  %v17170_v18 = vld [vmem:[#allocation3 + $0x24c] ss:$24 sps:$4 sm:$0xff]  }
 0x2fe   : > { %2633 = vmatprep.subr.bf16.mxu1 %v17086_v30  ;;  %v1565_v30 = vshll.u32 %v17151_v20, 16  ;;  %v17165_v20 = vld [vmem:[#allocation3 + $0x6d0] ss:$24 sps:$4 sm:$0xff]  }
 0x300   : > { %2448 = vmatpush1.bf16.msra.mxu0 %v17081_v34  ;;  %v17122_v34 = vld [vmem:[#allocation3 + $0xf8] ss:$24 sps:$4 sm:$0xff]  }
 0x301   : > { %2634 = vmatpush1.bf16.msra.mxu1 %v17084_v36  ;;  %2712 = vmatprep.subr.bf16.mxu0 %v17089_v37  ;;  %v1563_v36 = vor.u32 %v1561_v29, %v1543_v19  ;;  %v1567_v37 = vrot.slane %v1565_v30, 1  ;;  %v20026_v19 = vld [vmem:[%s19885_s8 + $0x4] ss:$12 sps:$4 sm:$0xff]   ;;  %v17179_v30 = vld [vmem:[#allocation3 + $0x734] ss:$24 sps:$4 sm:$0xff]  }
 0x302   : > { %3822 = vmatprep.subr.bf16.mxu1 %v17092_v38  ;;  %2413 = vmatmul.mubr.bf16.gmra.mrb[16].mxu0 %v19965_v39  ;;  %v17164_v38 = vld [vmem:[%s19885_s8 + $0x80] ss:$12 sps:$4 sm:$0xff]   ;;  %v17174_v29 = vld [vmem:[#allocation3 + $0x278] ss:$24 sps:$4 sm:$0xff]  }
 0x303   : > { %2599 = vmatmul.mubr.bf16.gmra.mrb[16].mxu1 %v19965_v39  ;;  %2422 = vmatprep.mubr.bf16.mxu0 %v19967_v40  ;;  %v20007_v46 = vsel %vm1460_vm0, %v1563_v36, %v1567_v37  ;;  %v1589_v49 = vshll.u32 %v17164_v38, 16  ;;  %v1599_v5 = vshrl.u32 %v17164_v38, 16  ;;  %v17183_v36 = vld [vmem:[#allocation3 + $0x760] ss:$24 sps:$4 sm:$0xff]   ;;  %v17191_v38 = vld [vmem:[#allocation3 + $0x794] ss:$24 sps:$4 sm:$0xff]  }
 0x304   : > { %2608 = vmatprep.mubr.bf16.mxu1 %v19967_v40 }
 0x30a   : > { %2423 = vmatmul.mubr.bf16.gmra.mrb[20].mxu0 %v19975_v45 }
 0x30b   : > { %2609 = vmatmul.mubr.bf16.gmra.mrb[20].mxu1 %v19975_v45  ;;  %2465 = vmatprep.mubr.bf16.mxu0 %v22617_v51 }
 0x30c   : > { %2651 = vmatprep.mubr.bf16.mxu1 %v22617_v51 }
 0x312   : > { %2466 = vmatmul.mubr.bf16.vlgmr.msra.gmra.mrb[0].mxu0 %v19983_v57 }
 0x313   : > { %2652 = vmatmul.mubr.bf16.vlgmr.msra.gmra.mrb[0].mxu1 %v19983_v57  ;;  %2713 = vmatpush1.bf16.msra.mxu0 %v17087_v55  ;;  %v17141_v55 = vld [vmem:[#allocation3 + $0x614] ss:$24 sps:$4 sm:$0xff]  }
 0x314   : > { %3823 = vmatpush1.bf16.msra.mxu1 %v17090_v56  ;;  %2714 = vmatprep.subr.bf16.mxu0 %v17097_v58  ;;  %v1587_v56 = vor.u32 %v1585_v47, %v1567_v37  ;;  %v1591_v58 = vrot.slane %v1589_v49, 1  ;;  %v17186_v37 = vld [vmem:[#allocation3 + $0x2d8] ss:$24 sps:$4 sm:$0xff]   ;;  %v17200_v47 = vld [vmem:[#allocation3 + $0x33c] ss:$24 sps:$4 sm:$0xff]  }
 0x315   : > { %3824 = vmatprep.subr.bf16.mxu1 %v17100_v61  ;;  %2475 = vmatprep.mubr.bf16.mxu0 %v22617_v51  ;;  %v17142_v61 = vld [vmem:[#allocation3 + $0x188] ss:$24 sps:$4 sm:$0xff]  }
 0x316   : > { %2661 = vmatprep.mubr.bf16.mxu1 %v22617_v51  ;;  %v20020_v12 = vor.u32 %v1599_v5, %v1591_v58  ;;  %v20031_v49 = vld [vmem:[%s19885_s8] ss:$12 sps:$4 sm:$0xff]  }
 0x317   : > { %2715 = vmatpush1.bf16.msra.mxu0 %v17095_v62  ;;  %v17147_v62 = vld [vmem:[#allocation3 + $0x644] ss:$24 sps:$4 sm:$0xff]   ;;  %v17216_v5 = vld [vmem:[#allocation3 + $0x3c8] ss:$24 sps:$4 sm:$0xff]  }
 0x318   : > { %3825 = vmatpush1.bf16.msra.mxu1 %v17098_v63  ;;  %2716 = vmatprep.subr.bf16.mxu0 %v17103_v0  ;;  %v20014_v63 = vsel %vm1460_vm0, %v1587_v56, %v1591_v58  ;;  %v17150_v0 = vld [vmem:[#allocation3 + $0x1bc] ss:$24 sps:$4 sm:$0xff]   ;;  %v17201_v56 = vld [vmem:[#allocation3 + $0x7f0] ss:$24 sps:$4 sm:$0xff]  }
 0x319   : > { %3826 = vmatprep.subr.bf16.mxu1 %v17106_v6  ;;  %v17154_v6 = vld [vmem:[#allocation3 + $0x674] ss:$24 sps:$4 sm:$0xff]   ;;  %v17204_v58 = vld [vmem:[#allocation3 + $0x368] ss:$24 sps:$4 sm:$0xff]  }
 0x31a   : > { %2476 = vmatmul.mubr.bf16.gmra.mrb[4].mxu0 %v19991_v11 }
 0x31b   : > { %2662 = vmatmul.mubr.bf16.gmra.mrb[4].mxu1 %v19991_v11  ;;  %2717 = vmatpush1.bf16.msra.mxu0 %v17101_v8  ;;  %v17157_v8 = vld [vmem:[#allocation3 + $0x1ec] ss:$24 sps:$4 sm:$0xff]  }
 0x31c   : > { %3827 = vmatpush1.bf16.msra.mxu1 %v17104_v9  ;;  %2718 = vmatprep.subr.bf16.mxu0 %v17109_v10  ;;  %v17152_v9 = vld [vmem:[#allocation3 + $0x670] ss:$24 sps:$4 sm:$0xff]  }
 0x31d   : > { %3828 = vmatprep.subr.bf16.mxu1 %v17112_v14  ;;  %2485 = vmatprep.mubr.bf16.mxu0 %v22617_v51  ;;  %v17155_v10 = vld [vmem:[#allocation3 + $0x1e8] ss:$24 sps:$4 sm:$0xff]   ;;  %v17163_v14 = vld [vmem:[#allocation3 + $0x21c] ss:$24 sps:$4 sm:$0xff]  }
 0x31e   : > { %2671 = vmatprep.mubr.bf16.mxu1 %v22617_v51 }
 0x31f   : > { %2719 = vmatpush1.bf16.msra.mxu0 %v17107_v15  ;;  %v17158_v15 = vld [vmem:[#allocation3 + $0x6a0] ss:$24 sps:$4 sm:$0xff]  }
 0x320   : > { %3829 = vmatpush1.bf16.msra.mxu1 %v17110_v16  ;;  %2720 = vmatprep.subr.bf16.mxu0 %v17115_v17  ;;  %v17161_v16 = vld [vmem:[#allocation3 + $0x218] ss:$24 sps:$4 sm:$0xff]   ;;  %v17167_v17 = vld [vmem:[#allocation3 + $0x6d4] ss:$24 sps:$4 sm:$0xff]  }
 0x321   : > { %3830 = vmatprep.subr.bf16.mxu1 %v17118_v21  ;;  %v17168_v21 = vld [vmem:[#allocation3 + $0x248] ss:$24 sps:$4 sm:$0xff]  }
 0x322   : > { %2486 = vmatmul.mubr.bf16.gmra.mrb[8].mxu0 %v19999_v28 }
 0x323   : > { %2672 = vmatmul.mubr.bf16.gmra.mrb[8].mxu1 %v19999_v28  ;;  %2721 = vmatpush1.bf16.msra.mxu0 %v17113_v22  ;;  %v17173_v22 = vld [vmem:[#allocation3 + $0x704] ss:$24 sps:$4 sm:$0xff]  }
 0x324   : > { %3831 = vmatpush1.bf16.msra.mxu1 %v17116_v24  ;;  %2722 = vmatprep.subr.bf16.mxu0 %v17121_v25  ;;  %v17176_v24 = vld [vmem:[#allocation3 + $0x27c] ss:$24 sps:$4 sm:$0xff]   ;;  %v17171_v25 = vld [vmem:[#allocation3 + $0x700] ss:$24 sps:$4 sm:$0xff]  }
 0x325   : > { %3832 = vmatprep.subr.bf16.mxu1 %v17124_v32  ;;  %2495 = vmatprep.mubr.bf16.mxu0 %v22617_v51  ;;  %v17177_v32 = vld [vmem:[#allocation3 + $0x730] ss:$24 sps:$4 sm:$0xff]  }
 0x326   : > { %2681 = vmatprep.mubr.bf16.mxu1 %v22617_v51 }
 0x327   : > { %2723 = vmatpush1.bf16.msra.mxu0 %v17119_v33  ;;  %v17180_v33 = vld [vmem:[#allocation3 + $0x2a8] ss:$24 sps:$4 sm:$0xff]  }
 0x328   : > { %3833 = vmatpush1.bf16.msra.mxu1 %v17122_v34  ;;  %2724 = vmatprep.subr.bf16.mxu0 %v17128_v35  ;;  %v17185_v34 = vld [vmem:[#allocation3 + $0x764] ss:$24 sps:$4 sm:$0xff]  }
 0x329   : > { %3834 = vmatprep.subr.bf16.mxu1 %v17131_v41  ;;  %v17188_v35 = vld [vmem:[#allocation3 + $0x2dc] ss:$24 sps:$4 sm:$0xff]   ;;  %v17197_v41 = vld [vmem:[#allocation3 + $0x30c] ss:$24 sps:$4 sm:$0xff]  }
 0x32a   : > { %2496 = vmatmul.mubr.bf16.gmra.mrb[12].mxu0 %v20007_v46 }
 0x32b   : > { %2682 = vmatmul.mubr.bf16.gmra.mrb[12].mxu1 %v20007_v46  ;;  %2725 = vmatpush1.bf16.msra.mxu0 %v17126_v42  ;;  %v17189_v42 = vld [vmem:[#allocation3 + $0x790] ss:$24 sps:$4 sm:$0xff]  }
 0x32c   : > { %3835 = vmatpush1.bf16.msra.mxu1 %v17129_v43  ;;  %2726 = vmatprep.subr.bf16.mxu0 %v17134_v44  ;;  %v17195_v43 = vld [vmem:[#allocation3 + $0x308] ss:$24 sps:$4 sm:$0xff]   ;;  %v17194_v44 = vld [vmem:[#allocation3 + $0x7c4] ss:$24 sps:$4 sm:$0xff]  }
 0x32d   : > { %3836 = vmatprep.subr.bf16.mxu1 %v17137_v52  ;;  %2505 = vmatprep.mubr.bf16.mxu0 %v22617_v51  ;;  %v20036_v52 = vld [vmem:[%s19885_s8 + $0x1c] ss:$12 sps:$4 sm:$0xff]  }
 0x32e   : > { %2691 = vmatprep.mubr.bf16.mxu1 %v22617_v51 }
 0x32f   : > { %2727 = vmatpush1.bf16.msra.mxu0 %v17132_v53  ;;  %v17192_v53 = vld [vmem:[#allocation3 + $0x7c0] ss:$24 sps:$4 sm:$0xff]  }
 0x330   : > { %3837 = vmatpush1.bf16.msra.mxu1 %v17135_v54  ;;  %2728 = vmatprep.subr.bf16.mxu0 %v17141_v55  ;;  %v17198_v54 = vld [vmem:[#allocation3 + $0x338] ss:$24 sps:$4 sm:$0xff]   ;;  %v17203_v55 = vld [vmem:[#allocation3 + $0x7f4] ss:$24 sps:$4 sm:$0xff]  }
 0x331   : > { %3838 = vmatprep.subr.bf16.mxu1 %v17144_v59  ;;  %v17212_v59 = vld [vmem:[#allocation3 + $0x39c] ss:$24 sps:$4 sm:$0xff]  }
 0x332   : > { %2506 = vmatmul.mubr.bf16.gmra.mrb[16].mxu0 %v20014_v63 }
 0x333   : > { %2692 = vmatmul.mubr.bf16.gmra.mrb[16].mxu1 %v20014_v63  ;;  %2729 = vmatpush1.bf16.msra.mxu0 %v17139_v60  ;;  %v20041_v60 = vld [vmem:[%s19885_s8 + $0x18] ss:$12 sps:$4 sm:$0xff]  }
 0x334   : > { %3839 = vmatpush1.bf16.msra.mxu1 %v17142_v61  ;;  %2730 = vmatprep.subr.bf16.mxu0 %v17147_v62  ;;  %v20046_v61 = vld [vmem:[%s19885_s8 + $0x34] ss:$12 sps:$4 sm:$0xff]  }
 0x335   : > { %3840 = vmatprep.subr.bf16.mxu1 %v17150_v0  ;;  %2515 = vmatprep.mubr.bf16.mxu0 %v22617_v51  ;;  %v17207_v62 = vld [vmem:[#allocation3 + $0x820] ss:$24 sps:$4 sm:$0xff]  }
 0x336   : > { %2701 = vmatprep.mubr.bf16.mxu1 %v22617_v51  ;;  %v17210_v0 = vld [vmem:[#allocation3 + $0x398] ss:$24 sps:$4 sm:$0xff]  }
 0x337   : > { %2731 = vmatpush1.bf16.msra.mxu0 %v17145_v1  ;;  %v17215_v1 = vld [vmem:[#allocation3 + $0x854] ss:$24 sps:$4 sm:$0xff]  }
 0x338   : > { %3841 = vmatpush1.bf16.msra.mxu1 %v17148_v4  ;;  %2732 = vmatprep.subr.bf16.mxu0 %v17154_v6  ;;  %v17213_v4 = vld [vmem:[#allocation3 + $0x850] ss:$24 sps:$4 sm:$0xff]   ;;  %v17224_v6 = vld [vmem:[#allocation3 + $0x3fc] ss:$24 sps:$4 sm:$0xff]  }
 0x339   : > { %3842 = vmatprep.subr.bf16.mxu1 %v17157_v8  ;;  %v20051_v8 = vld [vmem:[%s19885_s8 + $0x30] ss:$12 sps:$4 sm:$0xff]  }
 0x33a   : > { %2516 = vmatmul.mubr.bf16.gmra.mrb[20].mxu0 %v20020_v12 }
 0x33b   : > { %2702 = vmatmul.mubr.bf16.gmra.mrb[20].mxu1 %v20020_v12  ;;  %2733 = vmatpush1.bf16.msra.mxu0 %v17152_v9  ;;  %v20056_v9 = vld [vmem:[%s19885_s8 + $0x4c] ss:$12 sps:$4 sm:$0xff]  }
 0x33c   : > { %3843 = vmatpush1.bf16.msra.mxu1 %v17155_v10  ;;  %2734 = vmatprep.subr.bf16.mxu0 %v17160_v13  ;;  %v17219_v10 = vld [vmem:[#allocation3 + $0x880] ss:$24 sps:$4 sm:$0xff]  }
 0x33d   : > { %3844 = vmatprep.subr.bf16.mxu1 %v17163_v14  ;;  %2744 = vmatprep.mubr.bf16.mxu0 %v19891_v2  ;;  %v17182_v2 = vld [vmem:[#allocation3 + $0x2ac] ss:$24 sps:$4 sm:$0xff]   ;;  %v17222_v13 = vld [vmem:[#allocation3 + $0x3f8] ss:$24 sps:$4 sm:$0xff]  }
 0x33e   : > { %3854 = vmatprep.mubr.bf16.mxu1 %v20026_v19  ;;  %v17227_v14 = vld [vmem:[#allocation3 + $0x8b4] ss:$24 sps:$4 sm:$0xff]  }
 0x33f   : > { %2735 = vmatpush1.bf16.msra.mxu0 %v17158_v15  ;;  %v17225_v15 = vld [vmem:[#allocation3 + $0x8b0] ss:$24 sps:$4 sm:$0xff]  }
 0x340   : > { %3845 = vmatpush1.bf16.msra.mxu1 %v17161_v16  ;;  %2736 = vmatprep.subr.bf16.mxu0 %v17167_v17  ;;  %v17228_v16 = vld [vmem:[#allocation3 + $0x428] ss:$24 sps:$4 sm:$0xff]   ;;  %v17236_v17 = vld [vmem:[#allocation3 + $0x45c] ss:$24 sps:$4 sm:$0xff]  }
 0x341   : > { %3846 = vmatprep.subr.bf16.mxu1 %v17170_v18  ;;  %v20061_v18 = vld [vmem:[%s19885_s8 + $0x48] ss:$12 sps:$4 sm:$0xff]  }
 0x343   : > { %2737 = vmatpush1.bf16.msra.mxu0 %v17165_v20  ;;  %v20066_v20 = vld [vmem:[%s19885_s8 + $0x64] ss:$12 sps:$4 sm:$0xff]  }
 0x344   : > { %3847 = vmatpush1.bf16.msra.mxu1 %v17168_v21  ;;  %2738 = vmatprep.subr.bf16.mxu0 %v17173_v22  ;;  %v17231_v21 = vld [vmem:[#allocation3 + $0x8e0] ss:$24 sps:$4 sm:$0xff]  }
 0x345   : > { %3848 = vmatprep.subr.bf16.mxu1 %v17176_v24  ;;  %v17234_v22 = vld [vmem:[#allocation3 + $0x458] ss:$24 sps:$4 sm:$0xff]   ;;  %v17242_v24 = vld [vmem:[#allocation3 + $0x90c] ss:$24 sps:$4 sm:$0xff]  }
 0x347   : > { %2739 = vmatpush1.bf16.msra.mxu0 %v17171_v25  ;;  %v20076_v25 = vld [vmem:[%s19885_s8 + $0x7c] ss:$12 sps:$4 sm:$0xff]  }
 0x348   : > { %3849 = vmatpush1.bf16.msra.mxu1 %v17174_v29  ;;  %2740 = vmatprep.subr.bf16.mxu0 %v17179_v30  ;;  %v20081_v29 = vld [vmem:[%s19885_s8 + $0x78] ss:$12 sps:$4 sm:$0xff]   ;;  %v17240_v30 = vld [vmem:[#allocation3 + $0x908] ss:$24 sps:$4 sm:$0xff]  }
 0x349   : > { %3850 = vmatprep.subr.bf16.mxu1 %v17182_v2  ;;  %v17245_v2 = vld [vmem:[#allocation3 + $0x34] ss:$24 sps:$4 sm:$0xff]  }
 0x34b   : > { %2741 = vmatpush1.bf16.msra.mxu0 %v17177_v32  ;;  %v17248_v32 = vld [vmem:[#allocation3 + $0x93c] ss:$24 sps:$4 sm:$0xff]  }
 0x34c   : > { %3851 = vmatpush1.bf16.msra.mxu1 %v17180_v33  ;;  %2742 = vmatprep.subr.bf16.mxu0 %v17185_v34  ;;  %v17243_v33 = vld [vmem:[#allocation3 + $0x30] ss:$24 sps:$4 sm:$0xff]  }
 0x34d   : > { %3852 = vmatprep.subr.bf16.mxu1 %v17188_v35  ;;  %v18405_v34 = vld [vmem:[%s19885_s8 + $0x8] ss:$12 sps:$4 sm:$0xff]   ;;  %v17254_v35 = vld [vmem:[#allocation3 + $0x96c] ss:$24 sps:$4 sm:$0xff]  }
 0x34f   : > { %2743 = vmatpush1.bf16.msra.mxu0 %v17183_v36  ;;  %v17249_v36 = vld [vmem:[#allocation3 + $0x60] ss:$24 sps:$4 sm:$0xff]  }
 0x350   : > { %3853 = vmatpush1.bf16.msra.mxu1 %v17186_v37  ;;  %2805 = vmatprep.subr.bf16.mxu0 %v17191_v38  ;;  %v17252_v37 = vld [vmem:[#allocation3 + $0x968] ss:$24 sps:$4 sm:$0xff]   ;;  %v17257_v38 = vld [vmem:[#allocation3 + $0x94] ss:$24 sps:$4 sm:$0xff]  }
 0x351   : > { %3915 = vmatprep.subr.bf16.mxu1 %v17197_v41  ;;  %v17260_v41 = vld [vmem:[#allocation3 + $0x99c] ss:$24 sps:$4 sm:$0xff]  }
 0x352   : > { %2745 = vmatmul.mubr.bf16.vlgmr.msra.gmra.mrb[24].mxu0 %v19902_v27  ;;  %v17206_v27 = vld [vmem:[#allocation3 + $0x36c] ss:$24 sps:$4 sm:$0xff]  }
 0x353   : > { %3855 = vmatmul.mubr.bf16.vlgmr.msra.gmra.mrb[0].mxu1 %v20031_v49  ;;  %2754 = vmatprep.mubr.bf16.mxu0 %v19906_v31  ;;  %v17209_v31 = vld [vmem:[#allocation3 + $0x824] ss:$24 sps:$4 sm:$0xff]  }
 0x354   : > { %3864 = vmatprep.mubr.bf16.mxu1 %v20036_v52  ;;  %2806 = vmatpush1.bf16.msra.mxu0 %v17189_v42  ;;  %v17258_v42 = vld [vmem:[#allocation3 + $0x998] ss:$24 sps:$4 sm:$0xff]  }
 0x355   : > { %3916 = vmatpush1.bf16.msra.mxu1 %v17195_v43  ;;  %2807 = vmatprep.subr.bf16.mxu0 %v17194_v44  ;;  %v20092_v43 = vld [vmem:[%s19885_s8 + $0x20] ss:$12 sps:$4 sm:$0xff]   ;;  %v17263_v44 = vld [vmem:[#allocation3 + $0xc4] ss:$24 sps:$4 sm:$0xff]  }
 0x356   : > { %3917 = vmatprep.subr.bf16.mxu1 %v17200_v47  ;;  %v17266_v47 = vld [vmem:[#allocation3 + $0x9cc] ss:$24 sps:$4 sm:$0xff]  }
 0x358   : > { %2808 = vmatpush1.bf16.msra.mxu0 %v17192_v53  ;;  %v17261_v53 = vld [vmem:[#allocation3 + $0xc0] ss:$24 sps:$4 sm:$0xff]  }
 0x359   : > { %3918 = vmatpush1.bf16.msra.mxu1 %v17198_v54  ;;  %2809 = vmatprep.subr.bf16.mxu0 %v17203_v55  ;;  %v17264_v54 = vld [vmem:[#allocation3 + $0x9c8] ss:$24 sps:$4 sm:$0xff]   ;;  %v17272_v55 = vld [vmem:[#allocation3 + $0x9fc] ss:$24 sps:$4 sm:$0xff]  }
 0x35a   : > { %3919 = vmatprep.subr.bf16.mxu1 %v17206_v27  ;;  %2755 = vmatmul.mubr.bf16.gmra.mrb[28].mxu0 %v19921_v48  ;;  %v17218_v48 = vld [vmem:[#allocation3 + $0x3cc] ss:$24 sps:$4 sm:$0xff]   ;;  %v17267_v27 = vld [vmem:[#allocation3 + $0xf0] ss:$24 sps:$4 sm:$0xff]  }
 0x35b   : > { %3865 = vmatmul.mubr.bf16.gmra.mrb[4].mxu1 %v20041_v60  ;;  %2764 = vmatprep.mubr.bf16.mxu0 %v19925_v50  ;;  %v17221_v50 = vld [vmem:[#allocation3 + $0x884] ss:$24 sps:$4 sm:$0xff]  }
 0x35c   : > { %3874 = vmatprep.mubr.bf16.mxu1 %v20046_v61  ;;  %2810 = vmatpush1.bf16.msra.mxu0 %v17201_v56  ;;  %v17270_v56 = vld [vmem:[#allocation3 + $0x9f8] ss:$24 sps:$4 sm:$0xff]  }
 0x35d   : > { %3920 = vmatpush1.bf16.msra.mxu1 %v17204_v58  ;;  %2811 = vmatprep.subr.bf16.mxu0 %v17209_v31  ;;  %v20099_v58 = vld [vmem:[%s19885_s8 + $0x38] ss:$12 sps:$4 sm:$0xff]  }
 0x35e   : > { %3921 = vmatprep.subr.bf16.mxu1 %v17212_v59  ;;  %v17275_v31 = vld [vmem:[#allocation3 + $0x124] ss:$24 sps:$4 sm:$0xff]  }
 0x35f   : > { %v17278_v59 = vld [vmem:[#allocation3 + $0xa2c] ss:$24 sps:$4 sm:$0xff]  }
 0x360   : > { %2812 = vmatpush1.bf16.msra.mxu0 %v17207_v62  ;;  %v17273_v62 = vld [vmem:[#allocation3 + $0x120] ss:$24 sps:$4 sm:$0xff]  }
 0x361   : > { %3922 = vmatpush1.bf16.msra.mxu1 %v17210_v0  ;;  %2813 = vmatprep.subr.bf16.mxu0 %v17215_v1  ;;  %v17276_v0 = vld [vmem:[#allocation3 + $0xa28] ss:$24 sps:$4 sm:$0xff]   ;;  %v17284_v1 = vld [vmem:[#allocation3 + $0xa5c] ss:$24 sps:$4 sm:$0xff]  }
 0x362   : > { %3923 = vmatprep.subr.bf16.mxu1 %v17218_v48  ;;  %2765 = vmatmul.mubr.bf16.gmra.mrb[32].mxu0 %v19938_v3  ;;  %v17230_v3 = vld [vmem:[#allocation3 + $0x42c] ss:$24 sps:$4 sm:$0xff]   ;;  %v17279_v48 = vld [vmem:[#allocation3 + $0x150] ss:$24 sps:$4 sm:$0xff]  }
 0x363   : > { %3875 = vmatmul.mubr.bf16.gmra.mrb[8].mxu1 %v20051_v8  ;;  %2774 = vmatprep.mubr.bf16.mxu0 %v19943_v7  ;;  %v17233_v7 = vld [vmem:[#allocation3 + $0x8e4] ss:$24 sps:$4 sm:$0xff]  }
 0x364   : > { %3884 = vmatprep.mubr.bf16.mxu1 %v20056_v9  ;;  %2814 = vmatpush1.bf16.msra.mxu0 %v17213_v4  ;;  %v17282_v4 = vld [vmem:[#allocation3 + $0xa58] ss:$24 sps:$4 sm:$0xff]  }
 0x365   : > { %3924 = vmatpush1.bf16.msra.mxu1 %v17216_v5  ;;  %2815 = vmatprep.subr.bf16.mxu0 %v17221_v50  ;;  %v20106_v5 = vld [vmem:[%s19885_s8 + $0x50] ss:$12 sps:$4 sm:$0xff]  }
 0x366   : > { %3925 = vmatprep.subr.bf16.mxu1 %v17224_v6  ;;  %v17287_v50 = vld [vmem:[#allocation3 + $0x184] ss:$24 sps:$4 sm:$0xff]  }
 0x367   : > { %v17290_v6 = vld [vmem:[#allocation3 + $0xa8c] ss:$24 sps:$4 sm:$0xff]  }
 0x368   : > { %2816 = vmatpush1.bf16.msra.mxu0 %v17219_v10  ;;  %v17285_v10 = vld [vmem:[#allocation3 + $0x180] ss:$24 sps:$4 sm:$0xff]  }
 0x369   : > { %3926 = vmatpush1.bf16.msra.mxu1 %v17222_v13  ;;  %2817 = vmatprep.subr.bf16.mxu0 %v17227_v14  ;;  %v17288_v13 = vld [vmem:[#allocation3 + $0xa88] ss:$24 sps:$4 sm:$0xff]   ;;  %v17296_v14 = vld [vmem:[#allocation3 + $0xabc] ss:$24 sps:$4 sm:$0xff]  }
 0x36a   : > { %3927 = vmatprep.subr.bf16.mxu1 %v17230_v3  ;;  %2775 = vmatmul.mubr.bf16.gmra.mrb[36].mxu0 %v19953_v23  ;;  %v17239_v23 = vld [vmem:[#allocation3 + $0x4] ss:$24 sps:$4 sm:$0xff]   ;;  %v17291_v3 = vld [vmem:[#allocation3 + $0x1b0] ss:$24 sps:$4 sm:$0xff]  }
 0x36b   : > { %3885 = vmatmul.mubr.bf16.gmra.mrb[12].mxu1 %v20061_v18  ;;  %2784 = vmatprep.mubr.bf16.mxu0 %v19957_v26  ;;  %v20071_v26 = vld [vmem:[%s19885_s8 + $0x60] ss:$12 sps:$4 sm:$0xff]  }
 0x36c   : > { %3894 = vmatprep.mubr.bf16.mxu1 %v20066_v20  ;;  %2818 = vmatpush1.bf16.msra.mxu0 %v17225_v15  ;;  %v17294_v15 = vld [vmem:[#allocation3 + $0xab8] ss:$24 sps:$4 sm:$0xff]  }
 0x36d   : > { %3928 = vmatpush1.bf16.msra.mxu1 %v17228_v16  ;;  %2819 = vmatprep.subr.bf16.mxu0 %v17233_v7  ;;  %v20113_v16 = vld [vmem:[%s19885_s8 + $0x68] ss:$12 sps:$4 sm:$0xff]   ;;  %v17299_v7 = vld [vmem:[#allocation3 + $0x1e4] ss:$24 sps:$4 sm:$0xff]  }
 0x36e   : > { %3929 = vmatprep.subr.bf16.mxu1 %v17236_v17  ;;  %v17302_v17 = vld [vmem:[#allocation3 + $0xaec] ss:$24 sps:$4 sm:$0xff]  }
 0x370   : > { %2820 = vmatpush1.bf16.msra.mxu0 %v17231_v21  ;;  %v17297_v21 = vld [vmem:[#allocation3 + $0x1e0] ss:$24 sps:$4 sm:$0xff]  }
 0x371   : > { %3930 = vmatpush1.bf16.msra.mxu1 %v17234_v22  ;;  %3636 = vmatprep.subr.bf16.mxu0 %v17239_v23  ;;  %v17300_v22 = vld [vmem:[#allocation3 + $0xae8] ss:$24 sps:$4 sm:$0xff]   ;;  %v4343_v23 = vrot.slane %v20026_v19, 1 }
 0x372   : > { %5297 = vmatprep.subr.bf16.mxu1 %v17242_v24  ;;  %2785 = vmatmul.mubr.bf16.gmra.mrb[40].mxu0 %v19965_v39  ;;  %v17237_v39 = vld [vmem:[#allocation3] ss:$24 sps:$4 sm:$0xff]   ;;  %v17305_v24 = vld [vmem:[#allocation3 + $0x214] ss:$24 sps:$4 sm:$0xff]  }
 0x373   : > { %3895 = vmatmul.mubr.bf16.gmra.mrb[16].mxu1 %v20071_v26  ;;  %2794 = vmatprep.mubr.bf16.mxu0 %v19967_v40  ;;  %v17246_v40 = vld [vmem:[#allocation3 + $0x938] ss:$24 sps:$4 sm:$0xff]  }
 0x374   : > { %3904 = vmatprep.mubr.bf16.mxu1 %v20076_v25 }
 0x37a   : > { %2795 = vmatmul.mubr.bf16.gmra.mrb[44].mxu0 %v19975_v45  ;;  %v17251_v45 = vld [vmem:[#allocation3 + $0x64] ss:$24 sps:$4 sm:$0xff]  }
 0x37b   : > { %3905 = vmatmul.mubr.bf16.gmra.mrb[20].mxu1 %v20081_v29  ;;  %2837 = vmatprep.mubr.bf16.mxu0 %v22617_v51 }
 0x37c   : > { %3947 = vmatprep.mubr.bf16.mxu1 %v22617_v51 }
 0x382   : > { %2838 = vmatmul.mubr.bf16.vlgmr.msra.gmra.mrb[24].mxu0 %v19983_v57  ;;  %v17255_v57 = vld [vmem:[#allocation3 + $0x90] ss:$24 sps:$4 sm:$0xff]  }
 0x383   : > { %3948 = vmatmul.mubr.bf16.vlgmr.msra.gmra.mrb[0].mxu1 %v18405_v34  ;;  %3637 = vmatpush1.bf16.msra.mxu0 %v17237_v39  ;;  %v17308_v39 = vld [vmem:[#allocation3 + $0xb1c] ss:$24 sps:$4 sm:$0xff]   ;;  %v17314_v34 = vld [vmem:[#allocation3 + $0xb4c] ss:$24 sps:$4 sm:$0xff]  }
 0x384   : > { %5298 = vmatpush1.bf16.msra.mxu1 %v17240_v30  ;;  %3638 = vmatprep.subr.bf16.mxu0 %v17245_v2  ;;  %v17303_v30 = vld [vmem:[#allocation3 + $0x210] ss:$24 sps:$4 sm:$0xff]  }
 0x385   : > { %5299 = vmatprep.subr.bf16.mxu1 %v17248_v32  ;;  %2847 = vmatprep.mubr.bf16.mxu0 %v22617_v51  ;;  %v17306_v2 = vld [vmem:[#allocation3 + $0xb18] ss:$24 sps:$4 sm:$0xff]   ;;  %v20122_v32 = vld [vmem:[%s19885_s8 + $0x80] ss:$12 sps:$4 sm:$0xff]  }
 0x386   : > { %3957 = vmatprep.mubr.bf16.mxu1 %v22617_v51 }
 0x387   : > { %3639 = vmatpush1.bf16.msra.mxu0 %v17243_v33 }
 0x388   : > { %5300 = vmatpush1.bf16.msra.mxu1 %v17246_v40  ;;  %3640 = vmatprep.subr.bf16.mxu0 %v17251_v45  ;;  %v17311_v40 = vld [vmem:[#allocation3 + $0x244] ss:$24 sps:$4 sm:$0xff]   ;;  %v17309_v45 = vld [vmem:[#allocation3 + $0x240] ss:$24 sps:$4 sm:$0xff]  }
 0x389   : > { %5301 = vmatprep.subr.bf16.mxu1 %v17254_v35  ;;  %v17312_v35 = vld [vmem:[#allocation3 + $0xb48] ss:$24 sps:$4 sm:$0xff]  }
 0x38a   : > { %2848 = vmatmul.mubr.bf16.gmra.mrb[28].mxu0 %v19991_v11  ;;  %v17269_v11 = vld [vmem:[#allocation3 + $0xf4] ss:$24 sps:$4 sm:$0xff]  }
 0x38b   : > { %3958 = vmatmul.mubr.bf16.gmra.mrb[4].mxu1 %v20092_v43  ;;  %3641 = vmatpush1.bf16.msra.mxu0 %v17249_v36  ;;  %v17320_v36 = vld [vmem:[#allocation3 + $0xb7c] ss:$24 sps:$4 sm:$0xff]  }
 0x38c   : > { %5302 = vmatpush1.bf16.msra.mxu1 %v17252_v37  ;;  %3642 = vmatprep.subr.bf16.mxu0 %v17257_v38  ;;  %v17315_v37 = vld [vmem:[#allocation3 + $0x270] ss:$24 sps:$4 sm:$0xff]  }
 0x38d   : > { %5303 = vmatprep.subr.bf16.mxu1 %v17260_v41  ;;  %2857 = vmatprep.mubr.bf16.mxu0 %v22617_v51  ;;  %v17318_v38 = vld [vmem:[#allocation3 + $0xb78] ss:$24 sps:$4 sm:$0xff]   ;;  %v17323_v41 = vld [vmem:[#allocation3 + $0x2a4] ss:$24 sps:$4 sm:$0xff]  }
 0x38e   : > { %3967 = vmatprep.mubr.bf16.mxu1 %v22617_v51 }
 0x38f   : > { %3643 = vmatpush1.bf16.msra.mxu0 %v17255_v57  ;;  %v17326_v57 = vld [vmem:[#allocation3 + $0xbac] ss:$24 sps:$4 sm:$0xff]  }
 0x390   : > { %5304 = vmatpush1.bf16.msra.mxu1 %v17258_v42  ;;  %3644 = vmatprep.subr.bf16.mxu0 %v17263_v44  ;;  %v17321_v42 = vld [vmem:[#allocation3 + $0x2a0] ss:$24 sps:$4 sm:$0xff]  }
 0x391   : > { %5305 = vmatprep.subr.bf16.mxu1 %v17266_v47  ;;  %v17324_v44 = vld [vmem:[#allocation3 + $0xba8] ss:$24 sps:$4 sm:$0xff]   ;;  %v17329_v47 = vld [vmem:[#allocation3 + $0x2d4] ss:$24 sps:$4 sm:$0xff]  }
 0x392   : > { %2858 = vmatmul.mubr.bf16.gmra.mrb[32].mxu0 %v19999_v28  ;;  %v17281_v28 = vld [vmem:[#allocation3 + $0x154] ss:$24 sps:$4 sm:$0xff]  }
 0x393   : > { %3968 = vmatmul.mubr.bf16.gmra.mrb[8].mxu1 %v20099_v58  ;;  %3645 = vmatpush1.bf16.msra.mxu0 %v17261_v53  ;;  %v17327_v53 = vld [vmem:[#allocation3 + $0x2d0] ss:$24 sps:$4 sm:$0xff]  }
 0x394   : > { %5306 = vmatpush1.bf16.msra.mxu1 %v17264_v54  ;;  %3646 = vmatprep.subr.bf16.mxu0 %v17269_v11  ;;  %v17330_v54 = vld [vmem:[#allocation3 + $0xbd8] ss:$24 sps:$4 sm:$0xff]   ;;  %v17335_v11 = vld [vmem:[#allocation3 + $0x304] ss:$24 sps:$4 sm:$0xff]  }
 0x395   : > { %5307 = vmatprep.subr.bf16.mxu1 %v17272_v55  ;;  %2867 = vmatprep.mubr.bf16.mxu0 %v22617_v51  ;;  %v4340_v55 = vrot.slane %v20031_v49, 1 }
 0x396   : > { %3977 = vmatprep.mubr.bf16.mxu1 %v22617_v51 }
 0x397   : > { %3647 = vmatpush1.bf16.msra.mxu0 %v17267_v27  ;;  %v4341_v27 = vrot.slane %v20041_v60, 1  ;;  %v17336_v60 = vld [vmem:[#allocation3 + $0x330] ss:$24 sps:$4 sm:$0xff]  }
 0x398   : > { %5308 = vmatpush1.bf16.msra.mxu1 %v17270_v56  ;;  %3648 = vmatprep.subr.bf16.mxu0 %v17275_v31  ;;  %v17341_v56 = vld [vmem:[#allocation3 + $0xc0c] ss:$24 sps:$4 sm:$0xff]   ;;  %v4351_v31 = vrot.slane %v20046_v61, 1  ;;  %v17345_v61 = vld [vmem:[#allocation3 + $0xc38] ss:$24 sps:$4 sm:$0xff]  }
 0x399   : > { %5309 = vmatprep.subr.bf16.mxu1 %v17278_v59  ;;  %v17333_v59 = vld [vmem:[#allocation3 + $0x300] ss:$24 sps:$4 sm:$0xff]  }
 0x39a   : > { %2868 = vmatmul.mubr.bf16.gmra.mrb[36].mxu0 %v20007_v46  ;;  %v17293_v46 = vld [vmem:[#allocation3 + $0x1b4] ss:$24 sps:$4 sm:$0xff]  }
 0x39b   : > { %3978 = vmatmul.mubr.bf16.gmra.mrb[12].mxu1 %v20106_v5  ;;  %3649 = vmatpush1.bf16.msra.mxu0 %v17273_v62  ;;  %v17339_v62 = vld [vmem:[#allocation3 + $0xc08] ss:$24 sps:$4 sm:$0xff]  }
 0x39c   : > { %5310 = vmatpush1.bf16.msra.mxu1 %v17276_v0  ;;  %3650 = vmatprep.subr.bf16.mxu0 %v17281_v28  ;;  %v20136_v0 = vsel %vm4339_vm1, %v4340_v55, %v4341_v27  ;;  %v17338_v28 = vld [vmem:[#allocation3 + $0x334] ss:$24 sps:$4 sm:$0xff]  }
 0x39d   : > { %5311 = vmatprep.subr.bf16.mxu1 %v17284_v1  ;;  %2877 = vmatprep.mubr.bf16.mxu0 %v22617_v51  ;;  %v17347_v1 = vld [vmem:[#allocation3 + $0xc3c] ss:$24 sps:$4 sm:$0xff]   ;;  %v20212_v55 = vld [vmem:[%s19885_s8 + $0x60] ss:$12 sps:$4 sm:$0xff]  }
 0x39e   : > { %3987 = vmatprep.mubr.bf16.mxu1 %v22617_v51 }
 0x39f   : > { %3651 = vmatpush1.bf16.msra.mxu0 %v17279_v48 }
 0x3a0   : > { %5312 = vmatpush1.bf16.msra.mxu1 %v17282_v4  ;;  %3652 = vmatprep.subr.bf16.mxu0 %v17287_v50  ;;  %v4349_v4 = vrot.slane %v20051_v8, 1  ;;  %v17344_v50 = vld [vmem:[#allocation3 + $0x364] ss:$24 sps:$4 sm:$0xff]  }
 0x3a1   : > { %5313 = vmatprep.subr.bf16.mxu1 %v17290_v6  ;;  %v17350_v6 = vld [vmem:[#allocation3 + $0xc6c] ss:$24 sps:$4 sm:$0xff]  }
 0x3a2   : > { %2878 = vmatmul.mubr.bf16.gmra.mrb[40].mxu0 %v20014_v63  ;;  %v4344_v63 = vrot.slane %v20036_v52, 1 }
 0x3a3   : > { %3988 = vmatmul.mubr.bf16.gmra.mrb[16].mxu1 %v20113_v16  ;;  %3653 = vmatpush1.bf16.msra.mxu0 %v17285_v10  ;;  %v4357_v10 = vrot.slane %v20056_v9, 1  ;;  %v20157_v9 = vld [vmem:[%s19885_s8 + $0x18] ss:$12 sps:$4 sm:$0xff]  }
 0x3a4   : > { %5314 = vmatpush1.bf16.msra.mxu1 %v17288_v13  ;;  %3654 = vmatprep.subr.bf16.mxu0 %v17293_v46  ;;  %v20128_v33 = vsel %vm4339_vm1, %v4343_v23, %v4344_v63  ;;  %v20141_v48 = vsel %vm4339_vm1, %v4344_v63, %v4351_v31  ;;  %v17348_v13 = vld [vmem:[#allocation3 + $0xc68] ss:$24 sps:$4 sm:$0xff]   ;;  %v20150_v46 = vsel %vm4339_vm1, %v4341_v27, %v4349_v4 }
 0x3a5   : > { %5315 = vmatprep.subr.bf16.mxu1 %v17296_v14  ;;  %2887 = vmatprep.mubr.bf16.mxu0 %v22617_v51  ;;  %v17356_v14 = vld [vmem:[#allocation3 + $0xc9c] ss:$24 sps:$4 sm:$0xff]   ;;  %v20153_v8 = vsel %vm4339_vm1, %v4351_v31, %v4357_v10  ;;  %v17357_v23 = vld [vmem:[#allocation3 + $0x3c0] ss:$24 sps:$4 sm:$0xff]  }
 0x3a6   : > { %3997 = vmatprep.mubr.bf16.mxu1 %v22617_v51  ;;  %v17360_v63 = vld [vmem:[#allocation3 + $0xcc8] ss:$24 sps:$4 sm:$0xff]  }
 0x3a7   : > { %3655 = vmatpush1.bf16.msra.mxu0 %v17291_v3  ;;  %v4355_v3 = vrot.slane %v20061_v18, 1  ;;  %v4363_v18 = vrot.slane %v20066_v20, 1  ;;  %v17363_v20 = vld [vmem:[#allocation3 + $0x3f0] ss:$24 sps:$4 sm:$0xff]  }
 0x3a8   : > { %5316 = vmatpush1.bf16.msra.mxu1 %v17294_v15  ;;  %3656 = vmatprep.subr.bf16.mxu0 %v17299_v7  ;;  %v17351_v15 = vld [vmem:[#allocation3 + $0x390] ss:$24 sps:$4 sm:$0xff]  }
 0x3a9   : > { %5317 = vmatprep.subr.bf16.mxu1 %v17302_v17  ;;  %v17354_v7 = vld [vmem:[#allocation3 + $0xc98] ss:$24 sps:$4 sm:$0xff]   ;;  %v20162_v17 = vld [vmem:[%s19885_s8 + $0x34] ss:$12 sps:$4 sm:$0xff]   ;;  %v20217_v27 = vld [vmem:[%s19885_s8 + $0x7c] ss:$12 sps:$4 sm:$0xff]  }
 0x3aa   : > { %2888 = vmatmul.mubr.bf16.gmra.mrb[44].mxu0 %v20020_v12  ;;  %v17317_v12 = vld [vmem:[#allocation3 + $0x274] ss:$24 sps:$4 sm:$0xff]  }
 0x3ab   : > { %3998 = vmatmul.mubr.bf16.gmra.mrb[20].mxu1 %v20122_v32  ;;  %3657 = vmatpush1.bf16.msra.mxu0 %v17297_v21  ;;  %v17359_v21 = vld [vmem:[#allocation3 + $0x3c4] ss:$24 sps:$4 sm:$0xff]   ;;  %v20229_v31 = vld [vmem:[%s19885_s8 + $0x8] ss:$12 sps:$4 sm:$0xff]  }
 0x3ac   : > { %5318 = vmatpush1.bf16.msra.mxu1 %v17300_v22  ;;  %3658 = vmatprep.subr.bf16.mxu0 %v17305_v24  ;;  %v17362_v22 = vld [vmem:[#allocation3 + $0xccc] ss:$24 sps:$4 sm:$0xff]   ;;  %v20168_v24 = vsel %vm4339_vm1, %v4349_v4, %v4355_v3 }
 0x3ad   : > { %5319 = vmatprep.subr.bf16.mxu1 %v17308_v39  ;;  %3668 = vmatprep.mubr.bf16.mxu0 %v20026_v19  ;;  %v17332_v19 = vld [vmem:[#allocation3 + $0xbdc] ss:$24 sps:$4 sm:$0xff]  }
 0x3ae   : > { %5329 = vmatprep.mubr.bf16.mxu1 %v20128_v33  ;;  %v17365_v39 = vld [vmem:[#allocation3 + $0x3f4] ss:$24 sps:$4 sm:$0xff]  }
 0x3af   : > { %3659 = vmatpush1.bf16.msra.mxu0 %v17303_v30  ;;  %v17368_v30 = vld [vmem:[#allocation3 + $0xcfc] ss:$24 sps:$4 sm:$0xff]  }
 0x3b0   : > { %5320 = vmatpush1.bf16.msra.mxu1 %v17306_v2  ;;  %3660 = vmatprep.subr.bf16.mxu0 %v17311_v40  ;;  %v20171_v2 = vsel %vm4339_vm1, %v4357_v10, %v4363_v18  ;;  %v20174_v40 = vld [vmem:[%s19885_s8 + $0x30] ss:$12 sps:$4 sm:$0xff]   ;;  %v17389_v4 = vld [vmem:[#allocation3 + $0x74] ss:$24 sps:$4 sm:$0xff]  }
 0x3b1   : > { %5321 = vmatprep.subr.bf16.mxu1 %v17314_v34  ;;  %v17366_v34 = vld [vmem:[#allocation3 + $0xcf8] ss:$24 sps:$4 sm:$0xff]   ;;  %v17392_v10 = vld [vmem:[#allocation3 + $0xa4] ss:$24 sps:$4 sm:$0xff]  }
 0x3b3   : > { %3661 = vmatpush1.bf16.msra.mxu0 %v17309_v45  ;;  %v20179_v45 = vld [vmem:[%s19885_s8 + $0x4c] ss:$12 sps:$4 sm:$0xff]  }
 0x3b4   : > { %5322 = vmatpush1.bf16.msra.mxu1 %v17312_v35  ;;  %3662 = vmatprep.subr.bf16.mxu0 %v17317_v12  ;;  %v4361_v35 = vrot.slane %v20071_v26, 1  ;;  %v17371_v12 = vld [vmem:[#allocation3 + $0x424] ss:$24 sps:$4 sm:$0xff]  }
 0x3b5   : > { %5323 = vmatprep.subr.bf16.mxu1 %v17320_v36  ;;  %v17374_v36 = vld [vmem:[#allocation3 + $0xd2c] ss:$24 sps:$4 sm:$0xff]  }
 0x3b7   : > { %3663 = vmatpush1.bf16.msra.mxu0 %v17315_v37  ;;  %v20185_v37 = vrot.slane %v20076_v25, 1  ;;  %v20195_v25 = vld [vmem:[%s19885_s8 + $0x48] ss:$12 sps:$4 sm:$0xff]  }
 0x3b8   : > { %5324 = vmatpush1.bf16.msra.mxu1 %v17318_v38  ;;  %3664 = vmatprep.subr.bf16.mxu0 %v17323_v41  ;;  %v17369_v38 = vld [vmem:[#allocation3 + $0x420] ss:$24 sps:$4 sm:$0xff]  }
 0x3b9   : > { %5325 = vmatprep.subr.bf16.mxu1 %v17326_v57  ;;  %v17372_v41 = vld [vmem:[#allocation3 + $0xd28] ss:$24 sps:$4 sm:$0xff]   ;;  %v20188_v57 = vsel %vm4339_vm1, %v4355_v3, %v4361_v35  ;;  %v20192_v26 = vsel %vm4339_vm1, %v4363_v18, %v20185_v37 }
 0x3ba   : > { %v17399_v18 = vld [vmem:[#allocation3 + $0x130] ss:$24 sps:$4 sm:$0xff]  }
 0x3bb   : > { %3665 = vmatpush1.bf16.msra.mxu0 %v17321_v42  ;;  %v17377_v42 = vld [vmem:[#allocation3 + $0x454] ss:$24 sps:$4 sm:$0xff]  }
 0x3bc   : > { %5326 = vmatpush1.bf16.msra.mxu1 %v17324_v44  ;;  %3666 = vmatprep.subr.bf16.mxu0 %v17329_v47  ;;  %v17380_v44 = vld [vmem:[#allocation3 + $0xd5c] ss:$24 sps:$4 sm:$0xff]   ;;  %v20200_v47 = vrot.slane %v20081_v29, 1 }
 0x3bd   : > { %5327 = vmatprep.subr.bf16.mxu1 %v17332_v19  ;;  %v17375_v19 = vld [vmem:[#allocation3 + $0x450] ss:$24 sps:$4 sm:$0xff]  }
 0x3be   : > { %v20209_v29 = vsel %vm4339_vm1, %v4361_v35, %v20200_v47 }
 0x3bf   : > { %3667 = vmatpush1.bf16.msra.mxu0 %v17327_v53  ;;  %v20203_v53 = vld [vmem:[%s19885_s8 + $0x64] ss:$12 sps:$4 sm:$0xff]  }
 0x3c0   : > { %5328 = vmatpush1.bf16.msra.mxu1 %v17330_v54  ;;  %3729 = vmatprep.subr.bf16.mxu0 %v17335_v11  ;;  %v17378_v54 = vld [vmem:[#allocation3 + $0xd58] ss:$24 sps:$4 sm:$0xff]   ;;  %v17383_v11 = vld [vmem:[#allocation3 + $0x14] ss:$24 sps:$4 sm:$0xff]  }
 0x3c1   : > { %5390 = vmatprep.subr.bf16.mxu1 %v17341_v56  ;;  %v20222_v56 = vld [vmem:[%s19885_s8 + $0x78] ss:$12 sps:$4 sm:$0xff]  }
 0x3c2   : > { %3669 = vmatmul.mubr.bf16.vlgmr.msra.gmra.mrb[0].mxu0 %v20031_v49  ;;  %v17342_v49 = vld [vmem:[#allocation3 + $0x360] ss:$24 sps:$4 sm:$0xff]  }
 0x3c3   : > { %5330 = vmatmul.mubr.bf16.vlgmr.msra.gmra.mrb[0].mxu1 %v20136_v0  ;;  %3678 = vmatprep.mubr.bf16.mxu0 %v20036_v52  ;;  %v17353_v52 = vld [vmem:[#allocation3 + $0x394] ss:$24 sps:$4 sm:$0xff]  }
 0x3c4   : > { %5339 = vmatprep.mubr.bf16.mxu1 %v20141_v48  ;;  %3730 = vmatpush1.bf16.msra.mxu0 %v17333_v59  ;;  %v4346_v59 = vrot.slane %v20229_v31, 1 }
 0x3c5   : > { %5391 = vmatpush1.bf16.msra.mxu1 %v17339_v62  ;;  %3731 = vmatprep.subr.bf16.mxu0 %v17338_v28  ;;  %v4347_v62 = vrot.slane %v20092_v43, 1  ;;  %v17381_v28 = vld [vmem:[#allocation3 + $0x10] ss:$24 sps:$4 sm:$0xff]  }
 0x3c6   : > { %5392 = vmatprep.subr.bf16.mxu1 %v17347_v1  ;;  %v17387_v43 = vld [vmem:[#allocation3 + $0x70] ss:$24 sps:$4 sm:$0xff]  }
 0x3c7   : > { %v20234_v1 = vsel %vm4339_vm1, %v4346_v59, %v4347_v62  ;;  %v17417_v59 = vld [vmem:[#allocation3 + $0x250] ss:$24 sps:$4 sm:$0xff]  }
 0x3c8   : > { %3732 = vmatpush1.bf16.msra.mxu0 %v17336_v60  ;;  %v17386_v60 = vld [vmem:[#allocation3 + $0x44] ss:$24 sps:$4 sm:$0xff]  }
 0x3c9   : > { %5393 = vmatpush1.bf16.msra.mxu1 %v17345_v61  ;;  %3733 = vmatprep.subr.bf16.mxu0 %v17344_v50  ;;  %v17384_v61 = vld [vmem:[#allocation3 + $0x40] ss:$24 sps:$4 sm:$0xff]   ;;  %v4353_v50 = vrot.slane %v20099_v58, 1  ;;  %v17395_v58 = vld [vmem:[#allocation3 + $0xd4] ss:$24 sps:$4 sm:$0xff]  }
 0x3ca   : > { %5394 = vmatprep.subr.bf16.mxu1 %v17350_v6  ;;  %3679 = vmatmul.mubr.bf16.gmra.mrb[4].mxu0 %v20157_v9 }
 0x3cb   : > { %5340 = vmatmul.mubr.bf16.gmra.mrb[4].mxu1 %v20150_v46  ;;  %3688 = vmatprep.mubr.bf16.mxu0 %v20162_v17  ;;  %v20242_v6 = vsel %vm4339_vm1, %v4347_v62, %v4353_v50  ;;  %v17422_v62 = vld [vmem:[#allocation3 + $0x284] ss:$24 sps:$4 sm:$0xff]  }
 0x3cc   : > { %5349 = vmatprep.mubr.bf16.mxu1 %v20153_v8  ;;  %3734 = vmatpush1.bf16.msra.mxu0 %v17342_v49  ;;  %v17390_v49 = vld [vmem:[#allocation3 + $0xa0] ss:$24 sps:$4 sm:$0xff]  }
 0x3cd   : > { %5395 = vmatpush1.bf16.msra.mxu1 %v17348_v13  ;;  %3735 = vmatprep.subr.bf16.mxu0 %v17353_v52  ;;  %v20246_v13 = vld [vmem:[%s19885_s8 + $0x20] ss:$12 sps:$4 sm:$0xff]   ;;  %v4359_v52 = vrot.slane %v20106_v5, 1 }
 0x3ce   : > { %5396 = vmatprep.subr.bf16.mxu1 %v17356_v14  ;;  %v17393_v14 = vld [vmem:[#allocation3 + $0xd0] ss:$24 sps:$4 sm:$0xff]   ;;  %v17401_v5 = vld [vmem:[#allocation3 + $0x134] ss:$24 sps:$4 sm:$0xff]  }
 0x3cf   : > { %v20253_v3 = vsel %vm4339_vm1, %v4353_v50, %v4359_v52  ;;  %v17426_v50 = vld [vmem:[#allocation3 + $0x2e0] ss:$24 sps:$4 sm:$0xff]  }
 0x3d0   : > { %3736 = vmatpush1.bf16.msra.mxu0 %v17351_v15  ;;  %v17398_v15 = vld [vmem:[#allocation3 + $0x104] ss:$24 sps:$4 sm:$0xff]  }
 0x3d1   : > { %5397 = vmatpush1.bf16.msra.mxu1 %v17354_v7  ;;  %3737 = vmatprep.subr.bf16.mxu0 %v17359_v21  ;;  %v17396_v7 = vld [vmem:[#allocation3 + $0x100] ss:$24 sps:$4 sm:$0xff]  }
 0x3d2   : > { %5398 = vmatprep.subr.bf16.mxu1 %v17362_v22  ;;  %3689 = vmatmul.mubr.bf16.gmra.mrb[8].mxu0 %v20174_v40  ;;  %v20257_v21 = vld [vmem:[%s19885_s8 + $0x38] ss:$12 sps:$4 sm:$0xff]   ;;  %v4365_v22 = vrot.slane %v20113_v16, 1  ;;  %v17407_v16 = vld [vmem:[#allocation3 + $0x194] ss:$24 sps:$4 sm:$0xff]  }
 0x3d3   : > { %5350 = vmatmul.mubr.bf16.gmra.mrb[8].mxu1 %v20168_v24  ;;  %3698 = vmatprep.mubr.bf16.mxu0 %v20179_v45 }
 0x3d4   : > { %5359 = vmatprep.mubr.bf16.mxu1 %v20171_v2  ;;  %3738 = vmatpush1.bf16.msra.mxu0 %v17357_v23  ;;  %v20264_v23 = vsel %vm4339_vm1, %v4359_v52, %v4365_v22  ;;  %v17432_v52 = vld [vmem:[#allocation3 + $0x340] ss:$24 sps:$4 sm:$0xff]  }
 0x3d5   : > { %5399 = vmatpush1.bf16.msra.mxu1 %v17360_v63  ;;  %3739 = vmatprep.subr.bf16.mxu0 %v17365_v39  ;;  %v17404_v63 = vld [vmem:[#allocation3 + $0x164] ss:$24 sps:$4 sm:$0xff]  }
 0x3d6   : > { %5400 = vmatprep.subr.bf16.mxu1 %v17368_v30  ;;  %v20268_v39 = vld [vmem:[%s19885_s8 + $0x50] ss:$12 sps:$4 sm:$0xff]   ;;  %v17402_v30 = vld [vmem:[#allocation3 + $0x160] ss:$24 sps:$4 sm:$0xff]  }
 0x3d8   : > { %3740 = vmatpush1.bf16.msra.mxu0 %v17363_v20  ;;  %v20273_v20 = vrot.slane %v20122_v32, 1  ;;  %v17408_v32 = vld [vmem:[#allocation3 + $0x1c0] ss:$24 sps:$4 sm:$0xff]  }
 0x3d9   : > { %5401 = vmatpush1.bf16.msra.mxu1 %v17366_v34  ;;  %3741 = vmatprep.subr.bf16.mxu0 %v17371_v12  ;;  %v17405_v34 = vld [vmem:[#allocation3 + $0x190] ss:$24 sps:$4 sm:$0xff]   ;;  %v17410_v12 = vld [vmem:[#allocation3 + $0x1c4] ss:$24 sps:$4 sm:$0xff]  }
 0x3da   : > { %5402 = vmatprep.subr.bf16.mxu1 %v17374_v36  ;;  %3699 = vmatmul.mubr.bf16.gmra.mrb[12].mxu0 %v20195_v25  ;;  %v20278_v35 = vsel %vm4339_vm1, %v4365_v22, %v20273_v20  ;;  %v20282_v36 = vld [vmem:[%s19885_s8 + $0x68] ss:$12 sps:$4 sm:$0xff]   ;;  %v17438_v22 = vld [vmem:[#allocation3 + $0x3a0] ss:$24 sps:$4 sm:$0xff]  }
 0x3db   : > { %5360 = vmatmul.mubr.bf16.gmra.mrb[12].mxu1 %v20188_v57  ;;  %3708 = vmatprep.mubr.bf16.mxu0 %v20203_v53 }
 0x3dc   : > { %5369 = vmatprep.mubr.bf16.mxu1 %v20192_v26  ;;  %3742 = vmatpush1.bf16.msra.mxu0 %v17369_v38  ;;  %v17413_v38 = vld [vmem:[#allocation3 + $0x1f4] ss:$24 sps:$4 sm:$0xff]  }
 0x3dd   : > { %5403 = vmatpush1.bf16.msra.mxu1 %v17372_v41  ;;  %3743 = vmatprep.subr.bf16.mxu0 %v17377_v42  ;;  %v17411_v41 = vld [vmem:[#allocation3 + $0x1f0] ss:$24 sps:$4 sm:$0xff]   ;;  %v17416_v42 = vld [vmem:[#allocation3 + $0x224] ss:$24 sps:$4 sm:$0xff]  }
 0x3de   : > { %5404 = vmatprep.subr.bf16.mxu1 %v17380_v44  ;;  %v20289_v44 = vld [vmem:[%s19885_s8 + $0x80] ss:$12 sps:$4 sm:$0xff]  }
 0x3e0   : > { %3744 = vmatpush1.bf16.msra.mxu0 %v17375_v19  ;;  %v17414_v19 = vld [vmem:[#allocation3 + $0x220] ss:$24 sps:$4 sm:$0xff]  }
 0x3e1   : > { %5405 = vmatpush1.bf16.msra.mxu1 %v17378_v54  ;;  %4008 = vmatprep.subr.bf16.mxu0 %v17383_v11  ;;  %v17419_v54 = vld [vmem:[#allocation3 + $0x254] ss:$24 sps:$4 sm:$0xff]   ;;  %v18426_v11 = vld [vmem:[%s19885_s8 + $0x4] ss:$12 sps:$4 sm:$0xff]  }
 0x3e2   : > { %3709 = vmatmul.mubr.bf16.gmra.mrb[16].mxu0 %v20212_v55 }
 0x3e3   : > { %5370 = vmatmul.mubr.bf16.gmra.mrb[16].mxu1 %v20209_v29  ;;  %3718 = vmatprep.mubr.bf16.mxu0 %v20217_v27 }
 0x3e4   : > { %5379 = vmatprep.mubr.bf16.mxu1 %v20185_v37 }
 0x3ea   : > { %3719 = vmatmul.mubr.bf16.gmra.mrb[20].mxu0 %v20222_v56 }
 0x3eb   : > { %5380 = vmatmul.mubr.bf16.gmra.mrb[20].mxu1 %v20200_v47  ;;  %3761 = vmatprep.mubr.bf16.mxu0 %v22617_v51 }
 0x3ec   : > { %5422 = vmatprep.mubr.bf16.mxu1 %v22617_v51 }
 0x3f2   : > { %3762 = vmatmul.mubr.bf16.vlgmr.msra.gmra.mrb[0].mxu0 %v20229_v31 }
 0x3f3   : > { %5423 = vmatmul.mubr.bf16.vlgmr.msra.gmra.mrb[0].mxu1 %v20234_v1  ;;  %4009 = vmatpush1.bf16.msra.mxu0 %v17381_v28  ;;  %v17420_v28 = vld [vmem:[#allocation3 + $0x280] ss:$24 sps:$4 sm:$0xff]  }
 0x3f4   : > { %5432 = vmatprep.mubr.bf16.mxu1 %v22617_v51  ;;  %4010 = vmatprep.subr.bf16.mxu0 %v17386_v60  ;;  %v17425_v60 = vld [vmem:[#allocation3 + $0x2b4] ss:$24 sps:$4 sm:$0xff]  }
 0x3f5   : > { %3771 = vmatprep.mubr.bf16.mxu0 %v22617_v51 }
 0x3f7   : > { %4011 = vmatpush1.bf16.msra.mxu0 %v17384_v61  ;;  %v17423_v61 = vld [vmem:[#allocation3 + $0x2b0] ss:$24 sps:$4 sm:$0xff]  }
 0x3f8   : > { %4012 = vmatprep.subr.bf16.mxu0 %v17389_v4  ;;  %v17428_v4 = vld [vmem:[#allocation3 + $0x2e4] ss:$24 sps:$4 sm:$0xff]  }
 0x3fa   : > { %3772 = vmatmul.mubr.bf16.gmra.mrb[4].mxu0 %v20246_v13 }
 0x3fb   : > { %5433 = vmatmul.mubr.bf16.gmra.mrb[4].mxu1 %v20242_v6  ;;  %4013 = vmatpush1.bf16.msra.mxu0 %v17387_v43  ;;  %v17431_v43 = vld [vmem:[#allocation3 + $0x314] ss:$24 sps:$4 sm:$0xff]  }
 0x3fc   : > { %5442 = vmatprep.mubr.bf16.mxu1 %v22617_v51  ;;  %4014 = vmatprep.subr.bf16.mxu0 %v17392_v10  ;;  %v17429_v10 = vld [vmem:[#allocation3 + $0x310] ss:$24 sps:$4 sm:$0xff]  }
 0x3fd   : > { %3781 = vmatprep.mubr.bf16.mxu0 %v22617_v51 }
 0x3ff   : > { %4015 = vmatpush1.bf16.msra.mxu0 %v17390_v49  ;;  %v17434_v49 = vld [vmem:[#allocation3 + $0x344] ss:$24 sps:$4 sm:$0xff]  }
 0x400   : > { %4016 = vmatprep.subr.bf16.mxu0 %v17395_v58  ;;  %v18427_v58 = vld [vmem:[%s19885_s8] ss:$12 sps:$4 sm:$0xff]  }
 0x402   : > { %3782 = vmatmul.mubr.bf16.gmra.mrb[8].mxu0 %v20257_v21 }
 0x403   : > { %5443 = vmatmul.mubr.bf16.gmra.mrb[8].mxu1 %v20253_v3  ;;  %4017 = vmatpush1.bf16.msra.mxu0 %v17393_v14  ;;  %v17437_v14 = vld [vmem:[#allocation3 + $0x374] ss:$24 sps:$4 sm:$0xff]  }
 0x404   : > { %5452 = vmatprep.mubr.bf16.mxu1 %v22617_v51  ;;  %4018 = vmatprep.subr.bf16.mxu0 %v17398_v15  ;;  %v18428_v15 = vld [vmem:[%s19885_s8 + $0x1c] ss:$12 sps:$4 sm:$0xff]  }
 0x405   : > { %3791 = vmatprep.mubr.bf16.mxu0 %v22617_v51 }
 0x407   : > { %4019 = vmatpush1.bf16.msra.mxu0 %v17396_v7  ;;  %v17435_v7 = vld [vmem:[#allocation3 + $0x370] ss:$24 sps:$4 sm:$0xff]  }
 0x408   : > { %4020 = vmatprep.subr.bf16.mxu0 %v17401_v5  ;;  %v17440_v5 = vld [vmem:[#allocation3 + $0x3a4] ss:$24 sps:$4 sm:$0xff]  }
 0x40a   : > { %3792 = vmatmul.mubr.bf16.gmra.mrb[12].mxu0 %v20268_v39 }
 0x40b   : > { %5453 = vmatmul.mubr.bf16.gmra.mrb[12].mxu1 %v20264_v23  ;;  %4021 = vmatpush1.bf16.msra.mxu0 %v17399_v18  ;;  %v17443_v18 = vld [vmem:[#allocation3 + $0x3d4] ss:$24 sps:$4 sm:$0xff]  }
 0x40c   : > { %5462 = vmatprep.mubr.bf16.mxu1 %v22617_v51  ;;  %4022 = vmatprep.subr.bf16.mxu0 %v17404_v63  ;;  %v17441_v63 = vld [vmem:[#allocation3 + $0x3d0] ss:$24 sps:$4 sm:$0xff]  }
 0x40d   : > { %3801 = vmatprep.mubr.bf16.mxu0 %v22617_v51 }
 0x40f   : > { %4023 = vmatpush1.bf16.msra.mxu0 %v17402_v30  ;;  %v17446_v30 = vld [vmem:[#allocation3 + $0x404] ss:$24 sps:$4 sm:$0xff]  }
 0x410   : > { %4024 = vmatprep.subr.bf16.mxu0 %v17407_v16  ;;  %v17444_v16 = vld [vmem:[#allocation3 + $0x400] ss:$24 sps:$4 sm:$0xff]  }
 0x412   : > { %3802 = vmatmul.mubr.bf16.gmra.mrb[16].mxu0 %v20282_v36 }
 0x413   : > { %5463 = vmatmul.mubr.bf16.gmra.mrb[16].mxu1 %v20278_v35  ;;  %4025 = vmatpush1.bf16.msra.mxu0 %v17405_v34  ;;  %v17449_v34 = vld [vmem:[#allocation3 + $0x434] ss:$24 sps:$4 sm:$0xff]  }
 0x414   : > { %5472 = vmatprep.mubr.bf16.mxu1 %v22617_v51  ;;  %4026 = vmatprep.subr.bf16.mxu0 %v17410_v12  ;;  %v17450_v12 = vld [vmem:[#allocation3 + $0x460] ss:$24 sps:$4 sm:$0xff]  }
 0x415   : > { %3811 = vmatprep.mubr.bf16.mxu0 %v22617_v51 }
 0x417   : > { %4027 = vmatpush1.bf16.msra.mxu0 %v17408_v32  ;;  %v17455_v32 = vld [vmem:[#allocation3 + $0x904] ss:$24 sps:$4 sm:$0xff]  }
 0x418   : > { %4028 = vmatprep.subr.bf16.mxu0 %v17413_v38  ;;  %v17456_v38 = vld [vmem:[#allocation3 + $0x930] ss:$24 sps:$4 sm:$0xff]  }
 0x41a   : > { %3812 = vmatmul.mubr.bf16.gmra.mrb[20].mxu0 %v20289_v44 }
 0x41b   : > { %5473 = vmatmul.mubr.bf16.gmra.mrb[20].mxu1 %v20273_v20  ;;  %4029 = vmatpush1.bf16.msra.mxu0 %v17411_v41  ;;  %v17462_v41 = vld [vmem:[#allocation3 + $0x990] ss:$24 sps:$4 sm:$0xff]  }
 0x41c   : > { %4040 = vmatprep.mubr.bf16.mxu0 %v18426_v11  ;;  %4030 = vmatprep.subr.bf16.mxu0 %v17416_v42  ;;  %v17468_v42 = vld [vmem:[#allocation3 + $0x9f0] ss:$24 sps:$4 sm:$0xff]  }
 0x41d   : > { %6813 = vmatprep.mubr.bf16.mxu1 %v22617_v51  ;;  %v17474_v11 = vld [vmem:[#allocation3 + $0xa50] ss:$24 sps:$4 sm:$0xff]  }
 0x41f   : > { %4031 = vmatpush1.bf16.msra.mxu0 %v17414_v19  ;;  %v17473_v19 = vld [vmem:[#allocation3 + $0xa24] ss:$24 sps:$4 sm:$0xff]  }
 0x420   : > { %4032 = vmatprep.subr.bf16.mxu0 %v17419_v54  ;;  %v17471_v54 = vld [vmem:[#allocation3 + $0xa20] ss:$24 sps:$4 sm:$0xff]  }
 0x423   : > { %4033 = vmatpush1.bf16.msra.mxu0 %v17417_v59  ;;  %v17479_v59 = vld [vmem:[#allocation3 + $0xa84] ss:$24 sps:$4 sm:$0xff]  }
 0x424   : > { %4034 = vmatprep.subr.bf16.mxu0 %v17422_v62  ;;  %v17477_v62 = vld [vmem:[#allocation3 + $0xa80] ss:$24 sps:$4 sm:$0xff]  }
 0x427   : > { %4035 = vmatpush1.bf16.msra.mxu0 %v17420_v28  ;;  %v17480_v28 = vld [vmem:[#allocation3 + $0xab0] ss:$24 sps:$4 sm:$0xff]  }
 0x428   : > { %4036 = vmatprep.subr.bf16.mxu0 %v17425_v60  ;;  %v17485_v60 = vld [vmem:[#allocation3 + $0xae4] ss:$24 sps:$4 sm:$0xff]  }
 0x42b   : > { %4037 = vmatpush1.bf16.msra.mxu0 %v17423_v61  ;;  %v17488_v61 = vld [vmem:[#allocation3 + $0xb14] ss:$24 sps:$4 sm:$0xff]  }
 0x42c   : > { %4038 = vmatprep.subr.bf16.mxu0 %v17428_v4  ;;  %v17486_v4 = vld [vmem:[#allocation3 + $0xb10] ss:$24 sps:$4 sm:$0xff]  }
 0x42f   : > { %4039 = vmatpush1.bf16.msra.mxu0 %v17426_v50  ;;  %v17491_v50 = vld [vmem:[#allocation3 + $0xb44] ss:$24 sps:$4 sm:$0xff]  }
 0x430   : > { %4101 = vmatprep.subr.bf16.mxu0 %v17431_v43  ;;  %v17489_v43 = vld [vmem:[#allocation3 + $0xb40] ss:$24 sps:$4 sm:$0xff]  }
 0x432   : > { %4041 = vmatmul.mubr.bf16.vlgmr.msra.gmra.mrb[24].mxu0 %v18427_v58  ;;  %v17495_v58 = vld [vmem:[#allocation3 + $0xba0] ss:$24 sps:$4 sm:$0xff]  }
 0x433   : > { %4050 = vmatprep.mubr.bf16.mxu0 %v18428_v15  ;;  %4102 = vmatpush1.bf16.msra.mxu0 %v17429_v10  ;;  %v17492_v10 = vld [vmem:[#allocation3 + $0xb70] ss:$24 sps:$4 sm:$0xff]   ;;  %v17501_v15 = vld [vmem:[#allocation3 + $0xc00] ss:$24 sps:$4 sm:$0xff]  }
 0x434   : > { %4103 = vmatprep.subr.bf16.mxu0 %v17434_v49  ;;  %v17497_v49 = vld [vmem:[#allocation3 + $0xba4] ss:$24 sps:$4 sm:$0xff]  }
 0x437   : > { %4104 = vmatpush1.bf16.msra.mxu0 %v17432_v52  ;;  %v17500_v52 = vld [vmem:[#allocation3 + $0xbd4] ss:$24 sps:$4 sm:$0xff]  }
 0x438   : > { %4105 = vmatprep.subr.bf16.mxu0 %v17437_v14  ;;  %v17498_v14 = vld [vmem:[#allocation3 + $0xbd0] ss:$24 sps:$4 sm:$0xff]  }
 0x43a   : > { %4051 = vmatmul.mubr.bf16.gmra.mrb[28].mxu0 %v20157_v9  ;;  %v17447_v9 = vld [vmem:[#allocation3 + $0x430] ss:$24 sps:$4 sm:$0xff]  }
 0x43b   : > { %4060 = vmatprep.mubr.bf16.mxu0 %v20162_v17  ;;  %4106 = vmatpush1.bf16.msra.mxu0 %v17435_v7  ;;  %v17452_v17 = vld [vmem:[#allocation3 + $0x464] ss:$24 sps:$4 sm:$0xff]   ;;  %v17506_v7 = vld [vmem:[#allocation3 + $0xc34] ss:$24 sps:$4 sm:$0xff]  }
 0x43c   : > { %4107 = vmatprep.subr.bf16.mxu0 %v17440_v5  ;;  %v17504_v5 = vld [vmem:[#allocation3 + $0xc30] ss:$24 sps:$4 sm:$0xff]  }
 0x43f   : > { %4108 = vmatpush1.bf16.msra.mxu0 %v17438_v22  ;;  %v17509_v22 = vld [vmem:[#allocation3 + $0xc64] ss:$24 sps:$4 sm:$0xff]  }
 0x440   : > { %4109 = vmatprep.subr.bf16.mxu0 %v17443_v18  ;;  %v17507_v18 = vld [vmem:[#allocation3 + $0xc60] ss:$24 sps:$4 sm:$0xff]  }
 0x442   : > { %4061 = vmatmul.mubr.bf16.gmra.mrb[32].mxu0 %v20174_v40  ;;  %v17453_v40 = vld [vmem:[#allocation3 + $0x900] ss:$24 sps:$4 sm:$0xff]  }
 0x443   : > { %4070 = vmatprep.mubr.bf16.mxu0 %v20179_v45  ;;  %4110 = vmatpush1.bf16.msra.mxu0 %v17441_v63  ;;  %v17458_v45 = vld [vmem:[#allocation3 + $0x934] ss:$24 sps:$4 sm:$0xff]  }
 0x444   : > { %4111 = vmatprep.subr.bf16.mxu0 %v17446_v30  ;;  %v17512_v63 = vld [vmem:[#allocation3 + $0xc94] ss:$24 sps:$4 sm:$0xff]   ;;  %v17510_v30 = vld [vmem:[#allocation3 + $0xc90] ss:$24 sps:$4 sm:$0xff]  }
 0x447   : > { %4112 = vmatpush1.bf16.msra.mxu0 %v17444_v16  ;;  %v17515_v16 = vld [vmem:[#allocation3 + $0xcc4] ss:$24 sps:$4 sm:$0xff]  }
 0x448   : > { %4113 = vmatprep.subr.bf16.mxu0 %v17449_v34  ;;  %v17513_v34 = vld [vmem:[#allocation3 + $0xcc0] ss:$24 sps:$4 sm:$0xff]  }
 0x44a   : > { %4071 = vmatmul.mubr.bf16.gmra.mrb[36].mxu0 %v20195_v25  ;;  %v17461_v25 = vld [vmem:[#allocation3 + $0x964] ss:$24 sps:$4 sm:$0xff]  }
 0x44b   : > { %4080 = vmatprep.mubr.bf16.mxu0 %v20203_v53  ;;  %4114 = vmatpush1.bf16.msra.mxu0 %v17447_v9  ;;  %v17459_v53 = vld [vmem:[#allocation3 + $0x960] ss:$24 sps:$4 sm:$0xff]   ;;  %v5743_v9 = vlaneseq }
 0x44c   : > { %4115 = vmatprep.subr.bf16.mxu0 %v17452_v17  ;;  %v17518_v17 = vld [vmem:[#allocation3 + $0xcf4] ss:$24 sps:$4 sm:$0xff]  }
 0x44f   : > { %4116 = vmatpush1.bf16.msra.mxu0 %v17450_v12  ;;  %v17516_v12 = vld [vmem:[#allocation3 + $0xcf0] ss:$24 sps:$4 sm:$0xff]  }
 0x450   : > { %5111 = vmatprep.subr.bf16.mxu0 %v17455_v32  ;;  %v20323_v32 = vshrl.u32 %v5743_v9, 7 }
 0x452   : > { %4081 = vmatmul.mubr.bf16.gmra.mrb[40].mxu0 %v20212_v55  ;;  %v17464_v55 = vld [vmem:[#allocation3 + $0x994] ss:$24 sps:$4 sm:$0xff]   ;;  %22757 = vst [vmem:[#allocation62_spill] sm:$0xff] %v20323_v32 }
 0x453   : > { %4090 = vmatprep.mubr.bf16.mxu0 %v20217_v27  ;;  %v17467_v27 = vld [vmem:[#allocation3 + $0x9c4] ss:$24 sps:$4 sm:$0xff]  }
 0x45a   : > { %4091 = vmatmul.mubr.bf16.gmra.mrb[44].mxu0 %v20222_v56  ;;  %v17465_v56 = vld [vmem:[#allocation3 + $0x9c0] ss:$24 sps:$4 sm:$0xff]  }
 0x45b   : > { %4133 = vmatprep.mubr.bf16.mxu0 %v22617_v51 }
 0x462   : > { %4134 = vmatmul.mubr.bf16.vlgmr.msra.gmra.mrb[24].mxu0 %v20229_v31  ;;  %v17470_v31 = vld [vmem:[#allocation3 + $0x9f4] ss:$24 sps:$4 sm:$0xff]  }
 0x463   : > { %5112 = vmatpush1.bf16.msra.mxu0 %v17453_v40  ;;  %4143 = vmatprep.mubr.bf16.mxu0 %v22617_v51  ;;  %v17521_v40 = vld [vmem:[#allocation3 + $0xd24] ss:$24 sps:$4 sm:$0xff]  }
 0x464   : > { %5113 = vmatprep.subr.bf16.mxu0 %v17458_v45  ;;  %v17519_v45 = vld [vmem:[#allocation3 + $0xd20] ss:$24 sps:$4 sm:$0xff]  }
 0x467   : > { %5114 = vmatpush1.bf16.msra.mxu0 %v17456_v38  ;;  %v17524_v38 = vld [vmem:[#allocation3 + $0xd54] ss:$24 sps:$4 sm:$0xff]  }
 0x468   : > { %5115 = vmatprep.subr.bf16.mxu0 %v17461_v25  ;;  %v22616_v25 = vsub.s32 2, %v20323_v32 }
 0x46a   : > { %4144 = vmatmul.mubr.bf16.gmra.mrb[28].mxu0 %v20246_v13  ;;  %v17476_v13 = vld [vmem:[#allocation3 + $0xa54] ss:$24 sps:$4 sm:$0xff]  }
 0x46b   : > { %5116 = vmatpush1.bf16.msra.mxu0 %v17459_v53  ;;  %4153 = vmatprep.mubr.bf16.mxu0 %v22617_v51  ;;  %v5757_v53 = vsub.s32 3, %v20323_v32 }
 0x46c   : > { %5117 = vmatprep.subr.bf16.mxu0 %v17464_v55  ;;  %v17522_v55 = vld [vmem:[#allocation3 + $0xd50] ss:$24 sps:$4 sm:$0xff]  }
 0x46f   : > { %5118 = vmatpush1.bf16.msra.mxu0 %v17462_v41  ;;  %v17527_v41 = vld [vmem:[#allocation3 + $0x914] ss:$24 sps:$4 sm:$0xff]  }
 0x470   : > { %5119 = vmatprep.subr.bf16.mxu0 %v17467_v27  ;;  %v20330_v27 = vld [vmem:[#allocation6] sm:$0x3f] }
 0x472   : > { %4154 = vmatmul.mubr.bf16.gmra.mrb[32].mxu0 %v20257_v21  ;;  %v17482_v21 = vld [vmem:[#allocation3 + $0xab4] ss:$24 sps:$4 sm:$0xff]  }
 0x473   : > { %5120 = vmatpush1.bf16.msra.mxu0 %v17465_v56  ;;  %4163 = vmatprep.mubr.bf16.mxu0 %v22617_v51  ;;  %v20336_v56 = vrot.slane %v20330_v27, %v22616_v25 }
 0x474   : > { %5121 = vmatprep.subr.bf16.mxu0 %v17470_v31  ;;  %v20339_v31 = vrot.slane %v20330_v27, %v5757_v53 }
 0x477   : > { %5122 = vmatpush1.bf16.msra.mxu0 %v17468_v42 }
 0x478   : > { %5123 = vmatprep.subr.bf16.mxu0 %v17473_v19 }
 0x47a   : > { %4164 = vmatmul.mubr.bf16.gmra.mrb[36].mxu0 %v20268_v39  ;;  %v17483_v39 = vld [vmem:[#allocation3 + $0xae0] ss:$24 sps:$4 sm:$0xff]  }
 0x47b   : > { %5124 = vmatpush1.bf16.msra.mxu0 %v17471_v54  ;;  %4173 = vmatprep.mubr.bf16.mxu0 %v22617_v51 }
 0x47c   : > { %5125 = vmatprep.subr.bf16.mxu0 %v17476_v13 }
 0x47f   : > { %5126 = vmatpush1.bf16.msra.mxu0 %v17474_v11 }
 0x480   : > { %5127 = vmatprep.subr.bf16.mxu0 %v17479_v59 }
 0x482   : > { %4174 = vmatmul.mubr.bf16.gmra.mrb[40].mxu0 %v20282_v36  ;;  %v17494_v36 = vld [vmem:[#allocation3 + $0xb74] ss:$24 sps:$4 sm:$0xff]  }
 0x483   : > { %5128 = vmatpush1.bf16.msra.mxu0 %v17477_v62  ;;  %4183 = vmatprep.mubr.bf16.mxu0 %v22617_v51 }
 0x484   : > { %5129 = vmatprep.subr.bf16.mxu0 %v17482_v21 }
 0x487   : > { %5130 = vmatpush1.bf16.msra.mxu0 %v17480_v28 }
 0x488   : > { %5131 = vmatprep.subr.bf16.mxu0 %v17485_v60 }
 0x48a   : > { %4184 = vmatmul.mubr.bf16.gmra.mrb[44].mxu0 %v20289_v44  ;;  %v17503_v44 = vld [vmem:[#allocation3 + $0xc04] ss:$24 sps:$4 sm:$0xff]  }
 0x48b   : > { %5132 = vmatpush1.bf16.msra.mxu0 %v17483_v39  ;;  %5143 = vmatprep.mubr.bf16.mxu0 %v20128_v33 }
 0x48c   : > { %5133 = vmatprep.subr.bf16.mxu0 %v17488_v61 }
 0x48f   : > { %5134 = vmatpush1.bf16.msra.mxu0 %v17486_v4 }
 0x490   : > { %5135 = vmatprep.subr.bf16.mxu0 %v17491_v50 }
 0x493   : > { %5136 = vmatpush1.bf16.msra.mxu0 %v17489_v43 }
 0x494   : > { %5137 = vmatprep.subr.bf16.mxu0 %v17494_v36 }
 0x497   : > { %5138 = vmatpush1.bf16.msra.mxu0 %v17492_v10 }
 0x498   : > { %5139 = vmatprep.subr.bf16.mxu0 %v17497_v49  ;;  %v17525_v49 = vld [vmem:[#allocation3 + $0x910] ss:$24 sps:$4 sm:$0xff]  }
 0x49b   : > { %5140 = vmatpush1.bf16.msra.mxu0 %v17495_v58 }
 0x49c   : > { %5141 = vmatprep.subr.bf16.mxu0 %v17500_v52 }
 0x49f   : > { %5142 = vmatpush1.bf16.msra.mxu0 %v17498_v14  ;;  %v17530_v14 = vld [vmem:[#allocation3 + $0x944] ss:$24 sps:$4 sm:$0xff]  }
 0x4a0   : > { %5204 = vmatprep.subr.bf16.mxu0 %v17503_v44 }
 0x4a2   : > { %5144 = vmatmul.mubr.bf16.vlgmr.msra.gmra.mrb[0].mxu0 %v20136_v0 }
 0x4a3   : > { %5153 = vmatprep.mubr.bf16.mxu0 %v20141_v48  ;;  %5205 = vmatpush1.bf16.msra.mxu0 %v17501_v15 }
 0x4a4   : > { %5206 = vmatprep.subr.bf16.mxu0 %v17506_v7 }
 0x4a7   : > { %5207 = vmatpush1.bf16.msra.mxu0 %v17504_v5 }
 0x4a8   : > { %5208 = vmatprep.subr.bf16.mxu0 %v17509_v22 }
 0x4aa   : > { %5154 = vmatmul.mubr.bf16.gmra.mrb[4].mxu0 %v20150_v46 }
 0x4ab   : > { %5163 = vmatprep.mubr.bf16.mxu0 %v20153_v8  ;;  %5209 = vmatpush1.bf16.msra.mxu0 %v17507_v18 }
 0x4ac   : > { %5210 = vmatprep.subr.bf16.mxu0 %v17512_v63 }
 0x4af   : > { %5211 = vmatpush1.bf16.msra.mxu0 %v17510_v30 }
 0x4b0   : > { %5212 = vmatprep.subr.bf16.mxu0 %v17515_v16 }
 0x4b2   : > { %5164 = vmatmul.mubr.bf16.gmra.mrb[8].mxu0 %v20168_v24 }
 0x4b3   : > { %5173 = vmatprep.mubr.bf16.mxu0 %v20171_v2  ;;  %5213 = vmatpush1.bf16.msra.mxu0 %v17513_v34 }
 0x4b4   : > { %5214 = vmatprep.subr.bf16.mxu0 %v17518_v17  ;;  %v17528_v17 = vld [vmem:[#allocation3 + $0x940] ss:$24 sps:$4 sm:$0xff]  }
 0x4b7   : > { %5215 = vmatpush1.bf16.msra.mxu0 %v17516_v12 }
 0x4b8   : > { %5216 = vmatprep.subr.bf16.mxu0 %v17521_v40 }
 0x4ba   : > { %5174 = vmatmul.mubr.bf16.gmra.mrb[12].mxu0 %v20188_v57 }
 0x4bb   : > { %5183 = vmatprep.mubr.bf16.mxu0 %v20192_v26  ;;  %5217 = vmatpush1.bf16.msra.mxu0 %v17519_v45  ;;  %v17533_v45 = vld [vmem:[#allocation3 + $0x974] ss:$24 sps:$4 sm:$0xff]  }
 0x4bc   : > { %5218 = vmatprep.subr.bf16.mxu0 %v17524_v38 }
 0x4bf   : > { %5219 = vmatpush1.bf16.msra.mxu0 %v17522_v55 }
 0x4c0   : > { %5483 = vmatprep.subr.bf16.mxu0 %v17527_v41 }
 0x4c2   : > { %5184 = vmatmul.mubr.bf16.gmra.mrb[16].mxu0 %v20209_v29 }
 0x4c3   : > { %5193 = vmatprep.mubr.bf16.mxu0 %v20185_v37 }
 0x4c6   : > { %v5424_v42 = vpop.f32.mrb[0].mxu1 }
 0x4c7   : > { %v5775_v19 = vadd.f32 %v20336_v56, %v5424_v42  ;;  %v5426_v54 = vpop.f32.mrb[1].mxu1 }
 0x4c8   : > { %v5776_v13 = vadd.f32 %v20339_v31, %v5426_v54  ;;  %v5428_v11 = vpop.f32.mrb[2].mxu1  ;;  %v17531_v54 = vld [vmem:[#allocation3 + $0x970] ss:$24 sps:$4 sm:$0xff]  }
 0x4c9   : > { %v5847_v59 = vmax.f32 %v5775_v19, 0.0  ;;  %v5781_v62 = vadd.f32 %v20336_v56, %v5428_v11  ;;  %v5430_v21 = vpop.f32.mrb[3].mxu1 }
 0x4ca   : > { %v5848_v28 = vmax.f32 %v5776_v13, 0.0  ;;  %v5782_v60 = vadd.f32 %v20339_v31, %v5430_v21  ;;  %5194 = vmatmul.mubr.bf16.gmra.mrb[20].mxu0 %v20200_v47  ;;  %v17536_v21 = vld [vmem:[#allocation3 + $0x9a4] ss:$24 sps:$4 sm:$0xff]  }
 0x4cb   : > { %v5853_v39 = vmax.f32 %v5781_v62, 0.0  ;;  %v5996_v61 = vrot.slane %v5847_v59, 1  ;;  %5236 = vmatprep.mubr.bf16.mxu0 %v22617_v51 }
 0x4cc   : > { %v5854_v4 = vmax.f32 %v5782_v60, 0.0  ;;  %v5999_v50 = vrot.slane %v5848_v28, 1 }
 0x4cd   : > { %v5997_v43 = vrot.slane %v5853_v39, 1 }
 0x4ce   : > { %v6000_v36 = vrot.slane %v5854_v4, 1  ;;  %v5434_v10 = vpop.f32.mrb[4].mxu1 }
 0x4cf   : > { %v5787_v58 = vadd.f32 %v20336_v56, %v5434_v10  ;;  %v5436_v52 = vpop.f32.mrb[5].mxu1  ;;  %v5998_v44 = vsel %vm4339_vm1, %v5996_v61, %v5997_v43 }
 0x4d0   : > { %v5788_v15 = vadd.f32 %v20339_v31, %v5436_v52  ;;  %v5438_v7 = vpop.f32.mrb[6].mxu1  ;;  %v20351_v5 = vmax.f32 %v5847_v59, %v5998_v44  ;;  %v6001_v22 = vsel %vm4339_vm1, %v5999_v50, %v6000_v36 }
 0x4d1   : > { %v5859_v18 = vmax.f32 %v5787_v58, 0.0  ;;  %v5793_v63 = vadd.f32 %v20336_v56, %v5438_v7  ;;  %v5440_v30 = vpop.f32.mrb[7].mxu1  ;;  %v20355_v16 = vmax.f32 %v5848_v28, %v6001_v22  ;;  %v17539_v7 = vld [vmem:[#allocation3 + $0x9d4] ss:$24 sps:$4 sm:$0xff]  }
 0x4d2   : > { %22758 = vst [vmem:[#allocation63_spill] sm:$0xff] %v20351_v5  ;;  %v5860_v34 = vmax.f32 %v5788_v15, 0.0  ;;  %v5794_v9 = vadd.f32 %v20339_v31, %v5440_v30  ;;  %5237 = vmatmul.mubr.bf16.vlgmr.msra.gmra.mrb[0].mxu0 %v20234_v1 }
 0x4d3   : > { %22759 = vst [vmem:[#allocation64_spill] sm:$0xff] %v20355_v16  ;;  %v6012_v12 = vrot.slane %v5859_v18, 1  ;;  %v5865_v40 = vmax.f32 %v5793_v63, 0.0  ;;  %5484 = vmatpush1.bf16.msra.mxu0 %v17525_v49  ;;  %5246 = vmatprep.mubr.bf16.mxu0 %v22617_v51 }
 0x4d4   : > { %v6014_v38 = vrot.slane %v5860_v34, 1  ;;  %v5866_v53 = vmax.f32 %v5794_v9, 0.0  ;;  %5485 = vmatprep.subr.bf16.mxu0 %v17530_v14 }
 0x4d5   : > { %v6024_v55 = vrot.slane %v5865_v40, 1  ;;  %v6013_v41 = vsel %vm4339_vm1, %v5997_v43, %v6012_v12 }
 0x4d6   : > { %v6026_v42 = vrot.slane %v5866_v53, 1  ;;  %v5444_v19 = vpop.f32.mrb[8].mxu1  ;;  %v20361_v13 = vmax.f32 %v5853_v39, %v6013_v41  ;;  %v6015_v11 = vsel %vm4339_vm1, %v6000_v36, %v6014_v38 }
 0x4d7   : > { %v5799_v59 = vadd.f32 %v20336_v56, %v5444_v19  ;;  %v5446_v62 = vpop.f32.mrb[9].mxu1  ;;  %v6025_v28 = vsel %vm4339_vm1, %v6012_v12, %v6024_v55  ;;  %v20366_v60 = vmax.f32 %v5854_v4, %v6015_v11  ;;  %5486 = vmatpush1.bf16.msra.mxu0 %v17528_v17  ;;  %v17534_v4 = vld [vmem:[#allocation3 + $0x9a0] ss:$24 sps:$4 sm:$0xff]   ;;  %v17537_v17 = vld [vmem:[#allocation3 + $0x9d0] ss:$24 sps:$4 sm:$0xff]  }
 0x4d8   : > { %22760 = vst [vmem:[#allocation65_spill] sm:$0xff] %v20361_v13  ;;  %v5800_v61 = vadd.f32 %v20339_v31, %v5446_v62  ;;  %v5448_v50 = vpop.f32.mrb[10].mxu1  ;;  %v20369_v43 = vmax.f32 %v5859_v18, %v6025_v28  ;;  %v6027_v10 = vsel %vm4339_vm1, %v6014_v38, %v6026_v42  ;;  %5487 = vmatprep.subr.bf16.mxu0 %v17533_v45  ;;  %v17542_v19 = vld [vmem:[#allocation3 + $0xa04] ss:$24 sps:$4 sm:$0xff]  }
 0x4d9   : > { %22761 = vst [vmem:[#allocation66_spill] sm:$0xff] %v20366_v60  ;;  %v5871_v39 = vmax.f32 %v5799_v59, 0.0  ;;  %v5805_v49 = vadd.f32 %v20336_v56, %v5448_v50  ;;  %v5450_v36 = vpop.f32.mrb[11].mxu1  ;;  %v20373_v58 = vmax.f32 %v5860_v34, %v6027_v10 }
 0x4da   : > { %22762 = vst [vmem:[#allocation67_spill] sm:$0xff] %v20369_v43  ;;  %v5872_v52 = vmax.f32 %v5800_v61, 0.0  ;;  %v5806_v14 = vadd.f32 %v20339_v31, %v5450_v36  ;;  %5247 = vmatmul.mubr.bf16.gmra.mrb[4].mxu0 %v20242_v6 }
 0x4db   : > { %22763 = vst [vmem:[#allocation68_spill] sm:$0xff] %v20373_v58  ;;  %v6036_v44 = vrot.slane %v5871_v39, 1  ;;  %v5877_v15 = vmax.f32 %v5805_v49, 0.0  ;;  %5488 = vmatpush1.bf16.msra.mxu0 %v17531_v54  ;;  %5256 = vmatprep.mubr.bf16.mxu0 %v22617_v51 }
 0x4dc   : > { %v6038_v22 = vrot.slane %v5872_v52, 1  ;;  %v5878_v18 = vmax.f32 %v5806_v14, 0.0  ;;  %5489 = vmatprep.subr.bf16.mxu0 %v17536_v21  ;;  %v17545_v14 = vld [vmem:[#allocation3 + $0xa34] ss:$24 sps:$4 sm:$0xff]  }
 0x4dd   : > { %v6048_v63 = vrot.slane %v5877_v15, 1  ;;  %v6037_v30 = vsel %vm4339_vm1, %v6024_v55, %v6036_v44 }
 0x4de   : > { %v6050_v34 = vrot.slane %v5878_v18, 1  ;;  %v5454_v9 = vpop.f32.mrb[12].mxu1  ;;  %v20379_v12 = vmax.f32 %v5865_v40, %v6037_v30  ;;  %v6039_v45 = vsel %vm4339_vm1, %v6026_v42, %v6038_v22  ;;  %v17543_v30 = vld [vmem:[#allocation3 + $0xa30] ss:$24 sps:$4 sm:$0xff]  }
 0x4df   : > { %v5811_v38 = vadd.f32 %v20336_v56, %v5454_v9  ;;  %v5456_v41 = vpop.f32.mrb[13].mxu1  ;;  %v6049_v11 = vsel %vm4339_vm1, %v6036_v44, %v6048_v63  ;;  %v20384_v54 = vmax.f32 %v5866_v53, %v6039_v45  ;;  %5490 = vmatpush1.bf16.msra.mxu0 %v17534_v4  ;;  %v17540_v53 = vld [vmem:[#allocation3 + $0xa00] ss:$24 sps:$4 sm:$0xff]  }
 0x4e0   : > { %22764 = vst [vmem:[#allocation69_spill] sm:$0xff] %v20379_v12  ;;  %v5812_v59 = vadd.f32 %v20339_v31, %v5456_v41  ;;  %v5458_v62 = vpop.f32.mrb[14].mxu1  ;;  %v20387_v55 = vmax.f32 %v5871_v39, %v6049_v11  ;;  %v6051_v21 = vsel %vm4339_vm1, %v6038_v22, %v6050_v34  ;;  %5491 = vmatprep.subr.bf16.mxu0 %v17539_v7  ;;  %v17548_v11 = vld [vmem:[#allocation3 + $0xa64] ss:$24 sps:$4 sm:$0xff]  }
 0x4e1   : > { %22765 = vst [vmem:[#allocation70_spill] sm:$0xff] %v20384_v54  ;;  %v5883_v40 = vmax.f32 %v5811_v38, 0.0  ;;  %v5817_v28 = vadd.f32 %v20336_v56, %v5458_v62  ;;  %v5460_v42 = vpop.f32.mrb[15].mxu1  ;;  %v20391_v61 = vmax.f32 %v5872_v52, %v6051_v21 }
 0x4e2   : > { %22766 = vst [vmem:[#allocation71_spill] sm:$0xff] %v20387_v55  ;;  %v5884_v50 = vmax.f32 %v5812_v59, 0.0  ;;  %v5818_v10 = vadd.f32 %v20339_v31, %v5460_v42  ;;  %5257 = vmatmul.mubr.bf16.gmra.mrb[8].mxu0 %v20253_v3 }
 0x4e3   : > { %22767 = vst [vmem:[#allocation72_spill] sm:$0xff] %v20391_v61  ;;  %v6060_v49 = vrot.slane %v5883_v40, 1  ;;  %v5889_v36 = vmax.f32 %v5817_v28, 0.0  ;;  %5492 = vmatpush1.bf16.msra.mxu0 %v17537_v17  ;;  %5266 = vmatprep.mubr.bf16.mxu0 %v22617_v51 }
 0x4e4   : > { %v6062_v39 = vrot.slane %v5884_v50, 1  ;;  %v5890_v4 = vmax.f32 %v5818_v10, 0.0  ;;  %5493 = vmatprep.subr.bf16.mxu0 %v17542_v19 }
 0x4e5   : > { %v6072_v44 = vrot.slane %v5889_v36, 1  ;;  %v6061_v7 = vsel %vm4339_vm1, %v6048_v63, %v6060_v49 }
 0x4e6   : > { %v6074_v52 = vrot.slane %v5890_v4, 1  ;;  %v5464_v22 = vpop.f32.mrb[16].mxu1  ;;  %v20397_v9 = vmax.f32 %v5877_v15, %v6061_v7  ;;  %v6063_v45 = vsel %vm4339_vm1, %v6050_v34, %v6062_v39 }
 0x4e7   : > { %v5823_v38 = vadd.f32 %v20336_v56, %v5464_v22  ;;  %v5466_v41 = vpop.f32.mrb[17].mxu1  ;;  %v6073_v59 = vsel %vm4339_vm1, %v6060_v49, %v6072_v44  ;;  %v20402_v17 = vmax.f32 %v5878_v18, %v6063_v45  ;;  %5494 = vmatpush1.bf16.msra.mxu0 %v17540_v53  ;;  %v17546_v18 = vld [vmem:[#allocation3 + $0xa60] ss:$24 sps:$4 sm:$0xff]   ;;  %v17551_v22 = vld [vmem:[#allocation3 + $0xa94] ss:$24 sps:$4 sm:$0xff]  }
 0x4e8   : > { %22768 = vst [vmem:[#allocation73_spill] sm:$0xff] %v20397_v9  ;;  %v5824_v19 = vadd.f32 %v20339_v31, %v5466_v41  ;;  %v5468_v62 = vpop.f32.mrb[18].mxu1  ;;  %v20405_v63 = vmax.f32 %v5883_v40, %v6073_v59  ;;  %v6075_v21 = vsel %vm4339_vm1, %v6062_v39, %v6074_v52  ;;  %5495 = vmatprep.subr.bf16.mxu0 %v17545_v14 }
 0x4e9   : > { %22769 = vst [vmem:[#allocation74_spill] sm:$0xff] %v20402_v17  ;;  %v5895_v15 = vmax.f32 %v5823_v38, 0.0  ;;  %v5829_v28 = vadd.f32 %v20336_v56, %v5468_v62  ;;  %v5470_v34 = vpop.f32.mrb[19].mxu1  ;;  %v20409_v42 = vmax.f32 %v5884_v50, %v6075_v21 }
 0x4ea   : > { %22770 = vst [vmem:[#allocation75_spill] sm:$0xff] %v20405_v63  ;;  %v5896_v10 = vmax.f32 %v5824_v19, 0.0  ;;  %v5830_v49 = vadd.f32 %v20339_v31, %v5470_v34  ;;  %5267 = vmatmul.mubr.bf16.gmra.mrb[12].mxu0 %v20264_v23 }
 0x4eb   : > { %22771 = vst [vmem:[#allocation76_spill] sm:$0xff] %v20409_v42  ;;  %v6084_v7 = vrot.slane %v5895_v15, 1  ;;  %v5901_v53 = vmax.f32 %v5829_v28, 0.0  ;;  %5496 = vmatpush1.bf16.msra.mxu0 %v17543_v30  ;;  %5276 = vmatprep.mubr.bf16.mxu0 %v22617_v51 }
 0x4ec   : > { %v6086_v40 = vrot.slane %v5896_v10, 1  ;;  %v5902_v45 = vmax.f32 %v5830_v49, 0.0  ;;  %5497 = vmatprep.subr.bf16.mxu0 %v17548_v11  ;;  %v17549_v11 = vld [vmem:[#allocation3 + $0xa90] ss:$24 sps:$4 sm:$0xff]  }
 0x4ed   : > { %v6096_v39 = vrot.slane %v5901_v53, 1  ;;  %v6085_v14 = vsel %vm4339_vm1, %v6072_v44, %v6084_v7 }
 0x4ee   : > { %v6098_v50 = vrot.slane %v5902_v45, 1  ;;  %v5474_v38 = vpop.f32.mrb[20].mxu1  ;;  %v20415_v41 = vmax.f32 %v5889_v36, %v6085_v14  ;;  %v6087_v59 = vsel %vm4339_vm1, %v6074_v52, %v6086_v40 }
 0x4ef   : > { %v5835_v19 = vadd.f32 %v20336_v56, %v5474_v38  ;;  %v5476_v62 = vpop.f32.mrb[21].mxu1  ;;  %v6097_v21 = vsel %vm4339_vm1, %v6084_v7, %v6096_v39  ;;  %v20420_v28 = vmax.f32 %v5890_v4, %v6087_v59  ;;  %5498 = vmatpush1.bf16.msra.mxu0 %v17546_v18  ;;  %v17554_v38 = vld [vmem:[#allocation3 + $0xac4] ss:$24 sps:$4 sm:$0xff]  }
 0x4f0   : > { %22772 = vst [vmem:[#allocation77_spill] sm:$0xff] %v20415_v41  ;;  %v5836_v30 = vadd.f32 %v20339_v31, %v5476_v62  ;;  %v5478_v34 = vpop.f32.mrb[22].mxu1  ;;  %v20423_v49 = vmax.f32 %v5895_v15, %v6097_v21  ;;  %v6099_v44 = vsel %vm4339_vm1, %v6086_v40, %v6098_v50  ;;  %5499 = vmatprep.subr.bf16.mxu0 %v17551_v22  ;;  %v17557_v22 = vld [vmem:[#allocation3 + $0xaf4] ss:$24 sps:$4 sm:$0xff]  }
 0x4f1   : > { %v5907_v36 = vmax.f32 %v5835_v19, 0.0  ;;  %v20427_v14 = vadd.f32 %v20336_v56, %v5478_v34  ;;  %v5480_v52 = vpop.f32.mrb[23].mxu1  ;;  %v20429_v25 = vmax.f32 %v5896_v10, %v6099_v44  ;;  %v17552_v56 = vld [vmem:[#allocation3 + $0xac0] ss:$24 sps:$4 sm:$0xff]  }
 0x4f2   : > { %22773 = vst [vmem:[#allocation78_spill] sm:$0xff] %v20423_v49  ;;  %v5908_v4 = vmax.f32 %v5836_v30, 0.0  ;;  %v20432_v18 = vadd.f32 %v20339_v31, %v5480_v52  ;;  %5277 = vmatmul.mubr.bf16.gmra.mrb[16].mxu0 %v20278_v35  ;;  %v17560_v52 = vld [vmem:[#allocation3 + $0xb24] ss:$24 sps:$4 sm:$0xff]  }
 0x4f3   : > { %v6108_v7 = vrot.slane %v5907_v36, 1  ;;  %v22620_v59 = vmax.f32 %v20427_v14, 0.0  ;;  %5500 = vmatpush1.bf16.msra.mxu0 %v17549_v11  ;;  %5286 = vmatprep.mubr.bf16.mxu0 %v22617_v51  ;;  %v17555_v11 = vld [vmem:[#allocation3 + $0xaf0] ss:$24 sps:$4 sm:$0xff]  }
 0x4f4   : > { %v6110_v15 = vrot.slane %v5908_v4, 1  ;;  %v22619_v40 = vmax.f32 %v20432_v18, 0.0  ;;  %5501 = vmatprep.subr.bf16.mxu0 %v17554_v38 }
 0x4f5   : > { %v20440_v10 = vrot.slane %v22620_v59, 1  ;;  %v6109_v31 = vsel %vm4339_vm1, %v6096_v39, %v6108_v7 }
 0x4f6   : > { %v20445_v19 = vrot.slane %v22619_v40, 1  ;;  %v20447_v62 = vmax.f32 %v5901_v53, %v6109_v31  ;;  %v6111_v21 = vsel %vm4339_vm1, %v6098_v50, %v6110_v15  ;;  %v17558_v53 = vld [vmem:[#allocation3 + $0xb20] ss:$24 sps:$4 sm:$0xff]   ;;  %v17561_v50 = vld [vmem:[#allocation3 + $0xb50] ss:$24 sps:$4 sm:$0xff]  }
 0x4f7   : > { %v6121_v30 = vsel %vm4339_vm1, %v6108_v7, %v20440_v10  ;;  %v20452_v34 = vmax.f32 %v5902_v45, %v6111_v21  ;;  %5502 = vmatpush1.bf16.msra.mxu0 %v17552_v56  ;;  %v17563_v45 = vld [vmem:[#allocation3 + $0xb54] ss:$24 sps:$4 sm:$0xff]   ;;  %v17564_v7 = vld [vmem:[#allocation3 + $0xb80] ss:$24 sps:$4 sm:$0xff]   ;;  %v17567_v56 = vld [vmem:[#allocation3 + $0xbb0] ss:$24 sps:$4 sm:$0xff]  }
 0x4f8   : > { %22774 = vst [vmem:[#allocation79_spill] sm:$0xff] %v20447_v62  ;;  %v20454_v44 = vmax.f32 %v5907_v36, %v6121_v30  ;;  %v6123_v39 = vsel %vm4339_vm1, %v6110_v15, %v20445_v19  ;;  %5503 = vmatprep.subr.bf16.mxu0 %v17557_v22  ;;  %v17566_v36 = vld [vmem:[#allocation3 + $0xb84] ss:$24 sps:$4 sm:$0xff]   ;;  %v17569_v15 = vld [vmem:[#allocation3 + $0xbb4] ss:$24 sps:$4 sm:$0xff]  }
 0x4f9   : > { %v20458_v38 = vmax.f32 %v5908_v4, %v6123_v39  ;;  %v17572_v4 = vld [vmem:[#allocation3 + $0xbe4] ss:$24 sps:$4 sm:$0xff]   ;;  %v17570_v22 = vld [vmem:[#allocation3 + $0xbe0] ss:$24 sps:$4 sm:$0xff]   ;;  %v17575_v31 = vld [vmem:[#allocation3 + $0xc14] ss:$24 sps:$4 sm:$0xff]  }
 0x4fa   : > { %22775 = vst [vmem:[#allocation80_spill] sm:$0xff] %v20454_v44  ;;  %5287 = vmatmul.mubr.bf16.gmra.mrb[20].mxu0 %v20273_v20  ;;  %v17578_v21 = vld [vmem:[#allocation3 + $0xc44] ss:$24 sps:$4 sm:$0xff]   ;;  %v17576_v30 = vld [vmem:[#allocation3 + $0xc40] ss:$24 sps:$4 sm:$0xff]  }
 0x4fb   : > { %5504 = vmatpush1.bf16.msra.mxu0 %v17555_v11  ;;  %5515 = vmatprep.mubr.bf16.mxu0 %v20128_v33  ;;  %v17573_v33 = vld [vmem:[#allocation3 + $0xc10] ss:$24 sps:$4 sm:$0xff]   ;;  %v17581_v11 = vld [vmem:[#allocation3 + $0xc74] ss:$24 sps:$4 sm:$0xff]  }
 0x4fc   : > { %5505 = vmatprep.subr.bf16.mxu0 %v17560_v52  ;;  %v17579_v39 = vld [vmem:[#allocation3 + $0xc70] ss:$24 sps:$4 sm:$0xff]   ;;  %v17584_v52 = vld [vmem:[#allocation3 + $0xca4] ss:$24 sps:$4 sm:$0xff]  }
 0x4ff   : > { %5506 = vmatpush1.bf16.msra.mxu0 %v17558_v53  ;;  %v17582_v53 = vld [vmem:[#allocation3 + $0xca0] ss:$24 sps:$4 sm:$0xff]  }
 0x500   : > { %5507 = vmatprep.subr.bf16.mxu0 %v17563_v45  ;;  %v17587_v45 = vld [vmem:[#allocation3 + $0xcd4] ss:$24 sps:$4 sm:$0xff]  }
 0x503   : > { %5508 = vmatpush1.bf16.msra.mxu0 %v17561_v50  ;;  %v17588_v50 = vld [vmem:[#allocation3 + $0xd00] ss:$24 sps:$4 sm:$0xff]  }
 0x504   : > { %5509 = vmatprep.subr.bf16.mxu0 %v17566_v36  ;;  %v17593_v36 = vld [vmem:[#allocation3 + $0xd34] ss:$24 sps:$4 sm:$0xff]  }
 0x507   : > { %5510 = vmatpush1.bf16.msra.mxu0 %v17564_v7  ;;  %v17594_v7 = vld [vmem:[#allocation3 + $0xd60] ss:$24 sps:$4 sm:$0xff]  }
 0x508   : > { %5511 = vmatprep.subr.bf16.mxu0 %v17569_v15 }
 0x50b   : > { %5512 = vmatpush1.bf16.msra.mxu0 %v17567_v56 }
 0x50c   : > { %5513 = vmatprep.subr.bf16.mxu0 %v17572_v4 }
 0x50f   : > { %5514 = vmatpush1.bf16.msra.mxu0 %v17570_v22 }
 0x510   : > { %5576 = vmatprep.subr.bf16.mxu0 %v17575_v31 }
 0x512   : > { %5516 = vmatmul.mubr.bf16.vlgmr.msra.gmra.mrb[24].mxu0 %v20136_v0  ;;  %v17585_v0 = vld [vmem:[#allocation3 + $0xcd0] ss:$24 sps:$4 sm:$0xff]  }
 0x513   : > { %5525 = vmatprep.mubr.bf16.mxu0 %v20141_v48  ;;  %5577 = vmatpush1.bf16.msra.mxu0 %v17573_v33  ;;  %v17590_v48 = vld [vmem:[#allocation3 + $0xd04] ss:$24 sps:$4 sm:$0xff]  }
 0x514   : > { %5578 = vmatprep.subr.bf16.mxu0 %v17578_v21 }
 0x517   : > { %5579 = vmatpush1.bf16.msra.mxu0 %v17576_v30 }
 0x518   : > { %5580 = vmatprep.subr.bf16.mxu0 %v17581_v11 }
 0x51a   : > { %5526 = vmatmul.mubr.bf16.gmra.mrb[28].mxu0 %v20150_v46  ;;  %v17591_v46 = vld [vmem:[#allocation3 + $0xd30] ss:$24 sps:$4 sm:$0xff]  }
 0x51b   : > { %5535 = vmatprep.mubr.bf16.mxu0 %v20153_v8  ;;  %5581 = vmatpush1.bf16.msra.mxu0 %v17579_v39  ;;  %v17596_v8 = vld [vmem:[#allocation3 + $0xd64] ss:$24 sps:$4 sm:$0xff]  }
 0x51c   : > { %5582 = vmatprep.subr.bf16.mxu0 %v17584_v52 }
 0x51f   : > { %5583 = vmatpush1.bf16.msra.mxu0 %v17582_v53 }
 0x520   : > { %5584 = vmatprep.subr.bf16.mxu0 %v17587_v45 }
 0x522   : > { %5536 = vmatmul.mubr.bf16.gmra.mrb[32].mxu0 %v20168_v24  ;;  %v20486_v24 = vsub.s32 0, %v20323_v32 }
 0x523   : > { %5545 = vmatprep.mubr.bf16.mxu0 %v20171_v2  ;;  %5585 = vmatpush1.bf16.msra.mxu0 %v17585_v0  ;;  %v20489_v2 = vsub.s32 1, %v20323_v32 }
 0x524   : > { %5586 = vmatprep.subr.bf16.mxu0 %v17590_v48  ;;  %22776 = vst [vmem:[#allocation81_spill] sm:$0xff] %v20486_v24 }
 0x525   : > { %22777 = vst [vmem:[#allocation82_spill] sm:$0xff] %v20489_v2 }
 0x527   : > { %5587 = vmatpush1.bf16.msra.mxu0 %v17588_v50 }
 0x528   : > { %5588 = vmatprep.subr.bf16.mxu0 %v17593_v36 }
 0x52a   : > { %5546 = vmatmul.mubr.bf16.gmra.mrb[36].mxu0 %v20188_v57  ;;  %v20497_v57 = vrot.slane %v20330_v27, %v20489_v2 }
 0x52b   : > { %5555 = vmatprep.mubr.bf16.mxu0 %v20192_v26  ;;  %5589 = vmatpush1.bf16.msra.mxu0 %v17591_v46 }
 0x52c   : > { %5590 = vmatprep.subr.bf16.mxu0 %v17596_v8 }
 0x52f   : > { %5591 = vmatpush1.bf16.msra.mxu0 %v17594_v7 }
 0x532   : > { %5556 = vmatmul.mubr.bf16.gmra.mrb[40].mxu0 %v20209_v29 }
 0x533   : > { %5565 = vmatprep.mubr.bf16.mxu0 %v20185_v37  ;;  %v20493_v37 = vrot.slane %v20330_v27, %v20486_v24 }
 0x53a   : > { %5566 = vmatmul.mubr.bf16.gmra.mrb[44].mxu0 %v20200_v47 }
 0x53b   : > { %5608 = vmatprep.mubr.bf16.mxu0 %v22617_v51 }
 0x542   : > { %5609 = vmatmul.mubr.bf16.vlgmr.msra.gmra.mrb[24].mxu0 %v20234_v1 }
 0x543   : > { %5618 = vmatprep.mubr.bf16.mxu0 %v22617_v51 }
 0x54a   : > { %5619 = vmatmul.mubr.bf16.gmra.mrb[28].mxu0 %v20242_v6 }
 0x54b   : > { %5628 = vmatprep.mubr.bf16.mxu0 %v22617_v51 }
 0x552   : > { %5629 = vmatmul.mubr.bf16.gmra.mrb[32].mxu0 %v20253_v3 }
 0x553   : > { %5638 = vmatprep.mubr.bf16.mxu0 %v22617_v51 }
 0x55a   : > { %5639 = vmatmul.mubr.bf16.gmra.mrb[36].mxu0 %v20264_v23 }
 0x55b   : > { %5648 = vmatprep.mubr.bf16.mxu0 %v22617_v51 }
 0x562   : > { %5649 = vmatmul.mubr.bf16.gmra.mrb[40].mxu0 %v20278_v35 }
 0x563   : > { %5658 = vmatprep.mubr.bf16.mxu0 %v22617_v51 }
 0x56a   : > { %5659 = vmatmul.mubr.bf16.gmra.mrb[44].mxu0 %v20273_v20 }
 0x5a5   : > { %v5238_v26 = vpop.f32.mrb[0].mxu0 }
 0x5a6   : > { %v5773_v47 = vadd.f32 %v20493_v37, %v5238_v26  ;;  %v5240_v29 = vpop.f32.mrb[1].mxu0 }
 0x5a7   : > { %v5774_v1 = vadd.f32 %v20497_v57, %v5240_v29  ;;  %v5242_v6 = vpop.f32.mrb[2].mxu0 }
 0x5a8   : > { %v5845_v3 = vmax.f32 %v5773_v47, 0.0  ;;  %v5779_v23 = vadd.f32 %v20493_v37, %v5242_v6  ;;  %v5244_v20 = vpop.f32.mrb[3].mxu0 }
 0x5a9   : > { %v5846_v35 = vmax.f32 %v5774_v1, 0.0  ;;  %v5780_v15 = vadd.f32 %v20497_v57, %v5244_v20 }
 0x5aa   : > { %v5851_v56 = vmax.f32 %v5779_v23, 0.0  ;;  %v5990_v22 = vrot.slane %v5845_v3, 1 }
 0x5ab   : > { %v5852_v4 = vmax.f32 %v5780_v15, 0.0  ;;  %v5993_v27 = vrot.slane %v5846_v35, 1 }
 0x5ac   : > { %v5991_v31 = vrot.slane %v5851_v56, 1 }
 0x5ad   : > { %v5994_v33 = vrot.slane %v5852_v4, 1  ;;  %v5248_v21 = vpop.f32.mrb[4].mxu0 }
 0x5ae   : > { %v5785_v30 = vadd.f32 %v20493_v37, %v5248_v21  ;;  %v5250_v11 = vpop.f32.mrb[5].mxu0  ;;  %v5992_v39 = vsel %vm4339_vm1, %v5990_v22, %v5991_v31 }
 0x5af   : > { %v5786_v52 = vadd.f32 %v20497_v57, %v5250_v11  ;;  %v5252_v53 = vpop.f32.mrb[6].mxu0  ;;  %v5995_v45 = vsel %vm4339_vm1, %v5993_v27, %v5994_v33  ;;  %v20507_v0 = vmax.f32 %v5845_v3, %v5992_v39 }
 0x5b0   : > { %v5857_v48 = vmax.f32 %v5785_v30, 0.0  ;;  %v5791_v50 = vadd.f32 %v20493_v37, %v5252_v53  ;;  %v5254_v36 = vpop.f32.mrb[7].mxu0  ;;  %v20510_v46 = vmax.f32 %v5846_v35, %v5995_v45 }
 0x5b1   : > { %v5858_v8 = vmax.f32 %v5786_v52, 0.0  ;;  %v5792_v7 = vadd.f32 %v20497_v57, %v5254_v36 }
 0x5b2   : > { %v6008_v26 = vrot.slane %v5857_v48, 1  ;;  %v5863_v47 = vmax.f32 %v5791_v50, 0.0  ;;  %v16685_v29 = vpack.i.bf16 %v20351_v5, %v20510_v46 }
 0x5b3   : > { %v6010_v1 = vrot.slane %v5858_v8, 1  ;;  %v5864_v6 = vmax.f32 %v5792_v7, 0.0 }
 0x5b4   : > { %v6020_v23 = vrot.slane %v5863_v47, 1  ;;  %16686 = vrot.lane.b32.xlu0 %v16685_v29, %s19189_s7  ;;  %v6009_v3 = vsel %vm4339_vm1, %v5991_v31, %v6008_v26 }
 0x5b5   : > { %v6022_v20 = vrot.slane %v5864_v6, 1  ;;  %v5258_v15 = vpop.f32.mrb[8].mxu0  ;;  %v20517_v35 = vmax.f32 %v5851_v56, %v6009_v3  ;;  %v6011_v22 = vsel %vm4339_vm1, %v5994_v33, %v6010_v1 }
 0x5b6   : > { %v5797_v27 = vadd.f32 %v20493_v37, %v5258_v15  ;;  %v5260_v21 = vpop.f32.mrb[9].mxu0  ;;  %v20521_v30 = vmax.f32 %v5852_v4, %v6011_v22  ;;  %v6021_v11 = vsel %vm4339_vm1, %v6008_v26, %v6020_v23 }
 0x5b7   : > { %v5798_v39 = vadd.f32 %v20497_v57, %v5260_v21  ;;  %v5262_v52 = vpop.f32.mrb[10].mxu0  ;;  %v16690_v53 = vpack.i.bf16 %v20517_v35, %v20507_v0  ;;  %v6023_v31 = vsel %vm4339_vm1, %v6010_v1, %v6022_v20  ;;  %v20528_v45 = vmax.f32 %v5857_v48, %v6021_v11 }
 0x5b8   : > { %v5869_v56 = vmax.f32 %v5797_v27, 0.0  ;;  %v5803_v33 = vadd.f32 %v20493_v37, %v5262_v52  ;;  %v5264_v50 = vpop.f32.mrb[11].mxu0  ;;  %v16695_v4 = vpack.i.bf16 %v20361_v13, %v20521_v30  ;;  %v20533_v36 = vmax.f32 %v5858_v8, %v6023_v31 }
 0x5b9   : > { %v5870_v7 = vmax.f32 %v5798_v39, 0.0  ;;  %v5804_v26 = vadd.f32 %v20497_v57, %v5264_v50  ;;  %16691 = vrot.lane.b32.xlu1 %v16690_v53, %s19189_s7 }
 0x5ba   : > { %v6032_v29 = vrot.slane %v5869_v56, 1  ;;  %v5875_v3 = vmax.f32 %v5803_v33, 0.0  ;;  %16696 = vrot.lane.b32.xlu0 %v16695_v4, %s19189_s7  ;;  %v16700_v48 = vpack.i.bf16 %v20369_v43, %v20533_v36 }
 0x5bb   : > { %v6034_v1 = vrot.slane %v5870_v7, 1  ;;  %v5876_v15 = vmax.f32 %v5804_v26, 0.0 }
 0x5bc   : > { %v6044_v22 = vrot.slane %v5875_v3, 1  ;;  %v6033_v27 = vsel %vm4339_vm1, %v6020_v23, %v6032_v29 }
 0x5bd   : > { %v6046_v21 = vrot.slane %v5876_v15, 1  ;;  %16701 = vrot.lane.b32.xlu1 %v16700_v48, %s19189_s7  ;;  %v5268_v8 = vpop.f32.mrb[12].mxu0  ;;  %v20542_v11 = vmax.f32 %v5863_v47, %v6033_v27  ;;  %v6035_v39 = vsel %vm4339_vm1, %v6022_v20, %v6034_v1 }
 0x5be   : > { %v5809_v52 = vadd.f32 %v20493_v37, %v5268_v8  ;;  %v5270_v53 = vpop.f32.mrb[13].mxu0  ;;  %v20546_v31 = vmax.f32 %v5864_v6, %v6035_v39  ;;  %v6045_v33 = vsel %vm4339_vm1, %v6032_v29, %v6044_v22 }
 0x5bf   : > { %v5810_v50 = vadd.f32 %v20497_v57, %v5270_v53  ;;  %v5272_v4 = vpop.f32.mrb[14].mxu0  ;;  %v16705_v23 = vpack.i.bf16 %v20542_v11, %v20528_v45  ;;  %v6047_v26 = vsel %vm4339_vm1, %v6034_v1, %v6046_v21  ;;  %v20553_v48 = vmax.f32 %v5869_v56, %v6045_v33 }
 0x5c0   : > { %v5881_v47 = vmax.f32 %v5809_v52, 0.0  ;;  %v5815_v20 = vadd.f32 %v20493_v37, %v5272_v4  ;;  %v5274_v27 = vpop.f32.mrb[15].mxu0  ;;  %v16710_v6 = vpack.i.bf16 %v20379_v12, %v20546_v31  ;;  %v20558_v8 = vmax.f32 %v5870_v7, %v6047_v26 }
 0x5c1   : > { %v5882_v29 = vmax.f32 %v5810_v50, 0.0  ;;  %v5816_v39 = vadd.f32 %v20497_v57, %v5274_v27  ;;  %16706 = vrot.lane.b32.xlu1 %v16705_v23, %s19189_s7 }
 0x5c2   : > { %v6056_v53 = vrot.slane %v5881_v47, 1  ;;  %v5887_v51 = vmax.f32 %v5815_v20, 0.0  ;;  %16711 = vrot.lane.b32.xlu0 %v16710_v6, %s19189_s7  ;;  %v16715_v33 = vpack.i.bf16 %v20387_v55, %v20558_v8 }
 0x5c3   : > { %v6058_v56 = vrot.slane %v5882_v29, 1  ;;  %v5888_v1 = vmax.f32 %v5816_v39, 0.0 }
 0x5c4   : > { %v6068_v52 = vrot.slane %v5887_v51, 1  ;;  %v6057_v4 = vsel %vm4339_vm1, %v6044_v22, %v6056_v53 }
 0x5c5   : > { %v6070_v40 = vrot.slane %v5888_v1, 1  ;;  %v5278_v7 = vpop.f32.mrb[16].mxu0  ;;  %v20566_v26 = vmax.f32 %v5875_v3, %v6057_v4  ;;  %v6059_v50 = vsel %vm4339_vm1, %v6046_v21, %v6058_v56 }
 0x5c6   : > { %v5821_v23 = vadd.f32 %v20493_v37, %v5278_v7  ;;  %16716 = vrot.lane.b32.xlu0 %v16715_v33, %s19189_s7  ;;  %v5280_v20 = vpop.f32.mrb[17].mxu0  ;;  %v20571_v27 = vmax.f32 %v5876_v15, %v6059_v50  ;;  %v6069_v6 = vsel %vm4339_vm1, %v6056_v53, %v6068_v52 }
 0x5c7   : > { %v5822_v39 = vadd.f32 %v20497_v57, %v5280_v20  ;;  %v5282_v59 = vpop.f32.mrb[18].mxu0  ;;  %v16720_v22 = vpack.i.bf16 %v20566_v26, %v20553_v48  ;;  %v6071_v3 = vsel %vm4339_vm1, %v6058_v56, %v6070_v40  ;;  %v20578_v4 = vmax.f32 %v5881_v47, %v6069_v6 }
 0x5c8   : > { %v5893_v21 = vmax.f32 %v5821_v23, 0.0  ;;  %v5827_v7 = vadd.f32 %v20493_v37, %v5282_v59  ;;  %v5284_v2 = vpop.f32.mrb[19].mxu0  ;;  %v16725_v15 = vpack.i.bf16 %v20397_v9, %v20571_v27  ;;  %v20583_v33 = vmax.f32 %v5882_v29, %v6071_v3 }
 0x5c9   : > { %v5894_v53 = vmax.f32 %v5822_v39, 0.0  ;;  %v5828_v50 = vadd.f32 %v20497_v57, %v5284_v2 }
 0x5ca   : > { %v6080_v20 = vrot.slane %v5893_v21, 1  ;;  %v5899_v24 = vmax.f32 %v5827_v7, 0.0  ;;  %16721 = vrot.lane.b32.xlu0 %v16720_v22, %s19189_s7  ;;  %16726 = vrot.lane.b32.xlu1 %v16725_v15, %s19189_s7  ;;  %v16730_v59 = vpack.i.bf16 %v20405_v63, %v20583_v33 }
 0x5cb   : > { %v6082_v47 = vrot.slane %v5894_v53, 1  ;;  %v5900_v56 = vmax.f32 %v5828_v50, 0.0 }
 0x5cc   : > { %v6092_v23 = vrot.slane %v5899_v24, 1  ;;  %v6081_v6 = vsel %vm4339_vm1, %v6068_v52, %v6080_v20 }
 0x5cd   : > { %v6094_v9 = vrot.slane %v5900_v56, 1  ;;  %v5288_v29 = vpop.f32.mrb[20].mxu0  ;;  %v20591_v3 = vmax.f32 %v5887_v51, %v6081_v6  ;;  %v6083_v2 = vsel %vm4339_vm1, %v6070_v40, %v6082_v47 }
 0x5ce   : > { %v5833_v39 = vadd.f32 %v20493_v37, %v5288_v29  ;;  %16731 = vrot.lane.b32.xlu1 %v16730_v59, %s19189_s7  ;;  %v5290_v22 = vpop.f32.mrb[21].mxu0  ;;  %v20596_v7 = vmax.f32 %v5888_v1, %v6083_v2  ;;  %v6093_v15 = vsel %vm4339_vm1, %v6080_v20, %v6092_v23 }
 0x5cf   : > { %v5834_v50 = vadd.f32 %v20497_v57, %v5290_v22  ;;  %v5292_v63 = vpop.f32.mrb[22].mxu0  ;;  %v16735_v52 = vpack.i.bf16 %v20591_v3, %v20578_v4  ;;  %v6095_v51 = vsel %vm4339_vm1, %v6082_v47, %v6094_v9  ;;  %v20603_v6 = vmax.f32 %v5893_v21, %v6093_v15 }
 0x5d0   : > { %v5905_v40 = vmax.f32 %v5833_v39, 0.0  ;;  %v5839_v29 = vadd.f32 %v20493_v37, %v5292_v63  ;;  %v5294_v55 = vpop.f32.mrb[23].mxu0  ;;  %v16740_v1 = vpack.i.bf16 %v20415_v41, %v20596_v7  ;;  %v20608_v59 = vmax.f32 %v5894_v53, %v6095_v51 }
 0x5d1   : > { %v5906_v20 = vmax.f32 %v5834_v50, 0.0  ;;  %v5840_v2 = vadd.f32 %v20497_v57, %v5294_v55 }
 0x5d2   : > { %v6104_v22 = vrot.slane %v5905_v40, 1  ;;  %v5911_v12 = vmax.f32 %v5839_v29, 0.0  ;;  %16736 = vrot.lane.b32.xlu1 %v16735_v52, %s19189_s7  ;;  %16741 = vrot.lane.b32.xlu0 %v16740_v1, %s19189_s7  ;;  %v16745_v63 = vpack.i.bf16 %v20423_v49, %v20608_v59 }
 0x5d3   : > { %v6106_v21 = vrot.slane %v5906_v20, 1  ;;  %v5912_v47 = vmax.f32 %v5840_v2, 0.0 }
 0x5d4   : > { %v6116_v39 = vrot.slane %v5911_v12, 1  ;;  %v6105_v37 = vsel %vm4339_vm1, %v6092_v23, %v6104_v22 }
 0x5d5   : > { %v6118_v15 = vrot.slane %v5912_v47, 1  ;;  %v20616_v53 = vmax.f32 %v5899_v24, %v6105_v37  ;;  %v6107_v50 = vsel %vm4339_vm1, %v6094_v9, %v6106_v21  ;;  %v22780_v9 = vmax.f32 %v20427_v14, 0.0 }
 0x5d6   : > { %16746 = vrot.lane.b32.xlu0 %v16745_v63, %s19189_s7  ;;  %v20620_v55 = vmax.f32 %v5900_v56, %v6107_v50  ;;  %v6117_v57 = vsel %vm4339_vm1, %v6104_v22, %v6116_v39  ;;  %v20641_v2 = vmax.f32 %v5911_v12, %v6116_v39  ;;  %v5765_v12 = vsub.s32 5, %v20323_v32 }
 0x5d7   : > { %v16750_v52 = vpack.i.bf16 %v20616_v53, %v20603_v6  ;;  %v6119_v51 = vsel %vm4339_vm1, %v6106_v21, %v6118_v15  ;;  %v20626_v29 = vmax.f32 %v5905_v40, %v6117_v57  ;;  %v20628_v1 = vmax.f32 %v5912_v47, %v6118_v15 }
 0x5d8   : > { %v16755_v24 = vpack.i.bf16 %v20447_v62, %v20620_v55  ;;  %v20632_v23 = vmax.f32 %v5906_v20, %v6119_v51  ;;  %v20637_v56 = vmax.f32 %v22780_v9, %v20440_v10  ;;  %22782 = vst [vmem:[#allocation86_spill] sm:$0xff] %v20641_v2  ;;  %v5761_v10 = vsub.s32 4, %v20323_v32  ;;  %v18429_v20 = vld [vmem:[#allocation6] sm:$0x3f] }
 0x5d9   : > { %22778 = vst [vmem:[#allocation83_spill] sm:$0xff] %v20626_v29  ;;  %v16770_v14 = vpack.i.bf16 %v20641_v2, %v20626_v29  ;;  %v20656_v47 = vrot.slane %v18429_v20, %v5765_v12 }
 0x5da   : > { %22779 = vst [vmem:[#allocation84_spill] sm:$0xff] %v20632_v23  ;;  %22781 = vst [vmem:[#allocation85_spill] sm:$0xff] %v20637_v56  ;;  %16751 = vrot.lane.b32.xlu0 %v16750_v52, %s19189_s7  ;;  %16756 = vrot.lane.b32.xlu1 %v16755_v24, %s19189_s7  ;;  %v16760_v40 = vpack.i.bf16 %v20637_v56, %v20628_v1  ;;  %v16765_v22 = vpack.i.bf16 %v20454_v44, %v20632_v23 }
 0x5db   : > { %v20654_v21 = vrot.slane %v18429_v20, %v5761_v10 }
 0x5de   : > { %16761 = vrot.lane.b32.xlu0 %v16760_v40, %s19189_s7  ;;  %16766 = vrot.lane.b32.xlu1 %v16765_v22, %s19189_s7 }
 0x5e2   : > { %16771 = vrot.lane.b32.xlu1 %v16770_v14, %s19189_s7 }
 0x615   : > { %v5610_v39 = vpop.f32.mrb[24].mxu0 }
 0x616   : > { %v5777_v63 = vadd.f32 %v20654_v21, %v5610_v39  ;;  %v5612_v37 = vpop.f32.mrb[25].mxu0 }
 0x617   : > { %v5778_v15 = vadd.f32 %v20656_v47, %v5612_v37  ;;  %v5614_v50 = vpop.f32.mrb[26].mxu0 }
 0x618   : > { %v5849_v57 = vmax.f32 %v5777_v63, 0.0  ;;  %v5783_v52 = vadd.f32 %v20654_v21, %v5614_v50  ;;  %v5616_v51 = vpop.f32.mrb[27].mxu0 }
 0x619   : > { %v5850_v24 = vmax.f32 %v5778_v15, 0.0  ;;  %v5784_v9 = vadd.f32 %v20656_v47, %v5616_v51 }
 0x61a   : > { %v5855_v40 = vmax.f32 %v5783_v52, 0.0  ;;  %v6002_v14 = vrot.slane %v5849_v57, 1 }
 0x61b   : > { %v5856_v22 = vmax.f32 %v5784_v9, 0.0  ;;  %v6005_v12 = vrot.slane %v5850_v24, 1 }
 0x61c   : > { %v6003_v10 = vrot.slane %v5855_v40, 1 }
 0x61d   : > { %v6006_v20 = vrot.slane %v5856_v22, 1  ;;  %v5620_v32 = vpop.f32.mrb[28].mxu0 }
 0x61e   : > { %v5789_v39 = vadd.f32 %v20654_v21, %v5620_v32  ;;  %v5622_v44 = vpop.f32.mrb[29].mxu0  ;;  %v6004_v37 = vsel %vm4339_vm1, %v6002_v14, %v6003_v10 }
 0x61f   : > { %v5790_v63 = vadd.f32 %v20656_v47, %v5622_v44  ;;  %v5624_v56 = vpop.f32.mrb[30].mxu0  ;;  %v20665_v50 = vmax.f32 %v5849_v57, %v6004_v37  ;;  %v6007_v15 = vsel %vm4339_vm1, %v6005_v12, %v6006_v20 }
 0x620   : > { %v5861_v51 = vmax.f32 %v5789_v39, 0.0  ;;  %v5795_v52 = vadd.f32 %v20654_v21, %v5624_v56  ;;  %v5626_v9 = vpop.f32.mrb[31].mxu0  ;;  %v20669_v62 = vmax.f32 %v5850_v24, %v6007_v15 }
 0x621   : > { %22783 = vst [vmem:[#allocation87_spill] sm:$0xff] %v20665_v50  ;;  %v5862_v49 = vmax.f32 %v5790_v63, 0.0  ;;  %v20672_v41 = vadd.f32 %v20656_v47, %v5626_v9  ;;  %v16775_v32 = vpack.i.bf16 %v20665_v50, %v20355_v16 }
 0x622   : > { %v6016_v14 = vrot.slane %v5861_v51, 1  ;;  %v5867_v44 = vmax.f32 %v5795_v52, 0.0 }
 0x623   : > { %v6018_v43 = vrot.slane %v5862_v49, 1  ;;  %v22637_v57 = vmax.f32 %v20672_v41, 0.0  ;;  %16776 = vrot.lane.b32.xlu0 %v16775_v32, %s19189_s7 }
 0x624   : > { %v6028_v12 = vrot.slane %v5867_v44, 1  ;;  %v6017_v56 = vsel %vm4339_vm1, %v6003_v10, %v6016_v14 }
 0x625   : > { %v6030_v24 = vrot.slane %v22637_v57, 1  ;;  %v5630_v39 = vpop.f32.mrb[32].mxu0  ;;  %v20681_v37 = vmax.f32 %v5855_v40, %v6017_v56  ;;  %v6019_v63 = vsel %vm4339_vm1, %v6006_v20, %v6018_v43 }
 0x626   : > { %v20685_v15 = vadd.f32 %v20654_v21, %v5630_v39  ;;  %v5632_v52 = vpop.f32.mrb[33].mxu0  ;;  %v20687_v9 = vpop.permute.xlu0 %16686  ;;  %v6029_v32 = vsel %vm4339_vm1, %v6016_v14, %v6028_v12  ;;  %v20690_v50 = vmax.f32 %v5856_v22, %v6019_v63  ;;  %v22786_v39 = vmax.f32 %v20432_v18, 0.0 }
 0x627   : > { %22784 = vst [vmem:[#allocation88_spill] sm:$0xff] %v20681_v37  ;;  %22785 = vst [vmem:[#allocation89_spill] sm:$0xff] %v20687_v9  ;;  %v20693_v10 = vadd.f32 %v20656_v47, %v5632_v52  ;;  %v16688_v40 = vunpack.i.l.bf16 %v20687_v9  ;;  %v5634_v56 = vpop.f32.mrb[34].mxu0  ;;  %v16780_v20 = vpack.i.bf16 %v20681_v37, %v20366_v60  ;;  %v20708_v52 = vmax.f32 %v5861_v51, %v6029_v32 }
 0x628   : > { %v20702_v16 = vmax.f32 %v22786_v39, %v20445_v19  ;;  %v5873_v14 = vmax.f32 %v20685_v15, 0.0  ;;  %v20706_v22 = vadd.f32 %v20654_v21, %v5634_v56  ;;  %v5636_v63 = vpop.f32.mrb[35].mxu0  ;;  %v22788_v13 = vunpack.i.h.bf16 %v20687_v9 }
 0x629   : > { %22787 = vst [vmem:[#allocation90_spill] sm:$0xff] %v20708_v52  ;;  %v22647_v57 = vmax.f32 %v20693_v10, 0.0  ;;  %v20715_v37 = vadd.f32 %v20656_v47, %v5636_v63  ;;  %16781 = vrot.lane.b32.xlu1 %v16780_v20, %s19189_s7  ;;  %v6031_v18 = vsel %vm4339_vm1, %v6018_v43, %v6030_v24  ;;  %v16785_v51 = vpack.i.bf16 %v20708_v52, %v20373_v58 }
 0x62a   : > { %v6490_v5 = vsel %vm6488_vm2, %v16688_v40, %v22788_v13  ;;  %v6040_v19 = vrot.slane %v5873_v14, 1  ;;  %v22649_v15 = vmax.f32 %v20706_v22, 0.0  ;;  %v22644_v32 = vmov 65535  }
 0x62b   : > { %v20724_v56 = vsel %vm6760_vm3, 4294967295, %v22644_v32  ;;  %v20728_v13 = vrot.slane %v22647_v57, 1  ;;  %v16692_v39 = vpop.permute.xlu1 %16691  ;;  %v6622_v20 = vmax.f32 %v20510_v46, %v6490_v5  ;;  %v20733_v63 = vmax.f32 %v5862_v49, %v6031_v18  ;;  %16786 = vrot.lane.b32.xlu0 %v16785_v51, %s19189_s7 }
 0x62c   : > { %22789 = vst [vmem:[#allocation91_spill] sm:$0xff] %v20724_v56  ;;  %v6052_v52 = vrot.slane %v22649_v15, 1  ;;  %v16694_v58 = vunpack.i.h.bf16 %v16692_v39  ;;  %v16693_v32 = vunpack.i.l.bf16 %v16692_v39  ;;  %v20738_v60 = vpop.permute.xlu0 %16696  ;;  %v6041_v57 = vsel %vm4339_vm1, %v6028_v12, %v6040_v19 }
 0x62d   : > { %22790 = vst [vmem:[#allocation92_spill] sm:$0xff] %v20738_v60  ;;  %v16698_v46 = vunpack.i.l.bf16 %v20738_v60  ;;  %v5640_v43 = vpop.f32.mrb[36].mxu0  ;;  %v20744_v49 = vmax.f32 %v5867_v44, %v6041_v57  ;;  %v20753_v12 = vsel %vm4339_vm1, %v6030_v24, %v20728_v13  ;;  %v22792_v29 = vunpack.i.h.bf16 %v20738_v60 }
 0x62e   : > { %v6489_v18 = vsel %vm6488_vm2, %v16693_v32, %v16688_v40  ;;  %v20748_v15 = vadd.f32 %v20654_v21, %v5640_v43  ;;  %v5642_v51 = vpop.f32.mrb[37].mxu0  ;;  %v6053_v39 = vsel %vm4339_vm1, %v6040_v19, %v6052_v52 }
 0x62f   : > { %22791 = vst [vmem:[#allocation93_spill] sm:$0xff] %v20744_v49  ;;  %v6621_v9 = vmax.f32 %v20507_v0, %v6489_v18  ;;  %v6494_v5 = vsel %vm6488_vm2, %v16694_v58, %v16698_v46  ;;  %v6495_v44 = vsel %vm6488_vm2, %v16698_v46, %v22792_v29  ;;  %v20761_v57 = vadd.f32 %v20656_v47, %v5642_v51  ;;  %v5644_v40 = vpop.f32.mrb[38].mxu0  ;;  %v20763_v32 = vpop.permute.xlu1 %16701 }
 0x630   : > { %22793 = vst [vmem:[#allocation94_spill] sm:$0xff] %v20763_v32  ;;  %v6627_v19 = vmax.f32 %v20517_v35, %v6494_v5  ;;  %v5885_v43 = vmax.f32 %v20748_v15, 0.0  ;;  %v20768_v24 = vadd.f32 %v20654_v21, %v5644_v40  ;;  %v5646_v58 = vpop.f32.mrb[39].mxu0  ;;  %v16703_v29 = vunpack.i.l.bf16 %v20763_v32 }
 0x631   : > { %v22655_v18 = vmax.f32 %v20761_v57, 0.0  ;;  %v20774_v46 = vadd.f32 %v20656_v47, %v5646_v58  ;;  %v16790_v51 = vpack.i.bf16 %v20744_v49, %v20384_v54  ;;  %v20779_v15 = vmax.f32 %v5873_v14, %v6053_v39 }
 0x632   : > { %v6064_v60 = vrot.slane %v5885_v43, 1  ;;  %v6628_v5 = vmax.f32 %v20521_v30, %v6495_v44  ;;  %v22795_v40 = vmax.f32 %v20715_v37, 0.0  ;;  %v22796_v58 = vunpack.i.h.bf16 %v20763_v32 }
 0x633   : > { %22794 = vst [vmem:[#allocation95_spill] sm:$0xff] %v20779_v15  ;;  %v20788_v2 = vrot.slane %v22655_v18, 1  ;;  %16791 = vrot.lane.b32.xlu1 %v16790_v51, %s19189_s7  ;;  %v16707_v49 = vpop.permute.xlu1 %16706  ;;  %v6693_v35 = vpack.c.bf16 %v6627_v19, %v6621_v9  ;;  %v22797_v14 = vmax.f32 %v20768_v24, 0.0  ;;  %v16795_v30 = vpack.i.bf16 %v20779_v15, %v20391_v61 }
 0x634   : > { %v20784_v0 = vrot.slane %v22795_v40, 1  ;;  %v6500_v56 = vsel %vm6488_vm2, %v16703_v29, %v22796_v58  ;;  %v16709_v44 = vunpack.i.h.bf16 %v16707_v49  ;;  %v16708_v40 = vunpack.i.l.bf16 %v16707_v49  ;;  %v20798_v54 = vpop.permute.xlu0 %16711 }
 0x635   : > { %v6076_v39 = vrot.slane %v22797_v14, 1  ;;  %22798 = vst [vmem:[#allocation96_spill] sm:$0xff] %v20798_v54  ;;  %v6694_v23 = vpack.c.bf16 %v6628_v5, %v6622_v20  ;;  %v22659_v32 = vunpack.i.h.bf16 %v20798_v54  ;;  %v16713_v58 = vunpack.i.l.bf16 %v20798_v54  ;;  %v5650_v51 = vpop.f32.mrb[40].mxu0  ;;  %16796 = vrot.lane.b32.xlu0 %v16795_v30, %s19189_s7 }
 0x636   : > { %v6499_v9 = vsel %vm6488_vm2, %v16708_v40, %v16703_v29  ;;  %v20806_v19 = vadd.f32 %v20654_v21, %v5650_v51  ;;  %v5652_v14 = vpop.f32.mrb[41].mxu0  ;;  %v6065_v49 = vsel %vm4339_vm1, %v6052_v52, %v6064_v60  ;;  %v22800_v52 = vmax.f32 %v20706_v22, 0.0 }
 0x637   : > { %v6077_v15 = vsel %vm4339_vm1, %v6064_v60, %v6076_v39  ;;  %v6633_v18 = vmax.f32 %v20528_v45, %v6499_v9  ;;  %6781 = vmatprep.subr.bf16.mxu1 %v6694_v23  ;;  %v6504_v20 = vsel %vm6488_vm2, %v16709_v44, %v16713_v58  ;;  %v6505_v5 = vsel %vm6488_vm2, %v16713_v58, %v22659_v32  ;;  %v5654_v29 = vpop.f32.mrb[42].mxu0 }
 0x638   : > { %v20816_v30 = vadd.f32 %v20656_v47, %v5652_v14  ;;  %v6639_v40 = vmax.f32 %v20542_v11, %v6504_v20  ;;  %v5897_v51 = vmax.f32 %v20806_v19, 0.0  ;;  %6782 = vmatpush1.bf16.msra.mxu1 %v6693_v35  ;;  %v20821_v60 = vadd.f32 %v20654_v21, %v5654_v29  ;;  %v5656_v45 = vpop.f32.mrb[43].mxu0  ;;  %v20823_v23 = vpop.permute.xlu0 %16716 }
 0x639   : > { %22799 = vst [vmem:[#allocation97_spill] sm:$0xff] %v20823_v23  ;;  %v20827_v44 = vmax.f32 %v22800_v52, %v6065_v49  ;;  %v20831_v9 = vadd.f32 %v20656_v47, %v5656_v45  ;;  %v22665_v11 = vunpack.i.h.bf16 %v20823_v23  ;;  %v16718_v19 = vunpack.i.l.bf16 %v20823_v23 }
 0x63a   : > { %v22661_v58 = vmax.f32 %v20816_v30, 0.0  ;;  %v6088_v35 = vrot.slane %v5897_v51, 1  ;;  %v22667_v14 = vmax.f32 %v20821_v60, 0.0  ;;  %v20838_v29 = vmax.f32 %v5885_v43, %v6077_v15 }
 0x63b   : > { %22801 = vst [vmem:[#allocation98_spill] sm:$0xff] %v20827_v44  ;;  %v16800_v20 = vpack.i.bf16 %v20827_v44, %v20402_v17  ;;  %v22803_v22 = vmax.f32 %v20774_v46, 0.0  ;;  %v6510_v32 = vsel %vm6488_vm2, %v16718_v19, %v22665_v11  ;;  %v6634_v15 = vmax.f32 %v20533_v36, %v6500_v56 }
 0x63c   : > { %22802 = vst [vmem:[#allocation99_spill] sm:$0xff] %v20838_v29  ;;  %v20846_v45 = vrot.slane %v22661_v58, 1  ;;  %v6100_v61 = vrot.slane %v22667_v14, 1  ;;  %v16805_v43 = vpack.i.bf16 %v20838_v29, %v20409_v42  ;;  %v16722_v58 = vpop.permute.xlu0 %16721  ;;  %v20859_v44 = vpop.permute.xlu1 %16726  ;;  %v6699_v54 = vpack.c.bf16 %v6639_v40, %v6633_v18 }
 0x63d   : > { %v20842_v49 = vrot.slane %v22803_v22, 1  ;;  %16801 = vrot.lane.b32.xlu1 %v16800_v20, %s19189_s7  ;;  %v6640_v22 = vmax.f32 %v20546_v31, %v6505_v5  ;;  %v16724_v52 = vunpack.i.h.bf16 %v16722_v58  ;;  %v16723_v17 = vunpack.i.l.bf16 %v16722_v58  ;;  %v5660_v11 = vpop.f32.mrb[44].mxu0 }
 0x63e   : > { %16806 = vrot.lane.b32.xlu0 %v16805_v43, %s19189_s7  ;;  %v16728_v20 = vunpack.i.l.bf16 %v20859_v44  ;;  %v5837_v29 = vadd.f32 %v20654_v21, %v5660_v11  ;;  %v5662_v42 = vpop.f32.mrb[45].mxu0  ;;  %v6089_v36 = vsel %vm4339_vm1, %v6076_v39, %v6088_v35  ;;  %v22804_v58 = vmax.f32 %v20768_v24, 0.0 }
 0x63f   : > { %v6700_v14 = vpack.c.bf16 %v6640_v22, %v6634_v15  ;;  %v6509_v31 = vsel %vm6488_vm2, %v16723_v17, %v16718_v19  ;;  %v20868_v56 = vadd.f32 %v20656_v47, %v5662_v42  ;;  %v5664_v5 = vpop.f32.mrb[46].mxu0  ;;  %v6101_v18 = vsel %vm4339_vm1, %v6088_v35, %v6100_v61 }
 0x640   : > { %v20872_v23 = vmax.f32 %v22804_v58, %v6089_v36  ;;  %v22805_v40 = vmax.f32 %v20831_v9, 0.0  ;;  %v6645_v11 = vmax.f32 %v20553_v48, %v6509_v31  ;;  %v6514_v39 = vsel %vm6488_vm2, %v16724_v52, %v16728_v20  ;;  %v5666_v19 = vpop.f32.mrb[47].mxu0  ;;  %v20881_v42 = vpop.permute.xlu1 %16731 }
 0x641   : > { %6783 = vmatprep.subr.bf16.mxu1 %v6700_v14  ;;  %v5909_v17 = vmax.f32 %v5837_v29, 0.0  ;;  %v22806_v15 = vunpack.i.h.bf16 %v20859_v44  ;;  %v6651_v22 = vmax.f32 %v20566_v26, %v6514_v39  ;;  %v5843_v35 = vadd.f32 %v20654_v21, %v5664_v5 }
 0x642   : > { %v20877_v43 = vrot.slane %v22805_v40, 1  ;;  %6784 = vmatpush1.bf16.msra.mxu1 %v6699_v54  ;;  %v5844_v36 = vadd.f32 %v20656_v47, %v5666_v19  ;;  %v5910_v14 = vmax.f32 %v20868_v56, 0.0  ;;  %v22670_v48 = vunpack.i.h.bf16 %v20881_v42 }
 0x643   : > { %v6515_v24 = vsel %vm6488_vm2, %v16728_v20, %v22806_v15  ;;  %v16733_v29 = vunpack.i.l.bf16 %v20881_v42  ;;  %v16810_v52 = vpack.i.bf16 %v20872_v23, %v20420_v28  ;;  %v6112_v31 = vrot.slane %v5909_v17, 1 }
 0x644   : > { %v5915_v58 = vmax.f32 %v5843_v35, 0.0  ;;  %v5916_v40 = vmax.f32 %v5844_v36, 0.0  ;;  %v20894_v20 = vmax.f32 %v5897_v51, %v6101_v18  ;;  %v6646_v26 = vmax.f32 %v20558_v8, %v6510_v32  ;;  %v16737_v47 = vpop.permute.xlu1 %16736  ;;  %v20902_v5 = vpop.permute.xlu0 %16741 }
 0x645   : > { %v6520_v54 = vsel %vm6488_vm2, %v16733_v29, %v22670_v48  ;;  %16811 = vrot.lane.b32.xlu1 %v16810_v52, %s19189_s7  ;;  %v6652_v21 = vmax.f32 %v20571_v27, %v6515_v24  ;;  %v6705_v39 = vpack.c.bf16 %v6651_v22, %v6645_v11  ;;  %v16739_v18 = vunpack.i.h.bf16 %v16737_v47 }
 0x646   : > { %v6124_v19 = vrot.slane %v5915_v58, 1  ;;  %v20904_v15 = vrot.slane %v5916_v40, 1  ;;  %v16815_v51 = vpack.i.bf16 %v20894_v20, %v20429_v25  ;;  %v16738_v36 = vunpack.i.l.bf16 %v16737_v47 }
 0x647   : > { %v6706_v35 = vpack.c.bf16 %v6652_v21, %v6646_v26  ;;  %v16744_v48 = vunpack.i.h.bf16 %v20902_v5  ;;  %v16743_v52 = vunpack.i.l.bf16 %v20902_v5  ;;  %v6113_v32 = vsel %vm4339_vm1, %v6100_v61, %v6112_v31 }
 0x648   : > { %v20910_v8 = vmax.f32 %v5915_v58, %v6124_v19  ;;  %v20913_v27 = vmax.f32 %v5916_v40, %v20904_v15  ;;  %16816 = vrot.lane.b32.xlu0 %v16815_v51, %s19189_s7  ;;  %v6125_v11 = vsel %vm4339_vm1, %v6112_v31, %v6124_v19  ;;  %v6519_v24 = vsel %vm6488_vm2, %v16738_v36, %v16733_v29  ;;  %v20923_v58 = vpop.permute.xlu0 %16746 }
 0x649   : > { %6785 = vmatprep.subr.bf16.mxu1 %v6706_v35  ;;  %v6524_v22 = vsel %vm6488_vm2, %v16739_v18, %v16743_v52  ;;  %v6525_v26 = vsel %vm6488_vm2, %v16743_v52, %v16744_v48  ;;  %v22807_v40 = vmax.f32 %v20821_v60, 0.0  ;;  %v6657_v47 = vmax.f32 %v20578_v4, %v6519_v24 }
 0x64a   : > { %v6663_v61 = vmax.f32 %v20591_v3, %v6524_v22  ;;  %6786 = vmatpush1.bf16.msra.mxu1 %v6705_v39  ;;  %v16749_v31 = vunpack.i.h.bf16 %v20923_v58  ;;  %v16748_v29 = vunpack.i.l.bf16 %v20923_v58  ;;  %v20935_v51 = vmax.f32 %v5909_v17, %v6125_v11 }
 0x64b   : > { %v20927_v21 = vmax.f32 %v22807_v40, %v6113_v32  ;;  %v6658_v18 = vmax.f32 %v20583_v33, %v6520_v54  ;;  %v6664_v60 = vmax.f32 %v20596_v7, %v6525_v26  ;;  %v16830_v3 = vpack.i.bf16 %v20910_v8, %v20702_v16 }
 0x64c   : > { %v6530_v4 = vsel %vm6488_vm2, %v16748_v29, %v16749_v31  ;;  %v6711_v39 = vpack.c.bf16 %v6663_v61, %v6657_v47  ;;  %v22808_v35 = vmax.f32 %v20672_v41, 0.0  ;;  %v16825_v33 = vpack.i.bf16 %v20935_v51, %v20458_v38  ;;  %v16752_v7 = vpop.permute.xlu0 %16751  ;;  %v20952_v54 = vpop.permute.xlu1 %16756 }
 0x64d   : > { %v16820_v19 = vpack.i.bf16 %v20927_v21, %v20452_v34  ;;  %v6712_v17 = vpack.c.bf16 %v6664_v60, %v6658_v18  ;;  %v6055_v52 = vsel %vm4339_vm1, %v20728_v13, %v20784_v0  ;;  %v6067_v32 = vsel %vm4339_vm1, %v20784_v0, %v20788_v2 }
 0x64e   : > { %v20947_v36 = vmax.f32 %v22808_v35, %v20753_v12  ;;  %v16754_v41 = vunpack.i.h.bf16 %v16752_v7  ;;  %v16753_v12 = vunpack.i.l.bf16 %v16752_v7  ;;  %v16759_v11 = vunpack.i.h.bf16 %v20952_v54  ;;  %16826 = vrot.lane.b32.xlu0 %v16825_v33, %s19189_s7 }
 0x64f   : > { %16821 = vrot.lane.b32.xlu1 %v16820_v19, %s19189_s7  ;;  %v16758_v24 = vunpack.i.l.bf16 %v20952_v54  ;;  %v6114_v22 = vrot.slane %v5910_v14, 1  ;;  %6787 = vmatprep.subr.bf16.mxu1 %v6712_v17  ;;  %v22809_v13 = vmax.f32 %v20693_v10, 0.0  ;;  %v22810_v0 = vmax.f32 %v20715_v37, 0.0 }
 0x650   : > { %v16840_v26 = vpack.i.bf16 %v20947_v36, %v20733_v63  ;;  %v6529_v61 = vsel %vm6488_vm2, %v16753_v12, %v16748_v29  ;;  %6788 = vmatpush1.bf16.msra.mxu1 %v6711_v39  ;;  %v6670_v60 = vmax.f32 %v20608_v59, %v6530_v4  ;;  %v20984_v37 = vpop.permute.xlu0 %16761  ;;  %v20986_v33 = vpop.permute.xlu1 %16766  ;;  %v22812_v12 = vmax.f32 %v20761_v57, 0.0 }
 0x651   : > { %v20969_v40 = vmax.f32 %v22809_v13, %v6055_v52  ;;  %v20973_v47 = vmax.f32 %v22810_v0, %v6067_v32  ;;  %v6534_v19 = vsel %vm6488_vm2, %v16754_v41, %v16758_v24  ;;  %v6535_v18 = vsel %vm6488_vm2, %v16758_v24, %v16759_v11 }
 0x652   : > { %v6669_v35 = vmax.f32 %v20603_v6, %v6529_v61  ;;  %v6675_v10 = vmax.f32 %v20616_v53, %v6534_v19  ;;  %v6676_v17 = vmax.f32 %v20620_v55, %v6535_v18  ;;  %v22676_v7 = vunpack.i.h.bf16 %v20984_v37 }
 0x653   : > { %16831 = vrot.lane.b32.xlu1 %v16830_v3, %s19189_s7  ;;  %v16845_v29 = vpack.i.bf16 %v20973_v47, %v20969_v40  ;;  %v16763_v39 = vunpack.i.l.bf16 %v20984_v37  ;;  %v16769_v59 = vunpack.i.h.bf16 %v20986_v33  ;;  %v16768_v6 = vunpack.i.l.bf16 %v20986_v33 }
 0x654   : > { %v22811_v53 = vpack.i.bf16 %v20690_v50, %v20669_v62  ;;  %v6718_v4 = vpack.c.bf16 %v6676_v17, %v6670_v60  ;;  %v6079_v3 = vsel %vm4339_vm1, %v20788_v2, %v20842_v49  ;;  %v6091_v55 = vsel %vm4339_vm1, %v20842_v49, %v20846_v45  ;;  %v22814_v49 = vld [vmem:[#allocation84_spill] sm:$0xff]  ;;  %v16772_v19 = vpop.permute.xlu1 %16771  ;;  %v22815_v60 = vld [vmem:[#allocation91_spill] sm:$0xff] }
 0x655   : > { %v6717_v52 = vpack.c.bf16 %v6675_v10, %v6669_v35  ;;  %v6545_v32 = vsel %vm6488_vm2, %v16763_v39, %v22676_v7  ;;  %v6540_v41 = vsel %vm6488_vm2, %v16768_v6, %v16769_v59  ;;  %v21013_v24 = vmax.f32 %v22812_v12, %v6079_v3  ;;  %v21066_v12 = vld [vmem:[#allocation8 + $0x8] sm:$0xff]  }
 0x656   : > { %16836 = vrot.lane.b32.xlu0 %v22811_v53, %s19189_s7  ;;  %v22813_v13 = vmax.f32 %v20774_v46, 0.0  ;;  %v6688_v0 = vmax.f32 %v20628_v1, %v6545_v32  ;;  %v6682_v61 = vmax.f32 %v22814_v49, %v6540_v41  ;;  %6789 = vmatprep.subr.bf16.mxu1 %v6718_v4  ;;  %v6103_v18 = vsel %vm4339_vm1, %v20846_v45, %v20877_v43  ;;  %v22819_v32 = vld [vmem:[#allocation83_spill] sm:$0xff] }
 0x657   : > { %16841 = vrot.lane.b32.xlu1 %v16840_v26, %s19189_s7  ;;  %v21027_v57 = vsel %vm4339_vm1, %v22815_v60, 0  ;;  %v16774_v35 = vunpack.i.h.bf16 %v16772_v19  ;;  %v16773_v46 = vunpack.i.l.bf16 %v16772_v19  ;;  %6790 = vmatpush1.bf16.msra.mxu1 %v6717_v52  ;;  %v6115_v1 = vsel %vm4339_vm1, %v20877_v43, %v6114_v22 }
 0x658   : > { %v21017_v2 = vmax.f32 %v22813_v13, %v6091_v55  ;;  %v22816_v26 = vmax.f32 %v20816_v30, 0.0  ;;  %v22817_v45 = vmax.f32 %v20831_v9, 0.0  ;;  %v6127_v4 = vsel %vm4339_vm1, %v6114_v22, %v20904_v15  ;;  %v21071_v13 = vld [vmem:[#allocation8 + $0x10] sm:$0xff]  }
 0x659   : > { %v6724_v3 = vpack.c.bf16 %v6688_v0, %v6682_v61  ;;  %v6544_v55 = vsel %vm6488_vm2, %v16774_v35, %v16763_v39  ;;  %v6539_v52 = vsel %vm6488_vm2, %v16773_v46, %v16768_v6  ;;  %v21048_v43 = vmax.f32 %v5910_v14, %v6127_v4  ;;  %v21061_v14 = vld [vmem:[#allocation8] sm:$0xff]  }
 0x65a   : > { %v16850_v10 = vpack.i.bf16 %v21017_v2, %v21013_v24  ;;  %16846 = vrot.lane.b32.xlu0 %v16845_v29, %s19189_s7  ;;  %v21036_v17 = vmax.f32 %v22816_v26, %v6103_v18  ;;  %v21040_v53 = vmax.f32 %v22817_v45, %v6115_v1  ;;  %v22818_v29 = vld [vmem:[#allocation86_spill] sm:$0xff]  ;;  %v6681_v41 = vmax.f32 %v22819_v32, %v6539_v52  ;;  %v22821_v18 = vld [vmem:[#allocation89_spill] sm:$0xff]  ;;  %v22823_v26 = vld [vmem:[#allocation92_spill] sm:$0xff] }
 0x65b   : > { %v6687_v30 = vmax.f32 %v22818_v29, %v6544_v55  ;;  %v6767_v15 = vand.u32 %v21027_v57, %v6724_v3  ;;  %v16860_v39 = vpack.i.bf16 %v20913_v27, %v21048_v43  ;;  %v22820_v6 = vmov 0   ;;  %v22825_v55 = vld [vmem:[#allocation63_spill] sm:$0xff]  ;;  %v22826_v29 = vld [vmem:[#allocation65_spill] sm:$0xff] }
 0x65c   : > { %16851 = vrot.lane.b32.xlu1 %v16850_v10, %s19189_s7  ;;  %v16855_v9 = vpack.i.bf16 %v21040_v53, %v21036_v17  ;;  %v22822_v60 = vunpack.i.h.bf16 %v22821_v18  ;;  %v22824_v45 = vunpack.i.h.bf16 %v22823_v26  ;;  %v22844_v7 = vunpack.i.h.bf16 %v20881_v42 }
 0x65d   : > { %v6723_v22 = vpack.c.bf16 %v6687_v30, %v6681_v41  ;;  %6791 = vmatprep.subr.bf16.mxu1 %v6767_v15  ;;  %v22827_v41 = vld [vmem:[#allocation64_spill] sm:$0xff]  ;;  %v22828_v15 = vld [vmem:[#allocation66_spill] sm:$0xff] }
 0x65e   : > { %16856 = vrot.lane.b32.xlu0 %v16855_v9, %s19189_s7 }
 0x65f   : > { %v6764_v56 = vand.u32 %v21027_v57, %v6723_v22 }
 0x660   : > { %16861 = vrot.lane.b32.xlu1 %v16860_v39, %s19189_s7 }
 0x661   : > { %6792 = vmatpush1.bf16.msra.mxu1 %v6764_v56 }
 0x664   : > { %14463 = vmatmul.mubr.msk.bf16.vlgmr.msra.gmra.mrb[24].mxu1 %vm6750_vm4, %v21061_v14 }
 0x665   : > { %6823 = vmatprep.mubr.bf16.mxu1 %v22820_v6 }
 0x66c   : > { %14464 = vmatmul.mubr.msk.bf16.gmra.mrb[28].mxu1 %vm6750_vm4, %v21066_v12 }
 0x66d   : > { %6833 = vmatprep.mubr.bf16.mxu1 %v22820_v6 }
 0x674   : > { %14465 = vmatmul.mubr.msk.bf16.gmra.mrb[32].mxu1 %vm6750_vm4, %v21071_v13 }
 0x675   : > { %6876 = vmatprep.mubr.bf16.mxu1 %v22820_v6 }
 0x695   : > { %v21076_v0 = vpop.permute.xlu0 %16776 }
 0x696   : > { %v22672_v49 = vunpack.i.h.bf16 %v21076_v0  ;;  %v16778_v61 = vunpack.i.l.bf16 %v21076_v0 }
 0x698   : > { %v6491_v35 = vsel %vm6488_vm2, %v22822_v60, %v16778_v61  ;;  %v6492_v46 = vsel %vm6488_vm2, %v16778_v61, %v22672_v49 }
 0x699   : > { %v6623_v52 = vmax.f32 %v22825_v55, %v6491_v35  ;;  %v6624_v9 = vmax.f32 %v22827_v41, %v6492_v46  ;;  %v22833_v41 = vld [vmem:[#allocation67_spill] sm:$0xff] }
 0x69b   : > { %v21080_v19 = vpop.permute.xlu1 %16781 }
 0x69c   : > { %v22675_v10 = vunpack.i.h.bf16 %v21080_v19  ;;  %v16783_v1 = vunpack.i.l.bf16 %v21080_v19 }
 0x69d   : > { %v21098_v32 = vpop.permute.xlu0 %16786 }
 0x69e   : > { %v6496_v4 = vsel %vm6488_vm2, %v22824_v45, %v16783_v1  ;;  %v6497_v3 = vsel %vm6488_vm2, %v16783_v1, %v22675_v10  ;;  %v22671_v61 = vunpack.i.h.bf16 %v21098_v32  ;;  %v16788_v18 = vunpack.i.l.bf16 %v21098_v32  ;;  %v22829_v1 = vld [vmem:[#allocation94_spill] sm:$0xff] }
 0x69f   : > { %v6629_v30 = vmax.f32 %v22826_v29, %v6496_v4  ;;  %v6630_v22 = vmax.f32 %v22828_v15, %v6497_v3  ;;  %v22830_v35 = vunpack.i.h.bf16 %v22829_v1  ;;  %v22831_v3 = vld [vmem:[#allocation96_spill] sm:$0xff]  ;;  %v22834_v15 = vld [vmem:[#allocation69_spill] sm:$0xff] }
 0x6a0   : > { %v6502_v46 = vsel %vm6488_vm2, %v16788_v18, %v22671_v61  ;;  %v22832_v55 = vunpack.i.h.bf16 %v22831_v3 }
 0x6a1   : > { %v6696_v39 = vpack.c.bf16 %v6630_v22, %v6624_v9  ;;  %v6695_v56 = vpack.c.bf16 %v6629_v30, %v6623_v52  ;;  %v6501_v26 = vsel %vm6488_vm2, %v22830_v35, %v16788_v18  ;;  %v22836_v18 = vld [vmem:[#allocation70_spill] sm:$0xff] }
 0x6a2   : > { %v6635_v9 = vmax.f32 %v22833_v41, %v6501_v26 }
 0x6a3   : > { %6844 = vmatprep.subr.bf16.mxu1 %v6696_v39  ;;  %v22835_v39 = vld [vmem:[#allocation68_spill] sm:$0xff] }
 0x6a4   : > { %6845 = vmatpush1.bf16.msra.mxu1 %v6695_v56  ;;  %v6636_v56 = vmax.f32 %v22835_v39, %v6502_v46  ;;  %v22841_v39 = vld [vmem:[#allocation73_spill] sm:$0xff] }
 0x6a5   : > { %v21104_v60 = vpop.permute.xlu1 %16791 }
 0x6a6   : > { %v22673_v45 = vunpack.i.h.bf16 %v21104_v60  ;;  %v16793_v4 = vunpack.i.l.bf16 %v21104_v60 }
 0x6a7   : > { %v21120_v30 = vpop.permute.xlu0 %16796 }
 0x6a8   : > { %v6506_v52 = vsel %vm6488_vm2, %v22832_v55, %v16793_v4  ;;  %v6507_v29 = vsel %vm6488_vm2, %v16793_v4, %v22673_v45  ;;  %v22674_v35 = vunpack.i.h.bf16 %v21120_v30  ;;  %v16798_v3 = vunpack.i.l.bf16 %v21120_v30  ;;  %v22837_v4 = vld [vmem:[#allocation97_spill] sm:$0xff] }
 0x6a9   : > { %v6641_v22 = vmax.f32 %v22834_v15, %v6506_v52  ;;  %v6642_v1 = vmax.f32 %v22836_v18, %v6507_v29  ;;  %v22838_v45 = vunpack.i.h.bf16 %v22837_v4  ;;  %v22842_v18 = vld [vmem:[#allocation72_spill] sm:$0xff] }
 0x6aa   : > { %v6512_v46 = vsel %vm6488_vm2, %v16798_v3, %v22674_v35 }
 0x6ab   : > { %v6702_v61 = vpack.c.bf16 %v6642_v1, %v6636_v56  ;;  %v6701_v55 = vpack.c.bf16 %v6641_v22, %v6635_v9  ;;  %v6511_v26 = vsel %vm6488_vm2, %v22838_v45, %v16798_v3  ;;  %v22839_v9 = vunpack.i.h.bf16 %v20859_v44  ;;  %v22840_v22 = vld [vmem:[#allocation71_spill] sm:$0xff]  ;;  %v22843_v3 = vld [vmem:[#allocation74_spill] sm:$0xff] }
 0x6ac   : > { %v6647_v45 = vmax.f32 %v22840_v22, %v6511_v26  ;;  %v6648_v1 = vmax.f32 %v22842_v18, %v6512_v46 }
 0x6ad   : > { %6846 = vmatprep.subr.bf16.mxu1 %v6702_v61 }
 0x6ae   : > { %6847 = vmatpush1.bf16.msra.mxu1 %v6701_v55 }
 0x6af   : > { %v21128_v49 = vpop.permute.xlu1 %16801 }
 0x6b0   : > { %v16804_v52 = vunpack.i.h.bf16 %v21128_v49  ;;  %v16803_v29 = vunpack.i.l.bf16 %v21128_v49  ;;  %v21138_v41 = vpop.permute.xlu0 %16806 }
 0x6b1   : > { %v16809_v4 = vunpack.i.h.bf16 %v21138_v41  ;;  %v16808_v35 = vunpack.i.l.bf16 %v21138_v41 }
 0x6b2   : > { %v6516_v61 = vsel %vm6488_vm2, %v22839_v9, %v16803_v29  ;;  %v6517_v15 = vsel %vm6488_vm2, %v16803_v29, %v16804_v52 }
 0x6b3   : > { %v6653_v56 = vmax.f32 %v22841_v39, %v6516_v61  ;;  %v6654_v55 = vmax.f32 %v22843_v3, %v6517_v15  ;;  %v6521_v29 = vsel %vm6488_vm2, %v22844_v7, %v16808_v35  ;;  %v6522_v26 = vsel %vm6488_vm2, %v16808_v35, %v16809_v4  ;;  %v22845_v7 = vld [vmem:[#allocation75_spill] sm:$0xff]  ;;  %v22847_v35 = vld [vmem:[#allocation76_spill] sm:$0xff] }
 0x6b4   : > { %v6659_v22 = vmax.f32 %v22845_v7, %v6521_v29  ;;  %v22848_v7 = vld [vmem:[#allocation78_spill] sm:$0xff] }
 0x6b5   : > { %v6708_v10 = vpack.c.bf16 %v6654_v55, %v6648_v1  ;;  %v6707_v44 = vpack.c.bf16 %v6653_v56, %v6647_v45  ;;  %v22846_v45 = vld [vmem:[#allocation77_spill] sm:$0xff]  ;;  %v6660_v56 = vmax.f32 %v22847_v35, %v6522_v26 }
 0x6b7   : > { %6848 = vmatprep.subr.bf16.mxu1 %v6708_v10  ;;  %v21152_v9 = vpop.permute.xlu1 %16811 }
 0x6b8   : > { %v16814_v46 = vunpack.i.h.bf16 %v21152_v9  ;;  %v16813_v61 = vunpack.i.l.bf16 %v21152_v9  ;;  %6849 = vmatpush1.bf16.msra.mxu1 %v6707_v44 }
 0x6ba   : > { %v6526_v15 = vsel %vm6488_vm2, %v16744_v48, %v16813_v61  ;;  %v6527_v10 = vsel %vm6488_vm2, %v16813_v61, %v16814_v46  ;;  %v21168_v42 = vpop.permute.xlu0 %16816 }
 0x6bb   : > { %v6665_v39 = vmax.f32 %v22846_v45, %v6526_v15  ;;  %v6666_v18 = vmax.f32 %v20420_v28, %v6527_v10  ;;  %v16819_v1 = vunpack.i.h.bf16 %v21168_v42  ;;  %v16818_v5 = vunpack.i.l.bf16 %v21168_v42  ;;  %v22849_v45 = vld [vmem:[#allocation79_spill] sm:$0xff] }
 0x6bd   : > { %v6714_v3 = vpack.c.bf16 %v6666_v18, %v6660_v56  ;;  %v6713_v48 = vpack.c.bf16 %v6665_v39, %v6659_v22  ;;  %v6531_v44 = vsel %vm6488_vm2, %v16749_v31, %v16818_v5  ;;  %v6532_v29 = vsel %vm6488_vm2, %v16818_v5, %v16819_v1 }
 0x6be   : > { %v6671_v22 = vmax.f32 %v22848_v7, %v6531_v44  ;;  %v6672_v56 = vmax.f32 %v20429_v25, %v6532_v29  ;;  %v22851_v29 = vld [vmem:[#allocation85_spill] sm:$0xff] }
 0x6bf   : > { %6850 = vmatprep.subr.bf16.mxu1 %v6714_v3 }
 0x6c0   : > { %6851 = vmatpush1.bf16.msra.mxu1 %v6713_v48  ;;  %v21186_v61 = vpop.permute.xlu0 %16826 }
 0x6c1   : > { %v21176_v55 = vpop.permute.xlu1 %16821  ;;  %v22677_v31 = vunpack.i.h.bf16 %v21186_v61  ;;  %v16828_v10 = vunpack.i.l.bf16 %v21186_v61 }
 0x6c2   : > { %v16824_v26 = vunpack.i.h.bf16 %v21176_v55  ;;  %v16823_v28 = vunpack.i.l.bf16 %v21176_v55  ;;  %v22865_v55 = vunpack.i.h.bf16 %v21186_v61 }
 0x6c3   : > { %v6541_v5 = vsel %vm6488_vm2, %v16769_v59, %v16828_v10  ;;  %v6542_v44 = vsel %vm6488_vm2, %v16828_v10, %v22677_v31  ;;  %v22852_v59 = vld [vmem:[#allocation80_spill] sm:$0xff] }
 0x6c4   : > { %v6536_v15 = vsel %vm6488_vm2, %v16759_v11, %v16823_v28  ;;  %v6537_v58 = vsel %vm6488_vm2, %v16823_v28, %v16824_v26  ;;  %v6683_v7 = vmax.f32 %v22852_v59, %v6541_v5  ;;  %v22857_v59 = vunpack.i.h.bf16 %v21104_v60 }
 0x6c5   : > { %v6677_v39 = vmax.f32 %v22849_v45, %v6536_v15  ;;  %v21198_v35 = vpop.permute.xlu1 %16831  ;;  %v6678_v54 = vmax.f32 %v20452_v34, %v6537_v58  ;;  %v22850_v15 = vunpack.i.h.bf16 %v20984_v37  ;;  %v6684_v45 = vmax.f32 %v20458_v38, %v6542_v44 }
 0x6c6   : > { %v16834_v11 = vunpack.i.h.bf16 %v21198_v35  ;;  %v16833_v18 = vunpack.i.l.bf16 %v21198_v35 }
 0x6c7   : > { %v6720_v48 = vpack.c.bf16 %v6678_v54, %v6672_v56  ;;  %v6719_v28 = vpack.c.bf16 %v6677_v39, %v6671_v22  ;;  %v22853_v54 = vunpack.i.h.bf16 %v21080_v19 }
 0x6c8   : > { %v16837_v3 = vpop.permute.xlu0 %16836  ;;  %v6546_v25 = vsel %vm6488_vm2, %v22850_v15, %v16833_v18  ;;  %v6547_v34 = vsel %vm6488_vm2, %v16833_v18, %v16834_v11 }
 0x6c9   : > { %v6689_v58 = vmax.f32 %v22851_v29, %v6546_v25  ;;  %v6690_v33 = vmax.f32 %v20702_v16, %v6547_v34  ;;  %6852 = vmatprep.subr.bf16.mxu1 %v6720_v48  ;;  %v16839_v22 = vunpack.i.h.bf16 %v16837_v3  ;;  %v16838_v10 = vunpack.i.l.bf16 %v16837_v3  ;;  %v16842_v39 = vpop.permute.xlu1 %16841  ;;  %v22855_v3 = vld [vmem:[#allocation88_spill] sm:$0xff] }
 0x6ca   : > { %6853 = vmatpush1.bf16.msra.mxu1 %v6719_v28  ;;  %v16844_v18 = vunpack.i.h.bf16 %v16842_v39  ;;  %v16843_v31 = vunpack.i.l.bf16 %v16842_v39  ;;  %v22854_v48 = vunpack.i.h.bf16 %v21076_v0  ;;  %v22858_v0 = vunpack.i.h.bf16 %v21098_v32  ;;  %v22859_v39 = vld [vmem:[#allocation93_spill] sm:$0xff] }
 0x6cb   : > { %v6725_v37 = vpack.c.bf16 %v6689_v58, %v6683_v7  ;;  %v6726_v56 = vpack.c.bf16 %v6690_v33, %v6684_v45  ;;  %v6498_v15 = vsel %vm6488_vm2, %v22853_v54, %v16839_v22  ;;  %v6632_v16 = vmax.f32 %v20690_v50, %v16839_v22  ;;  %v22856_v58 = vld [vmem:[#allocation87_spill] sm:$0xff] }
 0x6cc   : > { %v16847_v25 = vpop.permute.xlu0 %16846  ;;  %v6493_v5 = vsel %vm6488_vm2, %v22854_v48, %v16838_v10  ;;  %v6626_v28 = vmax.f32 %v20669_v62, %v16838_v10  ;;  %v6631_v44 = vmax.f32 %v22855_v3, %v6498_v15  ;;  %v6508_v50 = vsel %vm6488_vm2, %v22857_v59, %v16844_v18 }
 0x6cd   : > { %v6770_v38 = vand.u32 %v21027_v57, %v6725_v37  ;;  %v16849_v34 = vunpack.i.h.bf16 %v16847_v25  ;;  %v6773_v19 = vand.u32 %v21027_v57, %v6726_v56  ;;  %v6625_v33 = vmax.f32 %v22856_v58, %v6493_v5  ;;  %v22860_v56 = vld [vmem:[#allocation90_spill] sm:$0xff] }
 0x6ce   : > { %v16852_v29 = vpop.permute.xlu1 %16851  ;;  %v6503_v7 = vsel %vm6488_vm2, %v22858_v0, %v16843_v31  ;;  %v16848_v22 = vunpack.i.l.bf16 %v16847_v25  ;;  %v6644_v62 = vmax.f32 %v20947_v36, %v16844_v18  ;;  %v6638_v45 = vmax.f32 %v20733_v63, %v16843_v31 }
 0x6cf   : > { %6854 = vmatprep.subr.bf16.mxu1 %v6773_v19  ;;  %v6698_v10 = vpack.c.bf16 %v6632_v16, %v6626_v28  ;;  %v6643_v37 = vmax.f32 %v22859_v39, %v6508_v50  ;;  %v6637_v54 = vmax.f32 %v22860_v56, %v6503_v7  ;;  %v6518_v60 = vsel %vm6488_vm2, %v16804_v52, %v16849_v34  ;;  %v22862_v52 = vld [vmem:[#allocation98_spill] sm:$0xff]  ;;  %v22863_v28 = vld [vmem:[#allocation95_spill] sm:$0xff] }
 0x6d0   : > { %6855 = vmatpush1.bf16.msra.mxu1 %v6770_v38  ;;  %v22861_v32 = vunpack.i.h.bf16 %v21120_v30  ;;  %v16854_v25 = vunpack.i.h.bf16 %v16852_v29  ;;  %v16853_v36 = vunpack.i.l.bf16 %v16852_v29  ;;  %v16857_v18 = vpop.permute.xlu0 %16856  ;;  %v6697_v63 = vpack.c.bf16 %v6631_v44, %v6625_v33  ;;  %v22864_v50 = vld [vmem:[#allocation99_spill] sm:$0xff] }
 0x6d1   : > { %6907 = vmatprep.subr.bf16.mxu1 %v6698_v10  ;;  %v6656_v31 = vmax.f32 %v20973_v47, %v16849_v34  ;;  %v6650_v16 = vmax.f32 %v20969_v40, %v16848_v22  ;;  %v6704_v49 = vpack.c.bf16 %v6644_v62, %v6638_v45  ;;  %v6655_v5 = vmax.f32 %v22862_v52, %v6518_v60  ;;  %v17603_v45 = vld [vmem:[#allocation9 + $0x18] ss:$12 sps:$4 sm:$0xff]   ;;  %v17608_v10 = vld [vmem:[#allocation9 + $0x34] ss:$12 sps:$4 sm:$0xff]   ;;  %v17606_v39 = vld [vmem:[#allocation9 + $0x30] ss:$12 sps:$4 sm:$0xff]  }
 0x6d2   : > { %v6513_v15 = vsel %vm6488_vm2, %v22861_v32, %v16848_v22  ;;  %v16862_v48 = vpop.permute.xlu1 %16861  ;;  %v16859_v38 = vunpack.i.h.bf16 %v16857_v18  ;;  %v16858_v3 = vunpack.i.l.bf16 %v16857_v18  ;;  %v6528_v47 = vsel %vm6488_vm2, %v16814_v46, %v16854_v25  ;;  %v17614_v56 = vld [vmem:[#allocation9 + $0x64] ss:$12 sps:$4 sm:$0xff]   ;;  %v17620_v32 = vld [vmem:[#allocation9 + $0x94] ss:$12 sps:$4 sm:$0xff]  }
 0x6d3   : > { %14466 = vmatmul.mubr.msk.bf16.vlgmr.msra.gmra.mrb[36].mxu1 %vm6750_vm4, %v21061_v14  ;;  %v6649_v30 = vmax.f32 %v22863_v28, %v6513_v15  ;;  %v6523_v40 = vsel %vm6488_vm2, %v16809_v4, %v16853_v36  ;;  %v16864_v44 = vunpack.i.h.bf16 %v16862_v48  ;;  %v6703_v34 = vpack.c.bf16 %v6643_v37, %v6637_v54  ;;  %v17611_v37 = vld [vmem:[#allocation9 + $0x4c] ss:$12 sps:$4 sm:$0xff]   ;;  %v17617_v54 = vld [vmem:[#allocation9 + $0x7c] ss:$12 sps:$4 sm:$0xff]   ;;  %v17638_v52 = vld [vmem:[#allocation9 + $0x124] ss:$12 sps:$4 sm:$0xff]  }
 0x6d4   : > { %6908 = vmatpush1.bf16.msra.mxu1 %v6697_v63  ;;  %6886 = vmatprep.mubr.bf16.mxu1 %v22820_v6  ;;  %v6668_v29 = vmax.f32 %v21017_v2, %v16854_v25  ;;  %v6662_v19 = vmax.f32 %v21013_v24, %v16853_v36  ;;  %v16863_v58 = vunpack.i.l.bf16 %v16862_v48  ;;  %v6710_v33 = vpack.c.bf16 %v6656_v31, %v6650_v16  ;;  %v17615_v60 = vld [vmem:[#allocation9 + $0x78] ss:$12 sps:$4 sm:$0xff]   ;;  %v17618_v15 = vld [vmem:[#allocation9 + $0x90] ss:$12 sps:$4 sm:$0xff]   ;;  %v17621_v25 = vld [vmem:[#allocation9 + $0xa8] ss:$12 sps:$4 sm:$0xff]  }
 0x6d5   : > { %6909 = vmatprep.subr.bf16.mxu1 %v6704_v49  ;;  %v6667_v59 = vmax.f32 %v20872_v23, %v6528_v47  ;;  %v6661_v0 = vmax.f32 %v22864_v50, %v6523_v40  ;;  %v6538_v9 = vsel %vm6488_vm2, %v16824_v26, %v16859_v38  ;;  %v6680_v41 = vmax.f32 %v21040_v53, %v16859_v38  ;;  %v17626_v36 = vld [vmem:[#allocation9 + $0xc4] ss:$12 sps:$4 sm:$0xff]   ;;  %v17624_v18 = vld [vmem:[#allocation9 + $0xc0] ss:$12 sps:$4 sm:$0xff]   ;;  %v17629_v63 = vld [vmem:[#allocation9 + $0xdc] ss:$12 sps:$4 sm:$0xff]  }
 0x6d6   : > { %v6533_v2 = vsel %vm6488_vm2, %v16819_v1, %v16858_v3  ;;  %v6674_v24 = vmax.f32 %v21036_v17, %v16858_v3  ;;  %v6548_v4 = vsel %vm6488_vm2, %v16834_v11, %v16864_v44  ;;  %v6709_v23 = vpack.c.bf16 %v6655_v5, %v6649_v30  ;;  %v17627_v31 = vld [vmem:[#allocation9 + $0xd8] ss:$12 sps:$4 sm:$0xff]   ;;  %v17630_v16 = vld [vmem:[#allocation9 + $0xf0] ss:$12 sps:$4 sm:$0xff]   ;;  %v17633_v49 = vld [vmem:[#allocation9 + $0x108] ss:$12 sps:$4 sm:$0xff]  }
 0x6d7   : > { %v6692_v46 = vmax.f32 %v20913_v27, %v16864_v44  ;;  %v6543_v26 = vsel %vm6488_vm2, %v22865_v55, %v16863_v58  ;;  %v6686_v53 = vmax.f32 %v21048_v43, %v16863_v58  ;;  %v6716_v7 = vpack.c.bf16 %v6668_v29, %v6662_v19  ;;  %v17635_v48 = vld [vmem:[#allocation9 + $0x10c] ss:$12 sps:$4 sm:$0xff]   ;;  %v17641_v28 = vld [vmem:[#allocation9 + $0x13c] ss:$12 sps:$4 sm:$0xff]   ;;  %v17644_v38 = vld [vmem:[#allocation9 + $0x154] ss:$12 sps:$4 sm:$0xff]  }
 0x6d8   : > { %6910 = vmatpush1.bf16.msra.mxu1 %v6703_v34  ;;  %v6679_v17 = vmax.f32 %v20927_v21, %v6538_v9  ;;  %v6673_v42 = vmax.f32 %v20894_v20, %v6533_v2  ;;  %v6691_v27 = vmax.f32 %v20910_v8, %v6548_v4  ;;  %v6685_v1 = vmax.f32 %v20935_v51, %v6543_v26  ;;  %v17602_v20 = vld [vmem:[#allocation9 + $0x4] ss:$12 sps:$4 sm:$0xff]   ;;  %v17600_v21 = vld [vmem:[#allocation9] ss:$12 sps:$4 sm:$0xff]   ;;  %v17605_v51 = vld [vmem:[#allocation9 + $0x1c] ss:$12 sps:$4 sm:$0xff]  }
 0x6d9   : > { %6911 = vmatprep.subr.bf16.mxu1 %v6710_v33  ;;  %v6715_v61 = vpack.c.bf16 %v6667_v59, %v6661_v0  ;;  %v6728_v35 = vpack.c.bf16 %v6692_v46, %v6686_v53  ;;  %v6722_v11 = vpack.c.bf16 %v6680_v41, %v6674_v24  ;;  %v17636_v5 = vld [vmem:[#allocation9 + $0x120] ss:$12 sps:$4 sm:$0xff]   ;;  %v17639_v30 = vld [vmem:[#allocation9 + $0x138] ss:$12 sps:$4 sm:$0xff]   ;;  %v17642_v3 = vld [vmem:[#allocation9 + $0x150] ss:$12 sps:$4 sm:$0xff]  }
 0x6da   : > { %v6727_v43 = vpack.c.bf16 %v6691_v27, %v6685_v1  ;;  %v6721_v22 = vpack.c.bf16 %v6679_v17, %v6673_v42  ;;  %v17647_v47 = vld [vmem:[#allocation9 + $0x16c] ss:$12 sps:$4 sm:$0xff]   ;;  %v17645_v40 = vld [vmem:[#allocation9 + $0x168] ss:$12 sps:$4 sm:$0xff]   ;;  %v17650_v44 = vld [vmem:[#allocation9 + $0x184] ss:$12 sps:$4 sm:$0xff]  }
 0x6db   : > { %14467 = vmatmul.mubr.msk.bf16.gmra.mrb[40].mxu1 %vm6750_vm4, %v21066_v12  ;;  %v6779_v62 = vand.u32 %v21027_v57, %v6728_v35  ;;  %v17648_v50 = vld [vmem:[#allocation9 + $0x180] ss:$12 sps:$4 sm:$0xff]   ;;  %v17653_v0 = vld [vmem:[#allocation9 + $0x19c] ss:$12 sps:$4 sm:$0xff]   ;;  %v17651_v9 = vld [vmem:[#allocation9 + $0x198] ss:$12 sps:$4 sm:$0xff]  }
 0x6dc   : > { %6912 = vmatpush1.bf16.msra.mxu1 %v6709_v23  ;;  %6896 = vmatprep.mubr.bf16.mxu1 %v22820_v6  ;;  %v6776_v8 = vand.u32 %v21027_v57, %v6727_v43  ;;  %v17609_v57 = vld [vmem:[#allocation9 + $0x48] ss:$12 sps:$4 sm:$0xff]   ;;  %v17654_v55 = vld [vmem:[#allocation9 + $0x1b0] ss:$12 sps:$4 sm:$0xff]   ;;  %v17659_v53 = vld [vmem:[#allocation9 + $0x1cc] ss:$12 sps:$4 sm:$0xff]  }
 0x6dd   : > { %6913 = vmatprep.subr.bf16.mxu1 %v6716_v7  ;;  %v17656_v2 = vld [vmem:[#allocation9 + $0x1b4] ss:$12 sps:$4 sm:$0xff]   ;;  %v17662_v42 = vld [vmem:[#allocation9 + $0x1e4] ss:$12 sps:$4 sm:$0xff]  }
 0x6de   : > { %v17657_v7 = vld [vmem:[#allocation9 + $0x1c8] ss:$12 sps:$4 sm:$0xff]  }
 0x6df   : > { %v17718_v43 = vld [vmem:[#allocation9 + $0x308] ss:$12 sps:$4 sm:$0xff]  }
 0x6e0   : > { %6914 = vmatpush1.bf16.msra.mxu1 %v6715_v61 }
 0x6e1   : > { %6915 = vmatprep.subr.bf16.mxu1 %v6722_v11  ;;  %v17717_v11 = vld [vmem:[#allocation9 + $0x3c8] ss:$12 sps:$4 sm:$0xff]  }
 0x6e2   : > { %15360 = vmatprep.subr.bf16.mxu0 %v17717_v11  ;;  %v17707_v11 = vld [vmem:[#allocation9 + $0x34c] ss:$12 sps:$4 sm:$0xff]  }
 0x6e3   : > { %14468 = vmatmul.mubr.msk.bf16.gmra.mrb[44].mxu1 %vm6750_vm4, %v21071_v13  ;;  %15361 = vmatpush3.bf16.msra.mxu0 %v17718_v43  ;;  %v17705_v43 = vld [vmem:[#allocation9 + $0x348] ss:$12 sps:$4 sm:$0xff]  }
 0x6e4   : > { %6916 = vmatpush1.bf16.msra.mxu1 %v6721_v22  ;;  %6939 = vmatprep.mubr.bf16.mxu1 %v22820_v6  ;;  %v17660_v22 = vld [vmem:[#allocation9 + $0x1e0] ss:$12 sps:$4 sm:$0xff]  }
 0x6e5   : > { %6917 = vmatprep.subr.bf16.mxu1 %v6779_v62 }
 0x6e8   : > { %6918 = vmatpush1.bf16.msra.mxu1 %v6776_v8  ;;  %v17722_v8 = vld [vmem:[#allocation9 + $0x3e0] ss:$12 sps:$4 sm:$0xff]  }
 0x6e9   : > { %7957 = vmatprep.subr.bf16.mxu1 %v17602_v20  ;;  %v17665_v20 = vld [vmem:[#allocation9 + $0x1fc] ss:$12 sps:$4 sm:$0xff]   ;;  %15362 = vmatprep.subr.bf16.mxu0 %v17722_v8 }
 0x6eb   : > { %14469 = vmatmul.mubr.msk.bf16.vlgmr.msra.gmra.mrb[48].mxu1 %vm6750_vm4, %v21061_v14  ;;  %v17612_v14 = vld [vmem:[#allocation9 + $0x60] ss:$12 sps:$4 sm:$0xff]  }
 0x6ec   : > { %6949 = vmatprep.mubr.bf16.mxu1 %v22820_v6  ;;  %7958 = vmatpush1.bf16.msra.mxu1 %v17600_v21  ;;  %v17723_v21 = vld [vmem:[#allocation9 + $0x320] ss:$12 sps:$4 sm:$0xff]  }
 0x6ed   : > { %7959 = vmatprep.subr.bf16.mxu1 %v17605_v51  ;;  %v17663_v51 = vld [vmem:[#allocation9 + $0x1f8] ss:$12 sps:$4 sm:$0xff]   ;;  %15363 = vmatpush3.bf16.msra.mxu0 %v17723_v21 }
 0x6f0   : > { %7960 = vmatpush1.bf16.msra.mxu1 %v17603_v45  ;;  %v17668_v45 = vld [vmem:[#allocation9 + $0x214] ss:$12 sps:$4 sm:$0xff]  }
 0x6f1   : > { %7961 = vmatprep.subr.bf16.mxu1 %v17608_v10  ;;  %v17727_v10 = vld [vmem:[#allocation9 + $0x3f8] ss:$12 sps:$4 sm:$0xff]  }
 0x6f2   : > { %15364 = vmatprep.subr.bf16.mxu0 %v17727_v10  ;;  %v17708_v10 = vld [vmem:[#allocation9 + $0x360] ss:$12 sps:$4 sm:$0xff]  }
 0x6f3   : > { %14470 = vmatmul.mubr.msk.bf16.gmra.mrb[52].mxu1 %vm6750_vm4, %v21066_v12  ;;  %v17623_v12 = vld [vmem:[#allocation9 + $0xac] ss:$12 sps:$4 sm:$0xff]  }
 0x6f4   : > { %6959 = vmatprep.mubr.bf16.mxu1 %v22820_v6  ;;  %7962 = vmatpush1.bf16.msra.mxu1 %v17606_v39  ;;  %v17728_v39 = vld [vmem:[#allocation9 + $0x338] ss:$12 sps:$4 sm:$0xff]  }
 0x6f5   : > { %7963 = vmatprep.subr.bf16.mxu1 %v17611_v37  ;;  %v17666_v37 = vld [vmem:[#allocation9 + $0x210] ss:$12 sps:$4 sm:$0xff]   ;;  %15365 = vmatpush3.bf16.msra.mxu0 %v17728_v39 }
 0x6f8   : > { %7964 = vmatpush1.bf16.msra.mxu1 %v17609_v57  ;;  %v17671_v57 = vld [vmem:[#allocation9 + $0x22c] ss:$12 sps:$4 sm:$0xff]  }
 0x6f9   : > { %7965 = vmatprep.subr.bf16.mxu1 %v17614_v56  ;;  %v17732_v56 = vld [vmem:[#allocation9 + $0x410] ss:$12 sps:$4 sm:$0xff]  }
 0x6fa   : > { %15366 = vmatprep.subr.bf16.mxu0 %v17732_v56 }
 0x6fb   : > { %14471 = vmatmul.mubr.msk.bf16.gmra.mrb[56].mxu1 %vm6750_vm4, %v21071_v13  ;;  %v17632_v13 = vld [vmem:[#allocation9 + $0xf4] ss:$12 sps:$4 sm:$0xff]  }
 0x6fc   : > { %7966 = vmatpush1.bf16.msra.mxu1 %v17612_v14  ;;  %v17733_v14 = vld [vmem:[#allocation9 + $0x350] ss:$12 sps:$4 sm:$0xff]  }
 0x6fd   : > { %7967 = vmatprep.subr.bf16.mxu1 %v17617_v54  ;;  %v17669_v54 = vld [vmem:[#allocation9 + $0x228] ss:$12 sps:$4 sm:$0xff]   ;;  %15367 = vmatpush3.bf16.msra.mxu0 %v17733_v14 }
 0x6fe   : > { %v17716_v14 = vld [vmem:[#allocation9 + $0x394] ss:$12 sps:$4 sm:$0xff]  }
 0x700   : > { %7968 = vmatpush1.bf16.msra.mxu1 %v17615_v60  ;;  %v17674_v60 = vld [vmem:[#allocation9 + $0x244] ss:$12 sps:$4 sm:$0xff]  }
 0x701   : > { %7969 = vmatprep.subr.bf16.mxu1 %v17620_v32  ;;  %v17737_v32 = vld [vmem:[#allocation9 + $0x428] ss:$12 sps:$4 sm:$0xff]  }
 0x702   : > { %15368 = vmatprep.subr.bf16.mxu0 %v17737_v32 }
 0x704   : > { %7970 = vmatpush1.bf16.msra.mxu1 %v17618_v15  ;;  %v17738_v15 = vld [vmem:[#allocation9 + $0x368] ss:$12 sps:$4 sm:$0xff]  }
 0x705   : > { %7971 = vmatprep.subr.bf16.mxu1 %v17623_v12  ;;  %v17672_v12 = vld [vmem:[#allocation9 + $0x240] ss:$12 sps:$4 sm:$0xff]   ;;  %15369 = vmatpush3.bf16.msra.mxu0 %v17738_v15 }
 0x708   : > { %7972 = vmatpush1.bf16.msra.mxu1 %v17621_v25  ;;  %v17677_v25 = vld [vmem:[#allocation9 + $0x25c] ss:$12 sps:$4 sm:$0xff]  }
 0x709   : > { %7973 = vmatprep.subr.bf16.mxu1 %v17626_v36  ;;  %v17742_v36 = vld [vmem:[#allocation9 + $0x440] ss:$12 sps:$4 sm:$0xff]  }
 0x70a   : > { %15370 = vmatprep.subr.bf16.mxu0 %v17742_v36  ;;  %v17721_v36 = vld [vmem:[#allocation9 + $0x3ac] ss:$12 sps:$4 sm:$0xff]  }
 0x70c   : > { %7974 = vmatpush1.bf16.msra.mxu1 %v17624_v18  ;;  %v17743_v18 = vld [vmem:[#allocation9 + $0x380] ss:$12 sps:$4 sm:$0xff]  }
 0x70d   : > { %7975 = vmatprep.subr.bf16.mxu1 %v17629_v63  ;;  %v17675_v63 = vld [vmem:[#allocation9 + $0x258] ss:$12 sps:$4 sm:$0xff]   ;;  %15371 = vmatpush3.bf16.msra.mxu0 %v17743_v18  ;;  %v17719_v18 = vld [vmem:[#allocation9 + $0x3a8] ss:$12 sps:$4 sm:$0xff]  }
 0x710   : > { %7976 = vmatpush1.bf16.msra.mxu1 %v17627_v31  ;;  %v17680_v31 = vld [vmem:[#allocation9 + $0x274] ss:$12 sps:$4 sm:$0xff]  }
 0x711   : > { %7977 = vmatprep.subr.bf16.mxu1 %v17632_v13  ;;  %v17747_v13 = vld [vmem:[#allocation9 + $0x458] ss:$12 sps:$4 sm:$0xff]  }
 0x712   : > { %15372 = vmatprep.subr.bf16.mxu0 %v17747_v13 }
 0x714   : > { %7978 = vmatpush1.bf16.msra.mxu1 %v17630_v16  ;;  %v17748_v16 = vld [vmem:[#allocation9 + $0x398] ss:$12 sps:$4 sm:$0xff]  }
 0x715   : > { %7979 = vmatprep.subr.bf16.mxu1 %v17635_v48  ;;  %v17678_v48 = vld [vmem:[#allocation9 + $0x270] ss:$12 sps:$4 sm:$0xff]   ;;  %15373 = vmatpush3.bf16.msra.mxu0 %v17748_v16 }
 0x718   : > { %7980 = vmatpush1.bf16.msra.mxu1 %v17633_v49  ;;  %v17683_v49 = vld [vmem:[#allocation9 + $0x28c] ss:$12 sps:$4 sm:$0xff]  }
 0x719   : > { %7981 = vmatprep.subr.bf16.mxu1 %v17638_v52  ;;  %v17752_v52 = vld [vmem:[#allocation9 + $0x470] ss:$0 sps:$4 sm:$0xff]  }
 0x71a   : > { %16408 = vmatprep.subr.msk.bf16.mxu0 %vm7947_vm5, %v17752_v52  ;;  %v17724_v52 = vld [vmem:[#allocation9 + $0x3c0] ss:$12 sps:$4 sm:$0xff]  }
 0x71c   : > { %7982 = vmatpush1.bf16.msra.mxu1 %v17636_v5  ;;  %v17753_v5 = vld [vmem:[#allocation9 + $0x3b0] ss:$12 sps:$4 sm:$0xff]  }
 0x71d   : > { %7983 = vmatprep.subr.bf16.mxu1 %v17641_v28  ;;  %v17681_v28 = vld [vmem:[#allocation9 + $0x288] ss:$12 sps:$4 sm:$0xff]   ;;  %15375 = vmatpush3.bf16.msra.mxu0 %v17753_v5 }
 0x720   : > { %7984 = vmatpush1.bf16.msra.mxu1 %v17639_v30  ;;  %v17686_v30 = vld [vmem:[#allocation9 + $0x2a4] ss:$12 sps:$4 sm:$0xff]  }
 0x721   : > { %7985 = vmatprep.subr.bf16.mxu1 %v17644_v38  ;;  %v17684_v38 = vld [vmem:[#allocation9 + $0x2a0] ss:$12 sps:$4 sm:$0xff]  }
 0x724   : > { %7986 = vmatpush1.bf16.msra.mxu1 %v17642_v3  ;;  %v17689_v3 = vld [vmem:[#allocation9 + $0x2bc] ss:$12 sps:$4 sm:$0xff]  }
 0x725   : > { %7987 = vmatprep.subr.bf16.mxu1 %v17647_v47  ;;  %v17687_v47 = vld [vmem:[#allocation9 + $0x2b8] ss:$12 sps:$4 sm:$0xff]  }
 0x728   : > { %7988 = vmatpush1.bf16.msra.mxu1 %v17645_v40  ;;  %v17692_v40 = vld [vmem:[#allocation9 + $0x2d4] ss:$12 sps:$4 sm:$0xff]  }
 0x729   : > { %8020 = vmatprep.subr.bf16.mxu1 %v17650_v44  ;;  %v17690_v44 = vld [vmem:[#allocation9 + $0x2d0] ss:$12 sps:$4 sm:$0xff]  }
 0x737   : > { %v6815_v34 = vpop.f32.mrb[24].mxu1 }
 0x738   : > { %v6817_v29 = vpop.f32.mrb[25].mxu1 }
 0x739   : > { %v6819_v19 = vpop.f32.mrb[26].mxu1 }
 0x73a   : > { %v21301_v58 = vpack.c.bf16 %v6819_v19, %v6815_v34  ;;  %v6821_v33 = vpop.f32.mrb[27].mxu1  ;;  %v17695_v34 = vld [vmem:[#allocation9 + $0x2ec] ss:$12 sps:$4 sm:$0xff]   ;;  %v17698_v19 = vld [vmem:[#allocation9 + $0x304] ss:$12 sps:$4 sm:$0xff]  }
 0x73b   : > { %v21303_v59 = vpack.c.bf16 %v6821_v33, %v6817_v29  ;;  %v17693_v29 = vld [vmem:[#allocation9 + $0x2e8] ss:$12 sps:$4 sm:$0xff]  }
 0x73d   : > { %7989 = vmatprep.mubr.bf16.mxu1 %v21303_v59 }
 0x73e   : > { %7990 = vmatmul.mubr.bf16.vlgmr.msra.gmra.mrb[60].mxu1 %v21301_v58 }
 0x73f   : > { %8021 = vmatpush1.bf16.msra.mxu1 %v17648_v50  ;;  %v6825_v41 = vpop.f32.mrb[28].mxu1 }
 0x740   : > { %8022 = vmatprep.subr.bf16.mxu1 %v17653_v0  ;;  %v6827_v24 = vpop.f32.mrb[29].mxu1 }
 0x741   : > { %v6829_v4 = vpop.f32.mrb[30].mxu1 }
 0x742   : > { %v21307_v23 = vpack.c.bf16 %v6829_v4, %v6825_v41  ;;  %v6831_v46 = vpop.f32.mrb[31].mxu1  ;;  %v17701_v4 = vld [vmem:[#allocation9 + $0x31c] ss:$12 sps:$4 sm:$0xff]  }
 0x743   : > { %8023 = vmatpush1.bf16.msra.mxu1 %v17651_v9  ;;  %v21309_v26 = vpack.c.bf16 %v6831_v46, %v6827_v24  ;;  %v17696_v24 = vld [vmem:[#allocation9 + $0x300] ss:$12 sps:$4 sm:$0xff]   ;;  %v17699_v46 = vld [vmem:[#allocation9 + $0x318] ss:$12 sps:$4 sm:$0xff]  }
 0x744   : > { %8024 = vmatprep.subr.bf16.mxu1 %v17656_v2 }
 0x745   : > { %7999 = vmatprep.mubr.bf16.mxu1 %v21309_v26 }
 0x746   : > { %8000 = vmatmul.mubr.bf16.gmra.mrb[64].mxu1 %v21307_v23 }
 0x747   : > { %8025 = vmatpush1.bf16.msra.mxu1 %v17654_v55  ;;  %v6835_v17 = vpop.f32.mrb[32].mxu1 }
 0x748   : > { %8026 = vmatprep.subr.bf16.mxu1 %v17659_v53  ;;  %v6837_v27 = vpop.f32.mrb[33].mxu1  ;;  %v17704_v53 = vld [vmem:[#allocation9 + $0x334] ss:$12 sps:$4 sm:$0xff]  }
 0x749   : > { %v6839_v1 = vpop.f32.mrb[34].mxu1 }
 0x74a   : > { %v21313_v61 = vpack.c.bf16 %v6839_v1, %v6835_v17  ;;  %v6841_v35 = vpop.f32.mrb[35].mxu1  ;;  %v17702_v1 = vld [vmem:[#allocation9 + $0x330] ss:$12 sps:$4 sm:$0xff]  }
 0x74b   : > { %8027 = vmatpush1.bf16.msra.mxu1 %v17657_v7  ;;  %v21315_v62 = vpack.c.bf16 %v6841_v35, %v6837_v27 }
 0x74c   : > { %8028 = vmatprep.subr.bf16.mxu1 %v17662_v42 }
 0x74d   : > { %8009 = vmatprep.mubr.bf16.mxu1 %v21315_v62 }
 0x74e   : > { %8010 = vmatmul.mubr.bf16.gmra.mrb[68].mxu1 %v21313_v61 }
 0x74f   : > { %8029 = vmatpush1.bf16.msra.mxu1 %v17660_v22 }
 0x750   : > { %8030 = vmatprep.subr.bf16.mxu1 %v17665_v20  ;;  %v17710_v20 = vld [vmem:[#allocation9 + $0x364] ss:$12 sps:$4 sm:$0xff]  }
 0x753   : > { %8031 = vmatpush1.bf16.msra.mxu1 %v17663_v51 }
 0x754   : > { %8032 = vmatprep.subr.bf16.mxu1 %v17668_v45 }
 0x757   : > { %8033 = vmatpush1.bf16.msra.mxu1 %v17666_v37  ;;  %v17713_v37 = vld [vmem:[#allocation9 + $0x37c] ss:$12 sps:$4 sm:$0xff]  }
 0x758   : > { %8034 = vmatprep.subr.bf16.mxu1 %v17671_v57  ;;  %v17711_v57 = vld [vmem:[#allocation9 + $0x378] ss:$12 sps:$4 sm:$0xff]  }
 0x75b   : > { %8035 = vmatpush1.bf16.msra.mxu1 %v17669_v54 }
 0x75c   : > { %8036 = vmatprep.subr.bf16.mxu1 %v17674_v60 }
 0x75f   : > { %8037 = vmatpush1.bf16.msra.mxu1 %v17672_v12  ;;  %v17714_v12 = vld [vmem:[#allocation9 + $0x390] ss:$12 sps:$4 sm:$0xff]  }
 0x760   : > { %8038 = vmatprep.subr.bf16.mxu1 %v17677_v25 }
 0x763   : > { %8039 = vmatpush1.bf16.msra.mxu1 %v17675_v63 }
 0x764   : > { %8040 = vmatprep.subr.bf16.mxu1 %v17680_v31  ;;  %v17726_v31 = vld [vmem:[#allocation9 + $0x3c4] ss:$12 sps:$4 sm:$0xff]  }
 0x767   : > { %8041 = vmatpush1.bf16.msra.mxu1 %v17678_v48 }
 0x768   : > { %8042 = vmatprep.subr.bf16.mxu1 %v17683_v49 }
 0x76b   : > { %8043 = vmatpush1.bf16.msra.mxu1 %v17681_v28  ;;  %v17731_v28 = vld [vmem:[#allocation9 + $0x3dc] ss:$12 sps:$4 sm:$0xff]  }
 0x76c   : > { %8044 = vmatprep.subr.bf16.mxu1 %v17686_v30  ;;  %v17818_v30 = vld [vmem:[%s22866_s29 + $0x308] ss:$12 sps:$4 sm:$0xff]  }
 0x76d   : > { %15394 = vmatprep.subr.bf16.mxu0 %v17818_v30  ;;  %v17788_v30 = vld [vmem:[#allocation9 + $0x218] ss:$12 sps:$4 sm:$0xff]  }
 0x76f   : > { %8045 = vmatpush1.bf16.msra.mxu1 %v17684_v38  ;;  %v17729_v38 = vld [vmem:[#allocation9 + $0x3d8] ss:$12 sps:$4 sm:$0xff]  }
 0x770   : > { %8046 = vmatprep.subr.bf16.mxu1 %v17689_v3 }
 0x773   : > { %8047 = vmatpush1.bf16.msra.mxu1 %v17687_v47  ;;  %v17819_v47 = vld [vmem:[%s22867_s1 + $0x248] ss:$12 sps:$4 sm:$0xff]  }
 0x774   : > { %8048 = vmatprep.subr.bf16.mxu1 %v17692_v40  ;;  %v17736_v40 = vld [vmem:[#allocation9 + $0x3f4] ss:$12 sps:$4 sm:$0xff]  }
 0x777   : > { %8049 = vmatpush1.bf16.msra.mxu1 %v17690_v44 }
 0x778   : > { %8050 = vmatprep.subr.bf16.mxu1 %v17695_v34  ;;  %v17823_v34 = vld [vmem:[%s22867_s1 + $0x320] ss:$12 sps:$4 sm:$0xff]  }
 0x77b   : > { %8051 = vmatpush1.bf16.msra.mxu1 %v17693_v29 }
 0x77c   : > { %8083 = vmatprep.subr.bf16.mxu1 %v17698_v19 }
 0x7a6   : > { %v6878_v33 = vpop.f32.mrb[36].mxu1 }
 0x7a7   : > { %v6880_v50 = vpop.f32.mrb[37].mxu1 }
 0x7a8   : > { %v6882_v0 = vpop.f32.mrb[38].mxu1 }
 0x7a9   : > { %v21320_v9 = vpack.c.bf16 %v6882_v0, %v6878_v33  ;;  %v6884_v41 = vpop.f32.mrb[39].mxu1 }
 0x7aa   : > { %v21322_v2 = vpack.c.bf16 %v6884_v41, %v6880_v50  ;;  %v17734_v50 = vld [vmem:[#allocation9 + $0x3f0] ss:$12 sps:$4 sm:$0xff]  }
 0x7ab   : > { %v17824_v41 = vld [vmem:[%s22867_s1 + $0x260] ss:$12 sps:$4 sm:$0xff]  }
 0x7ac   : > { %8052 = vmatprep.mubr.bf16.mxu1 %v21322_v2 }
 0x7ad   : > { %8053 = vmatmul.mubr.bf16.vlgmr.msra.gmra.mrb[60].mxu1 %v21320_v9 }
 0x7ae   : > { %8084 = vmatpush1.bf16.msra.mxu1 %v17696_v24  ;;  %v6888_v55 = vpop.f32.mrb[40].mxu1  ;;  %v17741_v24 = vld [vmem:[#allocation9 + $0x40c] ss:$12 sps:$4 sm:$0xff]  }
 0x7af   : > { %8085 = vmatprep.subr.bf16.mxu1 %v17701_v4  ;;  %v6890_v7 = vpop.f32.mrb[41].mxu1  ;;  %v17739_v4 = vld [vmem:[#allocation9 + $0x408] ss:$12 sps:$4 sm:$0xff]  }
 0x7b0   : > { %v6892_v17 = vpop.f32.mrb[42].mxu1 }
 0x7b1   : > { %v21326_v42 = vpack.c.bf16 %v6892_v17, %v6888_v55  ;;  %v6894_v27 = vpop.f32.mrb[43].mxu1  ;;  %v17744_v55 = vld [vmem:[#allocation9 + $0x420] ss:$12 sps:$4 sm:$0xff]  }
 0x7b2   : > { %8086 = vmatpush1.bf16.msra.mxu1 %v17699_v46  ;;  %v21328_v35 = vpack.c.bf16 %v6894_v27, %v6890_v7  ;;  %v17746_v46 = vld [vmem:[#allocation9 + $0x424] ss:$12 sps:$4 sm:$0xff]   ;;  %v17756_v17 = vld [vmem:[#allocation9 + $0x454] ss:$12 sps:$4 sm:$0xff]   ;;  %v7176_v27 = vld [vmem:[#allocation9 + $0x468] sm:$0xff] }
 0x7b3   : > { %8087 = vmatprep.subr.bf16.mxu1 %v17704_v53  ;;  %v17751_v53 = vld [vmem:[#allocation9 + $0x43c] ss:$12 sps:$4 sm:$0xff]   ;;  %v17749_v7 = vld [vmem:[#allocation9 + $0x438] ss:$12 sps:$4 sm:$0xff]  }
 0x7b4   : > { %8062 = vmatprep.mubr.bf16.mxu1 %v21328_v35 }
 0x7b5   : > { %8063 = vmatmul.mubr.bf16.gmra.mrb[64].mxu1 %v21326_v42 }
 0x7b6   : > { %8088 = vmatpush1.bf16.msra.mxu1 %v17702_v1  ;;  %v6898_v22 = vpop.f32.mrb[44].mxu1  ;;  %v17754_v1 = vld [vmem:[#allocation9 + $0x450] ss:$12 sps:$4 sm:$0xff]  }
 0x7b7   : > { %8089 = vmatprep.subr.bf16.mxu1 %v17707_v11  ;;  %v6900_v8 = vpop.f32.mrb[45].mxu1  ;;  %v14614_v11 = vcombine.high %v7176_v27, %v7176_v27 }
 0x7b8   : > { %v6902_v21 = vpop.f32.mrb[46].mxu1 }
 0x7b9   : > { %v21332_v51 = vpack.c.bf16 %v6902_v21, %v6898_v22  ;;  %v6904_v45 = vpop.f32.mrb[47].mxu1  ;;  %v17761_v21 = vld [vmem:[#allocation9 + $0xe0] ss:$12 sps:$4 sm:$0xff]  }
 0x7ba   : > { %8090 = vmatpush1.bf16.msra.mxu1 %v17705_v43  ;;  %v21334_v39 = vpack.c.bf16 %v6904_v45, %v6900_v8  ;;  %v14613_v43 = vcombine.low %v7176_v27, %v7176_v27  ;;  %v17760_v8 = vld [vmem:[#allocation9 + $0x8] ss:$12 sps:$4 sm:$0xff]   ;;  %v17762_v45 = vld [vmem:[#allocation9 + $0x20] ss:$12 sps:$4 sm:$0xff]  }
 0x7bb   : > { %8091 = vmatprep.subr.bf16.mxu1 %v17710_v20  ;;  %v17759_v20 = vld [vmem:[#allocation9 + $0xc8] ss:$12 sps:$4 sm:$0xff]  }
 0x7bc   : > { %8072 = vmatprep.mubr.bf16.mxu1 %v21334_v39  ;;  %v7949_v22 = vsel %vm7947_vm5, %v14613_v43, 0  ;;  %v17822_v27 = vld [vmem:[%s22867_s1 + $0x31c] ss:$12 sps:$4 sm:$0xff]   ;;  %v17820_v43 = vld [vmem:[%s22867_s1 + $0x318] ss:$12 sps:$4 sm:$0xff]  }
 0x7bd   : > { %8073 = vmatmul.mubr.bf16.gmra.mrb[68].mxu1 %v21332_v51 }
 0x7be   : > { %8092 = vmatpush1.bf16.msra.mxu1 %v17708_v10  ;;  %v6941_v56 = vpop.f32.mrb[48].mxu1  ;;  %v17763_v10 = vld [vmem:[#allocation9 + $0xf8] ss:$12 sps:$4 sm:$0xff]  }
 0x7bf   : > { %8093 = vmatprep.subr.bf16.mxu1 %v17713_v37  ;;  %v6943_v54 = vpop.f32.mrb[49].mxu1  ;;  %v17764_v37 = vld [vmem:[#allocation9 + $0x38] ss:$12 sps:$4 sm:$0xff]  }
 0x7c0   : > { %v6945_v60 = vpop.f32.mrb[50].mxu1 }
 0x7c1   : > { %v21338_v32 = vpack.c.bf16 %v6945_v60, %v6941_v56  ;;  %v6947_v15 = vpop.f32.mrb[51].mxu1  ;;  %v17766_v56 = vld [vmem:[#allocation9 + $0x50] ss:$12 sps:$4 sm:$0xff]   ;;  %v17769_v60 = vld [vmem:[#allocation9 + $0x140] ss:$12 sps:$4 sm:$0xff]  }
 0x7c2   : > { %8094 = vmatpush1.bf16.msra.mxu1 %v17711_v57  ;;  %v6975_v25 = vpack.c.bf16 %v6947_v15, %v6943_v54  ;;  %v17765_v57 = vld [vmem:[#allocation9 + $0x110] ss:$12 sps:$4 sm:$0xff]   ;;  %v17768_v54 = vld [vmem:[#allocation9 + $0x68] ss:$12 sps:$4 sm:$0xff]   ;;  %v17771_v15 = vld [vmem:[#allocation9 + $0x158] ss:$12 sps:$4 sm:$0xff]  }
 0x7c3   : > { %8095 = vmatprep.subr.bf16.mxu1 %v17716_v14  ;;  %v17767_v14 = vld [vmem:[#allocation9 + $0x128] ss:$12 sps:$4 sm:$0xff]  }
 0x7c4   : > { %14620 = vmatprep.mubr.msk.bf16.mxu0 %vm6488_vm2, %v6975_v25  ;;  %14617 = vmatprep.mubr.msk.bf16.mxu1 %vm6488_vm2, %v6975_v25  ;;  %v17773_v25 = vld [vmem:[#allocation9 + $0x170] ss:$12 sps:$4 sm:$0xff]  }
 0x7c5   : > { %8293 = vmatmul.mubr.bf16.vlgmr.msra.gmra.mrb[48].mxu0 %v21338_v32 }
 0x7c6   : > { %8096 = vmatpush1.bf16.msra.mxu1 %v17714_v12  ;;  %v6951_v63 = vpop.f32.mrb[52].mxu1  ;;  %15395 = vmatpush3.bf16.msra.mxu0 %v17819_v47  ;;  %v17772_v12 = vld [vmem:[#allocation9 + $0x98] ss:$12 sps:$4 sm:$0xff]  }
 0x7c7   : > { %8097 = vmatprep.subr.bf16.mxu1 %v17721_v36  ;;  %v6953_v13 = vpop.f32.mrb[53].mxu1  ;;  %15396 = vmatprep.subr.bf16.mxu0 %v17823_v34  ;;  %v17774_v36 = vld [vmem:[#allocation9 + $0xb0] ss:$12 sps:$4 sm:$0xff]  }
 0x7c8   : > { %v6955_v16 = vpop.f32.mrb[54].mxu1  ;;  %v17793_v47 = vld [vmem:[%s22867_s1 + $0x244] ss:$12 sps:$4 sm:$0xff]  }
 0x7c9   : > { %v21343_v48 = vpack.c.bf16 %v6955_v16, %v6951_v63  ;;  %v6957_v49 = vpop.f32.mrb[55].mxu1  ;;  %v17776_v63 = vld [vmem:[#allocation9 + $0x188] ss:$12 sps:$4 sm:$0xff]   ;;  %v17780_v16 = vld [vmem:[#allocation9 + $0x1b8] ss:$12 sps:$4 sm:$0xff]  }
 0x7ca   : > { %8098 = vmatpush1.bf16.msra.mxu1 %v17719_v18  ;;  %v6981_v5 = vpack.c.bf16 %v6957_v49, %v6953_v13  ;;  %15397 = vmatpush3.bf16.msra.mxu0 %v17824_v41  ;;  %v17775_v18 = vld [vmem:[#allocation9 + $0x248] ss:$12 sps:$4 sm:$0xff]   ;;  %v17779_v13 = vld [vmem:[#allocation9 + $0x278] ss:$12 sps:$4 sm:$0xff]   ;;  %v17782_v49 = vld [vmem:[#allocation9 + $0x1d0] ss:$12 sps:$4 sm:$0xff]  }
 0x7cb   : > { %8099 = vmatprep.subr.bf16.mxu1 %v17726_v31  ;;  %v17777_v31 = vld [vmem:[#allocation9 + $0x260] ss:$12 sps:$4 sm:$0xff]  }
 0x7cc   : > { %14621 = vmatprep.mubr.msk.bf16.mxu0 %vm6488_vm2, %v6981_v5  ;;  %v17797_v34 = vld [vmem:[%s22867_s1 + $0x270] ss:$12 sps:$4 sm:$0xff]   ;;  %v17814_v41 = vld [vmem:[%s22867_s1 + $0x2ec] ss:$12 sps:$4 sm:$0xff]  }
 0x7cd   : > { %8301 = vmatmul.mubr.bf16.gmra.mrb[52].mxu0 %v21343_v48 }
 0x7ce   : > { %8100 = vmatpush1.bf16.msra.mxu1 %v17724_v52  ;;  %v6961_v3 = vpop.f32.mrb[56].mxu1  ;;  %v17783_v52 = vld [vmem:[#allocation9 + $0x2a8] ss:$12 sps:$4 sm:$0xff]  }
 0x7cf   : > { %8101 = vmatprep.subr.bf16.mxu1 %v17731_v28  ;;  %v6963_v44 = vpop.f32.mrb[57].mxu1  ;;  %v17829_v28 = vld [vmem:[%s22867_s1 + $0x278] ss:$12 sps:$4 sm:$0xff]  }
 0x7d0   : > { %v6965_v29 = vpop.f32.mrb[58].mxu1 }
 0x7d1   : > { %v6986_v19 = vpack.c.bf16 %v6965_v29, %v6961_v3  ;;  %v6967_v33 = vpop.f32.mrb[59].mxu1  ;;  %v17790_v3 = vld [vmem:[#allocation9 + $0x230] ss:$12 sps:$4 sm:$0xff]  }
 0x7d2   : > { %8102 = vmatpush1.bf16.msra.mxu1 %v17729_v38  ;;  %v6987_v0 = vpack.c.bf16 %v6967_v33, %v6963_v44  ;;  %v17789_v38 = vld [vmem:[#allocation9 + $0x2f0] ss:$12 sps:$4 sm:$0xff]   ;;  %v17799_v44 = vld [vmem:[%s22867_s1 + $0x274] ss:$12 sps:$4 sm:$0xff]  }
 0x7d3   : > { %8103 = vmatprep.subr.bf16.mxu1 %v17736_v40  ;;  %v17794_v40 = vld [vmem:[%s22867_s1 + $0x258] ss:$12 sps:$4 sm:$0xff]   ;;  %v17811_v33 = vld [vmem:[%s22867_s1 + $0x2d4] ss:$12 sps:$4 sm:$0xff]  }
 0x7d4   : > { %14622 = vmatprep.mubr.msk.bf16.mxu0 %vm6488_vm2, %v6987_v0  ;;  %v17805_v29 = vld [vmem:[%s22867_s1 + $0x2a4] ss:$12 sps:$4 sm:$0xff]  }
 0x7d5   : > { %8309 = vmatmul.mubr.bf16.gmra.mrb[56].mxu0 %v6986_v19 }
 0x7d6   : > { %8104 = vmatpush1.bf16.msra.mxu1 %v17734_v50  ;;  %v17833_v50 = vld [vmem:[%s22867_s1 + $0x350] ss:$12 sps:$4 sm:$0xff]  }
 0x7d7   : > { %8105 = vmatprep.subr.bf16.mxu1 %v17741_v24  ;;  %v17838_v24 = vld [vmem:[%s22867_s1 + $0x368] ss:$12 sps:$4 sm:$0xff]  }
 0x7da   : > { %8106 = vmatpush1.bf16.msra.mxu1 %v17739_v4  ;;  %v17839_v4 = vld [vmem:[%s22867_s1 + $0x2a8] ss:$12 sps:$4 sm:$0xff]  }
 0x7db   : > { %8107 = vmatprep.subr.bf16.mxu1 %v17746_v46  ;;  %v17812_v46 = vld [vmem:[%s22867_s1 + $0x2e8] ss:$12 sps:$4 sm:$0xff]  }
 0x7de   : > { %8108 = vmatpush1.bf16.msra.mxu1 %v17744_v55  ;;  %v17817_v55 = vld [vmem:[%s22867_s1 + $0x304] ss:$12 sps:$4 sm:$0xff]  }
 0x7df   : > { %8109 = vmatprep.subr.bf16.mxu1 %v17751_v53  ;;  %v17843_v53 = vld [vmem:[%s22867_s1 + $0x380] ss:$12 sps:$4 sm:$0xff]  }
 0x7e2   : > { %8110 = vmatpush1.bf16.msra.mxu1 %v17749_v7  ;;  %v17844_v7 = vld [vmem:[%s22867_s1 + $0x2c0] ss:$12 sps:$4 sm:$0xff]  }
 0x7e3   : > { %8111 = vmatprep.subr.bf16.mxu1 %v17756_v17  ;;  %v17815_v17 = vld [vmem:[%s22867_s1 + $0x300] ss:$12 sps:$4 sm:$0xff]  }
 0x7e6   : > { %8112 = vmatpush1.bf16.msra.mxu1 %v17754_v1  ;;  %v17848_v1 = vld [vmem:[%s22867_s1 + $0x398] ss:$12 sps:$4 sm:$0xff]  }
 0x7e7   : > { %14616 = vmatprep.subr.msk.bf16.mxu1 %vm7947_vm5, %v14614_v11  ;;  %v17849_v11 = vld [vmem:[%s22867_s1 + $0x2d8] ss:$12 sps:$4 sm:$0xff]  }
 0x7ea   : > { %8114 = vmatpush1.bf16.msra.mxu1 %v7949_v22  ;;  %v17827_v22 = vld [vmem:[%s22867_s1 + $0x334] ss:$12 sps:$4 sm:$0xff]  }
 0x7eb   : > { %15292 = vmatprep.subr.bf16.mxu1 %v17759_v20  ;;  %v17853_v20 = vld [vmem:[%s22867_s1 + $0x3b0] ss:$12 sps:$4 sm:$0xff]  }
 0x7ed   : > { %8116 = vmatmul.mubr.bf16.vlgmr.msra.gmra.mrb[60].mxu1 %v21338_v32  ;;  %v17770_v32 = vld [vmem:[#allocation9 + $0x80] ss:$12 sps:$4 sm:$0xff]  }
 0x7ee   : > { %15293 = vmatpush3.bf16.msra.mxu1 %v17760_v8  ;;  %14618 = vmatprep.mubr.msk.bf16.mxu1 %vm6488_vm2, %v6981_v5  ;;  %v17785_v5 = vld [vmem:[#allocation9 + $0x2c0] ss:$12 sps:$4 sm:$0xff]  }
 0x7ef   : > { %15294 = vmatprep.subr.bf16.mxu1 %v17761_v21  ;;  %v17854_v8 = vld [vmem:[%s22867_s1 + $0x2f0] ss:$12 sps:$4 sm:$0xff]  }
 0x7f0   : > { %v17825_v21 = vld [vmem:[%s22867_s1 + $0x330] ss:$12 sps:$4 sm:$0xff]  }
 0x7f2   : > { %15295 = vmatpush3.bf16.msra.mxu1 %v17762_v45  ;;  %v17832_v45 = vld [vmem:[%s22867_s1 + $0x34c] ss:$12 sps:$4 sm:$0xff]  }
 0x7f3   : > { %15296 = vmatprep.subr.bf16.mxu1 %v17763_v10  ;;  %v17830_v10 = vld [vmem:[%s22867_s1 + $0x348] ss:$12 sps:$4 sm:$0xff]  }
 0x7f5   : > { %8126 = vmatmul.mubr.bf16.gmra.mrb[64].mxu1 %v21343_v48  ;;  %v17781_v48 = vld [vmem:[#allocation9 + $0x290] ss:$12 sps:$4 sm:$0xff]  }
 0x7f6   : > { %15297 = vmatpush3.bf16.msra.mxu1 %v17764_v37  ;;  %14619 = vmatprep.mubr.msk.bf16.mxu1 %vm6488_vm2, %v6987_v0  ;;  %v17834_v0 = vld [vmem:[%s22867_s1 + $0x290] ss:$12 sps:$4 sm:$0xff]  }
 0x7f7   : > { %15298 = vmatprep.subr.bf16.mxu1 %v17765_v57  ;;  %v17837_v37 = vld [vmem:[%s22867_s1 + $0x364] ss:$12 sps:$4 sm:$0xff]   ;;  %v17835_v57 = vld [vmem:[%s22867_s1 + $0x360] ss:$12 sps:$4 sm:$0xff]  }
 0x7fa   : > { %15299 = vmatpush3.bf16.msra.mxu1 %v17766_v56  ;;  %v17842_v56 = vld [vmem:[%s22867_s1 + $0x37c] ss:$12 sps:$4 sm:$0xff]  }
 0x7fb   : > { %15300 = vmatprep.subr.bf16.mxu1 %v17767_v14  ;;  %v17840_v14 = vld [vmem:[%s22867_s1 + $0x378] ss:$12 sps:$4 sm:$0xff]  }
 0x7fd   : > { %8136 = vmatmul.mubr.bf16.gmra.mrb[68].mxu1 %v6986_v19  ;;  %v17803_v19 = vld [vmem:[%s22867_s1 + $0x2a0] ss:$12 sps:$4 sm:$0xff]  }
 0x7fe   : > { %15301 = vmatpush3.bf16.msra.mxu1 %v17768_v54  ;;  %8178 = vmatprep.mubr.bf16.mxu1 %v21303_v59  ;;  %v17778_v59 = vld [vmem:[#allocation9 + $0x1a0] ss:$12 sps:$4 sm:$0xff]  }
 0x7ff   : > { %15302 = vmatprep.subr.bf16.mxu1 %v17769_v60  ;;  %v17847_v54 = vld [vmem:[%s22867_s1 + $0x394] ss:$12 sps:$4 sm:$0xff]   ;;  %v17845_v60 = vld [vmem:[%s22867_s1 + $0x390] ss:$12 sps:$4 sm:$0xff]  }
 0x802   : > { %15303 = vmatpush3.bf16.msra.mxu1 %v17770_v32  ;;  %v17852_v32 = vld [vmem:[%s22867_s1 + $0x3ac] ss:$12 sps:$4 sm:$0xff]  }
 0x803   : > { %15304 = vmatprep.subr.bf16.mxu1 %v17771_v15  ;;  %v17850_v15 = vld [vmem:[%s22867_s1 + $0x3a8] ss:$12 sps:$4 sm:$0xff]  }
 0x806   : > { %15305 = vmatpush3.bf16.msra.mxu1 %v17772_v12  ;;  %v17857_v12 = vld [vmem:[%s22867_s1 + $0x3c4] ss:$12 sps:$4 sm:$0xff]  }
 0x807   : > { %15306 = vmatprep.subr.bf16.mxu1 %v17773_v25  ;;  %v19191_v25 = vmov 0.0  }
 0x80a   : > { %15307 = vmatpush3.bf16.msra.mxu1 %v17774_v36 }
 0x80b   : > { %15326 = vmatprep.subr.bf16.mxu1 %v17775_v18 }
 0x80d   : > { %8179 = vmatmul.mubr.bf16.vlgmr.msra.gmra.mrb[72].mxu1 %v21301_v58  ;;  %v17784_v58 = vld [vmem:[#allocation9 + $0x1e8] ss:$12 sps:$4 sm:$0xff]  }
 0x80e   : > { %8186 = vmatprep.mubr.bf16.mxu1 %v21309_v26  ;;  %15327 = vmatpush3.bf16.msra.mxu1 %v17776_v63  ;;  %v17828_v26 = vld [vmem:[%s22867_s1 + $0x338] ss:$12 sps:$4 sm:$0xff]  }
 0x80f   : > { %15328 = vmatprep.subr.bf16.mxu1 %v17777_v31  ;;  %15398 = vmatprep.subr.bf16.mxu0 %v17828_v26 }
 0x810   : > { %15399 = vmatpush3.bf16.msra.mxu0 %v17829_v28 }
 0x811   : > { %15400 = vmatprep.subr.bf16.mxu0 %v17833_v50 }
 0x812   : > { %15329 = vmatpush3.bf16.msra.mxu1 %v17778_v59 }
 0x813   : > { %15330 = vmatprep.subr.bf16.mxu1 %v17779_v13 }
 0x814   : > { %15401 = vmatpush3.bf16.msra.mxu0 %v17834_v0 }
 0x815   : > { %8187 = vmatmul.mubr.bf16.gmra.mrb[76].mxu1 %v21307_v23  ;;  %v17786_v23 = vld [vmem:[#allocation9 + $0x200] ss:$12 sps:$4 sm:$0xff]   ;;  %15402 = vmatprep.subr.bf16.mxu0 %v17838_v24 }
 0x816   : > { %8194 = vmatprep.mubr.bf16.mxu1 %v21315_v62  ;;  %15331 = vmatpush3.bf16.msra.mxu1 %v17780_v16  ;;  %v17787_v62 = vld [vmem:[#allocation9 + $0x2d8] ss:$12 sps:$4 sm:$0xff]  }
 0x817   : > { %15332 = vmatprep.subr.bf16.mxu1 %v17781_v48 }
 0x818   : > { %15403 = vmatpush3.bf16.msra.mxu0 %v17839_v4 }
 0x819   : > { %15404 = vmatprep.subr.bf16.mxu0 %v17843_v53 }
 0x81a   : > { %15333 = vmatpush3.bf16.msra.mxu1 %v17782_v49 }
 0x81b   : > { %15334 = vmatprep.subr.bf16.mxu1 %v17783_v52 }
 0x81c   : > { %15405 = vmatpush3.bf16.msra.mxu0 %v17844_v7 }
 0x81d   : > { %8195 = vmatmul.mubr.bf16.gmra.mrb[80].mxu1 %v21313_v61  ;;  %v17791_v61 = vld [vmem:[%s22867_s1 + $0x240] ss:$12 sps:$4 sm:$0xff]   ;;  %15406 = vmatprep.subr.bf16.mxu0 %v17848_v1 }
 0x81e   : > { %15335 = vmatpush3.bf16.msra.mxu1 %v17784_v58  ;;  %8235 = vmatprep.mubr.bf16.mxu1 %v21322_v2  ;;  %v17796_v2 = vld [vmem:[%s22867_s1 + $0x25c] ss:$12 sps:$4 sm:$0xff]   ;;  %v17855_v1 = vld [vmem:[%s22867_s1 + $0x3c0] ss:$12 sps:$4 sm:$0xff]  }
 0x81f   : > { %15336 = vmatprep.subr.bf16.mxu1 %v17785_v5 }
 0x820   : > { %15407 = vmatpush3.bf16.msra.mxu0 %v17849_v11  ;;  %v17858_v11 = vld [vmem:[%s22867_s1 + $0x3c8] ss:$12 sps:$4 sm:$0xff]  }
 0x821   : > { %15408 = vmatprep.subr.bf16.mxu0 %v17853_v20  ;;  %v17861_v20 = vld [vmem:[%s22867_s1 + $0x3dc] ss:$12 sps:$4 sm:$0xff]  }
 0x822   : > { %15337 = vmatpush3.bf16.msra.mxu1 %v17786_v23 }
 0x823   : > { %15338 = vmatprep.subr.bf16.mxu1 %v17787_v62 }
 0x824   : > { %15409 = vmatpush3.bf16.msra.mxu0 %v17854_v8 }
 0x825   : > { %15648 = vmatprep.subr.bf16.mxu0 %v19191_v25 }
 0x826   : > { %15339 = vmatpush3.bf16.msra.mxu1 %v17788_v30 }
 0x827   : > { %15340 = vmatprep.subr.bf16.mxu1 %v17789_v38 }
 0x82a   : > { %15341 = vmatpush3.bf16.msra.mxu1 %v17790_v3 }
 0x82b   : > { %8981 = vmatprep.subr.bf16.mxu1 %v17793_v47 }
 0x82d   : > { %8236 = vmatmul.mubr.bf16.vlgmr.msra.gmra.mrb[84].mxu1 %v21320_v9  ;;  %v17802_v9 = vld [vmem:[%s22867_s1 + $0x28c] ss:$12 sps:$4 sm:$0xff]  }
 0x82e   : > { %8243 = vmatprep.mubr.bf16.mxu1 %v21328_v35  ;;  %8982 = vmatpush1.bf16.msra.mxu1 %v17791_v61  ;;  %v17800_v35 = vld [vmem:[%s22867_s1 + $0x288] ss:$12 sps:$4 sm:$0xff]  }
 0x82f   : > { %8983 = vmatprep.subr.bf16.mxu1 %v17796_v2 }
 0x832   : > { %8984 = vmatpush1.bf16.msra.mxu1 %v17794_v40 }
 0x833   : > { %8985 = vmatprep.subr.bf16.mxu1 %v17799_v44 }
 0x835   : > { %8244 = vmatmul.mubr.bf16.gmra.mrb[88].mxu1 %v21326_v42  ;;  %v17808_v42 = vld [vmem:[%s22867_s1 + $0x2bc] ss:$12 sps:$4 sm:$0xff]  }
 0x836   : > { %8251 = vmatprep.mubr.bf16.mxu1 %v21334_v39  ;;  %8986 = vmatpush1.bf16.msra.mxu1 %v17797_v34  ;;  %v17806_v39 = vld [vmem:[%s22867_s1 + $0x2b8] ss:$12 sps:$4 sm:$0xff]  }
 0x837   : > { %8987 = vmatprep.subr.bf16.mxu1 %v17802_v9 }
 0x83a   : > { %8988 = vmatpush1.bf16.msra.mxu1 %v17800_v35 }
 0x83b   : > { %8989 = vmatprep.subr.bf16.mxu1 %v17805_v29 }
 0x83d   : > { %8252 = vmatmul.mubr.bf16.gmra.mrb[92].mxu1 %v21332_v51  ;;  %v17809_v51 = vld [vmem:[%s22867_s1 + $0x2d0] ss:$12 sps:$4 sm:$0xff]  }
 0x83e   : > { %8990 = vmatpush1.bf16.msra.mxu1 %v17803_v19 }
 0x83f   : > { %8991 = vmatprep.subr.bf16.mxu1 %v17808_v42 }
 0x842   : > { %8992 = vmatpush1.bf16.msra.mxu1 %v17806_v39 }
 0x843   : > { %8993 = vmatprep.subr.bf16.mxu1 %v17811_v33 }
 0x846   : > { %8994 = vmatpush1.bf16.msra.mxu1 %v17809_v51 }
 0x847   : > { %8995 = vmatprep.subr.bf16.mxu1 %v17814_v41 }
 0x84a   : > { %8996 = vmatpush1.bf16.msra.mxu1 %v17812_v46 }
 0x84b   : > { %8997 = vmatprep.subr.bf16.mxu1 %v17817_v55 }
 0x84e   : > { %8998 = vmatpush1.bf16.msra.mxu1 %v17815_v17 }
 0x84f   : > { %8999 = vmatprep.subr.bf16.mxu1 %v17822_v27 }
 0x852   : > { %9000 = vmatpush1.bf16.msra.mxu1 %v17820_v43 }
 0x853   : > { %9001 = vmatprep.subr.bf16.mxu1 %v17827_v22 }
 0x856   : > { %9002 = vmatpush1.bf16.msra.mxu1 %v17825_v21 }
 0x857   : > { %9003 = vmatprep.subr.bf16.mxu1 %v17832_v45 }
 0x85a   : > { %9004 = vmatpush1.bf16.msra.mxu1 %v17830_v10 }
 0x85b   : > { %9005 = vmatprep.subr.bf16.mxu1 %v17837_v37 }
 0x85e   : > { %9006 = vmatpush1.bf16.msra.mxu1 %v17835_v57  ;;  %v17859_v57 = vld [vmem:[%s22867_s1 + $0x3d8] ss:$12 sps:$4 sm:$0xff]  }
 0x85f   : > { %9007 = vmatprep.subr.bf16.mxu1 %v17842_v56  ;;  %v17862_v56 = vld [vmem:[%s22867_s1 + $0x3e0] ss:$12 sps:$4 sm:$0xff]  }
 0x862   : > { %9008 = vmatpush1.bf16.msra.mxu1 %v17840_v14 }
 0x863   : > { %9009 = vmatprep.subr.bf16.mxu1 %v17847_v54 }
 0x866   : > { %9010 = vmatpush1.bf16.msra.mxu1 %v17845_v60  ;;  %v17865_v60 = vld [vmem:[%s22867_s1 + $0x3f4] ss:$12 sps:$4 sm:$0xff]  }
 0x867   : > { %9011 = vmatprep.subr.bf16.mxu1 %v17852_v32 }
 0x86a   : > { %9012 = vmatpush1.bf16.msra.mxu1 %v17850_v15 }
 0x86b   : > { %9044 = vmatprep.subr.bf16.mxu1 %v17857_v12 }
 0x898   : > { %v15376_v36 = vpop.f32.mrb[48].mxu0 }
 0x899   : > { %v15377_v18 = vpop.f32.mrb[49].mxu0 }
 0x89a   : > { %v21514_v63 = vadd.f32 %v15377_v18, %v15376_v36  ;;  %v15379_v31 = vpop.f32.mrb[50].mxu0 }
 0x89b   : > { %v15380_v59 = vpop.f32.mrb[51].mxu0 }
 0x89c   : > { %v21516_v13 = vadd.f32 %v15380_v59, %v15379_v31 }
 0x8a0   : > { %v15382_v16 = vpop.f32.mrb[52].mxu0 }
 0x8a1   : > { %v15383_v48 = vpop.f32.mrb[53].mxu0 }
 0x8a2   : > { %v21518_v49 = vadd.f32 %v15383_v48, %v15382_v16  ;;  %v15385_v52 = vpop.f32.mrb[54].mxu0  ;;  %v17863_v48 = vld [vmem:[%s22867_s1 + $0x3f0] ss:$12 sps:$4 sm:$0xff]  }
 0x8a3   : > { %v15386_v58 = vpop.f32.mrb[55].mxu0 }
 0x8a4   : > { %v21520_v26 = vadd.f32 %v15386_v58, %v15385_v52  ;;  %v17866_v52 = vld [vmem:[%s22867_s1 + $0x3f8] ss:$12 sps:$4 sm:$0xff]  }
 0x8a8   : > { %v15388_v5 = vpop.f32.mrb[56].mxu0 }
 0x8a9   : > { %v15389_v28 = vpop.f32.mrb[57].mxu0 }
 0x8aa   : > { %v21522_v23 = vadd.f32 %v15389_v28, %v15388_v5  ;;  %v15391_v62 = vpop.f32.mrb[58].mxu0  ;;  %v17869_v5 = vld [vmem:[%s22867_s1 + $0x40c] ss:$12 sps:$4 sm:$0xff]   ;;  %v17867_v28 = vld [vmem:[%s22867_s1 + $0x408] ss:$12 sps:$4 sm:$0xff]  }
 0x8ab   : > { %v15392_v30 = vpop.f32.mrb[59].mxu0 }
 0x8ac   : > { %v21524_v38 = vadd.f32 %v15392_v30, %v15391_v62  ;;  %v17870_v62 = vld [vmem:[%s22867_s1 + $0x410] ss:$12 sps:$4 sm:$0xff]  }
 0x8ad   : > { %v17873_v30 = vld [vmem:[%s22867_s1 + $0x424] ss:$12 sps:$4 sm:$0xff]  }
 0x8c0   : > { %v8117_v3 = vpop.f32.mrb[60].mxu1 }
 0x8c1   : > { %v8119_v47 = vpop.f32.mrb[61].mxu1 }
 0x8c2   : > { %v8121_v61 = vpop.f32.mrb[62].mxu1 }
 0x8c3   : > { %v21526_v2 = vpack.c.bf16 %v8121_v61, %v8117_v3  ;;  %v8123_v40 = vpop.f32.mrb[63].mxu1 }
 0x8c4   : > { %v21528_v44 = vpack.c.bf16 %v8123_v40, %v8119_v47 }
 0x8c5   : > { %v8522_v29 = vshll.u32 %v21526_v2, 16  ;;  %v8520_v4 = vshrl.u32 %v21526_v2, 16 }
 0x8c6   : > { %v8534_v9 = vshll.u32 %v21528_v44, 16  ;;  %v8532_v41 = vshrl.u32 %v21528_v44, 16 }
 0x8c7   : > { %v8524_v0 = vrot.slane %v8522_v29, 1  ;;  %v17874_v29 = vld [vmem:[%s22867_s1 + $0x428] ss:$12 sps:$4 sm:$0xff]  }
 0x8c8   : > { %v8127_v34 = vpop.f32.mrb[64].mxu1  ;;  %v8536_v50 = vrot.slane %v8534_v9, 1 }
 0x8c9   : > { %v8129_v35 = vpop.f32.mrb[65].mxu1  ;;  %v8525_v27 = vor.u32 %v8524_v0, %v8520_v4  ;;  %v17875_v0 = vld [vmem:[%s22867_s1 + $0x438] ss:$12 sps:$4 sm:$0xff]  }
 0x8ca   : > { %v8131_v19 = vpop.f32.mrb[66].mxu1  ;;  %v8537_v53 = vor.u32 %v8536_v50, %v8532_v41  ;;  %v17881_v41 = vld [vmem:[%s22867_s1 + $0x454] ss:$12 sps:$4 sm:$0xff]  }
 0x8cb   : > { %v21532_v42 = vpack.c.bf16 %v8131_v19, %v8127_v34  ;;  %v8133_v39 = vpop.f32.mrb[67].mxu1 }
 0x8cc   : > { %v21534_v33 = vpack.c.bf16 %v8133_v39, %v8129_v35  ;;  %v17871_v35 = vld [vmem:[%s22867_s1 + $0x420] ss:$12 sps:$4 sm:$0xff]   ;;  %v17877_v39 = vld [vmem:[%s22867_s1 + $0x43c] ss:$12 sps:$4 sm:$0xff]  }
 0x8cd   : > { %v8527_v51 = vshll.u32 %v21532_v42, 16  ;;  %v8555_v32 = vshrl.u32 %v21532_v42, 16 }
 0x8ce   : > { %v8539_v24 = vshll.u32 %v21534_v33, 16  ;;  %v8563_v14 = vshrl.u32 %v21534_v33, 16 }
 0x8cf   : > { %v8529_v46 = vrot.slane %v8527_v51, 1  ;;  %v17878_v51 = vld [vmem:[%s22867_s1 + $0x440] ss:$12 sps:$4 sm:$0xff]  }
 0x8d0   : > { %v8137_v55 = vpop.f32.mrb[68].mxu1  ;;  %v8541_v7 = vrot.slane %v8539_v24, 1 }
 0x8d1   : > { %v8139_v17 = vpop.f32.mrb[69].mxu1  ;;  %v8530_v45 = vsel %vm1460_vm0, %v8525_v27, %v8529_v46  ;;  %v8557_v31 = vor.u32 %v8555_v32, %v8529_v46  ;;  %v17885_v27 = vld [vmem:[%s22867_s1 + $0x46c] ss:$12 sps:$4 sm:$0xff]  }
 0x8d2   : > { %v8141_v43 = vpop.f32.mrb[70].mxu1  ;;  %v8542_v22 = vsel %vm1460_vm0, %v8537_v53, %v8541_v7  ;;  %v8565_v12 = vor.u32 %v8563_v14, %v8541_v7  ;;  %v17879_v53 = vld [vmem:[%s22867_s1 + $0x450] ss:$12 sps:$4 sm:$0xff]   ;;  %v17882_v7 = vld [vmem:[%s22867_s1 + $0x458] ss:$12 sps:$4 sm:$0xff]  }
 0x8d3   : > { %v21550_v8 = vpack.c.bf16 %v8141_v43, %v8137_v55  ;;  %v8143_v21 = vpop.f32.mrb[71].mxu1  ;;  %9013 = vmatprep.mubr.bf16.mxu1 %v8542_v22  ;;  %9139 = vmatprep.mubr.bf16.mxu0 %v8542_v22  ;;  %v17886_v43 = vld [vmem:[%s22867_s1 + $0x470] ss:$12 sps:$4 sm:$0xff]  }
 0x8d4   : > { %v21553_v10 = vpack.c.bf16 %v8143_v21, %v8139_v17  ;;  %9014 = vmatmul.mubr.bf16.vlgmr.msra.gmra.mrb[96].mxu1 %v8530_v45  ;;  %9140 = vmatmul.mubr.bf16.vlgmr.msra.gmra.mrb[60].mxu0 %v8530_v45  ;;  %v17889_v22 = vld [vmem:[%s22867_s1 + $0x4] ss:$12 sps:$4 sm:$0xff]  }
 0x8d5   : > { %v8559_v37 = vshll.u32 %v21550_v8, 16  ;;  %9045 = vmatpush1.bf16.msra.mxu1 %v17855_v1  ;;  %15649 = vmatpush3.bf16.msra.mxu0 %v17858_v11  ;;  %v8579_v47 = vshrl.u32 %v21550_v8, 16  ;;  %v17883_v11 = vld [vmem:[%s22867_s1 + $0x468] ss:$12 sps:$4 sm:$0xff]  }
 0x8d6   : > { %v8567_v54 = vshll.u32 %v21553_v10, 16  ;;  %9046 = vmatprep.subr.bf16.mxu1 %v17861_v20  ;;  %15650 = vmatprep.subr.bf16.mxu0 %v19191_v25  ;;  %v8582_v18 = vshrl.u32 %v21553_v10, 16  ;;  %v17890_v20 = vld [vmem:[%s22867_s1 + $0xc8] ss:$12 sps:$4 sm:$0xff]  }
 0x8d7   : > { %v8561_v15 = vrot.slane %v8559_v37, 1 }
 0x8d8   : > { %v8569_v36 = vrot.slane %v8567_v54, 1 }
 0x8d9   : > { %9047 = vmatpush1.bf16.msra.mxu1 %v17859_v57  ;;  %15651 = vmatpush3.bf16.msra.mxu0 %v17862_v56  ;;  %v8562_v58 = vsel %vm1460_vm0, %v8557_v31, %v8561_v15  ;;  %v8581_v9 = vor.u32 %v8579_v47, %v8561_v15 }
 0x8da   : > { %v8570_v59 = vsel %vm1460_vm0, %v8565_v12, %v8569_v36  ;;  %v8584_v16 = vor.u32 %v8582_v18, %v8569_v36  ;;  %9048 = vmatprep.subr.bf16.mxu1 %v17865_v60  ;;  %15652 = vmatprep.subr.bf16.mxu0 %v19191_v25 }
 0x8db   : > { %9023 = vmatprep.mubr.bf16.mxu1 %v8570_v59  ;;  %9147 = vmatprep.mubr.bf16.mxu0 %v8570_v59 }
 0x8dc   : > { %9024 = vmatmul.mubr.bf16.gmra.mrb[100].mxu1 %v8562_v58  ;;  %9148 = vmatmul.mubr.bf16.gmra.mrb[64].mxu0 %v8562_v58 }
 0x8dd   : > { %9033 = vmatprep.mubr.bf16.mxu1 %v8584_v16  ;;  %9155 = vmatprep.mubr.bf16.mxu0 %v8584_v16 }
 0x8de   : > { %9049 = vmatpush1.bf16.msra.mxu1 %v17863_v48  ;;  %15653 = vmatpush3.bf16.msra.mxu0 %v17866_v52 }
 0x8df   : > { %9050 = vmatprep.subr.bf16.mxu1 %v17869_v5  ;;  %15654 = vmatprep.subr.bf16.mxu0 %v19191_v25 }
 0x8e0   : > { %v15308_v3 = vpop.f32.mrb[72].mxu1 }
 0x8e1   : > { %v15309_v61 = vpop.f32.mrb[73].mxu1 }
 0x8e2   : > { %v15310_v40 = vadd.f32 %v15309_v61, %v15308_v3  ;;  %v15311_v34 = vpop.f32.mrb[74].mxu1  ;;  %9051 = vmatpush1.bf16.msra.mxu1 %v17867_v28  ;;  %15655 = vmatpush3.bf16.msra.mxu0 %v17870_v62 }
 0x8e3   : > { %v15312_v19 = vpop.f32.mrb[75].mxu1  ;;  %9052 = vmatprep.subr.bf16.mxu1 %v17873_v30  ;;  %15656 = vmatprep.subr.bf16.mxu0 %v19191_v25 }
 0x8e4   : > { %v15313_v50 = vadd.f32 %v15312_v19, %v15311_v34  ;;  %9034 = vmatmul.mubr.bf16.gmra.mrb[104].mxu1 %v8581_v9  ;;  %9156 = vmatmul.mubr.bf16.gmra.mrb[68].mxu0 %v8581_v9 }
 0x8e5   : > { %9076 = vmatprep.mubr.bf16.mxu1 %v22820_v6  ;;  %15664 = vmatprep.mubr.msk.bf16.mxu0 %vm19192_vm6, %v19191_v25 }
 0x8e6   : > { %9053 = vmatpush1.bf16.msra.mxu1 %v17871_v35  ;;  %15657 = vmatpush3.bf16.msra.mxu0 %v17874_v29 }
 0x8e7   : > { %9054 = vmatprep.subr.bf16.mxu1 %v17877_v39  ;;  %15658 = vmatprep.subr.bf16.mxu0 %v19191_v25 }
 0x8e8   : > { %v15314_v24 = vpop.f32.mrb[76].mxu1 }
 0x8e9   : > { %v15315_v4 = vpop.f32.mrb[77].mxu1 }
 0x8ea   : > { %v15316_v46 = vadd.f32 %v15315_v4, %v15314_v24  ;;  %v15317_v55 = vpop.f32.mrb[78].mxu1  ;;  %9055 = vmatpush1.bf16.msra.mxu1 %v17875_v0  ;;  %15659 = vmatpush3.bf16.msra.mxu0 %v17878_v51 }
 0x8eb   : > { %v15318_v17 = vpop.f32.mrb[79].mxu1  ;;  %9056 = vmatprep.subr.bf16.mxu1 %v17881_v41  ;;  %15660 = vmatprep.subr.bf16.mxu0 %v19191_v25 }
 0x8ec   : > { %v15319_v1 = vadd.f32 %v15318_v17, %v15317_v55  ;;  %v17891_v55 = vld [vmem:[%s22867_s1 + $0x8] ss:$12 sps:$4 sm:$0xff]  }
 0x8ee   : > { %9057 = vmatpush1.bf16.msra.mxu1 %v17879_v53  ;;  %15661 = vmatpush3.bf16.msra.mxu0 %v17882_v7  ;;  %v17894_v53 = vld [vmem:[%s22867_s1 + $0x1c] ss:$12 sps:$4 sm:$0xff]   ;;  %v17895_v7 = vld [vmem:[%s22867_s1 + $0xe0] ss:$12 sps:$4 sm:$0xff]  }
 0x8ef   : > { %9058 = vmatprep.subr.bf16.mxu1 %v17885_v27  ;;  %15662 = vmatprep.subr.bf16.mxu0 %v19191_v25 }
 0x8f0   : > { %v15320_v21 = vpop.f32.mrb[80].mxu1 }
 0x8f1   : > { %v15321_v45 = vpop.f32.mrb[81].mxu1 }
 0x8f2   : > { %v15322_v37 = vadd.f32 %v15321_v45, %v15320_v21  ;;  %v15323_v57 = vpop.f32.mrb[82].mxu1  ;;  %9059 = vmatpush1.bf16.msra.mxu1 %v17883_v11  ;;  %15663 = vmatpush3.bf16.msra.mxu0 %v17886_v43  ;;  %v17896_v11 = vld [vmem:[%s22867_s1 + $0x20] ss:$12 sps:$4 sm:$0xff]   ;;  %v17900_v43 = vld [vmem:[%s22867_s1 + $0xf8] ss:$12 sps:$4 sm:$0xff]  }
 0x8f3   : > { %v15324_v56 = vpop.f32.mrb[83].mxu1  ;;  %9605 = vmatprep.subr.bf16.mxu1 %v17889_v22  ;;  %15439 = vmatprep.subr.bf16.mxu0 %v17890_v20  ;;  %v17897_v21 = vld [vmem:[%s22867_s1 + $0x30] ss:$12 sps:$4 sm:$0xff]  }
 0x8f4   : > { %v15325_v14 = vadd.f32 %v15324_v56, %v15323_v57  ;;  %v17901_v57 = vld [vmem:[%s22867_s1 + $0x38] ss:$12 sps:$4 sm:$0xff]  }
 0x8f5   : > { %v17904_v56 = vld [vmem:[%s22867_s1 + $0x4c] ss:$12 sps:$4 sm:$0xff]  }
 0x900   : > { %v15342_v54 = vpop.f32.mrb[84].mxu1 }
 0x901   : > { %v15343_v60 = vpop.f32.mrb[85].mxu1 }
 0x902   : > { %v15344_v32 = vadd.f32 %v15343_v60, %v15342_v54  ;;  %v15345_v15 = vpop.f32.mrb[86].mxu1  ;;  %v17902_v60 = vld [vmem:[%s22867_s1 + $0x48] ss:$12 sps:$4 sm:$0xff]  }
 0x903   : > { %v15346_v12 = vpop.f32.mrb[87].mxu1 }
 0x904   : > { %v8238_v36 = vadd.f32 %v15344_v32, %v15310_v40  ;;  %v15347_v18 = vadd.f32 %v15346_v12, %v15345_v15  ;;  %v17906_v32 = vld [vmem:[%s22867_s1 + $0x50] ss:$12 sps:$4 sm:$0xff]   ;;  %v17910_v12 = vld [vmem:[%s22867_s1 + $0x128] ss:$12 sps:$4 sm:$0xff]  }
 0x905   : > { %v17909_v15 = vld [vmem:[%s22867_s1 + $0x64] ss:$12 sps:$4 sm:$0xff]  }
 0x906   : > { %v8295_v31 = vadd.f32 %v21514_v63, %v8238_v36  ;;  %v8241_v59 = vadd.f32 %v15347_v18, %v15313_v50  ;;  %v17907_v18 = vld [vmem:[%s22867_s1 + $0x60] ss:$12 sps:$4 sm:$0xff]  }
 0x908   : > { %v8298_v16 = vadd.f32 %v21516_v13, %v8241_v59  ;;  %v15348_v48 = vpop.f32.mrb[88].mxu1 }
 0x909   : > { %v15349_v52 = vpop.f32.mrb[89].mxu1 }
 0x90a   : > { %v21641_v58 = vpack.c.bf16 %v8298_v16, %v8295_v31  ;;  %v15350_v5 = vadd.f32 %v15349_v52, %v15348_v48  ;;  %v15351_v28 = vpop.f32.mrb[90].mxu1  ;;  %v17911_v31 = vld [vmem:[%s22867_s1 + $0x68] ss:$12 sps:$4 sm:$0xff]   ;;  %v17915_v48 = vld [vmem:[%s22867_s1 + $0x140] ss:$12 sps:$4 sm:$0xff]  }
 0x90b   : > { %v15352_v62 = vpop.f32.mrb[91].mxu1  ;;  %v17914_v16 = vld [vmem:[%s22867_s1 + $0x7c] ss:$12 sps:$4 sm:$0xff]   ;;  %v17912_v52 = vld [vmem:[%s22867_s1 + $0x78] ss:$12 sps:$4 sm:$0xff]  }
 0x90c   : > { %v8246_v30 = vadd.f32 %v15350_v5, %v15316_v46  ;;  %v15353_v3 = vadd.f32 %v15352_v62, %v15351_v28  ;;  %v8546_v40 = vshll.u32 %v21641_v58, 16  ;;  %v8544_v51 = vshrl.u32 %v21641_v58, 16  ;;  %v17916_v5 = vld [vmem:[%s22867_s1 + $0x80] ss:$12 sps:$4 sm:$0xff]   ;;  %v17920_v62 = vld [vmem:[%s22867_s1 + $0x158] ss:$12 sps:$4 sm:$0xff]  }
 0x90d   : > { %v17919_v28 = vld [vmem:[%s22867_s1 + $0x94] ss:$12 sps:$4 sm:$0xff]  }
 0x90e   : > { %v8303_v47 = vadd.f32 %v21518_v49, %v8246_v30  ;;  %v8249_v61 = vadd.f32 %v15353_v3, %v15319_v1  ;;  %v8548_v19 = vrot.slane %v8546_v40, 1  ;;  %v17892_v1 = vld [vmem:[%s22867_s1 + $0x18] ss:$12 sps:$4 sm:$0xff]   ;;  %v17917_v30 = vld [vmem:[%s22867_s1 + $0x90] ss:$12 sps:$4 sm:$0xff]  }
 0x90f   : > { %v17921_v3 = vld [vmem:[%s22867_s1 + $0x98] ss:$12 sps:$4 sm:$0xff]   ;;  %v17922_v40 = vld [vmem:[%s22867_s1 + $0xa8] ss:$12 sps:$4 sm:$0xff]  }
 0x910   : > { %v8306_v34 = vadd.f32 %v21520_v26, %v8249_v61  ;;  %v15354_v63 = vpop.f32.mrb[92].mxu1  ;;  %v17887_v26 = vld [vmem:[%s22867_s1] ss:$12 sps:$4 sm:$0xff]   ;;  %v8549_v4 = vor.u32 %v8548_v19, %v8544_v51  ;;  %v17925_v61 = vld [vmem:[%s22867_s1 + $0x170] ss:$12 sps:$4 sm:$0xff]  }
 0x911   : > { %v15355_v9 = vpop.f32.mrb[93].mxu1  ;;  %v17931_v19 = vld [vmem:[%s22867_s1 + $0xd8] ss:$12 sps:$4 sm:$0xff]  }
 0x912   : > { %v21646_v35 = vpack.c.bf16 %v8306_v34, %v8303_v47  ;;  %v15356_v13 = vadd.f32 %v15355_v9, %v15354_v63  ;;  %v15357_v29 = vpop.f32.mrb[94].mxu1  ;;  %v17924_v47 = vld [vmem:[%s22867_s1 + $0xac] ss:$12 sps:$4 sm:$0xff]   ;;  %v17926_v34 = vld [vmem:[%s22867_s1 + $0xb0] ss:$12 sps:$4 sm:$0xff]  }
 0x913   : > { %v15358_v39 = vpop.f32.mrb[95].mxu1  ;;  %v17929_v63 = vld [vmem:[%s22867_s1 + $0xc4] ss:$12 sps:$4 sm:$0xff]   ;;  %v17927_v9 = vld [vmem:[%s22867_s1 + $0xc0] ss:$12 sps:$4 sm:$0xff]  }
 0x914   : > { %v8254_v50 = vadd.f32 %v15356_v13, %v15322_v37  ;;  %v15359_v0 = vadd.f32 %v15358_v39, %v15357_v29  ;;  %v8551_v41 = vshll.u32 %v21646_v35, 16  ;;  %v8571_v22 = vshrl.u32 %v21646_v35, 16  ;;  %v17930_v13 = vld [vmem:[%s22867_s1 + $0x188] ss:$12 sps:$4 sm:$0xff]   ;;  %v17934_v39 = vld [vmem:[%s22867_s1 + $0x1a0] ss:$12 sps:$4 sm:$0xff]  }
 0x915   : > { %v17933_v29 = vld [vmem:[%s22867_s1 + $0xdc] ss:$12 sps:$4 sm:$0xff]   ;;  %v17938_v51 = vld [vmem:[%s22867_s1 + $0x1b8] ss:$12 sps:$4 sm:$0xff]  }
 0x916   : > { %v8311_v49 = vadd.f32 %v21522_v23, %v8254_v50  ;;  %v8257_v24 = vadd.f32 %v15359_v0, %v15325_v14  ;;  %v8553_v46 = vrot.slane %v8551_v41, 1  ;;  %v17905_v14 = vld [vmem:[%s22867_s1 + $0x110] ss:$12 sps:$4 sm:$0xff]   ;;  %v17937_v50 = vld [vmem:[%s22867_s1 + $0xf4] ss:$12 sps:$4 sm:$0xff]  }
 0x917   : > { %v17935_v0 = vld [vmem:[%s22867_s1 + $0xf0] ss:$12 sps:$4 sm:$0xff]   ;;  %v17941_v41 = vld [vmem:[%s22867_s1 + $0x10c] ss:$12 sps:$4 sm:$0xff]  }
 0x918   : > { %v8314_v23 = vadd.f32 %v21524_v38, %v8257_v24  ;;  %v8554_v17 = vsel %vm1460_vm0, %v8549_v4, %v8553_v46  ;;  %v17899_v38 = vld [vmem:[%s22867_s1 + $0x34] ss:$12 sps:$4 sm:$0xff]   ;;  %v8573_v45 = vor.u32 %v8571_v22, %v8553_v46  ;;  %v17942_v24 = vld [vmem:[%s22867_s1 + $0x1d0] ss:$12 sps:$4 sm:$0xff]  }
 0x919   : > { %9077 = vmatmul.mubr.bf16.vlgmr.msra.gmra.mrb[96].mxu1 %v8554_v17  ;;  %15665 = vmatmul.mubr.bf16.vlgmr.msra.gmra.mrb[72].mxu0 %v8554_v17  ;;  %v17943_v4 = vld [vmem:[%s22867_s1 + $0x120] ss:$12 sps:$4 sm:$0xff]   ;;  %v17946_v46 = vld [vmem:[%s22867_s1 + $0x1e8] ss:$12 sps:$4 sm:$0xff]   ;;  %v17951_v17 = vld [vmem:[%s22867_s1 + $0x150] ss:$12 sps:$4 sm:$0xff]  }
 0x91a   : > { %v21665_v27 = vpack.c.bf16 %v8314_v23, %v8311_v49  ;;  %9606 = vmatpush1.bf16.msra.mxu1 %v17887_v26  ;;  %15440 = vmatpush3.bf16.msra.mxu0 %v17891_v55  ;;  %v17939_v49 = vld [vmem:[%s22867_s1 + $0x108] ss:$12 sps:$4 sm:$0xff]   ;;  %v17945_v26 = vld [vmem:[%s22867_s1 + $0x124] ss:$12 sps:$4 sm:$0xff]  }
 0x91b   : > { %9607 = vmatprep.subr.bf16.mxu1 %v17894_v53  ;;  %15441 = vmatprep.subr.bf16.mxu0 %v17895_v7  ;;  %v17949_v55 = vld [vmem:[%s22867_s1 + $0x13c] ss:$12 sps:$4 sm:$0xff]   ;;  %v17947_v53 = vld [vmem:[%s22867_s1 + $0x138] ss:$12 sps:$4 sm:$0xff]   ;;  %v17950_v7 = vld [vmem:[%s22867_s1 + $0x200] ss:$12 sps:$4 sm:$0xff]  }
 0x91c   : > { %9086 = vmatprep.mubr.bf16.mxu1 %v22820_v6  ;;  %15668 = vmatprep.mubr.msk.bf16.mxu0 %vm19192_vm6, %v19191_v25  ;;  %v8575_v20 = vshll.u32 %v21665_v27, 16  ;;  %v8585_v36 = vshrl.u32 %v21665_v27, 16  ;;  %v17953_v23 = vld [vmem:[%s22867_s1 + $0x154] ss:$12 sps:$4 sm:$0xff]   ;;  %v17961_v22 = vld [vmem:[%s22867_s1 + $0x184] ss:$12 sps:$4 sm:$0xff]  }
 0x91e   : > { %9608 = vmatpush1.bf16.msra.mxu1 %v17892_v1  ;;  %15442 = vmatpush3.bf16.msra.mxu0 %v17896_v11  ;;  %v8577_v37 = vrot.slane %v8575_v20, 1  ;;  %v17954_v1 = vld [vmem:[%s22867_s1 + $0x218] ss:$12 sps:$4 sm:$0xff]   ;;  %v17962_v20 = vld [vmem:[%s22867_s1 + $0x548] ss:$12 sps:$4 sm:$0xff]  }
 0x91f   : > { %9609 = vmatprep.subr.bf16.mxu1 %v17899_v38  ;;  %15443 = vmatprep.subr.bf16.mxu0 %v17900_v43  ;;  %v17957_v11 = vld [vmem:[%s22867_s1 + $0x16c] ss:$12 sps:$4 sm:$0xff]   ;;  %v17955_v38 = vld [vmem:[%s22867_s1 + $0x168] ss:$12 sps:$4 sm:$0xff]   ;;  %v17958_v43 = vld [vmem:[%s22867_s1 + $0x230] ss:$12 sps:$4 sm:$0xff]  }
 0x920   : > { %v8578_v54 = vsel %vm1460_vm0, %v8573_v45, %v8577_v37  ;;  %v8587_v59 = vor.u32 %v8585_v36, %v8577_v37  ;;  %v17963_v45 = vld [vmem:[%s22867_s1 + $0x488] ss:$12 sps:$4 sm:$0xff]   ;;  %v17977_v36 = vld [vmem:[%s22867_s1 + $0x590] ss:$12 sps:$4 sm:$0xff]  }
 0x921   : > { %9087 = vmatmul.mubr.bf16.gmra.mrb[100].mxu1 %v8578_v54  ;;  %15669 = vmatmul.mubr.bf16.gmra.mrb[76].mxu0 %v8578_v54  ;;  %v17966_v37 = vld [vmem:[%s22867_s1 + $0x19c] ss:$12 sps:$4 sm:$0xff]   ;;  %v17971_v54 = vld [vmem:[%s22867_s1 + $0x1b4] ss:$12 sps:$4 sm:$0xff]  }
 0x922   : > { %9610 = vmatpush1.bf16.msra.mxu1 %v17897_v21  ;;  %15444 = vmatpush3.bf16.msra.mxu0 %v17901_v57  ;;  %v17959_v21 = vld [vmem:[%s22867_s1 + $0x180] ss:$12 sps:$4 sm:$0xff]  }
 0x923   : > { %9611 = vmatprep.subr.bf16.mxu1 %v17904_v56  ;;  %15445 = vmatprep.subr.bf16.mxu0 %v17905_v14  ;;  %v17967_v57 = vld [vmem:[%s22867_s1 + $0x560] ss:$12 sps:$4 sm:$0xff]   ;;  %v17964_v56 = vld [vmem:[%s22867_s1 + $0x198] ss:$12 sps:$4 sm:$0xff]  }
 0x924   : > { %9096 = vmatprep.mubr.bf16.mxu1 %v22820_v6  ;;  %15672 = vmatprep.mubr.msk.bf16.mxu0 %vm19192_vm6, %v19191_v25  ;;  %v17968_v14 = vld [vmem:[%s22867_s1 + $0x4a0] ss:$12 sps:$4 sm:$0xff]  }
 0x926   : > { %9612 = vmatpush1.bf16.msra.mxu1 %v17902_v60  ;;  %15446 = vmatpush3.bf16.msra.mxu0 %v17906_v32  ;;  %v17972_v60 = vld [vmem:[%s22867_s1 + $0x578] ss:$12 sps:$4 sm:$0xff]   ;;  %v17969_v32 = vld [vmem:[%s22867_s1 + $0x1b0] ss:$12 sps:$4 sm:$0xff]  }
 0x927   : > { %9613 = vmatprep.subr.bf16.mxu1 %v17909_v15  ;;  %15447 = vmatprep.subr.bf16.mxu0 %v17910_v12  ;;  %v17973_v15 = vld [vmem:[%s22867_s1 + $0x4b8] ss:$12 sps:$4 sm:$0xff]  }
 0x928   : > { %v17976_v12 = vld [vmem:[%s22867_s1 + $0x1cc] ss:$12 sps:$4 sm:$0xff]  }
 0x929   : > { %9097 = vmatmul.mubr.bf16.gmra.mrb[104].mxu1 %v8587_v59  ;;  %15673 = vmatmul.mubr.bf16.gmra.mrb[80].mxu0 %v8587_v59  ;;  %v17981_v59 = vld [vmem:[%s22867_s1 + $0x1e4] ss:$12 sps:$4 sm:$0xff]  }
 0x92a   : > { %9614 = vmatpush1.bf16.msra.mxu1 %v17907_v18  ;;  %15448 = vmatpush3.bf16.msra.mxu0 %v17911_v31  ;;  %v17974_v18 = vld [vmem:[%s22867_s1 + $0x1c8] ss:$12 sps:$4 sm:$0xff]   ;;  %v17978_v31 = vld [vmem:[%s22867_s1 + $0x4d0] ss:$12 sps:$4 sm:$0xff]  }
 0x92b   : > { %9637 = vmatprep.mubr.bf16.mxu1 %v21528_v44  ;;  %9763 = vmatprep.mubr.bf16.mxu0 %v21528_v44 }
 0x92c   : > { %9615 = vmatprep.subr.bf16.mxu1 %v17914_v16  ;;  %15449 = vmatprep.subr.bf16.mxu0 %v17915_v48  ;;  %v17982_v16 = vld [vmem:[%s22867_s1 + $0x5a8] ss:$12 sps:$4 sm:$0xff]   ;;  %v17979_v48 = vld [vmem:[%s22867_s1 + $0x1e0] ss:$12 sps:$4 sm:$0xff]  }
 0x92e   : > { %9616 = vmatpush1.bf16.msra.mxu1 %v17912_v52  ;;  %15450 = vmatpush3.bf16.msra.mxu0 %v17916_v5  ;;  %v17983_v52 = vld [vmem:[%s22867_s1 + $0x4e8] ss:$12 sps:$4 sm:$0xff]   ;;  %v9955_v5 = vrot.slane %v21534_v33, 1 }
 0x92f   : > { %9617 = vmatprep.subr.bf16.mxu1 %v17919_v28  ;;  %15451 = vmatprep.subr.bf16.mxu0 %v17920_v62  ;;  %v17986_v28 = vld [vmem:[%s22867_s1 + $0x1fc] ss:$12 sps:$4 sm:$0xff]   ;;  %v9954_v62 = vrot.slane %v21528_v44, 1  ;;  %v17988_v44 = vld [vmem:[%s22867_s1 + $0x500] ss:$12 sps:$4 sm:$0xff]  }
 0x932   : > { %9618 = vmatpush1.bf16.msra.mxu1 %v17917_v30  ;;  %15452 = vmatpush3.bf16.msra.mxu0 %v17921_v3  ;;  %v17987_v30 = vld [vmem:[%s22867_s1 + $0x5c0] ss:$12 sps:$4 sm:$0xff]   ;;  %v17984_v3 = vld [vmem:[%s22867_s1 + $0x1f8] ss:$12 sps:$4 sm:$0xff]  }
 0x933   : > { %9619 = vmatprep.subr.bf16.mxu1 %v17924_v47  ;;  %15453 = vmatprep.subr.bf16.mxu0 %v17925_v61  ;;  %v17991_v47 = vld [vmem:[%s22867_s1 + $0x214] ss:$12 sps:$4 sm:$0xff]   ;;  %v17992_v61 = vld [vmem:[%s22867_s1 + $0x5d8] ss:$12 sps:$4 sm:$0xff]  }
 0x936   : > { %9620 = vmatpush1.bf16.msra.mxu1 %v17922_v40  ;;  %15454 = vmatpush3.bf16.msra.mxu0 %v17926_v34  ;;  %v17989_v40 = vld [vmem:[%s22867_s1 + $0x210] ss:$12 sps:$4 sm:$0xff]   ;;  %v17993_v34 = vld [vmem:[%s22867_s1 + $0x518] ss:$12 sps:$4 sm:$0xff]  }
 0x937   : > { %9621 = vmatprep.subr.bf16.mxu1 %v17929_v63  ;;  %15676 = vmatprep.subr.bf16.mxu0 %v19191_v25  ;;  %v17996_v63 = vld [vmem:[%s22867_s1 + $0x22c] ss:$12 sps:$4 sm:$0xff]  }
 0x939   : > { %9764 = vmatmul.mubr.bf16.vlgmr.msra.gmra.mrb[84].mxu0 %v21526_v2 }
 0x93a   : > { %9622 = vmatpush1.bf16.msra.mxu1 %v17927_v9  ;;  %9771 = vmatprep.mubr.bf16.mxu0 %v21534_v33  ;;  %v17997_v9 = vld [vmem:[%s22867_s1 + $0x5f0] ss:$12 sps:$4 sm:$0xff]  }
 0x93b   : > { %15677 = vmatpush3.bf16.msra.mxu0 %v17930_v13  ;;  %9623 = vmatprep.subr.bf16.mxu1 %v17933_v29  ;;  %v17994_v13 = vld [vmem:[%s22867_s1 + $0x228] ss:$12 sps:$4 sm:$0xff]   ;;  %v17998_v29 = vld [vmem:[%s22867_s1 + $0x530] ss:$12 sps:$4 sm:$0xff]  }
 0x93c   : > { %15678 = vmatprep.subr.bf16.mxu0 %v19191_v25 }
 0x93e   : > { %9624 = vmatpush1.bf16.msra.mxu1 %v17931_v19  ;;  %v18001_v19 = vld [vmem:[%s22867_s1 + $0x484] ss:$12 sps:$4 sm:$0xff]  }
 0x93f   : > { %15679 = vmatpush3.bf16.msra.mxu0 %v17934_v39  ;;  %9625 = vmatprep.subr.bf16.mxu1 %v17937_v50  ;;  %v9952_v39 = vrot.slane %v21532_v42, 1  ;;  %v21964_v50 = vrot.slane %v21553_v10, 1 }
 0x940   : > { %15680 = vmatprep.subr.bf16.mxu0 %v19191_v25 }
 0x941   : > { %9772 = vmatmul.mubr.bf16.gmra.mrb[88].mxu0 %v21532_v42 }
 0x942   : > { %9626 = vmatpush1.bf16.msra.mxu1 %v17935_v0  ;;  %9779 = vmatprep.mubr.bf16.mxu0 %v21553_v10  ;;  %v17999_v0 = vld [vmem:[%s22867_s1 + $0x480] ss:$12 sps:$4 sm:$0xff]  }
 0x943   : > { %15681 = vmatpush3.bf16.msra.mxu0 %v17938_v51  ;;  %9627 = vmatprep.subr.bf16.mxu1 %v17941_v41  ;;  %v9951_v51 = vrot.slane %v21526_v2, 1  ;;  %v18002_v41 = vld [vmem:[%s22867_s1 + $0x608] ss:$12 sps:$4 sm:$0xff]  }
 0x944   : > { %15682 = vmatprep.subr.bf16.mxu0 %v19191_v25 }
 0x946   : > { %9628 = vmatpush1.bf16.msra.mxu1 %v17939_v49  ;;  %v18003_v49 = vld [vmem:[%s22867_s1 + $0x498] ss:$12 sps:$4 sm:$0xff]  }
 0x947   : > { %15683 = vmatpush3.bf16.msra.mxu0 %v17942_v24  ;;  %9629 = vmatprep.subr.bf16.mxu1 %v17945_v26  ;;  %v18006_v24 = vld [vmem:[%s22867_s1 + $0x620] ss:$12 sps:$4 sm:$0xff]  }
 0x948   : > { %15684 = vmatprep.subr.bf16.mxu0 %v19191_v25  ;;  %v18009_v26 = vld [vmem:[%s22867_s1 + $0x4b4] ss:$12 sps:$4 sm:$0xff]  }
 0x949   : > { %9780 = vmatmul.mubr.bf16.gmra.mrb[92].mxu0 %v21550_v8 }
 0x94a   : > { %9630 = vmatpush1.bf16.msra.mxu1 %v17943_v4  ;;  %15692 = vmatprep.mubr.msk.bf16.mxu0 %vm19192_vm6, %v19191_v25  ;;  %v21999_v4 = vrot.slane %v21550_v8, 1 }
 0x94b   : > { %15685 = vmatpush3.bf16.msra.mxu0 %v17946_v46  ;;  %9631 = vmatprep.subr.bf16.mxu1 %v17949_v55  ;;  %v18007_v46 = vld [vmem:[%s22867_s1 + $0x4b0] ss:$12 sps:$4 sm:$0xff]   ;;  %v18010_v55 = vld [vmem:[%s22867_s1 + $0x638] ss:$12 sps:$4 sm:$0xff]  }
 0x94c   : > { %15686 = vmatprep.subr.bf16.mxu0 %v19191_v25 }
 0x94e   : > { %9632 = vmatpush1.bf16.msra.mxu1 %v17947_v53  ;;  %v18013_v53 = vld [vmem:[%s22867_s1 + $0x4cc] ss:$12 sps:$4 sm:$0xff]  }
 0x94f   : > { %15687 = vmatpush3.bf16.msra.mxu0 %v17950_v7  ;;  %9633 = vmatprep.subr.bf16.mxu1 %v17953_v23  ;;  %v22012_v7 = vsel %vm4339_vm1, %v9952_v39, %v21999_v4  ;;  %v18014_v23 = vld [vmem:[%s22867_s1 + $0x650] ss:$12 sps:$4 sm:$0xff]  }
 0x950   : > { %15688 = vmatprep.subr.bf16.mxu0 %v19191_v25 }
 0x952   : > { %9634 = vmatpush1.bf16.msra.mxu1 %v17951_v17  ;;  %v18017_v17 = vld [vmem:[%s22867_s1 + $0x4e4] ss:$12 sps:$4 sm:$0xff]  }
 0x953   : > { %15689 = vmatpush3.bf16.msra.mxu0 %v17954_v1  ;;  %9635 = vmatprep.subr.bf16.mxu1 %v17957_v11  ;;  %v18015_v1 = vld [vmem:[%s22867_s1 + $0x4e0] ss:$12 sps:$4 sm:$0xff]   ;;  %v18018_v11 = vld [vmem:[%s22867_s1 + $0x668] ss:$12 sps:$4 sm:$0xff]  }
 0x954   : > { %15690 = vmatprep.subr.bf16.mxu0 %v19191_v25 }
 0x956   : > { %9636 = vmatpush1.bf16.msra.mxu1 %v17955_v38  ;;  %v18021_v38 = vld [vmem:[%s22867_s1 + $0x4fc] ss:$12 sps:$4 sm:$0xff]  }
 0x957   : > { %15691 = vmatpush3.bf16.msra.mxu0 %v17958_v43  ;;  %9668 = vmatprep.subr.bf16.mxu1 %v17961_v22  ;;  %v18019_v43 = vld [vmem:[%s22867_s1 + $0x4f8] ss:$12 sps:$4 sm:$0xff]   ;;  %v18022_v22 = vld [vmem:[%s22867_s1 + $0x680] ss:$12 sps:$4 sm:$0xff]  }
 0x958   : > { %15484 = vmatprep.subr.bf16.mxu0 %v17962_v20  ;;  %v18025_v20 = vld [vmem:[%s22867_s1 + $0x514] ss:$12 sps:$4 sm:$0xff]  }
 0x959   : > { %9638 = vmatmul.mubr.bf16.vlgmr.msra.gmra.mrb[96].mxu1 %v21526_v2  ;;  %v21984_v2 = vsel %vm4339_vm1, %v9955_v5, %v21964_v50 }
 0x95a   : > { %15693 = vmatmul.mubr.bf16.vlgmr.msra.gmra.mrb[96].mxu0 %v21641_v58  ;;  %9647 = vmatprep.mubr.bf16.mxu1 %v21534_v33  ;;  %v21926_v33 = vsel %vm4339_vm1, %v9954_v62, %v9955_v5 }
 0x95b   : > { %9669 = vmatpush1.bf16.msra.mxu1 %v17959_v21  ;;  %15485 = vmatpush3.bf16.msra.mxu0 %v17963_v45  ;;  %v18023_v21 = vld [vmem:[%s22867_s1 + $0x510] ss:$12 sps:$4 sm:$0xff]   ;;  %v18026_v45 = vld [vmem:[%s22867_s1 + $0x698] ss:$12 sps:$4 sm:$0xff]  }
 0x95c   : > { %9670 = vmatprep.subr.bf16.mxu1 %v17966_v37  ;;  %15486 = vmatprep.subr.bf16.mxu0 %v17967_v57  ;;  %v18029_v37 = vld [vmem:[%s22867_s1 + $0x52c] ss:$12 sps:$4 sm:$0xff]   ;;  %v18027_v57 = vld [vmem:[%s22867_s1 + $0x528] ss:$12 sps:$4 sm:$0xff]  }
 0x95d   : > { %15696 = vmatprep.mubr.msk.bf16.mxu0 %vm19192_vm6, %v19191_v25 }
 0x95f   : > { %9671 = vmatpush1.bf16.msra.mxu1 %v17964_v56  ;;  %15487 = vmatpush3.bf16.msra.mxu0 %v17968_v14  ;;  %v18030_v56 = vld [vmem:[%s22867_s1 + $0x6b0] ss:$12 sps:$4 sm:$0xff]  }
 0x960   : > { %9672 = vmatprep.subr.bf16.mxu1 %v17971_v54  ;;  %15488 = vmatprep.subr.bf16.mxu0 %v17972_v60  ;;  %v18033_v14 = vld [vmem:[%s22867_s1 + $0x544] ss:$12 sps:$4 sm:$0xff]   ;;  %v9958_v54 = vrot.slane %v21646_v35, 1  ;;  %v18031_v60 = vld [vmem:[%s22867_s1 + $0x540] ss:$12 sps:$4 sm:$0xff]  }
 0x961   : > { %9648 = vmatmul.mubr.bf16.gmra.mrb[100].mxu1 %v21532_v42  ;;  %v18005_v42 = vld [vmem:[%s22867_s1 + $0x49c] ss:$12 sps:$4 sm:$0xff]  }
 0x962   : > { %15697 = vmatmul.mubr.bf16.gmra.mrb[100].mxu0 %v21646_v35  ;;  %9657 = vmatprep.mubr.bf16.mxu1 %v21553_v10  ;;  %v21978_v10 = vsel %vm4339_vm1, %v9951_v51, %v9952_v39  ;;  %v18052_v39 = vld [vmem:[%s22867_s1 + $0x5e8] ss:$12 sps:$4 sm:$0xff]  }
 0x963   : > { %9673 = vmatpush1.bf16.msra.mxu1 %v17969_v32  ;;  %15489 = vmatpush3.bf16.msra.mxu0 %v17973_v15  ;;  %v9957_v32 = vrot.slane %v21641_v58, 1  ;;  %v18036_v15 = vld [vmem:[%s22867_s1 + $0x55c] ss:$12 sps:$4 sm:$0xff]  }
 0x964   : > { %9674 = vmatprep.subr.bf16.mxu1 %v17976_v12  ;;  %15490 = vmatprep.subr.bf16.mxu0 %v17977_v36  ;;  %v22095_v36 = vrot.slane %v21665_v27, 1 }
 0x965   : > { %15700 = vmatprep.mubr.msk.bf16.mxu0 %vm19192_vm6, %v19191_v25  ;;  %v22083_v12 = vsel %vm4339_vm1, %v9957_v32, %v9958_v54 }
 0x967   : > { %9675 = vmatpush1.bf16.msra.mxu1 %v17974_v18  ;;  %15491 = vmatpush3.bf16.msra.mxu0 %v17978_v31  ;;  %v18037_v18 = vld [vmem:[%s22867_s1 + $0x570] ss:$12 sps:$4 sm:$0xff]   ;;  %v18042_v31 = vld [vmem:[%s22867_s1 + $0x58c] ss:$12 sps:$4 sm:$0xff]  }
 0x968   : > { %9676 = vmatprep.subr.bf16.mxu1 %v17981_v59  ;;  %15492 = vmatprep.subr.bf16.mxu0 %v17982_v16  ;;  %v22105_v59 = vsel %vm4339_vm1, %v9958_v54, %v22095_v36  ;;  %v18045_v16 = vld [vmem:[%s22867_s1 + $0x5a4] ss:$12 sps:$4 sm:$0xff]  }
 0x969   : > { %9658 = vmatmul.mubr.bf16.gmra.mrb[104].mxu1 %v21550_v8  ;;  %v18011_v8 = vld [vmem:[%s22867_s1 + $0x4c8] ss:$12 sps:$4 sm:$0xff]  }
 0x96a   : > { %15701 = vmatmul.mubr.bf16.gmra.mrb[104].mxu0 %v21665_v27  ;;  %9700 = vmatprep.mubr.bf16.mxu1 %v22820_v6 }
 0x96b   : > { %9677 = vmatpush1.bf16.msra.mxu1 %v17979_v48  ;;  %15493 = vmatpush3.bf16.msra.mxu0 %v17983_v52  ;;  %v18043_v52 = vld [vmem:[%s22867_s1 + $0x5a0] ss:$12 sps:$4 sm:$0xff]  }
 0x96c   : > { %10517 = vmatprep.mubr.bf16.mxu0 %v21926_v33  ;;  %9678 = vmatprep.subr.bf16.mxu1 %v17986_v28  ;;  %v18048_v28 = vld [vmem:[%s22867_s1 + $0x5bc] ss:$12 sps:$4 sm:$0xff]  }
 0x96d   : > { %15494 = vmatprep.subr.bf16.mxu0 %v17987_v30 }
 0x96f   : > { %9679 = vmatpush1.bf16.msra.mxu1 %v17984_v3  ;;  %15495 = vmatpush3.bf16.msra.mxu0 %v17988_v44  ;;  %v18046_v44 = vld [vmem:[%s22867_s1 + $0x5b8] ss:$12 sps:$4 sm:$0xff]  }
 0x970   : > { %9680 = vmatprep.subr.bf16.mxu1 %v17991_v47  ;;  %15496 = vmatprep.subr.bf16.mxu0 %v17992_v61  ;;  %v18051_v47 = vld [vmem:[%s22867_s1 + $0x5d4] ss:$12 sps:$4 sm:$0xff]  }
 0x973   : > { %9681 = vmatpush1.bf16.msra.mxu1 %v17989_v40  ;;  %15497 = vmatpush3.bf16.msra.mxu0 %v17993_v34  ;;  %v18049_v40 = vld [vmem:[%s22867_s1 + $0x5d0] ss:$12 sps:$4 sm:$0xff]  }
 0x974   : > { %9682 = vmatprep.subr.bf16.mxu1 %v17996_v63  ;;  %15498 = vmatprep.subr.bf16.mxu0 %v17997_v9  ;;  %v18054_v63 = vld [vmem:[%s22867_s1 + $0x5ec] ss:$12 sps:$4 sm:$0xff]  }
 0x977   : > { %9683 = vmatpush1.bf16.msra.mxu1 %v17994_v13  ;;  %15499 = vmatpush3.bf16.msra.mxu0 %v17998_v29 }
 0x978   : > { %10359 = vmatprep.subr.bf16.mxu1 %v18001_v19  ;;  %15704 = vmatprep.subr.bf16.mxu0 %v19191_v25 }
 0x97a   : > { %9701 = vmatmul.mubr.bf16.vlgmr.msra.gmra.mrb[96].mxu1 %v21641_v58  ;;  %10518 = vmatmul.mubr.bf16.vlgmr.msra.gmra.mrb[108].mxu0 %v21978_v10  ;;  %v18039_v58 = vld [vmem:[%s22867_s1 + $0x574] ss:$12 sps:$4 sm:$0xff]  }
 0x97b   : > { %10360 = vmatpush1.bf16.msra.mxu1 %v17999_v0  ;;  %10525 = vmatprep.mubr.bf16.mxu0 %v21984_v2  ;;  %v18057_v0 = vld [vmem:[%s22867_s1 + $0x604] ss:$12 sps:$4 sm:$0xff]  }
 0x97c   : > { %15705 = vmatpush3.bf16.msra.mxu0 %v18002_v41  ;;  %10361 = vmatprep.subr.bf16.mxu1 %v18005_v42  ;;  %v18055_v41 = vld [vmem:[%s22867_s1 + $0x600] ss:$12 sps:$4 sm:$0xff]  }
 0x97d   : > { %15706 = vmatprep.subr.bf16.mxu0 %v19191_v25  ;;  %9710 = vmatprep.mubr.bf16.mxu1 %v22820_v6 }
 0x97f   : > { %10362 = vmatpush1.bf16.msra.mxu1 %v18003_v49  ;;  %v18060_v49 = vld [vmem:[%s22867_s1 + $0x61c] ss:$12 sps:$4 sm:$0xff]  }
 0x980   : > { %15707 = vmatpush3.bf16.msra.mxu0 %v18006_v24  ;;  %10363 = vmatprep.subr.bf16.mxu1 %v18009_v26 }
 0x981   : > { %15708 = vmatprep.subr.bf16.mxu0 %v19191_v25 }
 0x982   : > { %9711 = vmatmul.mubr.bf16.gmra.mrb[100].mxu1 %v21646_v35  ;;  %10526 = vmatmul.mubr.bf16.gmra.mrb[112].mxu0 %v22012_v7  ;;  %v18034_v35 = vld [vmem:[%s22867_s1 + $0x558] ss:$12 sps:$4 sm:$0xff]  }
 0x983   : > { %10364 = vmatpush1.bf16.msra.mxu1 %v18007_v46  ;;  %10533 = vmatprep.mubr.bf16.mxu0 %v21964_v50 }
 0x984   : > { %15709 = vmatpush3.bf16.msra.mxu0 %v18010_v55  ;;  %10365 = vmatprep.subr.bf16.mxu1 %v18013_v53  ;;  %v18058_v53 = vld [vmem:[%s22867_s1 + $0x618] ss:$12 sps:$4 sm:$0xff]  }
 0x985   : > { %15710 = vmatprep.subr.bf16.mxu0 %v19191_v25  ;;  %9720 = vmatprep.mubr.bf16.mxu1 %v22820_v6 }
 0x987   : > { %10366 = vmatpush1.bf16.msra.mxu1 %v18011_v8  ;;  %v18063_v8 = vld [vmem:[%s22867_s1 + $0x634] ss:$12 sps:$4 sm:$0xff]  }
 0x988   : > { %15711 = vmatpush3.bf16.msra.mxu0 %v18014_v23  ;;  %10367 = vmatprep.subr.bf16.mxu1 %v18017_v17  ;;  %v18061_v23 = vld [vmem:[%s22867_s1 + $0x630] ss:$12 sps:$4 sm:$0xff]  }
 0x989   : > { %15712 = vmatprep.subr.bf16.mxu0 %v19191_v25  ;;  %v18069_v17 = vld [vmem:[%s22867_s1 + $0x664] ss:$12 sps:$4 sm:$0xff]  }
 0x98a   : > { %9721 = vmatmul.mubr.bf16.gmra.mrb[104].mxu1 %v21665_v27  ;;  %10534 = vmatmul.mubr.bf16.gmra.mrb[116].mxu0 %v21999_v4  ;;  %v18040_v27 = vld [vmem:[%s22867_s1 + $0x588] ss:$12 sps:$4 sm:$0xff]  }
 0x98b   : > { %10368 = vmatpush1.bf16.msra.mxu1 %v18015_v1  ;;  %10391 = vmatprep.mubr.bf16.mxu1 %v21926_v33  ;;  %v18067_v1 = vld [vmem:[%s22867_s1 + $0x660] ss:$12 sps:$4 sm:$0xff]  }
 0x98c   : > { %15713 = vmatpush3.bf16.msra.mxu0 %v18018_v11  ;;  %10369 = vmatprep.subr.bf16.mxu1 %v18021_v38  ;;  %v18075_v11 = vld [vmem:[%s22867_s1 + $0x694] ss:$12 sps:$4 sm:$0xff]   ;;  %v18073_v38 = vld [vmem:[%s22867_s1 + $0x690] ss:$12 sps:$4 sm:$0xff]  }
 0x98d   : > { %15714 = vmatprep.subr.bf16.mxu0 %v19191_v25  ;;  %15720 = vmatprep.mubr.msk.bf16.mxu0 %vm19192_vm6, %v19191_v25 }
 0x98f   : > { %10370 = vmatpush1.bf16.msra.mxu1 %v18019_v43  ;;  %v18076_v43 = vld [vmem:[%s22867_s1 + $0x6a8] ss:$12 sps:$4 sm:$0xff]  }
 0x990   : > { %15715 = vmatpush3.bf16.msra.mxu0 %v18022_v22  ;;  %10371 = vmatprep.subr.bf16.mxu1 %v18025_v20 }
 0x991   : > { %15716 = vmatprep.subr.bf16.mxu0 %v19191_v25 }
 0x993   : > { %10372 = vmatpush1.bf16.msra.mxu1 %v18023_v21 }
 0x994   : > { %15717 = vmatpush3.bf16.msra.mxu0 %v18026_v45  ;;  %10373 = vmatprep.subr.bf16.mxu1 %v18029_v37 }
 0x995   : > { %15718 = vmatprep.subr.bf16.mxu0 %v19191_v25 }
 0x997   : > { %10374 = vmatpush1.bf16.msra.mxu1 %v18027_v57 }
 0x998   : > { %15719 = vmatpush3.bf16.msra.mxu0 %v18030_v56  ;;  %10375 = vmatprep.subr.bf16.mxu1 %v18033_v14 }
 0x99b   : > { %15721 = vmatmul.mubr.bf16.vlgmr.msra.gmra.mrb[120].mxu0 %v22083_v12  ;;  %10376 = vmatpush1.bf16.msra.mxu1 %v18031_v60 }
 0x99c   : > { %10377 = vmatprep.subr.bf16.mxu1 %v18036_v15  ;;  %15724 = vmatprep.mubr.msk.bf16.mxu0 %vm19192_vm6, %v19191_v25 }
 0x99f   : > { %10378 = vmatpush1.bf16.msra.mxu1 %v18034_v35 }
 0x9a0   : > { %10379 = vmatprep.subr.bf16.mxu1 %v18039_v58 }
 0x9a3   : > { %15725 = vmatmul.mubr.bf16.gmra.mrb[124].mxu0 %v22105_v59  ;;  %10380 = vmatpush1.bf16.msra.mxu1 %v18037_v18 }
 0x9a4   : > { %10381 = vmatprep.subr.bf16.mxu1 %v18042_v31  ;;  %15728 = vmatprep.mubr.msk.bf16.mxu0 %vm19192_vm6, %v19191_v25 }
 0x9a7   : > { %10382 = vmatpush1.bf16.msra.mxu1 %v18040_v27  ;;  %v15410_v48 = vpop.f32.mrb[60].mxu0 }
 0x9a8   : > { %v15411_v5 = vpop.f32.mrb[61].mxu0  ;;  %10383 = vmatprep.subr.bf16.mxu1 %v18045_v16 }
 0x9a9   : > { %v22122_v62 = vadd.f32 %v15411_v5, %v15410_v48  ;;  %v15413_v30 = vpop.f32.mrb[62].mxu0 }
 0x9aa   : > { %v15414_v33 = vpop.f32.mrb[63].mxu0 }
 0x9ab   : > { %15729 = vmatmul.mubr.bf16.gmra.mrb[128].mxu0 %v22095_v36  ;;  %10384 = vmatpush1.bf16.msra.mxu1 %v18043_v52  ;;  %v22125_v3 = vadd.f32 %v15414_v33, %v15413_v30 }
 0x9ac   : > { %10385 = vmatprep.subr.bf16.mxu1 %v18048_v28  ;;  %10927 = vmatprep.mubr.bf16.mxu0 %v22820_v6 }
 0x9af   : > { %10386 = vmatpush1.bf16.msra.mxu1 %v18046_v44  ;;  %v15416_v61 = vpop.f32.mrb[64].mxu0 }
 0x9b0   : > { %v15417_v34 = vpop.f32.mrb[65].mxu0  ;;  %10387 = vmatprep.subr.bf16.mxu1 %v18051_v47 }
 0x9b1   : > { %v22140_v9 = vadd.f32 %v15417_v34, %v15416_v61  ;;  %v15419_v13 = vpop.f32.mrb[66].mxu0 }
 0x9b2   : > { %v15420_v29 = vpop.f32.mrb[67].mxu0 }
 0x9b3   : > { %10388 = vmatpush1.bf16.msra.mxu1 %v18049_v40  ;;  %v22142_v19 = vadd.f32 %v15420_v29, %v15419_v13 }
 0x9b4   : > { %10389 = vmatprep.subr.bf16.mxu1 %v18054_v63 }
 0x9b7   : > { %10390 = vmatpush1.bf16.msra.mxu1 %v18052_v39  ;;  %v15422_v51 = vpop.f32.mrb[68].mxu0 }
 0x9b8   : > { %v15423_v42 = vpop.f32.mrb[69].mxu0  ;;  %10422 = vmatprep.subr.bf16.mxu1 %v18057_v0 }
 0x9b9   : > { %v15424_v24 = vadd.f32 %v15423_v42, %v15422_v51  ;;  %v15425_v26 = vpop.f32.mrb[70].mxu0 }
 0x9ba   : > { %10392 = vmatmul.mubr.bf16.vlgmr.msra.gmra.mrb[96].mxu1 %v21978_v10  ;;  %v15426_v46 = vpop.f32.mrb[71].mxu0  ;;  %v18066_v10 = vld [vmem:[%s22867_s1 + $0x64c] ss:$12 sps:$4 sm:$0xff]  }
 0x9bb   : > { %10401 = vmatprep.mubr.bf16.mxu1 %v21984_v2  ;;  %10423 = vmatpush1.bf16.msra.mxu1 %v18055_v41  ;;  %v15427_v55 = vadd.f32 %v15426_v46, %v15425_v26  ;;  %v18064_v2 = vld [vmem:[%s22867_s1 + $0x648] ss:$12 sps:$4 sm:$0xff]  }
 0x9bc   : > { %10424 = vmatprep.subr.bf16.mxu1 %v18060_v49 }
 0x9bf   : > { %10425 = vmatpush1.bf16.msra.mxu1 %v18058_v53 }
 0x9c0   : > { %10426 = vmatprep.subr.bf16.mxu1 %v18063_v8 }
 0x9c2   : > { %10402 = vmatmul.mubr.bf16.gmra.mrb[100].mxu1 %v22012_v7  ;;  %v18070_v7 = vld [vmem:[%s22867_s1 + $0x678] ss:$12 sps:$4 sm:$0xff]  }
 0x9c3   : > { %10411 = vmatprep.mubr.bf16.mxu1 %v21964_v50  ;;  %10427 = vmatpush1.bf16.msra.mxu1 %v18061_v23  ;;  %v18072_v50 = vld [vmem:[%s22867_s1 + $0x67c] ss:$12 sps:$4 sm:$0xff]  }
 0x9c4   : > { %10428 = vmatprep.subr.bf16.mxu1 %v18066_v10 }
 0x9c7   : > { %10429 = vmatpush1.bf16.msra.mxu1 %v18064_v2 }
 0x9c8   : > { %10430 = vmatprep.subr.bf16.mxu1 %v18069_v17 }
 0x9ca   : > { %10412 = vmatmul.mubr.bf16.gmra.mrb[104].mxu1 %v21999_v4  ;;  %v18078_v4 = vld [vmem:[%s22867_s1 + $0x6ac] ss:$12 sps:$4 sm:$0xff]  }
 0x9cb   : > { %10431 = vmatpush1.bf16.msra.mxu1 %v18067_v1  ;;  %10454 = vmatprep.mubr.bf16.mxu1 %v22820_v6 }
 0x9cc   : > { %10432 = vmatprep.subr.bf16.mxu1 %v18072_v50 }
 0x9cf   : > { %10433 = vmatpush1.bf16.msra.mxu1 %v18070_v7 }
 0x9d0   : > { %10434 = vmatprep.subr.bf16.mxu1 %v18075_v11 }
 0x9d3   : > { %10435 = vmatpush1.bf16.msra.mxu1 %v18073_v38 }
 0x9d4   : > { %10436 = vmatprep.subr.bf16.mxu1 %v18078_v4 }
 0x9d7   : > { %10437 = vmatpush1.bf16.msra.mxu1 %v18076_v43 }
 0x9da   : > { %10455 = vmatmul.mubr.bf16.vlgmr.msra.gmra.mrb[96].mxu1 %v22083_v12 }
 0x9db   : > { %10464 = vmatprep.mubr.bf16.mxu1 %v22820_v6 }
 0x9e2   : > { %10465 = vmatmul.mubr.bf16.gmra.mrb[100].mxu1 %v22105_v59 }
 0x9e3   : > { %10474 = vmatprep.mubr.bf16.mxu1 %v22820_v6 }
 0x9ea   : > { %10475 = vmatmul.mubr.bf16.gmra.mrb[104].mxu1 %v22095_v36 }
 0x9ec   : > { %v9198_v22 = vpop.f32.mrb[72].mxu0 }
 0x9ed   : > { %v9199_v20 = vadd.f32 %v22122_v62, %v9198_v22  ;;  %v15666_v21 = vpop.f32.mrb[73].mxu0 }
 0x9ee   : > { %v9201_v45 = vpop.f32.mrb[74].mxu0 }
 0x9ef   : > { %v9202_v37 = vadd.f32 %v22125_v3, %v9201_v45  ;;  %v15667_v57 = vpop.f32.mrb[75].mxu0 }
 0x9f4   : > { %v9206_v56 = vpop.f32.mrb[76].mxu0 }
 0x9f5   : > { %v9207_v14 = vadd.f32 %v22140_v9, %v9206_v56  ;;  %v15670_v54 = vpop.f32.mrb[77].mxu0 }
 0x9f6   : > { %v9209_v60 = vpop.f32.mrb[78].mxu0 }
 0x9f7   : > { %v9210_v32 = vadd.f32 %v22142_v19, %v9209_v60  ;;  %v15671_v15 = vpop.f32.mrb[79].mxu0 }
 0x9fc   : > { %v9214_v12 = vpop.f32.mrb[80].mxu0 }
 0x9fd   : > { %v9215_v35 = vadd.f32 %v15424_v24, %v9214_v12  ;;  %v15674_v58 = vpop.f32.mrb[81].mxu0 }
 0x9fe   : > { %v9217_v36 = vpop.f32.mrb[82].mxu0 }
 0x9ff   : > { %v9218_v18 = vadd.f32 %v15427_v55, %v9217_v36  ;;  %v15675_v31 = vpop.f32.mrb[83].mxu0 }
 0xa0c   : > { %v15455_v59 = vpop.f32.mrb[84].mxu0 }
 0xa0d   : > { %v15456_v27 = vpop.f32.mrb[85].mxu0 }
 0xa0e   : > { %v15457_v16 = vadd.f32 %v15456_v27, %v15455_v59  ;;  %v15458_v48 = vpop.f32.mrb[86].mxu0  ;;  %v22868_v27 = vld [vmem:[#allocation62_spill] sm:$0xff] }
 0xa0f   : > { %v15459_v52 = vpop.f32.mrb[87].mxu0 }
 0xa10   : > { %v15460_v5 = vadd.f32 %v15459_v52, %v15458_v48  ;;  %v9766_v28 = vadd.f32 %v15457_v16, %v9199_v20  ;;  %v22869_v16 = vsub.s32 2, %v22868_v27 }
 0xa12   : > { %v9769_v62 = vadd.f32 %v15460_v5, %v9202_v37 }
 0xa14   : > { %v15461_v30 = vpop.f32.mrb[88].mxu0 }
 0xa15   : > { %v15462_v33 = vpop.f32.mrb[89].mxu0 }
 0xa16   : > { %v15463_v3 = vadd.f32 %v15462_v33, %v15461_v30  ;;  %v15464_v44 = vpop.f32.mrb[90].mxu0 }
 0xa17   : > { %v15465_v47 = vpop.f32.mrb[91].mxu0 }
 0xa18   : > { %v15466_v61 = vadd.f32 %v15465_v47, %v15464_v44  ;;  %v9774_v40 = vadd.f32 %v15463_v3, %v9207_v14 }
 0xa1a   : > { %v9777_v34 = vadd.f32 %v15466_v61, %v9210_v32 }
 0xa1c   : > { %v15467_v63 = vpop.f32.mrb[92].mxu0 }
 0xa1d   : > { %v15468_v9 = vpop.f32.mrb[93].mxu0 }
 0xa1e   : > { %v15469_v13 = vadd.f32 %v15468_v9, %v15467_v63  ;;  %v15470_v29 = vpop.f32.mrb[94].mxu0 }
 0xa1f   : > { %v15471_v19 = vpop.f32.mrb[95].mxu0 }
 0xa20   : > { %v15472_v39 = vadd.f32 %v15471_v19, %v15470_v29  ;;  %v9782_v0 = vadd.f32 %v15469_v13, %v9215_v35 }
 0xa22   : > { %v9785_v51 = vadd.f32 %v15472_v39, %v9218_v18  ;;  %v10617_v18 = vld [vmem:[#allocation11] sm:$0x7] }
 0xa23   : > { %v10630_v48 = vrot.slane %v10617_v18, %v22869_v16 }
 0xa2d   : > { %v9822_v41 = vpop.f32.mrb[96].mxu0 }
 0xa2e   : > { %v9823_v42 = vadd.f32 %v9822_v41, %v9766_v28  ;;  %v15694_v49 = vpop.f32.mrb[97].mxu0 }
 0xa2f   : > { %v9825_v24 = vpop.f32.mrb[98].mxu0 }
 0xa30   : > { %v9826_v26 = vadd.f32 %v9825_v24, %v9769_v62  ;;  %v15695_v46 = vpop.f32.mrb[99].mxu0 }
 0xa35   : > { %v9830_v55 = vpop.f32.mrb[100].mxu0 }
 0xa36   : > { %v9831_v53 = vadd.f32 %v9830_v55, %v9774_v40  ;;  %v15698_v8 = vpop.f32.mrb[101].mxu0 }
 0xa37   : > { %v9833_v23 = vpop.f32.mrb[102].mxu0 }
 0xa38   : > { %v9834_v10 = vadd.f32 %v9833_v23, %v9777_v34  ;;  %v15699_v2 = vpop.f32.mrb[103].mxu0 }
 0xa3d   : > { %v9838_v17 = vpop.f32.mrb[104].mxu0 }
 0xa3e   : > { %v9839_v1 = vadd.f32 %v9838_v17, %v9782_v0  ;;  %v15702_v50 = vpop.f32.mrb[105].mxu0 }
 0xa3f   : > { %v9841_v7 = vpop.f32.mrb[106].mxu0 }
 0xa40   : > { %v9842_v11 = vadd.f32 %v9841_v7, %v9785_v51  ;;  %v15703_v38 = vpop.f32.mrb[107].mxu0 }
 0xa4d   : > { %v15500_v4 = vpop.f32.mrb[108].mxu0 }
 0xa4e   : > { %v15501_v43 = vpop.f32.mrb[109].mxu0 }
 0xa4f   : > { %v15502_v22 = vadd.f32 %v15501_v43, %v15500_v4  ;;  %v15503_v20 = vpop.f32.mrb[110].mxu0 }
 0xa50   : > { %v15504_v21 = vpop.f32.mrb[111].mxu0 }
 0xa51   : > { %v15505_v45 = vadd.f32 %v15504_v21, %v15503_v20 }
 0xa55   : > { %v15506_v37 = vpop.f32.mrb[112].mxu0 }
 0xa56   : > { %v15507_v57 = vpop.f32.mrb[113].mxu0 }
 0xa57   : > { %v15508_v56 = vadd.f32 %v15507_v57, %v15506_v37  ;;  %v15509_v14 = vpop.f32.mrb[114].mxu0 }
 0xa58   : > { %v15510_v54 = vpop.f32.mrb[115].mxu0 }
 0xa59   : > { %v15511_v60 = vadd.f32 %v15510_v54, %v15509_v14 }
 0xa5d   : > { %v15512_v32 = vpop.f32.mrb[116].mxu0 }
 0xa5e   : > { %v15513_v15 = vpop.f32.mrb[117].mxu0 }
 0xa5f   : > { %v15514_v12 = vadd.f32 %v15513_v15, %v15512_v32  ;;  %v15515_v35 = vpop.f32.mrb[118].mxu0  ;;  %v22870_v32 = vld [vmem:[#allocation81_spill] sm:$0xff] }
 0xa60   : > { %v15516_v58 = vpop.f32.mrb[119].mxu0  ;;  %v10622_v15 = vrot.slane %v10617_v18, %v22870_v32 }
 0xa61   : > { %v15517_v36 = vadd.f32 %v15516_v58, %v15515_v35 }
 0xa6e   : > { %v10576_v31 = vpop.f32.mrb[120].mxu0 }
 0xa6f   : > { %v10577_v59 = vadd.f32 %v15502_v22, %v10576_v31  ;;  %v15722_v52 = vpop.f32.mrb[121].mxu0 }
 0xa70   : > { %v10579_v5 = vpop.f32.mrb[122].mxu0 }
 0xa71   : > { %v10601_v28 = vadd.f32 %v10577_v59, %v9823_v42  ;;  %v10580_v62 = vadd.f32 %v15505_v45, %v10579_v5  ;;  %v15723_v30 = vpop.f32.mrb[123].mxu0 }
 0xa73   : > { %v10636_v33 = vadd.f32 %v10630_v48, %v10601_v28  ;;  %v10604_v3 = vadd.f32 %v10580_v62, %v9826_v26 }
 0xa75   : > { %v10654_v44 = vmax.f32 %v10636_v33, 0.0  ;;  %v10639_v47 = vadd.f32 %v10630_v48, %v10604_v3 }
 0xa76   : > { %v10584_v61 = vpop.f32.mrb[124].mxu0 }
 0xa77   : > { %v10657_v40 = vmax.f32 %v10639_v47, 0.0  ;;  %v10585_v34 = vadd.f32 %v15508_v56, %v10584_v61  ;;  %v15726_v63 = vpop.f32.mrb[125].mxu0  ;;  %v10694_v13 = vrot.slane %v10654_v44, 1 }
 0xa78   : > { %v10587_v9 = vpop.f32.mrb[126].mxu0 }
 0xa79   : > { %v10695_v29 = vrot.slane %v10657_v40, 1  ;;  %v10607_v19 = vadd.f32 %v10585_v34, %v9831_v53  ;;  %v10588_v39 = vadd.f32 %v15511_v60, %v10587_v9  ;;  %v15727_v0 = vpop.f32.mrb[127].mxu0 }
 0xa7b   : > { %v10642_v51 = vadd.f32 %v10630_v48, %v10607_v19  ;;  %v10610_v41 = vadd.f32 %v10588_v39, %v9834_v10  ;;  %v10696_v42 = vsel %vm4339_vm1, %v10694_v13, %v10695_v29 }
 0xa7c   : > { %v22213_v49 = vmax.f32 %v10654_v44, %v10696_v42 }
 0xa7d   : > { %v10660_v24 = vmax.f32 %v10642_v51, 0.0  ;;  %v10645_v26 = vadd.f32 %v10630_v48, %v10610_v41 }
 0xa7e   : > { %v10592_v46 = vpop.f32.mrb[128].mxu0 }
 0xa7f   : > { %v10701_v55 = vrot.slane %v10660_v24, 1  ;;  %v10663_v8 = vmax.f32 %v10645_v26, 0.0  ;;  %v10593_v23 = vadd.f32 %v15514_v12, %v10592_v46  ;;  %v15730_v2 = vpop.f32.mrb[129].mxu0  ;;  %v22871_v12 = vld [vmem:[#allocation82_spill] sm:$0xff] }
 0xa80   : > { %v10595_v17 = vpop.f32.mrb[130].mxu0  ;;  %v10626_v35 = vrot.slane %v10617_v18, %v22871_v12 }
 0xa81   : > { %v10707_v50 = vrot.slane %v10663_v8, 1  ;;  %v10613_v7 = vadd.f32 %v10593_v23, %v9839_v1  ;;  %v10596_v38 = vadd.f32 %v15517_v36, %v10595_v17  ;;  %v15731_v53 = vpop.f32.mrb[131].mxu0  ;;  %v10702_v4 = vsel %vm4339_vm1, %v10695_v29, %v10701_v55 }
 0xa82   : > { %v22216_v43 = vmax.f32 %v10657_v40, %v10702_v4 }
 0xa83   : > { %v10648_v10 = vadd.f32 %v10630_v48, %v10613_v7  ;;  %v10616_v22 = vadd.f32 %v10596_v38, %v9842_v11  ;;  %v10708_v20 = vsel %vm4339_vm1, %v10701_v55, %v10707_v50 }
 0xa84   : > { %v22219_v21 = vmax.f32 %v10660_v24, %v10708_v20 }
 0xa85   : > { %v10666_v45 = vmax.f32 %v10648_v10, 0.0  ;;  %v22221_v37 = vadd.f32 %v10630_v48, %v10616_v22 }
 0xa87   : > { %v10713_v57 = vrot.slane %v10666_v45, 1  ;;  %v10669_v56 = vmax.f32 %v22221_v37, 0.0 }
 0xa89   : > { %v22226_v1 = vrot.slane %v10669_v56, 1  ;;  %v10714_v14 = vsel %vm4339_vm1, %v10707_v50, %v10713_v57 }
 0xa8a   : > { %v22229_v54 = vmax.f32 %v10663_v8, %v10714_v14 }
 0xa8b   : > { %v10720_v11 = vsel %vm4339_vm1, %v10713_v57, %v22226_v1 }
 0xa8c   : > { %v22233_v60 = vmax.f32 %v10666_v45, %v10720_v11 }
 0xaad   : > { %v10456_v58 = vpop.f32.mrb[96].mxu1 }
 0xaae   : > { %v10634_v36 = vadd.f32 %v10622_v15, %v10456_v58  ;;  %v10458_v31 = vpop.f32.mrb[97].mxu1 }
 0xaaf   : > { %v10635_v59 = vadd.f32 %v10626_v35, %v10458_v31  ;;  %v10460_v27 = vpop.f32.mrb[98].mxu1 }
 0xab0   : > { %v10652_v16 = vmax.f32 %v10634_v36, 0.0  ;;  %v10637_v48 = vadd.f32 %v10622_v15, %v10460_v27  ;;  %v10462_v52 = vpop.f32.mrb[99].mxu1 }
 0xab1   : > { %v10653_v5 = vmax.f32 %v10635_v59, 0.0  ;;  %v10638_v28 = vadd.f32 %v10626_v35, %v10462_v52 }
 0xab2   : > { %v10655_v62 = vmax.f32 %v10637_v48, 0.0  ;;  %v10688_v33 = vrot.slane %v10652_v16, 1 }
 0xab3   : > { %v10656_v30 = vmax.f32 %v10638_v28, 0.0  ;;  %v10691_v44 = vrot.slane %v10653_v5, 1 }
 0xab4   : > { %v10689_v3 = vrot.slane %v10655_v62, 1 }
 0xab5   : > { %v10692_v47 = vrot.slane %v10656_v30, 1  ;;  %v10466_v61 = vpop.f32.mrb[100].mxu1 }
 0xab6   : > { %v10640_v40 = vadd.f32 %v10622_v15, %v10466_v61  ;;  %v10468_v34 = vpop.f32.mrb[101].mxu1  ;;  %v10690_v18 = vsel %vm4339_vm1, %v10688_v33, %v10689_v3 }
 0xab7   : > { %v10641_v63 = vadd.f32 %v10626_v35, %v10468_v34  ;;  %v10470_v9 = vpop.f32.mrb[102].mxu1  ;;  %v10693_v13 = vsel %vm4339_vm1, %v10691_v44, %v10692_v47  ;;  %v22239_v29 = vmax.f32 %v10652_v16, %v10690_v18 }
 0xab8   : > { %v10658_v19 = vmax.f32 %v10640_v40, 0.0  ;;  %v10643_v39 = vadd.f32 %v10622_v15, %v10470_v9  ;;  %v10472_v0 = vpop.f32.mrb[103].mxu1  ;;  %v22241_v51 = vmax.f32 %v10653_v5, %v10693_v13 }
 0xab9   : > { %v10659_v41 = vmax.f32 %v10641_v63, 0.0  ;;  %v10644_v42 = vadd.f32 %v10626_v35, %v10472_v0 }
 0xaba   : > { %v10697_v24 = vrot.slane %v10658_v19, 1  ;;  %v10661_v26 = vmax.f32 %v10643_v39, 0.0  ;;  %v16865_v46 = vpack.i.bf16 %v22213_v49, %v22241_v51 }
 0xabb   : > { %v10699_v55 = vrot.slane %v10659_v41, 1  ;;  %v10662_v8 = vmax.f32 %v10644_v42, 0.0 }
 0xabc   : > { %v10703_v23 = vrot.slane %v10661_v26, 1  ;;  %16866 = vrot.lane.b32.xlu0 %v16865_v46, %s19189_s7  ;;  %v10698_v2 = vsel %vm4339_vm1, %v10689_v3, %v10697_v24 }
 0xabd   : > { %v10705_v17 = vrot.slane %v10662_v8, 1  ;;  %v10476_v50 = vpop.f32.mrb[104].mxu1  ;;  %v22247_v7 = vmax.f32 %v10655_v62, %v10698_v2  ;;  %v10700_v38 = vsel %vm4339_vm1, %v10692_v47, %v10699_v55 }
 0xabe   : > { %v10646_v53 = vadd.f32 %v10622_v15, %v10476_v50  ;;  %v10478_v4 = vpop.f32.mrb[105].mxu1  ;;  %v22250_v10 = vmax.f32 %v10656_v30, %v10700_v38  ;;  %v10704_v22 = vsel %vm4339_vm1, %v10697_v24, %v10703_v23 }
 0xabf   : > { %v10647_v20 = vadd.f32 %v10626_v35, %v10478_v4  ;;  %v10480_v45 = vpop.f32.mrb[106].mxu1  ;;  %v16870_v57 = vpack.i.bf16 %v22247_v7, %v22239_v29  ;;  %v10706_v14 = vsel %vm4339_vm1, %v10699_v55, %v10705_v17  ;;  %v22256_v11 = vmax.f32 %v10658_v19, %v10704_v22 }
 0xac0   : > { %v10664_v58 = vmax.f32 %v10646_v53, 0.0  ;;  %v10649_v36 = vadd.f32 %v10622_v15, %v10480_v45  ;;  %v10482_v31 = vpop.f32.mrb[107].mxu1  ;;  %v16875_v59 = vpack.i.bf16 %v22216_v43, %v22250_v10  ;;  %v22260_v27 = vmax.f32 %v10659_v41, %v10706_v14 }
 0xac1   : > { %v10665_v16 = vmax.f32 %v10647_v20, 0.0  ;;  %v10650_v48 = vadd.f32 %v10626_v35, %v10482_v31  ;;  %16871 = vrot.lane.b32.xlu0 %v16870_v57, %s19189_s7  ;;  %v22295_v41 = vmax.f32 %v10669_v56, %v22226_v1 }
 0xac2   : > { %v10709_v52 = vrot.slane %v10664_v58, 1  ;;  %v10667_v5 = vmax.f32 %v10649_v36, 0.0  ;;  %16876 = vrot.lane.b32.xlu1 %v16875_v59, %s19189_s7  ;;  %v16880_v15 = vpack.i.bf16 %v22219_v21, %v22260_v27 }
 0xac3   : > { %v10711_v28 = vrot.slane %v10665_v16, 1  ;;  %v10668_v62 = vmax.f32 %v10650_v48, 0.0 }
 0xac4   : > { %v10715_v30 = vrot.slane %v10667_v5, 1  ;;  %v10710_v33 = vsel %vm4339_vm1, %v10703_v23, %v10709_v52 }
 0xac5   : > { %v10717_v3 = vrot.slane %v10668_v62, 1  ;;  %v22267_v44 = vmax.f32 %v10661_v26, %v10710_v33  ;;  %v10712_v47 = vsel %vm4339_vm1, %v10705_v17, %v10711_v28 }
 0xac6   : > { %16881 = vrot.lane.b32.xlu1 %v16880_v15, %s19189_s7  ;;  %v10749_v35 = vmax.f32 %v10662_v8, %v10712_v47  ;;  %v10716_v61 = vsel %vm4339_vm1, %v10709_v52, %v10715_v30  ;;  %v22277_v63 = vmax.f32 %v10667_v5, %v10715_v30 }
 0xac7   : > { %v16885_v40 = vpack.i.bf16 %v22267_v44, %v22256_v11  ;;  %v10718_v34 = vsel %vm4339_vm1, %v10711_v28, %v10717_v3  ;;  %v22275_v18 = vmax.f32 %v10664_v58, %v10716_v61  ;;  %v22284_v19 = vmax.f32 %v10668_v62, %v10717_v3 }
 0xac8   : > { %v16890_v9 = vpack.i.bf16 %v22229_v54, %v10749_v35  ;;  %v22280_v13 = vmax.f32 %v10665_v16, %v10718_v34  ;;  %v16895_v39 = vpack.i.bf16 %v22277_v63, %v22233_v60 }
 0xac9   : > { %v16905_v42 = vpack.i.bf16 %v22295_v41, %v22284_v19 }
 0xaca   : > { %16886 = vrot.lane.b32.xlu1 %v16885_v40, %s19189_s7  ;;  %16891 = vrot.lane.b32.xlu0 %v16890_v9, %s19189_s7  ;;  %v16900_v0 = vpack.i.bf16 %v22280_v13, %v22275_v18 }
 0xace   : > { %16896 = vrot.lane.b32.xlu1 %v16895_v39, %s19189_s7  ;;  %16901 = vrot.lane.b32.xlu0 %v16900_v0, %s19189_s7 }
 0xad2   : > { %16906 = vrot.lane.b32.xlu0 %v16905_v42, %s19189_s7 }
 0xb2e   : > { %v16867_v24 = vpop.permute.xlu0 %16866 }
 0xb2f   : > { %v16869_v26 = vunpack.i.h.bf16 %v16867_v24  ;;  %v16868_v46 = vunpack.i.l.bf16 %v16867_v24 }
 0xb31   : > { %v10812_v17 = vsel %vm6488_vm2, %v16868_v46, %v16869_v26 }
 0xb32   : > { %v10842_v20 = vmax.f32 %v22241_v51, %v10812_v17  ;;  %v10843_v17 = vmax.f32 %v22213_v49, %v16869_v26  ;;  %v18083_v26 = vld [vmem:[#allocation14 + $0x4] ss:$8 sps:$4 sm:$0xff]  }
 0xb33   : > { %v16872_v55 = vpop.permute.xlu0 %16871 }
 0xb34   : > { %v16874_v8 = vunpack.i.h.bf16 %v16872_v55  ;;  %v16873_v23 = vunpack.i.l.bf16 %v16872_v55  ;;  %v16877_v2 = vpop.permute.xlu1 %16876 }
 0xb35   : > { %v16879_v50 = vunpack.i.h.bf16 %v16877_v2  ;;  %v16878_v38 = vunpack.i.l.bf16 %v16877_v2 }
 0xb36   : > { %v10811_v37 = vsel %vm6488_vm2, %v16873_v23, %v16868_v46 }
 0xb37   : > { %v10841_v56 = vmax.f32 %v22239_v29, %v10811_v37  ;;  %v10813_v1 = vsel %vm6488_vm2, %v16874_v8, %v16878_v38  ;;  %v10814_v53 = vsel %vm6488_vm2, %v16878_v38, %v16879_v50 }
 0xb38   : > { %v10844_v4 = vmax.f32 %v22247_v7, %v10813_v1  ;;  %v16882_v22 = vpop.permute.xlu1 %16881  ;;  %v10845_v45 = vmax.f32 %v22250_v10, %v10814_v53  ;;  %v18079_v1 = vld [vmem:[#allocation12] sm:$0xff]  }
 0xb39   : > { %v16884_v57 = vunpack.i.h.bf16 %v16882_v22  ;;  %v16883_v14 = vunpack.i.l.bf16 %v16882_v22  ;;  %v18086_v53 = vld [vmem:[#allocation14 + $0x14] ss:$8 sps:$4 sm:$0xff]   ;;  %v18087_v22 = vld [vmem:[#allocation14 + $0x20] ss:$8 sps:$4 sm:$0xff]  }
 0xb3a   : > { %v10860_v58 = vpack.c.bf16 %v10845_v45, %v10842_v20  ;;  %v10859_v36 = vpack.c.bf16 %v10844_v4, %v10841_v56  ;;  %v18089_v4 = vld [vmem:[#allocation14 + $0x24] ss:$8 sps:$4 sm:$0xff]   ;;  %v18092_v20 = vld [vmem:[#allocation14 + $0x34] ss:$8 sps:$4 sm:$0xff]   ;;  %v18090_v45 = vld [vmem:[#allocation14 + $0x30] ss:$8 sps:$4 sm:$0xff]  }
 0xb3b   : > { %v10816_v31 = vsel %vm6488_vm2, %v16883_v14, %v16884_v57 }
 0xb3c   : > { %10895 = vmatprep.subr.bf16.mxu0 %v10860_v58  ;;  %v16887_v59 = vpop.permute.xlu1 %16886  ;;  %v16892_v29 = vpop.permute.xlu0 %16891  ;;  %v10848_v33 = vmax.f32 %v22260_v27, %v10816_v31  ;;  %v18098_v58 = vld [vmem:[#allocation14 + $0x54] ss:$8 sps:$4 sm:$0xff]   ;;  %v18101_v31 = vld [vmem:[#allocation14 + $0x64] ss:$8 sps:$4 sm:$0xff]  }
 0xb3d   : > { %v16889_v16 = vunpack.i.h.bf16 %v16887_v59  ;;  %v16888_v48 = vunpack.i.l.bf16 %v16887_v59  ;;  %v16894_v52 = vunpack.i.h.bf16 %v16892_v29  ;;  %v16893_v5 = vunpack.i.l.bf16 %v16892_v29  ;;  %10896 = vmatpush1.bf16.msra.mxu0 %v10859_v36  ;;  %v18096_v36 = vld [vmem:[#allocation14 + $0x50] ss:$8 sps:$4 sm:$0xff]   ;;  %v18099_v59 = vld [vmem:[#allocation14 + $0x60] ss:$8 sps:$4 sm:$0xff]   ;;  %v18104_v29 = vld [vmem:[#allocation14 + $0x74] ss:$8 sps:$4 sm:$0xff]  }
 0xb3f   : > { %v10815_v7 = vsel %vm6488_vm2, %v16888_v48, %v16883_v14  ;;  %v10817_v51 = vsel %vm6488_vm2, %v16889_v16, %v16893_v5  ;;  %v10818_v10 = vsel %vm6488_vm2, %v16893_v5, %v16894_v52  ;;  %v10852_v56 = vmax.f32 %v22229_v54, %v16894_v52  ;;  %v18093_v14 = vld [vmem:[#allocation14 + $0x40] ss:$8 sps:$4 sm:$0xff]   ;;  %v18102_v16 = vld [vmem:[#allocation14 + $0x70] ss:$8 sps:$4 sm:$0xff]   ;;  %v18107_v48 = vld [vmem:[#allocation14 + $0x84] ss:$8 sps:$4 sm:$0xff]  }
 0xb40   : > { %v10847_v28 = vmax.f32 %v22256_v11, %v10815_v7  ;;  %v10850_v62 = vmax.f32 %v22267_v44, %v10817_v51  ;;  %v16897_v30 = vpop.permute.xlu1 %16896  ;;  %v16902_v15 = vpop.permute.xlu0 %16901  ;;  %v10851_v3 = vmax.f32 %v10749_v35, %v10818_v10  ;;  %v10846_v44 = vmax.f32 %v22216_v43, %v16879_v50  ;;  %v18105_v52 = vld [vmem:[#allocation14 + $0x80] ss:$8 sps:$4 sm:$0xff]   ;;  %v18110_v5 = vld [vmem:[#allocation14 + $0x94] ss:$8 sps:$4 sm:$0xff]   ;;  %v18108_v7 = vld [vmem:[#allocation14 + $0x90] ss:$8 sps:$4 sm:$0xff]  }
 0xb41   : > { %v16898_v47 = vunpack.i.l.bf16 %v16897_v30  ;;  %v16904_v61 = vunpack.i.h.bf16 %v16902_v15  ;;  %v16903_v40 = vunpack.i.l.bf16 %v16902_v15  ;;  %v16899_v39 = vunpack.i.h.bf16 %v16897_v30  ;;  %v18113_v51 = vld [vmem:[#allocation14 + $0xa4] ss:$8 sps:$4 sm:$0xff]   ;;  %v18111_v10 = vld [vmem:[#allocation14 + $0xa0] ss:$8 sps:$4 sm:$0xff]  }
 0xb42   : > { %v10863_v34 = vpack.c.bf16 %v10851_v3, %v10848_v33  ;;  %v10862_v9 = vpack.c.bf16 %v10850_v62, %v10847_v28  ;;  %v10861_v50 = vpack.c.bf16 %v10846_v44, %v10843_v17  ;;  %v18116_v28 = vld [vmem:[#allocation14 + $0xb4] ss:$8 sps:$4 sm:$0xff]   ;;  %v18114_v62 = vld [vmem:[#allocation14 + $0xb0] ss:$8 sps:$4 sm:$0xff]   ;;  %v18119_v30 = vld [vmem:[#allocation14 + $0xc4] ss:$8 sps:$4 sm:$0xff]  }
 0xb43   : > { %v10820_v42 = vsel %vm6488_vm2, %v16904_v61, %v16898_v47  ;;  %v10819_v24 = vsel %vm6488_vm2, %v16903_v40, %v16904_v61  ;;  %v10855_v54 = vmax.f32 %v22233_v60, %v16898_v47  ;;  %v18084_v60 = vld [vmem:[#allocation14 + $0x10] ss:$8 sps:$4 sm:$0xff]   ;;  %v18117_v15 = vld [vmem:[#allocation14 + $0xc0] ss:$8 sps:$4 sm:$0xff]   ;;  %v18122_v33 = vld [vmem:[#allocation14 + $0xd4] ss:$8 sps:$4 sm:$0xff]  }
 0xb44   : > { %10897 = vmatprep.subr.bf16.mxu0 %v10863_v34  ;;  %v16907_v0 = vpop.permute.xlu0 %16906  ;;  %v10854_v55 = vmax.f32 %v22280_v13, %v10820_v42  ;;  %v10853_v8 = vmax.f32 %v22275_v18, %v10819_v24  ;;  %v10849_v18 = vmax.f32 %v22219_v21, %v16884_v57  ;;  %v18095_v57 = vld [vmem:[#allocation14 + $0x44] ss:$8 sps:$4 sm:$0xff]   ;;  %v18120_v3 = vld [vmem:[#allocation14 + $0xd0] ss:$8 sps:$4 sm:$0xff]   ;;  %v18123_v61 = vld [vmem:[#allocation14 + $0xe0] ss:$8 sps:$4 sm:$0xff]  }
 0xb45   : > { %v16909_v11 = vunpack.i.h.bf16 %v16907_v0  ;;  %v16908_v46 = vunpack.i.l.bf16 %v16907_v0  ;;  %10898 = vmatpush1.bf16.msra.mxu0 %v10862_v9  ;;  %v18125_v47 = vld [vmem:[#allocation14 + $0xe4] ss:$8 sps:$4 sm:$0xff]   ;;  %v18126_v40 = vld [vmem:[#allocation14 + $0xf0] ss:$8 sps:$4 sm:$0xff]   ;;  %v18128_v34 = vld [vmem:[#allocation14 + $0xf4] ss:$8 sps:$4 sm:$0xff]  }
 0xb46   : > { %v10864_v49 = vpack.c.bf16 %v10852_v56, %v10849_v18  ;;  %v18131_v9 = vld [vmem:[#allocation14 + $0x104] ss:$8 sps:$4 sm:$0xff]   ;;  %v18155_v24 = vld [vmem:[#allocation15 + $0x110] ss:$8 sps:$4 sm:$0xff]   ;;  %v18170_v17 = vld [vmem:[#allocation15 + $0x160] ss:$8 sps:$4 sm:$0xff]  }
 0xb47   : > { %v10821_v27 = vsel %vm6488_vm2, %v16899_v39, %v16908_v46  ;;  %v10822_v35 = vsel %vm6488_vm2, %v16908_v46, %v16909_v11  ;;  %v18152_v39 = vld [vmem:[#allocation15 + $0x100] ss:$8 sps:$4 sm:$0xff]   ;;  %v18154_v0 = vld [vmem:[#allocation15 + $0x104] ss:$8 sps:$4 sm:$0xff]   ;;  %v18157_v42 = vld [vmem:[#allocation15 + $0x114] ss:$8 sps:$4 sm:$0xff]  }
 0xb48   : > { %v10856_v23 = vmax.f32 %v22277_v63, %v10821_v27  ;;  %v10857_v2 = vmax.f32 %v22284_v19, %v10822_v35  ;;  %v10858_v63 = vmax.f32 %v22295_v41, %v16909_v11  ;;  %v18080_v19 = vld [vmem:[#allocation12 + $0x8] ss:$0 sps:$4 sm:$0x77]   ;;  %v18081_v41 = vld [vmem:[#allocation14] ss:$8 sps:$4 sm:$0xff]   ;;  %11659 = vmatprep.subr.bf16.mxu1 %v18154_v0 }
 0xb49   : > { %11660 = vmatpush1.bf16.msra.mxu1 %v18152_v39  ;;  %v18160_v11 = vld [vmem:[#allocation15 + $0x124] ss:$8 sps:$4 sm:$0xff]   ;;  %v18158_v46 = vld [vmem:[#allocation15 + $0x120] ss:$8 sps:$4 sm:$0xff]   ;;  %v18163_v44 = vld [vmem:[#allocation15 + $0x134] ss:$8 sps:$4 sm:$0xff]  }
 0xb4a   : > { %v10866_v38 = vpack.c.bf16 %v10857_v2, %v10854_v55  ;;  %v10865_v37 = vpack.c.bf16 %v10856_v23, %v10853_v8  ;;  %v10867_v13 = vpack.c.bf16 %v10858_v63, %v10855_v54  ;;  %11661 = vmatprep.subr.bf16.mxu1 %v18157_v42  ;;  %v18161_v27 = vld [vmem:[#allocation15 + $0x130] ss:$8 sps:$4 sm:$0xff]   ;;  %v18166_v35 = vld [vmem:[#allocation15 + $0x144] ss:$8 sps:$4 sm:$0xff]   ;;  %v18164_v55 = vld [vmem:[#allocation15 + $0x140] ss:$8 sps:$4 sm:$0xff]  }
 0xb4b   : > { %v18169_v8 = vld [vmem:[#allocation15 + $0x154] ss:$8 sps:$4 sm:$0xff]   ;;  %v18167_v23 = vld [vmem:[#allocation15 + $0x150] ss:$8 sps:$4 sm:$0xff]   ;;  %v18172_v2 = vld [vmem:[#allocation15 + $0x164] ss:$8 sps:$4 sm:$0xff]  }
 0xb4c   : > { %15033 = vmatprep.subr.msk.bf16.mxu0 %vm6760_vm3, %v10866_v38  ;;  %v10887_v43 = vsel %vm6760_vm3, %v10865_v37, 0  ;;  %v10893_v21 = vsel %vm6760_vm3, %v10867_v13, 0  ;;  %v18175_v38 = vld [vmem:[#allocation15 + $0x174] ss:$8 sps:$4 sm:$0xff]   ;;  %v18173_v37 = vld [vmem:[#allocation15 + $0x170] ss:$8 sps:$4 sm:$0xff]  }
 0xb4d   : > { %10900 = vmatpush1.bf16.msra.mxu0 %v10887_v43  ;;  %11662 = vmatpush1.bf16.msra.mxu1 %v18155_v24  ;;  %v18178_v56 = vld [vmem:[#allocation15 + $0x184] ss:$8 sps:$4 sm:$0xff]   ;;  %v18176_v43 = vld [vmem:[#allocation15 + $0x180] ss:$8 sps:$4 sm:$0xff]   ;;  %v18185_v54 = vld [vmem:[#allocation15 + $0x1b0] ss:$8 sps:$4 sm:$0xff]  }
 0xb4e   : > { %15732 = vmatprep.subr.bf16.mxu0 %v10861_v50  ;;  %11663 = vmatprep.subr.bf16.mxu1 %v18160_v11  ;;  %v18184_v18 = vld [vmem:[#allocation15 + $0x1a4] ss:$8 sps:$4 sm:$0xff]   ;;  %v18182_v63 = vld [vmem:[#allocation15 + $0x1a0] ss:$8 sps:$4 sm:$0xff]   ;;  %v18191_v0 = vld [vmem:[#allocation15 + $0x1d0] ss:$8 sps:$4 sm:$0xff]  }
 0xb4f   : > { %v18190_v39 = vld [vmem:[#allocation15 + $0x1c4] ss:$8 sps:$4 sm:$0xff]   ;;  %v18193_v42 = vld [vmem:[#allocation15 + $0x1d4] ss:$8 sps:$4 sm:$0xff]   ;;  %v18194_v24 = vld [vmem:[#allocation15 + $0x1e0] ss:$8 sps:$4 sm:$0xff]  }
 0xb50   : > { %15034 = vmatmul.mubr.msk.bf16.vlgmr.msra.gmra.mrb[132].mxu0 %vm10879_vm7, %v18079_v1  ;;  %v18196_v11 = vld [vmem:[#allocation15 + $0x1e4] ss:$8 sps:$4 sm:$0xff]  }
 0xb51   : > { %15733 = vmatpush3.bf16.msra.mxu0 %v10861_v50  ;;  %10937 = vmatprep.mubr.bf16.mxu0 %v22820_v6  ;;  %v18181_v50 = vld [vmem:[#allocation15 + $0x194] ss:$8 sps:$4 sm:$0xff]  }
 0xb52   : > { %15734 = vmatprep.subr.bf16.mxu0 %v10864_v49  ;;  %11664 = vmatpush1.bf16.msra.mxu1 %v18158_v46  ;;  %v18199_v46 = vld [vmem:[#allocation15 + $0x1f4] ss:$8 sps:$4 sm:$0xff]  }
 0xb53   : > { %11665 = vmatprep.subr.bf16.mxu1 %v18163_v44  ;;  %v18197_v44 = vld [vmem:[#allocation15 + $0x1f0] ss:$8 sps:$4 sm:$0xff]  }
 0xb55   : > { %15735 = vmatpush3.bf16.msra.mxu0 %v10864_v49  ;;  %v18187_v49 = vld [vmem:[#allocation15 + $0x1b4] ss:$8 sps:$4 sm:$0xff]  }
 0xb56   : > { %16409 = vmatprep.subr.msk.bf16.mxu0 %vm6760_vm3, %v10867_v13  ;;  %11666 = vmatpush1.bf16.msra.mxu1 %v18161_v27  ;;  %v18202_v27 = vld [vmem:[#allocation15 + $0x4] ss:$8 sps:$4 sm:$0xff]  }
 0xb57   : > { %11667 = vmatprep.subr.bf16.mxu1 %v18166_v35 }
 0xb58   : > { %15035 = vmatmul.mubr.msk.bf16.gmra.mrb[136].mxu0 %vm10879_vm7, %v18080_v19 }
 0xb59   : > { %15737 = vmatpush3.bf16.msra.mxu0 %v10893_v21  ;;  %15738 = vmatprep.mubr.msk.bf16.mxu0 %vm10879_vm7, %v18079_v1  ;;  %v18179_v1 = vld [vmem:[#allocation15 + $0x190] ss:$8 sps:$4 sm:$0xff]  }
 0xb5a   : > { %11294 = vmatprep.subr.bf16.mxu0 %v18083_v26  ;;  %11668 = vmatpush1.bf16.msra.mxu1 %v18164_v55 }
 0xb5b   : > { %11669 = vmatprep.subr.bf16.mxu1 %v18169_v8 }
 0xb5e   : > { %11670 = vmatpush1.bf16.msra.mxu1 %v18167_v23 }
 0xb5f   : > { %11671 = vmatprep.subr.bf16.mxu1 %v18172_v2 }
 0xb60   : > { %15739 = vmatmul.mubr.msk.bf16.vlgmr.msra.gmra.mrb[140].mxu0 %vm10879_vm7, %v18080_v19 }
 0xb61   : > { %11295 = vmatpush1.bf16.msra.mxu0 %v18081_v41 }
 0xb62   : > { %11296 = vmatprep.subr.bf16.mxu0 %v18086_v53  ;;  %11672 = vmatpush1.bf16.msra.mxu1 %v18170_v17 }
 0xb63   : > { %11673 = vmatprep.subr.bf16.mxu1 %v18175_v38 }
 0xb65   : > { %11297 = vmatpush1.bf16.msra.mxu0 %v18084_v60  ;;  %v18129_v60 = vld [vmem:[#allocation14 + $0x100] ss:$8 sps:$4 sm:$0xff]  }
 0xb66   : > { %11298 = vmatprep.subr.bf16.mxu0 %v18089_v4  ;;  %11674 = vmatpush1.bf16.msra.mxu1 %v18173_v37  ;;  %v18134_v4 = vld [vmem:[#allocation14 + $0x114] ss:$8 sps:$4 sm:$0xff]  }
 0xb67   : > { %11675 = vmatprep.subr.bf16.mxu1 %v18178_v56 }
 0xb69   : > { %11299 = vmatpush1.bf16.msra.mxu0 %v18087_v22  ;;  %v18132_v22 = vld [vmem:[#allocation14 + $0x110] ss:$8 sps:$4 sm:$0xff]  }
 0xb6a   : > { %11300 = vmatprep.subr.bf16.mxu0 %v18092_v20  ;;  %11676 = vmatpush1.bf16.msra.mxu1 %v18176_v43 }
 0xb6b   : > { %11677 = vmatprep.subr.bf16.mxu1 %v18181_v50 }
 0xb6d   : > { %11301 = vmatpush1.bf16.msra.mxu0 %v18090_v45  ;;  %v18137_v45 = vld [vmem:[#allocation14 + $0x124] ss:$8 sps:$4 sm:$0xff]  }
 0xb6e   : > { %11302 = vmatprep.subr.bf16.mxu0 %v18095_v57  ;;  %11678 = vmatpush1.bf16.msra.mxu1 %v18179_v1 }
 0xb6f   : > { %11679 = vmatprep.subr.bf16.mxu1 %v18184_v18 }
 0xb71   : > { %11303 = vmatpush1.bf16.msra.mxu0 %v18093_v14 }
 0xb72   : > { %11304 = vmatprep.subr.bf16.mxu0 %v18098_v58  ;;  %11680 = vmatpush1.bf16.msra.mxu1 %v18182_v63 }
 0xb73   : > { %11681 = vmatprep.subr.bf16.mxu1 %v18187_v49 }
 0xb75   : > { %11305 = vmatpush1.bf16.msra.mxu0 %v18096_v36 }
 0xb76   : > { %11306 = vmatprep.subr.bf16.mxu0 %v18101_v31  ;;  %11682 = vmatpush1.bf16.msra.mxu1 %v18185_v54 }
 0xb77   : > { %11683 = vmatprep.subr.bf16.mxu1 %v18190_v39  ;;  %v18238_v39 = vld [vmem:[#allocation15 + $0xc4] ss:$8 sps:$4 sm:$0xff]  }
 0xb79   : > { %11307 = vmatpush1.bf16.msra.mxu0 %v18099_v59  ;;  %v18135_v59 = vld [vmem:[#allocation14 + $0x120] ss:$8 sps:$4 sm:$0xff]  }
 0xb7a   : > { %11308 = vmatprep.subr.bf16.mxu0 %v18104_v29  ;;  %v18140_v29 = vld [vmem:[#allocation14 + $0x134] ss:$8 sps:$4 sm:$0xff]  }
 0xb7d   : > { %11309 = vmatpush1.bf16.msra.mxu0 %v18102_v16  ;;  %v18138_v16 = vld [vmem:[#allocation14 + $0x130] ss:$8 sps:$4 sm:$0xff]  }
 0xb7e   : > { %11310 = vmatprep.subr.bf16.mxu0 %v18107_v48 }
 0xb81   : > { %11311 = vmatpush1.bf16.msra.mxu0 %v18105_v52  ;;  %v18143_v52 = vld [vmem:[#allocation14 + $0x144] ss:$8 sps:$4 sm:$0xff]  }
 0xb82   : > { %11312 = vmatprep.subr.bf16.mxu0 %v18110_v5 }
 0xb85   : > { %11313 = vmatpush1.bf16.msra.mxu0 %v18108_v7 }
 0xb86   : > { %11314 = vmatprep.subr.bf16.mxu0 %v18113_v51 }
 0xb89   : > { %11315 = vmatpush1.bf16.msra.mxu0 %v18111_v10  ;;  %v18141_v10 = vld [vmem:[#allocation14 + $0x140] ss:$8 sps:$4 sm:$0xff]  }
 0xb8a   : > { %11316 = vmatprep.subr.bf16.mxu0 %v18116_v28 }
 0xb8d   : > { %11317 = vmatpush1.bf16.msra.mxu0 %v18114_v62  ;;  %v18146_v62 = vld [vmem:[#allocation14 + $0x154] ss:$8 sps:$4 sm:$0xff]  }
 0xb8e   : > { %11318 = vmatprep.subr.bf16.mxu0 %v18119_v30  ;;  %v18144_v30 = vld [vmem:[#allocation14 + $0x150] ss:$8 sps:$4 sm:$0xff]  }
 0xb91   : > { %11319 = vmatpush1.bf16.msra.mxu0 %v18117_v15  ;;  %v18149_v15 = vld [vmem:[#allocation14 + $0x164] ss:$8 sps:$4 sm:$0xff]  }
 0xb92   : > { %11320 = vmatprep.subr.bf16.mxu0 %v18122_v33  ;;  %v11046_v33 = vld [vmem:[#allocation14 + $0x170] sm:$0xff] }
 0xb95   : > { %11321 = vmatpush1.bf16.msra.mxu0 %v18120_v3  ;;  %v18147_v3 = vld [vmem:[#allocation14 + $0x160] ss:$8 sps:$4 sm:$0xff]  }
 0xb96   : > { %11322 = vmatprep.subr.bf16.mxu0 %v18125_v47  ;;  %v15085_v47 = vcombine.high %v11046_v33, %v11046_v33 }
 0xb99   : > { %11323 = vmatpush1.bf16.msra.mxu0 %v18123_v61  ;;  %v15084_v61 = vcombine.low %v11046_v33, %v11046_v33  ;;  %v18224_v33 = vld [vmem:[#allocation15 + $0x80] ss:$8 sps:$4 sm:$0xff]  }
 0xb9a   : > { %11324 = vmatprep.subr.bf16.mxu0 %v18128_v34 }
 0xb9d   : > { %11325 = vmatpush1.bf16.msra.mxu0 %v18126_v40  ;;  %v11289_v40 = vsel %vm7947_vm5, %v15084_v61, 0  ;;  %v18232_v61 = vld [vmem:[#allocation15 + $0xa4] ss:$8 sps:$4 sm:$0xff]  }
 0xb9e   : > { %11345 = vmatprep.subr.bf16.mxu0 %v18131_v9  ;;  %v18188_v9 = vld [vmem:[#allocation15 + $0x1c0] ss:$8 sps:$4 sm:$0xff]  }
 0xb9f   : > { %11684 = vmatpush1.bf16.msra.mxu1 %v18188_v9  ;;  %v18233_v9 = vld [vmem:[#allocation15 + $0xb0] ss:$8 sps:$4 sm:$0xff]  }
 0xba0   : > { %11685 = vmatprep.subr.bf16.mxu1 %v18193_v42  ;;  %v18241_v42 = vld [vmem:[#allocation15 + $0xd4] ss:$8 sps:$4 sm:$0xff]  }
 0xba3   : > { %11686 = vmatpush1.bf16.msra.mxu1 %v18191_v0  ;;  %v18236_v0 = vld [vmem:[#allocation15 + $0xc0] ss:$8 sps:$4 sm:$0xff]  }
 0xba4   : > { %11687 = vmatprep.subr.bf16.mxu1 %v18196_v11  ;;  %v18244_v11 = vld [vmem:[#allocation15 + $0xe4] ss:$8 sps:$4 sm:$0xff]  }
 0xba7   : > { %11688 = vmatpush1.bf16.msra.mxu1 %v18194_v24  ;;  %v18239_v24 = vld [vmem:[#allocation15 + $0xd0] ss:$8 sps:$4 sm:$0xff]  }
 0xba8   : > { %11689 = vmatprep.subr.bf16.mxu1 %v18199_v46  ;;  %v18242_v46 = vld [vmem:[#allocation15 + $0xe0] ss:$8 sps:$4 sm:$0xff]  }
 0xbab   : > { %11690 = vmatpush1.bf16.msra.mxu1 %v18197_v44  ;;  %v18247_v44 = vld [vmem:[#allocation15 + $0xf4] ss:$8 sps:$4 sm:$0xff]  }
 0xbac   : > { %11870 = vmatprep.subr.bf16.mxu1 %v18202_v27  ;;  %v18245_v27 = vld [vmem:[#allocation15 + $0xf0] ss:$8 sps:$4 sm:$0xff]  }
 0xc23   : > { %v10929_v13 = vpop.f32.mrb[132].mxu0 }
 0xc24   : > { %v10931_v19 = vpop.f32.mrb[133].mxu0 }
 0xc25   : > { %v10933_v26 = vpop.f32.mrb[134].mxu0 }
 0xc26   : > { %v10994_v21 = vpack.c.bf16 %v10933_v26, %v10929_v13  ;;  %v10935_v41 = vpop.f32.mrb[135].mxu0 }
 0xc27   : > { %v10995_v53 = vpack.c.bf16 %v10935_v41, %v10931_v19 }
 0xc29   : > { %11326 = vmatprep.mubr.bf16.mxu0 %v10995_v53 }
 0xc2a   : > { %11327 = vmatmul.mubr.bf16.vlgmr.msra.gmra.mrb[144].mxu0 %v10994_v21 }
 0xc2b   : > { %11346 = vmatpush1.bf16.msra.mxu0 %v18129_v60  ;;  %v10939_v20 = vpop.f32.mrb[136].mxu0 }
 0xc2c   : > { %11347 = vmatprep.subr.bf16.mxu0 %v18134_v4  ;;  %v10941_v57 = vpop.f32.mrb[137].mxu0  ;;  %v10997_v36 = vpack.c.bf16 %v10939_v20, %v10939_v20  ;;  %v18200_v4 = vld [vmem:[#allocation15] ss:$8 sps:$4 sm:$0xff]  }
 0xc2d   : > { %v10998_v14 = vpack.c.bf16 %v10941_v57, %v10941_v57  ;;  %v10943_v58 = vpop.f32.mrb[138].mxu0  ;;  %v18205_v57 = vld [vmem:[#allocation15 + $0x14] ss:$8 sps:$4 sm:$0xff]  }
 0xc2e   : > { %v10944_v31 = vpop.f32.mrb[139].mxu0  ;;  %v18203_v58 = vld [vmem:[#allocation15 + $0x10] ss:$8 sps:$4 sm:$0xff]  }
 0xc2f   : > { %11348 = vmatpush1.bf16.msra.mxu0 %v18132_v22  ;;  %11336 = vmatprep.mubr.bf16.mxu0 %v10998_v14 }
 0xc30   : > { %11349 = vmatprep.subr.bf16.mxu0 %v18137_v45 }
 0xc32   : > { %11337 = vmatmul.mubr.bf16.gmra.mrb[148].mxu0 %v10997_v36  ;;  %v18208_v36 = vld [vmem:[#allocation15 + $0x24] ss:$8 sps:$4 sm:$0xff]  }
 0xc33   : > { %11350 = vmatpush1.bf16.msra.mxu0 %v18135_v59  ;;  %v15740_v48 = vpop.f32.mrb[140].mxu0  ;;  %11377 = vmatprep.mubr.bf16.mxu0 %v22820_v6  ;;  %v18206_v59 = vld [vmem:[#allocation15 + $0x20] ss:$8 sps:$4 sm:$0xff]  }
 0xc34   : > { %11351 = vmatprep.subr.bf16.mxu0 %v18140_v29  ;;  %v10980_v5 = vpop.f32.mrb[141].mxu0  ;;  %v10999_v34 = vpack.c.bf16 %v15740_v48, %v15740_v48  ;;  %v18209_v48 = vld [vmem:[#allocation15 + $0x30] ss:$8 sps:$4 sm:$0xff]  }
 0xc35   : > { %v15741_v7 = vpop.f32.mrb[142].mxu0 }
 0xc36   : > { %v10983_v51 = vpop.f32.mrb[143].mxu0  ;;  %v18217_v7 = vld [vmem:[#allocation15 + $0x54] ss:$8 sps:$4 sm:$0xff]  }
 0xc37   : > { %11352 = vmatpush1.bf16.msra.mxu0 %v18138_v16  ;;  %v10996_v28 = vpack.c.bf16 %v10983_v51, %v10980_v5  ;;  %v18211_v16 = vld [vmem:[#allocation15 + $0x34] ss:$8 sps:$4 sm:$0xff]   ;;  %v18212_v5 = vld [vmem:[#allocation15 + $0x40] ss:$8 sps:$4 sm:$0xff]   ;;  %v18215_v51 = vld [vmem:[#allocation15 + $0x50] ss:$8 sps:$4 sm:$0xff]  }
 0xc38   : > { %11353 = vmatprep.subr.bf16.mxu0 %v18143_v52  ;;  %v18214_v52 = vld [vmem:[#allocation15 + $0x44] ss:$8 sps:$4 sm:$0xff]  }
 0xc3b   : > { %11354 = vmatpush1.bf16.msra.mxu0 %v18141_v10  ;;  %v18220_v10 = vld [vmem:[#allocation15 + $0x64] ss:$8 sps:$4 sm:$0xff]  }
 0xc3c   : > { %11355 = vmatprep.subr.bf16.mxu0 %v18146_v62  ;;  %v18223_v62 = vld [vmem:[#allocation15 + $0x74] ss:$8 sps:$4 sm:$0xff]  }
 0xc3f   : > { %11356 = vmatpush1.bf16.msra.mxu0 %v18144_v30  ;;  %v18221_v30 = vld [vmem:[#allocation15 + $0x70] ss:$8 sps:$4 sm:$0xff]  }
 0xc40   : > { %11357 = vmatprep.subr.bf16.mxu0 %v18149_v15  ;;  %v18226_v15 = vld [vmem:[#allocation15 + $0x84] ss:$8 sps:$4 sm:$0xff]  }
 0xc43   : > { %11358 = vmatpush1.bf16.msra.mxu0 %v18147_v3  ;;  %v18229_v3 = vld [vmem:[#allocation15 + $0x94] ss:$8 sps:$4 sm:$0xff]  }
 0xc44   : > { %15086 = vmatprep.subr.msk.bf16.mxu0 %vm7947_vm5, %v15085_v47  ;;  %v18227_v47 = vld [vmem:[#allocation15 + $0x90] ss:$8 sps:$4 sm:$0xff]  }
 0xc47   : > { %11360 = vmatpush1.bf16.msra.mxu0 %v11289_v40  ;;  %v18230_v40 = vld [vmem:[#allocation15 + $0xa0] ss:$8 sps:$4 sm:$0xff]  }
 0xc4a   : > { %15087 = vmatmul.mubr.msk.bf16.vlgmr.msra.gmra.mrb[144].mxu0 %vm6488_vm2, %v10996_v28  ;;  %v18218_v28 = vld [vmem:[#allocation15 + $0x60] ss:$8 sps:$4 sm:$0xff]  }
 0xc4b   : > { %11387 = vmatprep.mubr.bf16.mxu0 %v22820_v6 }
 0xc52   : > { %15088 = vmatmul.mubr.msk.bf16.gmra.mrb[148].mxu0 %vm6488_vm2, %v10999_v34  ;;  %v18235_v34 = vld [vmem:[#allocation15 + $0xb4] ss:$8 sps:$4 sm:$0xff]  }
 0xc53   : > { %12327 = vmatprep.mubr.bf16.mxu0 %v22820_v6 }
 0xd1d   : > { %v11379_v35 = vpop.f32.mrb[144].mxu0 }
 0xd1e   : > { %v11381_v6 = vpop.f32.mrb[145].mxu0 }
 0xd1f   : > { %v11383_v55 = vpop.f32.mrb[146].mxu0 }
 0xd20   : > { %v22345_v8 = vpack.c.bf16 %v11383_v55, %v11379_v35  ;;  %v11385_v23 = vpop.f32.mrb[147].mxu0  ;;  %v18250_v35 = vld [vmem:[#allocation15 + $0x204] ss:$8 sps:$4 sm:$0xff]   ;;  %v18253_v55 = vld [vmem:[#allocation15 + $0x214] ss:$8 sps:$4 sm:$0xff]  }
 0xd21   : > { %v22347_v2 = vpack.c.bf16 %v11385_v23, %v11381_v6  ;;  %v18248_v6 = vld [vmem:[#allocation15 + $0x200] ss:$8 sps:$4 sm:$0xff]   ;;  %v18251_v23 = vld [vmem:[#allocation15 + $0x210] ss:$8 sps:$4 sm:$0xff]  }
 0xd22   : > { %v11468_v38 = vshll.u32 %v22345_v8, 16  ;;  %v11466_v26 = vshrl.u32 %v22345_v8, 16 }
 0xd23   : > { %v11480_v17 = vshll.u32 %v22347_v2, 16  ;;  %v11478_v13 = vshrl.u32 %v22347_v2, 16 }
 0xd24   : > { %v11470_v63 = vrot.slane %v11468_v38, 1 }
 0xd25   : > { %v11389_v37 = vpop.f32.mrb[148].mxu0  ;;  %v11482_v18 = vrot.slane %v11480_v17, 1  ;;  %v18256_v17 = vld [vmem:[#allocation15 + $0x224] ss:$8 sps:$4 sm:$0xff]  }
 0xd26   : > { %v22351_v56 = vpack.c.bf16 %v11389_v37, %v11389_v37  ;;  %v11391_v43 = vpop.f32.mrb[149].mxu0  ;;  %v11471_v22 = vor.u32 %v11470_v63, %v11466_v26  ;;  %v18254_v37 = vld [vmem:[#allocation15 + $0x220] ss:$8 sps:$4 sm:$0xff]   ;;  %v18257_v63 = vld [vmem:[#allocation15 + $0x230] ss:$8 sps:$4 sm:$0xff]  }
 0xd27   : > { %v22353_v50 = vpack.c.bf16 %v11391_v43, %v11391_v43  ;;  %v11393_v1 = vpop.f32.mrb[150].mxu0  ;;  %v11483_v41 = vor.u32 %v11482_v18, %v11478_v13  ;;  %v11961_v43 = vrot.slane %v22347_v2, 1  ;;  %v18265_v13 = vld [vmem:[#allocation15 + $0x254] ss:$8 sps:$4 sm:$0xff]   ;;  %v18266_v26 = vld [vmem:[#allocation15 + $0x260] ss:$8 sps:$4 sm:$0xff]  }
 0xd28   : > { %v11473_v49 = vshll.u32 %v22351_v56, 16  ;;  %v11394_v54 = vpop.f32.mrb[151].mxu0  ;;  %v11489_v31 = vshrl.u32 %v22351_v56, 16  ;;  %v18259_v1 = vld [vmem:[#allocation15 + $0x234] ss:$8 sps:$4 sm:$0xff]  }
 0xd29   : > { %v11485_v19 = vshll.u32 %v22353_v50, 16  ;;  %v11492_v60 = vshrl.u32 %v22353_v50, 16  ;;  %v11962_v38 = vrot.slane %v22353_v50, 1  ;;  %v18260_v54 = vld [vmem:[#allocation15 + $0x240] ss:$8 sps:$4 sm:$0xff]  }
 0xd2a   : > { %v11475_v21 = vrot.slane %v11473_v49, 1  ;;  %v18262_v49 = vld [vmem:[#allocation15 + $0x244] ss:$8 sps:$4 sm:$0xff]  }
 0xd2b   : > { %v11487_v53 = vrot.slane %v11485_v19, 1  ;;  %v11963_v18 = vsel %vm4339_vm1, %v11961_v43, %v11962_v38  ;;  %v18263_v19 = vld [vmem:[#allocation15 + $0x250] ss:$8 sps:$4 sm:$0xff]  }
 0xd2c   : > { %v11476_v14 = vsel %vm1460_vm0, %v11471_v22, %v11475_v21  ;;  %v11491_v29 = vor.u32 %v11489_v31, %v11475_v21  ;;  %v18271_v21 = vld [vmem:[#allocation15 + $0x274] ss:$8 sps:$4 sm:$0xff]   ;;  %v18275_v22 = vld [vmem:[#allocation15 + $0x290] ss:$8 sps:$4 sm:$0xff]  }
 0xd2d   : > { %v11488_v20 = vsel %vm1460_vm0, %v11483_v41, %v11487_v53  ;;  %v11494_v45 = vor.u32 %v11492_v60, %v11487_v53  ;;  %v18269_v41 = vld [vmem:[#allocation15 + $0x270] ss:$8 sps:$4 sm:$0xff]   ;;  %v18274_v53 = vld [vmem:[#allocation15 + $0x284] ss:$8 sps:$4 sm:$0xff]   ;;  %v18272_v60 = vld [vmem:[#allocation15 + $0x280] ss:$8 sps:$4 sm:$0xff]  }
 0xd2e   : > { %11691 = vmatprep.mubr.bf16.mxu1 %v11488_v20  ;;  %v18280_v20 = vld [vmem:[#allocation15 + $0x2a4] ss:$8 sps:$4 sm:$0xff]   ;;  %v18289_v31 = vld [vmem:[#allocation15 + $0x2d4] ss:$8 sps:$4 sm:$0xff]  }
 0xd2f   : > { %11692 = vmatmul.mubr.bf16.vlgmr.msra.gmra.mrb[108].mxu1 %v11476_v14  ;;  %v18281_v14 = vld [vmem:[#allocation15 + $0x2b0] ss:$8 sps:$4 sm:$0xff]  }
 0xd30   : > { %11871 = vmatpush1.bf16.msra.mxu1 %v18200_v4  ;;  %11701 = vmatprep.mubr.bf16.mxu1 %v11494_v45  ;;  %v18277_v4 = vld [vmem:[#allocation15 + $0x294] ss:$8 sps:$4 sm:$0xff]   ;;  %v18278_v45 = vld [vmem:[#allocation15 + $0x2a0] ss:$8 sps:$4 sm:$0xff]  }
 0xd31   : > { %11872 = vmatprep.subr.bf16.mxu1 %v18205_v57  ;;  %v18283_v57 = vld [vmem:[#allocation15 + $0x2b4] ss:$8 sps:$4 sm:$0xff]  }
 0xd34   : > { %11873 = vmatpush1.bf16.msra.mxu1 %v18203_v58  ;;  %v18286_v58 = vld [vmem:[#allocation15 + $0x2c4] ss:$8 sps:$4 sm:$0xff]  }
 0xd35   : > { %11874 = vmatprep.subr.bf16.mxu1 %v18208_v36  ;;  %v18284_v36 = vld [vmem:[#allocation15 + $0x2c0] ss:$8 sps:$4 sm:$0xff]  }
 0xd37   : > { %11702 = vmatmul.mubr.bf16.gmra.mrb[112].mxu1 %v11491_v29  ;;  %v18292_v29 = vld [vmem:[#allocation15 + $0x2e4] ss:$8 sps:$4 sm:$0xff]  }
 0xd38   : > { %11875 = vmatpush1.bf16.msra.mxu1 %v18206_v59  ;;  %11902 = vmatprep.mubr.bf16.mxu1 %v22347_v2  ;;  %v18268_v2 = vld [vmem:[#allocation15 + $0x264] ss:$8 sps:$4 sm:$0xff]   ;;  %v18287_v59 = vld [vmem:[#allocation15 + $0x2d0] ss:$8 sps:$4 sm:$0xff]  }
 0xd39   : > { %11876 = vmatprep.subr.bf16.mxu1 %v18211_v16  ;;  %v18290_v16 = vld [vmem:[#allocation15 + $0x2e0] ss:$8 sps:$4 sm:$0xff]  }
 0xd3c   : > { %11877 = vmatpush1.bf16.msra.mxu1 %v18209_v48  ;;  %v18295_v48 = vld [vmem:[#allocation15 + $0x2f4] ss:$8 sps:$4 sm:$0xff]  }
 0xd3d   : > { %11878 = vmatprep.subr.bf16.mxu1 %v18214_v52  ;;  %v18293_v52 = vld [vmem:[#allocation15 + $0x2f0] ss:$8 sps:$4 sm:$0xff]  }
 0xd40   : > { %11879 = vmatpush1.bf16.msra.mxu1 %v18212_v5  ;;  %v11959_v5 = vrot.slane %v22351_v56, 1 }
 0xd41   : > { %11880 = vmatprep.subr.bf16.mxu1 %v18217_v7  ;;  %v11958_v7 = vrot.slane %v22345_v8, 1 }
 0xd44   : > { %11881 = vmatpush1.bf16.msra.mxu1 %v18215_v51  ;;  %v11960_v51 = vsel %vm4339_vm1, %v11958_v7, %v11959_v5 }
 0xd45   : > { %11882 = vmatprep.subr.bf16.mxu1 %v18220_v10 }
 0xd48   : > { %11883 = vmatpush1.bf16.msra.mxu1 %v18218_v28 }
 0xd49   : > { %11884 = vmatprep.subr.bf16.mxu1 %v18223_v62 }
 0xd4c   : > { %11885 = vmatpush1.bf16.msra.mxu1 %v18221_v30 }
 0xd4d   : > { %11886 = vmatprep.subr.bf16.mxu1 %v18226_v15 }
 0xd50   : > { %11887 = vmatpush1.bf16.msra.mxu1 %v18224_v33 }
 0xd51   : > { %11888 = vmatprep.subr.bf16.mxu1 %v18229_v3 }
 0xd54   : > { %11889 = vmatpush1.bf16.msra.mxu1 %v18227_v47 }
 0xd55   : > { %11890 = vmatprep.subr.bf16.mxu1 %v18232_v61  ;;  %v12185_v61 = vld [vmem:[#allocation17] sm:$0x3] }
 0xd58   : > { %11891 = vmatpush1.bf16.msra.mxu1 %v18230_v40  ;;  %v12190_v40 = vrot.slane %v12185_v61, %v22870_v32 }
 0xd59   : > { %11892 = vmatprep.subr.bf16.mxu1 %v18235_v34 }
 0xd5c   : > { %11893 = vmatpush1.bf16.msra.mxu1 %v18233_v9 }
 0xd5d   : > { %11894 = vmatprep.subr.bf16.mxu1 %v18238_v39 }
 0xd60   : > { %11895 = vmatpush1.bf16.msra.mxu1 %v18236_v0 }
 0xd61   : > { %11896 = vmatprep.subr.bf16.mxu1 %v18241_v42 }
 0xd64   : > { %11897 = vmatpush1.bf16.msra.mxu1 %v18239_v24 }
 0xd65   : > { %11898 = vmatprep.subr.bf16.mxu1 %v18244_v11 }
 0xd68   : > { %11899 = vmatpush1.bf16.msra.mxu1 %v18242_v46 }
 0xd69   : > { %11900 = vmatprep.subr.bf16.mxu1 %v18247_v44 }
 0xd6c   : > { %11901 = vmatpush1.bf16.msra.mxu1 %v18245_v27 }
 0xd6d   : > { %12128 = vmatprep.subr.bf16.mxu1 %v18250_v35 }
 0xd6f   : > { %11903 = vmatmul.mubr.bf16.vlgmr.msra.gmra.mrb[108].mxu1 %v22345_v8 }
 0xd70   : > { %11912 = vmatprep.mubr.bf16.mxu1 %v22353_v50  ;;  %12129 = vmatpush1.bf16.msra.mxu1 %v18248_v6  ;;  %v12194_v50 = vrot.slane %v12185_v61, %v22871_v12 }
 0xd71   : > { %12130 = vmatprep.subr.bf16.mxu1 %v18253_v55 }
 0xd74   : > { %12131 = vmatpush1.bf16.msra.mxu1 %v18251_v23 }
 0xd75   : > { %12132 = vmatprep.subr.bf16.mxu1 %v18256_v17 }
 0xd77   : > { %11913 = vmatmul.mubr.bf16.gmra.mrb[116].mxu1 %v22351_v56 }
 0xd78   : > { %12133 = vmatpush1.bf16.msra.mxu1 %v18254_v37  ;;  %12160 = vmatprep.mubr.bf16.mxu1 %v11963_v18 }
 0xd79   : > { %12134 = vmatprep.subr.bf16.mxu1 %v18259_v1 }
 0xd7c   : > { %12135 = vmatpush1.bf16.msra.mxu1 %v18257_v63 }
 0xd7d   : > { %12136 = vmatprep.subr.bf16.mxu1 %v18262_v49 }
 0xd80   : > { %12137 = vmatpush1.bf16.msra.mxu1 %v18260_v54 }
 0xd81   : > { %12138 = vmatprep.subr.bf16.mxu1 %v18265_v13 }
 0xd84   : > { %12139 = vmatpush1.bf16.msra.mxu1 %v18263_v19 }
 0xd85   : > { %12140 = vmatprep.subr.bf16.mxu1 %v18268_v2 }
 0xd88   : > { %12141 = vmatpush1.bf16.msra.mxu1 %v18266_v26 }
 0xd89   : > { %12142 = vmatprep.subr.bf16.mxu1 %v18271_v21 }
 0xd8c   : > { %12143 = vmatpush1.bf16.msra.mxu1 %v18269_v41 }
 0xd8d   : > { %12144 = vmatprep.subr.bf16.mxu1 %v18274_v53 }
 0xd90   : > { %12145 = vmatpush1.bf16.msra.mxu1 %v18272_v60 }
 0xd91   : > { %12146 = vmatprep.subr.bf16.mxu1 %v18277_v4 }
 0xd94   : > { %12147 = vmatpush1.bf16.msra.mxu1 %v18275_v22 }
 0xd95   : > { %12148 = vmatprep.subr.bf16.mxu1 %v18280_v20 }
 0xd98   : > { %12149 = vmatpush1.bf16.msra.mxu1 %v18278_v45 }
 0xd99   : > { %12150 = vmatprep.subr.bf16.mxu1 %v18283_v57 }
 0xd9c   : > { %12151 = vmatpush1.bf16.msra.mxu1 %v18281_v14 }
 0xd9d   : > { %12152 = vmatprep.subr.bf16.mxu1 %v18286_v58 }
 0xda0   : > { %12153 = vmatpush1.bf16.msra.mxu1 %v18284_v36 }
 0xda1   : > { %12154 = vmatprep.subr.bf16.mxu1 %v18289_v31 }
 0xda4   : > { %12155 = vmatpush1.bf16.msra.mxu1 %v18287_v59 }
 0xda5   : > { %12156 = vmatprep.subr.bf16.mxu1 %v18292_v29 }
 0xda8   : > { %12157 = vmatpush1.bf16.msra.mxu1 %v18290_v16 }
 0xda9   : > { %12158 = vmatprep.subr.bf16.mxu1 %v18295_v48  ;;  %v22872_v48 = vmov 65535  }
 0xdac   : > { %12159 = vmatpush1.bf16.msra.mxu1 %v18293_v52  ;;  %v12287_v52 = vsel %vm12285_vm8, 4294967295, %v22872_v48 }
 0xdad   : > { %15808 = vmatprep.subr.bf16.mxu1 %v19191_v25 }
 0xdaf   : > { %12161 = vmatmul.mubr.bf16.vlgmr.msra.gmra.mrb[108].mxu1 %v11960_v51 }
 0xdb0   : > { %12170 = vmatprep.mubr.bf16.mxu1 %v11962_v38 }
 0xdb7   : > { %12171 = vmatmul.mubr.bf16.gmra.mrb[120].mxu1 %v11959_v5 }
 0xdb8   : > { %15824 = vmatprep.mubr.msk.bf16.mxu1 %vm19192_vm6, %v19191_v25 }
 0xe0a   : > { %v11703_v10 = vpop.f32.mrb[112].mxu1 }
 0xe0b   : > { %v11705_v28 = vpop.f32.mrb[113].mxu1 }
 0xe0c   : > { %v11707_v62 = vpop.f32.mrb[114].mxu1 }
 0xe0d   : > { %v11708_v30 = vpop.f32.mrb[115].mxu1 }
 0xe4a   : > { %v11914_v56 = vpop.f32.mrb[116].mxu1 }
 0xe4b   : > { %v11915_v15 = vadd.f32 %v11914_v56, %v11703_v10  ;;  %v11916_v8 = vpop.f32.mrb[117].mxu1 }
 0xe4c   : > { %v11917_v33 = vadd.f32 %v11916_v8, %v11705_v28  ;;  %v11918_v3 = vpop.f32.mrb[118].mxu1 }
 0xe4d   : > { %v11919_v47 = vpop.f32.mrb[119].mxu1 }
 0xe82   : > { %v12162_v34 = vpop.f32.mrb[108].mxu1 }
 0xe83   : > { %v12197_v9 = vadd.f32 %v12190_v40, %v12162_v34  ;;  %v12164_v39 = vpop.f32.mrb[109].mxu1 }
 0xe84   : > { %v12198_v0 = vadd.f32 %v12194_v50, %v12164_v39  ;;  %v12166_v42 = vpop.f32.mrb[110].mxu1 }
 0xe85   : > { %v12203_v24 = vmax.f32 %v12197_v9, 0.0  ;;  %v12199_v11 = vadd.f32 %v12190_v40, %v12166_v42  ;;  %v12168_v46 = vpop.f32.mrb[111].mxu1  ;;  %v18297_v42 = vld [vmem:[#allocation20 + $0x40] sm:$0xff]  }
 0xe86   : > { %v12204_v44 = vmax.f32 %v12198_v0, 0.0  ;;  %v12200_v27 = vadd.f32 %v12194_v50, %v12168_v46  ;;  %v18298_v46 = vld [vmem:[#allocation20] sm:$0xff]  }
 0xe87   : > { %v12205_v35 = vmax.f32 %v12199_v11, 0.0  ;;  %v12215_v55 = vrot.slane %v12203_v24, 1  ;;  %v18296_v11 = vld [vmem:[#allocation18] sm:$0x1f]  }
 0xe88   : > { %v12206_v6 = vmax.f32 %v12200_v27, 0.0  ;;  %v12218_v17 = vrot.slane %v12204_v44, 1  ;;  %v18300_v27 = vld [vmem:[#allocation20 + $0x8] sm:$0xff]  }
 0xe89   : > { %v12216_v23 = vrot.slane %v12205_v35, 1 }
 0xe8a   : > { %v12219_v38 = vrot.slane %v12206_v6, 1  ;;  %v12172_v37 = vpop.f32.mrb[120].mxu1 }
 0xe8b   : > { %v12183_v32 = vadd.f32 %v12172_v37, %v11915_v15  ;;  %v12174_v43 = vpop.f32.mrb[121].mxu1  ;;  %v12217_v12 = vsel %vm4339_vm1, %v12215_v55, %v12216_v23  ;;  %v12288_v15 = vsel %vm12286_vm9, %v12287_v52, 0  ;;  %v18303_v55 = vld [vmem:[#allocation20 + $0x58] sm:$0xff]   ;;  %v18307_v37 = vld [vmem:[#allocation20 + $0x68] sm:$0xff]  }
 0xe8c   : > { %v12184_v1 = vadd.f32 %v12174_v43, %v11917_v33  ;;  %v12176_v18 = vpop.f32.mrb[122].mxu1  ;;  %v12220_v63 = vsel %vm4339_vm1, %v12218_v17, %v12219_v38  ;;  %v12231_v49 = vmax.f32 %v12203_v24, %v12217_v12  ;;  %v18305_v17 = vld [vmem:[#allocation20 + $0x60] sm:$0xff]   ;;  %v18309_v43 = vld [vmem:[#allocation20 + $0x70] sm:$0xff]  }
 0xe8d   : > { %v12201_v54 = vadd.f32 %v12190_v40, %v12183_v32  ;;  %v12177_v13 = vpop.f32.mrb[123].mxu1  ;;  %v12232_v19 = vmax.f32 %v12204_v44, %v12220_v63  ;;  %v18299_v44 = vld [vmem:[#allocation20 + $0x48] sm:$0xff]   ;;  %v18310_v12 = vld [vmem:[#allocation20 + $0x30] sm:$0xff]   ;;  %v18312_v18 = vld [vmem:[#allocation20 + $0x38] sm:$0xff]  }
 0xe8e   : > { %v12202_v2 = vadd.f32 %v12194_v50, %v12184_v1  ;;  %v18308_v32 = vld [vmem:[#allocation20 + $0x28] sm:$0xff]   ;;  %v18311_v1 = vld [vmem:[#allocation20 + $0x78] ss:$0 sps:$4 sm:$0xff]  }
 0xe8f   : > { %v12207_v26 = vmax.f32 %v12201_v54, 0.0  ;;  %v16910_v21 = vpack.i.bf16 %v12232_v19, %v12231_v49 }
 0xe90   : > { %v12208_v41 = vmax.f32 %v12202_v2, 0.0 }
 0xe91   : > { %v12221_v53 = vrot.slane %v12207_v26, 1  ;;  %16911 = vrot.lane.b32.xlu1 %v16910_v21, %s19189_s7  ;;  %v18314_v21 = vld [vmem:[#allocation21 + $0x48] sm:$0xff]  }
 0xe92   : > { %v12223_v60 = vrot.slane %v12208_v41, 1 }
 0xe93   : > { %v12235_v4 = vmax.f32 %v12207_v26, %v12221_v53  ;;  %v12222_v22 = vsel %vm4339_vm1, %v12216_v23, %v12221_v53  ;;  %v18304_v23 = vld [vmem:[#allocation20 + $0x18] sm:$0xff]  }
 0xe94   : > { %v12236_v20 = vmax.f32 %v12208_v41, %v12223_v60  ;;  %v12224_v45 = vsel %vm4339_vm1, %v12219_v38, %v12223_v60  ;;  %v12233_v57 = vmax.f32 %v12205_v35, %v12222_v22  ;;  %v18301_v35 = vld [vmem:[#allocation20 + $0x50] sm:$0xff]   ;;  %v18306_v38 = vld [vmem:[#allocation20 + $0x20] sm:$0xff]  }
 0xe95   : > { %v12234_v14 = vmax.f32 %v12206_v6, %v12224_v45  ;;  %v18302_v6 = vld [vmem:[#allocation20 + $0x10] sm:$0xff]   ;;  %v18313_v26 = vld [vmem:[#allocation21 + $0x40] sm:$0xff]  }
 0xe96   : > { %v16920_v58 = vpack.i.bf16 %v12236_v20, %v12235_v4  ;;  %v18315_v41 = vld [vmem:[#allocation21 + $0x50] sm:$0xff]   ;;  %v18316_v53 = vld [vmem:[#allocation21 + $0x58] sm:$0xff]   ;;  %v18317_v60 = vld [vmem:[#allocation21 + $0x60] sm:$0xff]  }
 0xe97   : > { %v16915_v36 = vpack.i.bf16 %v12234_v14, %v12233_v57  ;;  %v18319_v22 = vld [vmem:[#allocation21 + $0x70] sm:$0xff]  }
 0xe98   : > { %16921 = vrot.lane.b32.xlu1 %v16920_v58, %s19189_s7 }
 0xe99   : > { %16916 = vrot.lane.b32.xlu0 %v16915_v36, %s19189_s7 }
 0xf03   : > { %v16912_v31 = vpop.permute.xlu1 %16911 }
 0xf04   : > { %v16914_v59 = vunpack.i.h.bf16 %v16912_v31  ;;  %v16913_v29 = vunpack.i.l.bf16 %v16912_v31 }
 0xf06   : > { %v12255_v10 = vsel %vm6488_vm2, %v16913_v29, %v16914_v59  ;;  %v12265_v8 = vmax.f32 %v12232_v19, %v16914_v59 }
 0xf07   : > { %v12264_v61 = vmax.f32 %v12231_v49, %v12255_v10  ;;  %v18323_v10 = vld [vmem:[#allocation21 + $0x10] sm:$0xff]  }
 0xf0a   : > { %v16922_v16 = vpop.permute.xlu1 %16921 }
 0xf0b   : > { %v16924_v5 = vunpack.i.h.bf16 %v16922_v16  ;;  %v16923_v7 = vunpack.i.l.bf16 %v16922_v16  ;;  %v16917_v51 = vpop.permute.xlu0 %16916 }
 0xf0c   : > { %v16919_v28 = vunpack.i.h.bf16 %v16917_v51  ;;  %v16918_v62 = vunpack.i.l.bf16 %v16917_v51  ;;  %v18322_v51 = vld [vmem:[#allocation21 + $0x8] sm:$0xff]  }
 0xf0d   : > { %v12269_v30 = vmax.f32 %v12236_v20, %v16924_v5  ;;  %v12257_v56 = vsel %vm6488_vm2, %v16923_v7, %v16924_v5  ;;  %v18320_v20 = vld [vmem:[#allocation21 + $0x78] sm:$0xff]   ;;  %v18321_v5 = vld [vmem:[#allocation21] sm:$0xff]  }
 0xf0e   : > { %v12268_v33 = vmax.f32 %v12235_v4, %v12257_v56  ;;  %v12267_v3 = vmax.f32 %v12234_v14, %v16919_v28  ;;  %v12256_v47 = vsel %vm6488_vm2, %v16918_v62, %v16919_v28  ;;  %v18318_v4 = vld [vmem:[#allocation21 + $0x68] sm:$0xff]   ;;  %v18324_v28 = vld [vmem:[#allocation21 + $0x18] sm:$0xff]   ;;  %v18325_v62 = vld [vmem:[#allocation21 + $0x20] sm:$0xff]  }
 0xf0f   : > { %v12273_v40 = vpack.c.bf16 %v12269_v30, %v12269_v30  ;;  %v12266_v50 = vmax.f32 %v12233_v57, %v12256_v47  ;;  %v18326_v30 = vld [vmem:[#allocation21 + $0x28] sm:$0xff]   ;;  %v18327_v56 = vld [vmem:[#allocation21 + $0x30] sm:$0xff]   ;;  %v18332_v47 = vld [vmem:[#allocation21 + $0x98] sm:$0xff]  }
 0xf10   : > { %v12271_v34 = vpack.c.bf16 %v12267_v3, %v12265_v8  ;;  %v12272_v9 = vpack.c.bf16 %v12268_v33, %v12268_v33  ;;  %v18329_v8 = vld [vmem:[#allocation21 + $0x80] sm:$0xff]   ;;  %v18330_v33 = vld [vmem:[#allocation21 + $0x88] sm:$0xff]   ;;  %v18331_v3 = vld [vmem:[#allocation21 + $0x90] sm:$0xff]  }
 0xf11   : > { %v12270_v39 = vpack.c.bf16 %v12266_v50, %v12264_v61  ;;  %v12293_v0 = vand.u32 %v12288_v15, %v12273_v40  ;;  %v18333_v61 = vld [vmem:[#allocation21 + $0xa0] sm:$0xff]   ;;  %v18334_v40 = vld [vmem:[#allocation21 + $0xa8] sm:$0xff]   ;;  %v18335_v50 = vld [vmem:[#allocation21 + $0xb0] sm:$0xff]  }
 0xf12   : > { %12295 = vmatprep.subr.bf16.mxu0 %v12271_v34  ;;  %v12290_v24 = vand.u32 %v12288_v15, %v12272_v9  ;;  %v18328_v15 = vld [vmem:[#allocation21 + $0x38] sm:$0xff]  }
 0xf13   : > { %12296 = vmatpush1.bf16.msra.mxu0 %v12270_v39  ;;  %v18336_v34 = vld [vmem:[#allocation21 + $0xb8] sm:$0xff]  }
 0xf14   : > { %12297 = vmatprep.subr.bf16.mxu0 %v12293_v0 }
 0xf17   : > { %12298 = vmatpush1.bf16.msra.mxu0 %v12290_v24 }
 0xf18   : > { %15534 = vmatprep.subr.bf16.mxu0 %v18297_v42 }
 0xf1a   : > { %15186 = vmatmul.mubr.msk.bf16.vlgmr.msra.gmra.mrb[152].mxu0 %vm12281_vm10, %v18296_v11 }
 0xf1b   : > { %15535 = vmatpush3.bf16.msra.mxu0 %v18298_v46 }
 0xf1c   : > { %15536 = vmatprep.subr.bf16.mxu0 %v18299_v44 }
 0xf1f   : > { %15537 = vmatpush3.bf16.msra.mxu0 %v18300_v27 }
 0xf20   : > { %15538 = vmatprep.subr.bf16.mxu0 %v18301_v35 }
 0xf23   : > { %15539 = vmatpush3.bf16.msra.mxu0 %v18302_v6 }
 0xf24   : > { %15540 = vmatprep.subr.bf16.mxu0 %v18303_v55  ;;  %v15228_v55 = vld [vmem:[#allocation23] ss:$0 sm:$0xff] }
 0xf27   : > { %15541 = vmatpush3.bf16.msra.mxu0 %v18304_v23 }
 0xf28   : > { %15542 = vmatprep.subr.bf16.mxu0 %v18305_v17 }
 0xf2b   : > { %15543 = vmatpush3.bf16.msra.mxu0 %v18306_v38 }
 0xf2c   : > { %15544 = vmatprep.subr.bf16.mxu0 %v18307_v37 }
 0xf2f   : > { %15545 = vmatpush3.bf16.msra.mxu0 %v18308_v32 }
 0xf30   : > { %15546 = vmatprep.subr.bf16.mxu0 %v18309_v43 }
 0xf33   : > { %15547 = vmatpush3.bf16.msra.mxu0 %v18310_v12 }
 0xf34   : > { %16410 = vmatprep.subr.msk.bf16.mxu0 %vm7947_vm5, %v18311_v1  ;;  %v18337_v1 = vld [vmem:[#allocation26] sm:$0xff]  }
 0xf35   : > { %15809 = vmatpush3.bf16.msra.mxu1 %v18337_v1 }
 0xf36   : > { %15810 = vmatprep.subr.bf16.mxu1 %v19191_v25 }
 0xf37   : > { %15549 = vmatpush3.bf16.msra.mxu0 %v18312_v18 }
 0xf38   : > { %15742 = vmatprep.subr.bf16.mxu0 %v19191_v25 }
 0xfed   : > { %v12329_v63 = vpop.f32.mrb[152].mxu0 }
 0xfee   : > { %v12331_v49 = vpop.f32.mrb[153].mxu0 }
 0xfef   : > { %v12333_v54 = vpop.f32.mrb[154].mxu0 }
 0xff0   : > { %v12338_v13 = vpack.c.bf16 %v12333_v54, %v12329_v63  ;;  %v12335_v19 = vpop.f32.mrb[155].mxu0  ;;  %v18338_v63 = vld [vmem:[#allocation26 + $0x8] sm:$0xff]   ;;  %v18340_v54 = vld [vmem:[#allocation26 + $0x18] sm:$0xff]  }
 0xff1   : > { %v12339_v2 = vpack.c.bf16 %v12335_v19, %v12331_v49  ;;  %15811 = vmatpush3.bf16.msra.mxu1 %v18338_v63  ;;  %v18339_v49 = vld [vmem:[#allocation26 + $0x10] sm:$0xff]   ;;  %v18342_v19 = vld [vmem:[#allocation26 + $0x28] sm:$0xff]  }
 0xff2   : > { %15812 = vmatprep.subr.bf16.mxu1 %v19191_v25 }
 0xff3   : > { %15203 = vmatprep.mubr.msk.bf16.mxu0 %vm6488_vm2, %v12339_v2  ;;  %v18343_v2 = vld [vmem:[#allocation26 + $0x30] sm:$0xff]  }
 0xff4   : > { %12503 = vmatmul.mubr.bf16.vlgmr.msra.gmra.mrb[156].mxu0 %v12338_v13  ;;  %v18341_v13 = vld [vmem:[#allocation26 + $0x20] sm:$0xff]  }
 0xff5   : > { %15743 = vmatpush3.bf16.msra.mxu0 %v18313_v26  ;;  %15758 = vmatprep.mubr.msk.bf16.mxu0 %vm19192_vm6, %v19191_v25  ;;  %v12863_v26 = vsel %vm12862_vm11, 4294967295, %v22872_v48  ;;  %v18347_v48 = vld [vmem:[#allocation27 + $0x48] sm:$0xff]  }
 0xff6   : > { %15744 = vmatprep.subr.bf16.mxu0 %v19191_v25  ;;  %15813 = vmatpush3.bf16.msra.mxu1 %v18339_v49 }
 0xff7   : > { %15814 = vmatprep.subr.bf16.mxu1 %v19191_v25 }
 0xff9   : > { %15745 = vmatpush3.bf16.msra.mxu0 %v18314_v21 }
 0xffa   : > { %15746 = vmatprep.subr.bf16.mxu0 %v19191_v25  ;;  %15815 = vmatpush3.bf16.msra.mxu1 %v18340_v54 }
 0xffb   : > { %15816 = vmatprep.subr.bf16.mxu1 %v19191_v25 }
 0xffd   : > { %15747 = vmatpush3.bf16.msra.mxu0 %v18315_v41 }
 0xffe   : > { %15748 = vmatprep.subr.bf16.mxu0 %v19191_v25  ;;  %15817 = vmatpush3.bf16.msra.mxu1 %v18341_v13 }
 0xfff   : > { %15818 = vmatprep.subr.bf16.mxu1 %v19191_v25 }
0x1001   : > { %15749 = vmatpush3.bf16.msra.mxu0 %v18316_v53  ;;  %v12864_v53 = vsel %vm7947_vm5, %v12863_v26, 0 }
0x1002   : > { %15750 = vmatprep.subr.bf16.mxu0 %v19191_v25  ;;  %15819 = vmatpush3.bf16.msra.mxu1 %v18342_v19 }
0x1003   : > { %15820 = vmatprep.subr.bf16.mxu1 %v19191_v25 }
0x1005   : > { %15751 = vmatpush3.bf16.msra.mxu0 %v18317_v60 }
0x1006   : > { %15752 = vmatprep.subr.bf16.mxu0 %v19191_v25  ;;  %15821 = vmatpush3.bf16.msra.mxu1 %v18343_v2 }
0x1007   : > { %15822 = vmatprep.subr.bf16.mxu1 %v19191_v25 }
0x1009   : > { %15753 = vmatpush3.bf16.msra.mxu0 %v18318_v4 }
0x100a   : > { %15754 = vmatprep.subr.bf16.mxu0 %v19191_v25 }
0x100d   : > { %15755 = vmatpush3.bf16.msra.mxu0 %v18319_v22  ;;  %v12857_v22 = vld [vmem:[#allocation24] sm:$0x3] }
0x100e   : > { %15756 = vmatprep.subr.bf16.mxu0 %v19191_v25 }
0x1011   : > { %15757 = vmatpush3.bf16.msra.mxu0 %v18320_v20  ;;  %v18344_v20 = vld [vmem:[#allocation26 + $0x38] ss:$0 sps:$4 sm:$0xff]  }
0x1012   : > { %15762 = vmatprep.subr.bf16.mxu0 %v19191_v25 }
0x10c7   : > { %v15550_v45 = vpop.f32.mrb[156].mxu0 }
0x10c8   : > { %v15551_v57 = vpop.f32.mrb[157].mxu0 }
0x10c9   : > { %v15552_v14 = vadd.f32 %v15551_v57, %v15550_v45  ;;  %v15553_v58 = vpop.f32.mrb[158].mxu0  ;;  %v12973_v45 = vsel %vm7947_vm5, %v18344_v20, 0  ;;  %v18345_v57 = vld [vmem:[#allocation27 + $0x40] sm:$0xff]  }
0x10ca   : > { %v15554_v36 = vpop.f32.mrb[159].mxu0  ;;  %15823 = vmatpush3.bf16.msra.mxu1 %v12973_v45  ;;  %v18377_v45 = vld [vmem:[#allocation32] sm:$0xff]  }
0x10cb   : > { %v15555_v31 = vadd.f32 %v15554_v36, %v15553_v58  ;;  %15848 = vmatprep.subr.bf16.mxu1 %v19191_v25  ;;  %v18351_v58 = vld [vmem:[#allocation27 + $0x58] sm:$0xff]   ;;  %v18353_v36 = vld [vmem:[#allocation27 + $0x60] sm:$0xff]  }
0x10cd   : > { %v12511_v59 = vpack.c.bf16 %v15555_v31, %v15552_v14  ;;  %v18349_v14 = vld [vmem:[#allocation27 + $0x50] sm:$0xff]   ;;  %v18355_v31 = vld [vmem:[#allocation27 + $0x68] sm:$0xff]  }
0x10cf   : > { %v12548_v29 = vshll.u32 %v12511_v59, 16  ;;  %v12546_v16 = vshrl.u32 %v12511_v59, 16  ;;  %v12747_v9 = vrot.slane %v12511_v59, 1 }
0x10d1   : > { %v12550_v52 = vrot.slane %v12548_v29, 1  ;;  %v18346_v29 = vld [vmem:[#allocation27] sm:$0xff]  }
0x10d3   : > { %v12551_v7 = vor.u32 %v12550_v52, %v12546_v16 }
0x10d5   : > { %15759 = vmatmul.mubr.bf16.vlgmr.msra.gmra.mrb[160].mxu0 %v12551_v7 }
0x10d6   : > { %15763 = vmatpush3.bf16.msra.mxu0 %v18321_v5  ;;  %15778 = vmatprep.mubr.msk.bf16.mxu0 %vm19192_vm6, %v19191_v25 }
0x10d7   : > { %15764 = vmatprep.subr.bf16.mxu0 %v19191_v25 }
0x10da   : > { %15765 = vmatpush3.bf16.msra.mxu0 %v18322_v51  ;;  %v18348_v51 = vld [vmem:[#allocation27 + $0x8] sm:$0xff]  }
0x10db   : > { %15766 = vmatprep.subr.bf16.mxu0 %v19191_v25 }
0x10de   : > { %15767 = vmatpush3.bf16.msra.mxu0 %v18323_v10  ;;  %v18350_v10 = vld [vmem:[#allocation27 + $0x10] sm:$0xff]  }
0x10df   : > { %15768 = vmatprep.subr.bf16.mxu0 %v19191_v25 }
0x10e2   : > { %15769 = vmatpush3.bf16.msra.mxu0 %v18324_v28  ;;  %v18352_v28 = vld [vmem:[#allocation27 + $0x18] sm:$0xff]  }
0x10e3   : > { %15770 = vmatprep.subr.bf16.mxu0 %v19191_v25 }
0x10e6   : > { %15771 = vmatpush3.bf16.msra.mxu0 %v18325_v62  ;;  %v18354_v62 = vld [vmem:[#allocation27 + $0x20] sm:$0xff]  }
0x10e7   : > { %15772 = vmatprep.subr.bf16.mxu0 %v19191_v25 }
0x10ea   : > { %15773 = vmatpush3.bf16.msra.mxu0 %v18326_v30  ;;  %v18356_v30 = vld [vmem:[#allocation27 + $0x28] sm:$0xff]  }
0x10eb   : > { %15774 = vmatprep.subr.bf16.mxu0 %v19191_v25 }
0x10ee   : > { %15775 = vmatpush3.bf16.msra.mxu0 %v18327_v56  ;;  %v18357_v56 = vld [vmem:[#allocation27 + $0x70] sm:$0xff]  }
0x10ef   : > { %15776 = vmatprep.subr.bf16.mxu0 %v19191_v25 }
0x10f2   : > { %15777 = vmatpush3.bf16.msra.mxu0 %v18328_v15  ;;  %v18358_v15 = vld [vmem:[#allocation27 + $0x30] sm:$0xff]  }
0x10f3   : > { %15782 = vmatprep.subr.bf16.mxu0 %v19191_v25 }
0x10f5   : > { %15779 = vmatmul.mubr.bf16.vlgmr.msra.gmra.mrb[164].mxu0 %v12511_v59 }
0x10f6   : > { %15783 = vmatpush3.bf16.msra.mxu0 %v18329_v8  ;;  %15798 = vmatprep.mubr.msk.bf16.mxu0 %vm19192_vm6, %v19191_v25  ;;  %v18359_v8 = vld [vmem:[#allocation27 + $0x78] sm:$0xff]  }
0x10f7   : > { %15784 = vmatprep.subr.bf16.mxu0 %v19191_v25 }
0x10fa   : > { %15785 = vmatpush3.bf16.msra.mxu0 %v18330_v33  ;;  %v18360_v33 = vld [vmem:[#allocation27 + $0x38] sm:$0xff]  }
0x10fb   : > { %15786 = vmatprep.subr.bf16.mxu0 %v19191_v25 }
0x10fe   : > { %15787 = vmatpush3.bf16.msra.mxu0 %v18331_v3 }
0x10ff   : > { %15788 = vmatprep.subr.bf16.mxu0 %v19191_v25 }
0x1102   : > { %15789 = vmatpush3.bf16.msra.mxu0 %v18332_v47 }
0x1103   : > { %15790 = vmatprep.subr.bf16.mxu0 %v19191_v25 }
0x1106   : > { %15791 = vmatpush3.bf16.msra.mxu0 %v18333_v61 }
0x1107   : > { %15792 = vmatprep.subr.bf16.mxu0 %v19191_v25 }
0x110a   : > { %15793 = vmatpush3.bf16.msra.mxu0 %v18334_v40 }
0x110b   : > { %15794 = vmatprep.subr.bf16.mxu0 %v19191_v25 }
0x110e   : > { %15795 = vmatpush3.bf16.msra.mxu0 %v18335_v50 }
0x110f   : > { %15796 = vmatprep.subr.bf16.mxu0 %v19191_v25 }
0x1112   : > { %15797 = vmatpush3.bf16.msra.mxu0 %v18336_v34 }
0x1113   : > { %15802 = vmatprep.subr.bf16.mxu0 %v19191_v25 }
0x1115   : > { %15799 = vmatmul.mubr.bf16.vlgmr.msra.gmra.mrb[168].mxu0 %v12747_v9 }
0x1116   : > { %15804 = vmatprep.mubr.msk.bf16.mxu0 %vm19192_vm6, %v19191_v25 }
0x11a8   : > { %v12635_v39 = vpop.f32.mrb[160].mxu0 }
0x11a9   : > { %v15760_v0 = vpop.f32.mrb[161].mxu0 }
0x11aa   : > { %v12638_v42 = vpop.f32.mrb[162].mxu0  ;;  %v18361_v0 = vld [vmem:[#allocation27 + $0x80] sm:$0xff]  }
0x11ab   : > { %v15761_v24 = vpop.f32.mrb[163].mxu0 }
0x11ac   : > { %v18362_v24 = vld [vmem:[#allocation27 + $0x88] sm:$0xff]  }
0x11c8   : > { %v12723_v11 = vpop.f32.mrb[164].mxu0 }
0x11c9   : > { %v12724_v46 = vadd.f32 %v12723_v11, %v12635_v39  ;;  %v15780_v44 = vpop.f32.mrb[165].mxu0  ;;  %v18363_v11 = vld [vmem:[#allocation27 + $0x90] sm:$0xff]  }
0x11ca   : > { %v12726_v27 = vpop.f32.mrb[166].mxu0  ;;  %v18365_v44 = vld [vmem:[#allocation27 + $0xa0] sm:$0xff]  }
0x11cb   : > { %v15781_v35 = vpop.f32.mrb[167].mxu0  ;;  %v18366_v27 = vld [vmem:[#allocation27 + $0xa8] sm:$0xff]  }
0x11cc   : > { %v18367_v35 = vld [vmem:[#allocation27 + $0xb0] sm:$0xff]  }
0x11e8   : > { %v12831_v6 = vpop.f32.mrb[168].mxu0 }
0x11e9   : > { %v12837_v23 = vadd.f32 %v12831_v6, %v12724_v46  ;;  %v15800_v17 = vpop.f32.mrb[169].mxu0  ;;  %v18364_v46 = vld [vmem:[#allocation27 + $0x98] sm:$0xff]  }
0x11ea   : > { %v12834_v38 = vpop.f32.mrb[170].mxu0  ;;  %v18368_v6 = vld [vmem:[#allocation27 + $0xb8] sm:$0xff]   ;;  %v18370_v17 = vld [vmem:[#allocation30 + $0x8] sm:$0xff]  }
0x11eb   : > { %v12845_v37 = vadd.f32 %v15228_v55, %v12837_v23  ;;  %v15801_v32 = vpop.f32.mrb[171].mxu0  ;;  %v18369_v23 = vld [vmem:[#allocation30] sm:$0xff]   ;;  %v18371_v38 = vld [vmem:[#allocation30 + $0x10] sm:$0xff]  }
0x11ec   : > { %v18373_v32 = vld [vmem:[#allocation30 + $0x20] sm:$0xff]  }
0x11ed   : > { %v12846_v43 = vmax.f32 %v12845_v37, 0.0  ;;  %v18372_v37 = vld [vmem:[#allocation30 + $0x18] sm:$0xff]  }
0x11ef   : > { %v12848_v12 = vrot.slane %v12846_v43, 1 }
0x11f1   : > { %v12850_v18 = vmax.f32 %v12846_v43, %v12848_v12  ;;  %v18374_v43 = vld [vmem:[#allocation30 + $0x28] sm:$0xff]   ;;  %v18375_v12 = vld [vmem:[#allocation30 + $0x30] sm:$0xff]  }
0x11f3   : > { %12852 = vrot.lane.b32.xlu0 %v12850_v18, %s19189_s7 }
0x1265   : > { %v12853_v21 = vpop.permute.xlu0 %12852 }
0x1266   : > { %v12855_v41 = vmax.f32 %v12850_v18, %v12853_v21 }
0x1268   : > { %v12856_v60 = vpack.c.bf16 %v12855_v41, %v12855_v41  ;;  %v15263_v41 = vld [vmem:[#allocation29] ss:$0 sm:$0xff] }
0x126a   : > { %v12866_v4 = vand.u32 %v12864_v53, %v12856_v60  ;;  %v18376_v53 = vld [vmem:[#allocation30 + $0x38] ss:$0 sps:$4 sm:$0xff]  }
0x126b   : > { %v13425_v20 = vsel %vm7947_vm5, %v18376_v53, 0 }
0x126c   : > { %15803 = vmatpush3.bf16.msra.mxu0 %v12866_v4 }
0x126d   : > { %15828 = vmatprep.subr.bf16.mxu0 %v19191_v25 }
0x126f   : > { %15805 = vmatmul.mubr.msk.bf16.vlgmr.msra.gmra.mrb[172].mxu0 %vm12858_vm12, %v12857_v22 }
0x1270   : > { %15844 = vmatprep.mubr.msk.bf16.mxu0 %vm19192_vm6, %v19191_v25  ;;  %15829 = vmatpush3.bf16.msra.mxu0 %v18345_v57 }
0x1271   : > { %15830 = vmatprep.subr.bf16.mxu0 %v19191_v25 }
0x1274   : > { %15831 = vmatpush3.bf16.msra.mxu0 %v18347_v48 }
0x1275   : > { %15832 = vmatprep.subr.bf16.mxu0 %v19191_v25 }
0x1278   : > { %15833 = vmatpush3.bf16.msra.mxu0 %v18349_v14  ;;  %v18378_v14 = vld [vmem:[#allocation32 + $0x8] sm:$0xff]  }
0x1279   : > { %15834 = vmatprep.subr.bf16.mxu0 %v19191_v25 }
0x127c   : > { %15835 = vmatpush3.bf16.msra.mxu0 %v18351_v58 }
0x127d   : > { %15836 = vmatprep.subr.bf16.mxu0 %v19191_v25 }
0x1280   : > { %15837 = vmatpush3.bf16.msra.mxu0 %v18353_v36 }
0x1281   : > { %15838 = vmatprep.subr.bf16.mxu0 %v19191_v25 }
0x1284   : > { %15839 = vmatpush3.bf16.msra.mxu0 %v18355_v31  ;;  %v18379_v31 = vld [vmem:[#allocation32 + $0x10] sm:$0xff]  }
0x1285   : > { %15840 = vmatprep.subr.bf16.mxu0 %v19191_v25 }
0x1288   : > { %15841 = vmatpush3.bf16.msra.mxu0 %v18357_v56  ;;  %v18387_v56 = vld [vmem:[#allocation35 + $0x10] sm:$0xff]  }
0x1289   : > { %15842 = vmatprep.subr.bf16.mxu0 %v19191_v25 }
0x128c   : > { %15843 = vmatpush3.bf16.msra.mxu0 %v18359_v8  ;;  %v18389_v8 = vld [vmem:[#allocation35 + $0x20] sm:$0xff]  }
0x128d   : > { %15868 = vmatprep.subr.bf16.mxu0 %v19191_v25 }
0x1342   : > { %v12902_v59 = vpop.f32.mrb[172].mxu0 }
0x1343   : > { %v12908_v16 = vpack.c.bf16 %v12902_v59, %v12902_v59  ;;  %v15806_v52 = vpop.f32.mrb[173].mxu0 }
0x1344   : > { %v12905_v5 = vpop.f32.mrb[174].mxu0  ;;  %v18382_v52 = vld [vmem:[#allocation32 + $0x28] sm:$0xff]  }
0x1345   : > { %15825 = vmatmul.mubr.msk.bf16.vlgmr.msra.gmra.mrb[124].mxu1 %vm6488_vm2, %v12908_v16  ;;  %v15807_v7 = vpop.f32.mrb[175].mxu0  ;;  %v18381_v16 = vld [vmem:[#allocation32 + $0x20] sm:$0xff]   ;;  %v18383_v5 = vld [vmem:[#allocation32 + $0x30] sm:$0xff]  }
0x1346   : > { %15849 = vmatpush3.bf16.msra.mxu1 %v18346_v29  ;;  %15864 = vmatprep.mubr.msk.bf16.mxu1 %vm19192_vm6, %v19191_v25  ;;  %v18380_v29 = vld [vmem:[#allocation32 + $0x18] sm:$0xff]  }
0x1347   : > { %15850 = vmatprep.subr.bf16.mxu1 %v19191_v25 }
0x134a   : > { %15851 = vmatpush3.bf16.msra.mxu1 %v18348_v51 }
0x134b   : > { %15852 = vmatprep.subr.bf16.mxu1 %v19191_v25 }
0x134e   : > { %15853 = vmatpush3.bf16.msra.mxu1 %v18350_v10 }
0x134f   : > { %15854 = vmatprep.subr.bf16.mxu1 %v19191_v25 }
0x1352   : > { %15855 = vmatpush3.bf16.msra.mxu1 %v18352_v28  ;;  %v18384_v28 = vld [vmem:[#allocation32 + $0x38] sm:$0xff]  }
0x1353   : > { %15856 = vmatprep.subr.bf16.mxu1 %v19191_v25 }
0x1356   : > { %15857 = vmatpush3.bf16.msra.mxu1 %v18354_v62  ;;  %v18385_v62 = vld [vmem:[#allocation35] sm:$0xff]  }
0x1357   : > { %15858 = vmatprep.subr.bf16.mxu1 %v19191_v25 }
0x135a   : > { %15859 = vmatpush3.bf16.msra.mxu1 %v18356_v30  ;;  %v18386_v30 = vld [vmem:[#allocation35 + $0x8] sm:$0xff]  }
0x135b   : > { %15860 = vmatprep.subr.bf16.mxu1 %v19191_v25 }
0x135e   : > { %15861 = vmatpush3.bf16.msra.mxu1 %v18358_v15  ;;  %v18388_v15 = vld [vmem:[#allocation35 + $0x18] sm:$0xff]  }
0x135f   : > { %15862 = vmatprep.subr.bf16.mxu1 %v19191_v25 }
0x1362   : > { %15863 = vmatpush3.bf16.msra.mxu1 %v18360_v33  ;;  %v18390_v33 = vld [vmem:[#allocation35 + $0x28] sm:$0xff]  }
0x1363   : > { %15888 = vmatprep.subr.bf16.mxu1 %v19191_v25 }
0x1418   : > { %v13009_v3 = vpop.f32.mrb[124].mxu1 }
0x1419   : > { %v13015_v47 = vpack.c.bf16 %v13009_v3, %v13009_v3  ;;  %v15826_v61 = vpop.f32.mrb[125].mxu1 }
0x141a   : > { %v13012_v40 = vpop.f32.mrb[126].mxu1 }
0x141b   : > { %v13052_v50 = vshll.u32 %v13015_v47, 16  ;;  %v15827_v34 = vpop.f32.mrb[127].mxu1  ;;  %15865 = vmatmul.mubr.bf16.vlgmr.msra.gmra.mrb[128].mxu1 %v13015_v47  ;;  %v13050_v9 = vshrl.u32 %v13015_v47, 16  ;;  %v13251_v55 = vrot.slane %v13015_v47, 1 }
0x141c   : > { %15904 = vmatprep.mubr.msk.bf16.mxu1 %vm19192_vm6, %v19191_v25  ;;  %15889 = vmatpush3.bf16.msra.mxu1 %v18369_v23  ;;  %v18391_v34 = vld [vmem:[#allocation35 + $0x30] sm:$0xff]  }
0x141d   : > { %v13054_v39 = vrot.slane %v13052_v50, 1  ;;  %15890 = vmatprep.subr.bf16.mxu1 %v19191_v25 }
0x141f   : > { %v13055_v42 = vor.u32 %v13054_v39, %v13050_v9  ;;  %v18392_v9 = vld [vmem:[#allocation35 + $0x38] sm:$0xff]  }
0x1420   : > { %15891 = vmatpush3.bf16.msra.mxu1 %v18370_v17  ;;  %v13484_v39 = vld [vmem:[#allocation33] sm:$0x1] }
0x1421   : > { %15845 = vmatmul.mubr.bf16.vlgmr.msra.gmra.mrb[176].mxu0 %v13055_v42  ;;  %15892 = vmatprep.subr.bf16.mxu1 %v19191_v25 }
0x1422   : > { %15869 = vmatpush3.bf16.msra.mxu0 %v18361_v0  ;;  %15884 = vmatprep.mubr.msk.bf16.mxu0 %vm19192_vm6, %v19191_v25 }
0x1423   : > { %15870 = vmatprep.subr.bf16.mxu0 %v19191_v25 }
0x1424   : > { %15893 = vmatpush3.bf16.msra.mxu1 %v18371_v38 }
0x1425   : > { %15894 = vmatprep.subr.bf16.mxu1 %v19191_v25 }
0x1426   : > { %15871 = vmatpush3.bf16.msra.mxu0 %v18362_v24 }
0x1427   : > { %15872 = vmatprep.subr.bf16.mxu0 %v19191_v25 }
0x1428   : > { %15895 = vmatpush3.bf16.msra.mxu1 %v18372_v37 }
0x1429   : > { %15896 = vmatprep.subr.bf16.mxu1 %v19191_v25 }
0x142a   : > { %15873 = vmatpush3.bf16.msra.mxu0 %v18363_v11 }
0x142b   : > { %15874 = vmatprep.subr.bf16.mxu0 %v19191_v25 }
0x142c   : > { %15897 = vmatpush3.bf16.msra.mxu1 %v18373_v32 }
0x142d   : > { %15898 = vmatprep.subr.bf16.mxu1 %v19191_v25 }
0x142e   : > { %15875 = vmatpush3.bf16.msra.mxu0 %v18364_v46 }
0x142f   : > { %15876 = vmatprep.subr.bf16.mxu0 %v19191_v25 }
0x1430   : > { %15899 = vmatpush3.bf16.msra.mxu1 %v18374_v43 }
0x1431   : > { %15900 = vmatprep.subr.bf16.mxu1 %v19191_v25 }
0x1432   : > { %15877 = vmatpush3.bf16.msra.mxu0 %v18365_v44 }
0x1433   : > { %15878 = vmatprep.subr.bf16.mxu0 %v19191_v25 }
0x1434   : > { %15901 = vmatpush3.bf16.msra.mxu1 %v18375_v12 }
0x1435   : > { %15902 = vmatprep.subr.bf16.mxu1 %v19191_v25 }
0x1436   : > { %15879 = vmatpush3.bf16.msra.mxu0 %v18366_v27 }
0x1437   : > { %15880 = vmatprep.subr.bf16.mxu0 %v19191_v25 }
0x1438   : > { %15903 = vmatpush3.bf16.msra.mxu1 %v13425_v20 }
0x1439   : > { %15928 = vmatprep.subr.bf16.mxu1 %v19191_v25 }
0x143a   : > { %15881 = vmatpush3.bf16.msra.mxu0 %v18367_v35  ;;  %v13591_v35 = vld [vmem:[#allocation36] sm:$0x1] }
0x143b   : > { %15882 = vmatprep.subr.bf16.mxu0 %v19191_v25 }
0x143e   : > { %15883 = vmatpush3.bf16.msra.mxu0 %v18368_v6 }
0x143f   : > { %15908 = vmatprep.subr.bf16.mxu0 %v19191_v25 }
0x1441   : > { %15885 = vmatmul.mubr.bf16.vlgmr.msra.gmra.mrb[180].mxu0 %v13251_v55 }
0x1442   : > { %15924 = vmatprep.mubr.msk.bf16.mxu0 %vm19192_vm6, %v19191_v25  ;;  %15909 = vmatpush3.bf16.msra.mxu0 %v18377_v45 }
0x1443   : > { %15910 = vmatprep.subr.bf16.mxu0 %v19191_v25 }
0x1446   : > { %15911 = vmatpush3.bf16.msra.mxu0 %v18378_v14 }
0x1447   : > { %15912 = vmatprep.subr.bf16.mxu0 %v19191_v25 }
0x144a   : > { %15913 = vmatpush3.bf16.msra.mxu0 %v18379_v31 }
0x144b   : > { %15914 = vmatprep.subr.bf16.mxu0 %v19191_v25 }
0x144e   : > { %15915 = vmatpush3.bf16.msra.mxu0 %v18380_v29 }
0x144f   : > { %15916 = vmatprep.subr.bf16.mxu0 %v19191_v25 }
0x1452   : > { %15917 = vmatpush3.bf16.msra.mxu0 %v18381_v16 }
0x1453   : > { %15918 = vmatprep.subr.bf16.mxu0 %v19191_v25 }
0x1456   : > { %15919 = vmatpush3.bf16.msra.mxu0 %v18382_v52 }
0x1457   : > { %15920 = vmatprep.subr.bf16.mxu0 %v19191_v25 }
0x145a   : > { %15921 = vmatpush3.bf16.msra.mxu0 %v18383_v5 }
0x145b   : > { %15922 = vmatprep.subr.bf16.mxu0 %v19191_v25 }
0x145e   : > { %15923 = vmatpush3.bf16.msra.mxu0 %v18384_v28 }
0x14ee   : > { %v13227_v1 = vpop.f32.mrb[128].mxu1 }
0x14ef   : > { %v15866_v18 = vpop.f32.mrb[129].mxu1 }
0x14f0   : > { %v13230_v63 = vpop.f32.mrb[130].mxu1 }
0x14f1   : > { %v15867_v49 = vpop.f32.mrb[131].mxu1 }
0x14f4   : > { %v13139_v54 = vpop.f32.mrb[176].mxu0 }
0x14f5   : > { %v13228_v13 = vadd.f32 %v13227_v1, %v13139_v54  ;;  %v15846_v19 = vpop.f32.mrb[177].mxu0 }
0x14f6   : > { %v13142_v2 = vpop.f32.mrb[178].mxu0 }
0x14f7   : > { %v15847_v26 = vpop.f32.mrb[179].mxu0 }
0x1514   : > { %v13335_v21 = vpop.f32.mrb[180].mxu0 }
0x1515   : > { %v13341_v60 = vadd.f32 %v13335_v21, %v13228_v13  ;;  %v15886_v4 = vpop.f32.mrb[181].mxu0 }
0x1516   : > { %v13338_v22 = vpop.f32.mrb[182].mxu0 }
0x1517   : > { %v13349_v57 = vadd.f32 %v15263_v41, %v13341_v60  ;;  %v15887_v48 = vpop.f32.mrb[183].mxu0 }
0x1519   : > { %v13350_v58 = vmax.f32 %v13349_v57, 0.0 }
0x151b   : > { %v13352_v36 = vrot.slane %v13350_v58, 1 }
0x151d   : > { %v13354_v59 = vmax.f32 %v13350_v58, %v13352_v36 }
0x151f   : > { %13356 = vrot.lane.b32.xlu1 %v13354_v59, %s19189_s7  ;;  %s22873_s7 = sld [smem:[#allocation53_spill]] }
0x1525   : > { %s1061_s8 = sand.u32 1, %s22873_s7  }
0x1526   : > { %s1062_s29 = scalar_lea.vmem [#allocation38], %s1061_s8  ;;  %s13682_s9 = scalar_lea.sflag [#allocation5], %s1061_s8 }
0x1527   : > { %s13694_s30 = sshll.u32 %s1062_s29, 4  ;;  %s22510_s30 = int_to_ptr.vmem [resolvable:$true] %s13694_s30 }
0x1528   : > { %s19046_s11 = scalar_lea.vmem %s22510_s30, 16  ;;  %p19053_p0 = scmp.lt.s32.totalorder %s22510_s30, %s19051_s0 }
0x1529   : > { %p19047_p8 = scmp.ne.s32.totalorder %s22510_s30, %s19046_s11  ;;  %p19054_p6 = scmp.lt.s32.totalorder %s19052_s24, %s19046_s11 }
0x152b   : > { %p19048_p13 = pnand %p19047_p8, %p22877_p11  ;;  %p19055_p5 = por %p19054_p6, %p19053_p0 }
0x152d   : > { %p19049_p1 = pneg %p19048_p13 }
0x152f   : > { %p19056_p9 = pnand %p19055_p5, %p19049_p1 }
0x1591   : > { %v13357_v7 = vpop.permute.xlu1 %13356 }
0x1592   : > { %v13359_v51 = vmax.f32 %v13354_v59, %v13357_v7 }
0x1594   : > { %v13360_v10 = vpack.c.bf16 %v13359_v51, %v13359_v51 }
0x1596   : > { %15905 = vmatmul.mubr.msk.bf16.vlgmr.msra.gmra.mrb[132].mxu1 %vm6488_vm2, %v13360_v10 }
0x1597   : > { %15944 = vmatprep.mubr.msk.bf16.mxu1 %vm19192_vm6, %v19191_v25  ;;  %15929 = vmatpush3.bf16.msra.mxu1 %v18385_v62 }
0x1598   : > { %15930 = vmatprep.subr.bf16.mxu1 %v19191_v25 }
0x159b   : > { %15931 = vmatpush3.bf16.msra.mxu1 %v18386_v30 }
0x159c   : > { %15932 = vmatprep.subr.bf16.mxu1 %v19191_v25 }
0x159f   : > { %15933 = vmatpush3.bf16.msra.mxu1 %v18387_v56 }
0x15a0   : > { %15934 = vmatprep.subr.bf16.mxu1 %v19191_v25 }
0x15a3   : > { %15935 = vmatpush3.bf16.msra.mxu1 %v18388_v15 }
0x15a4   : > { %15936 = vmatprep.subr.bf16.mxu1 %v19191_v25 }
0x15a7   : > { %15937 = vmatpush3.bf16.msra.mxu1 %v18389_v8 }
0x15a8   : > { %15938 = vmatprep.subr.bf16.mxu1 %v19191_v25 }
0x15ab   : > { %15939 = vmatpush3.bf16.msra.mxu1 %v18390_v33 }
0x15ac   : > { %15940 = vmatprep.subr.bf16.mxu1 %v19191_v25 }
0x15af   : > { %15941 = vmatpush3.bf16.msra.mxu1 %v18391_v34 }
0x15b0   : > { %15942 = vmatprep.subr.bf16.mxu1 %v19191_v25 }
0x15b3   : > { %15943 = vmatpush3.bf16.msra.mxu1 %v18392_v9 }
0x1669   : > { %v13461_v3 = vpop.f32.mrb[132].mxu1 }
0x166a   : > { %v13467_v47 = vpack.c.bf16 %v13461_v3, %v13461_v3  ;;  %v15906_v61 = vpop.f32.mrb[133].mxu1 }
0x166b   : > { %v13464_v40 = vpop.f32.mrb[134].mxu1 }
0x166c   : > { %v15907_v50 = vpop.f32.mrb[135].mxu1  ;;  %15925 = vmatmul.mubr.bf16.vlgmr.msra.gmra.mrb[184].mxu0 %v13467_v47 }
0x173f   : > { %v13567_v0 = vpop.f32.mrb[184].mxu0 }
0x1740   : > { %v13568_v42 = vadd.f32 %v13567_v0, %v13484_v39  ;;  %v15926_v24 = vpop.f32.mrb[185].mxu0 }
0x1741   : > { %v13570_v11 = vpop.f32.mrb[186].mxu0 }
0x1742   : > { %v13573_v46 = vmax.f32 %v13568_v42, 0.0  ;;  %v15927_v44 = vpop.f32.mrb[187].mxu0 }
0x1744   : > { %v13574_v27 = vpack.c.bf16 %v13573_v46, %v13573_v46 }
0x1746   : > { %15945 = vmatmul.mubr.bf16.vlgmr.msra.gmra.mrb[136].mxu1 %v13574_v27 }
0x1819   : > { %v13674_v6 = vpop.f32.mrb[136].mxu1 }
0x181a   : > { %v13675_v55 = vadd.f32 %v13674_v6, %v13591_v35  ;;  %v15946_v23 = vpop.f32.mrb[137].mxu1 }
0x181b   : > { %v13677_v25 = vpop.f32.mrb[138].mxu1 }
0x181c   : > { %13680 = vst [vmem:[%s1062_s29] sm:$0x1] %v13675_v55  ;;  %v15947_v17 = vpop.f32.mrb[139].mxu1 }
0x181d   : > { %19059 = shalt.err (!%p19056_p9)
}
0x181e   : > { %s19060_s7 = scalar_lea.hbm %s22508_s26, 16  ;;  %s19064_s29 = scalar_lea.hbm %s22876_s10, 32 }
0x181f   : > { %p19061_p12 = scmp.ne.s32.totalorder %s22508_s26, %s19060_s7  ;;  %p19065_p3 = scmp.lt.u32.totalorder %s22508_s26, %s22876_s10 }
0x1820   : > { %p19066_p4 = scmp.lt.u32.totalorder %s19064_s29, %s19060_s7  ;;  %p19068_p8 = scmp.lt.u32.totalorder %s19060_s7, %s22508_s26 }
0x1821   : > { %p19062_p10 = pnand %p19061_p12, %p22877_p11 }
0x1822   : > { %p19067_p7 = por %p19066_p4, %p19065_p3 }
0x1823   : > { %p19063_p2 = pneg %p19062_p10 }
0x1824   : > { %p19069_p13 = por %p19068_p8, %p19067_p7 }
0x1826   : > { %p19070_p1 = pnand %p19069_p13, %p19063_p2 }
0x1828   : > { %19073 = shalt.err (!%p19070_p1)
}
0x1829   : > { %16500 = dma.vmem_to_hbm [thread:$0]  (%p22877_p11), %s22510_s30, 16, %s22508_s26, %s13682_s9  }
0x182a PF: > { %s22878_s19 = sld [smem:[#allocation55_spill]]  ;;  %s22879_s11 = sld [smem:[#allocation52_spill]] }
0x182b   : > { %s22880_s4 = sld [smem:[#allocation60_spill]] }
0x1830   : > { %p16617_p0 = scmp.ge.s32.totalorder %s22878_s19, 2  ;;  %s13706_s0 = sand.u32 1, %s22879_s11  }
0x1831   : > { %p22881_p6 = scmp.ne.s32.totalorder %s22880_s4, 0  ;;  %s13707_s24 = scalar_lea.sflag [#allocation5], %s13706_s0 }
0x1833   : > { %p16570_p5 = pnand %p16617_p0, %p22881_p6 }
0x1835   : > { %19139 = dma.done.wait (!%p16570_p5), %s13707_s24, 16  }
0x1836   : > { %19141 = vsyncadd (!%p16570_p5), %s13707_s24, 4294967280  ;;  %s22882_s6 = sld [smem:[#allocation57_spill]]  ;;  %s22883_s19 = sld [smem:[#allocation53_spill]] }
0x1837   : > { %s22884_s29 = sld [smem:[#allocation54_spill]]  ;;  %s22885_s2 = sld [smem:[#allocation58_spill]] }
0x183c   : > { %p49_p9 = scmp.ge.s32.totalorder %s22882_s6, 4  }
0x183e   :  { %51 = sbr.rel (!%p49_p9) target bundleno = 32 (0x20), region = 254 }
0x1845   :  { %13711 = vsyncpa [#allocation4], 1 }
0x1846   :  { %13713 = vsyncpa [#allocation4 + $0x1], 1 }
0x1847   :  { %13714 = vsyncpa [#allocation7], 1 }
0x1848   :  { %13715 = vsyncpa [#allocation10], 1 }
0x1849   :  { %13716 = vsyncpa [#allocation13], 1 }
0x184a   :  { %13717 = vsyncpa [#allocation16], 1 }
0x184b   :  { %13718 = vsyncpa [#allocation19], 1 }
0x184c   :  { %13719 = vsyncpa [#allocation22], 1 }
0x184d   :  { %13720 = vsyncpa [#allocation25], 1 }
0x184e   :  { %13721 = vsyncpa [#allocation28], 1 }
0x184f   :  { %13722 = vsyncpa [#allocation31], 1 }
0x1850   :  { %13723 = vsyncpa [#allocation34], 1 }
0x1851   :  { %13724 = vsyncpa [#allocation37], 1 }
0x1852   :  { %13725 = vsyncpa [#allocation5], 1 }
0x1853   :  { %13727 = vsyncpa [#allocation5 + $0x1], 1 }

</bundles_post_ra>
